<compile_context>
chip_gen: v6e
topology: v6e:2x2x1
jax: 0.10.0
libtpu: 0.0.40
codegen_flags: <defaults>
</compile_context>

<pallas_src>
import jax
import jax.numpy as jnp
from jax.experimental import pallas as pl
from jax.experimental.pallas import tpu as pltpu


_CPARAMS = pltpu.CompilerParams(dimension_semantics=("parallel",))


# ---------------------------------------------------------------------------
# Host-side constant builders.
# ---------------------------------------------------------------------------
def _tap_shifts(W, M, dil):
    """Static lane-roll amounts for the 9 taps of a (dilated) 3x3 conv."""
    shifts = []
    for ky in range(3):
        for kx in range(3):
            d = dil * (ky - 1) * W + dil * (kx - 1)     # flat source offset
            shifts.append((-d) % M)                     # jnp.roll convention
    return tuple(shifts)


def _tap_masks(H, W, dil):
    """(9, 1, M) f32 zero-padding validity masks matching _tap_shifts."""
    M = H * W
    p = jnp.arange(M)
    y, x = p // W, p % W
    masks = []
    for ky in range(3):
        for kx in range(3):
            dy, dx = dil * (ky - 1), dil * (kx - 1)
            valid = (y + dy >= 0) & (y + dy < H) & (x + dx >= 0) & (x + dx < W)
            masks.append(valid.astype(jnp.float32))
    return jnp.stack(masks).reshape(9, 1, M)


def _gather_mats(H, W):
    """(9, M, M) bf16 shift matrices for the small (sub-vreg) levels only."""
    M = H * W
    p = jnp.arange(M)
    y, x = p // W, p % W
    rows = jnp.arange(M)[:, None]
    mats = []
    for ky in range(3):
        for kx in range(3):
            dy, dx = ky - 1, kx - 1
            valid = (y + dy >= 0) & (y + dy < H) & (x + dx >= 0) & (x + dx < W)
            src = jnp.clip((y + dy) * W + (x + dx), 0, M - 1)
            g = (rows == src[None, :]) & valid[None, :]
            mats.append(g.astype(jnp.float32))
    return jnp.stack(mats).astype(jnp.bfloat16)


def _pool_mats(H, W):
    """Pt: (M, M/4) so x @ Pt = 2x2 avg-pool;  Ut: (M/4, M) nearest 2x up."""
    M1 = H * W
    M2 = (H // 2) * (W // 2)
    p = jnp.arange(M1)
    q = ((p // W) // 2) * (W // 2) + (p % W) // 2
    Pt = (q[:, None] == jnp.arange(M2)[None, :]).astype(jnp.float32) * 0.25
    Ut = Pt.T * 4.0
    return Pt.astype(jnp.bfloat16), Ut.astype(jnp.bfloat16)


# ---------------------------------------------------------------------------
# In-kernel building blocks (values f32, MXU operands bf16, f32 accumulation).
# ---------------------------------------------------------------------------
def _prelu(v, alpha):
    return jnp.where(v >= 0.0, v, alpha * v)


def _conv3x3(x, w_ref, mask_ref, shifts):
    """(dilated) 3x3 conv as one wide-K MXU matmul over rolled+masked taps.

    x: (Cin, M) f32.  w_ref: (Cout, 9*Cin) bf16 im2col (tap-major, cin-minor).
    mask_ref: (9, 1, M) f32 padding masks.  shifts: 9 static lane-roll amounts.
    """
    taps = []
    for t in range(9):
        tap = x if shifts[t] == 0 else pltpu.roll(x, shift=shifts[t], axis=1)
        if t != 4:                                      # center tap: no mask
            tap = tap * mask_ref[t]
        taps.append(tap)
    col = jnp.concatenate(taps, axis=0).astype(jnp.bfloat16)   # (9*Cin, M)
    return jnp.dot(w_ref[...], col, preferred_element_type=jnp.float32)


def _conv3x3_gather(x, w_ref, g_ref):
    """3x3 conv on a sub-vreg level (M < 128 lanes): tiny gather-matrix taps."""
    xb = x.astype(jnp.bfloat16)
    taps = []
    for t in range(9):
        tap = x if t == 4 else jnp.dot(xb, g_ref[t],
                                       preferred_element_type=jnp.float32)
        taps.append(tap)
    col = jnp.concatenate(taps, axis=0).astype(jnp.bfloat16)
    return jnp.dot(w_ref[...], col, preferred_element_type=jnp.float32)


def _dwconv3x3(x, w_ref, b_ref, mask_ref, shifts):
    """Depthwise 3x3 (pure VPU, uniform f32).  x: (C, M).  w_ref: (9, C, 1)."""
    acc = None
    for t in range(9):
        tap = x if shifts[t] == 0 else pltpu.roll(x, shift=shifts[t], axis=1)
        if t != 4:
            tap = tap * mask_ref[t]
        y = w_ref[t] * tap
        acc = y if acc is None else acc + y
    return acc + b_ref[...]


def _conv1x1(x, w_ref):
    return jnp.dot(w_ref[...], x.astype(jnp.bfloat16),
                   preferred_element_type=jnp.float32)


def _resample(x, m_ref):
    return jnp.dot(x.astype(jnp.bfloat16), m_ref[...],
                   preferred_element_type=jnp.float32)


# ---------------------------------------------------------------------------
# Single fused kernel (one batch element per grid step).
# ---------------------------------------------------------------------------
def _make_kernel(H, W):
    M1 = H * W
    sh1 = _tap_shifts(W, M1, 1)
    sh2 = _tap_shifts(W, M1, 2)
    sh4 = _tap_shifts(W, M1, 4)

    def kernel(alpha_ref, x_ref,
               w_sh, w_e1, w_d12, w_e2, w_d23, w_e3,
               w_dc3, w_u32, w_dc2, w_u21, w_dc1,
               w_dl1, b_dl1, w_dl2, b_dl2, w_dl3, b_dl3,
               dw1_w, dw1_b, pw1_w, pw1_b,
               dw2_w, dw2_b, pw2_w, pw2_b,
               w11, w12, w13, w21, w22, w23,
               m1_ref, m2_ref, m4_ref, g2_ref, g3_ref,
               p1_ref, p2_ref, u32_ref, u21_ref,
               out_ref):
        al = alpha_ref[0]
        x = x_ref[0]                                        # (2nf, M1)

        # shallow_feat2 + encoder2 + decoder2 (UNet-style, see TODO in params).
        xfeat = _prelu(_conv3x3(x, w_sh, m1_ref, sh1), al)
        e1 = _prelu(_conv3x3(xfeat, w_e1, m1_ref, sh1), al)
        t = _conv1x1(_resample(e1, p1_ref), w_d12)          # down 1 -> 2
        e2 = _prelu(_conv3x3_gather(t, w_e2, g2_ref), al)
        t = _conv1x1(_resample(e2, p2_ref), w_d23)          # down 2 -> 3
        e3 = _prelu(_conv3x3_gather(t, w_e3, g3_ref), al)
        d3 = _prelu(_conv3x3_gather(e3, w_dc3, g3_ref), al)
        t = _conv1x1(_resample(d3, u32_ref), w_u32) + e2    # up 3 -> 2 + skip
        d2 = _prelu(_conv3x3_gather(t, w_dc2, g2_ref), al)
        t = _conv1x1(_resample(d2, u21_ref), w_u21) + e1    # up 2 -> 1 + skip
        r0 = _prelu(_conv3x3(t, w_dc1, m1_ref, sh1), al)

        # dilated1/2/3 + concat (kept in vregs) + body (depthwise-separable).
        dl1 = _prelu(_conv3x3(r0, w_dl1, m1_ref, sh1) + b_dl1[...], al)
        dl2 = _prelu(_conv3x3(r0, w_dl2, m2_ref, sh2) + b_dl2[...], al)
        dl3 = _prelu(_conv3x3(r0, w_dl3, m4_ref, sh4) + b_dl3[...], al)
        f1 = jnp.concatenate([r0, dl1, dl2, dl3], axis=0)   # (7nf, M1)
        h = _dwconv3x3(f1, dw1_w, dw1_b, m1_ref, sh1)
        h = _prelu(_conv1x1(h, pw1_w) + pw1_b[...], al)     # 7nf -> 4nf
        h = _dwconv3x3(h, dw2_w, dw2_b, m1_ref, sh1)
        feat = _prelu(_conv1x1(h, pw2_w) + pw2_b[...], al)  # 4nf -> nf

        # tail convs with residual skips + tanh + affine.
        x1 = _prelu(_conv3x3(feat, w11, m1_ref, sh1), al) + xfeat
        x2 = _prelu(_conv3x3(x1, w12, m1_ref, sh1), al)
        x3 = _prelu(_conv3x3(x2, w13, m1_ref, sh1), al)
        x4 = _prelu(_conv3x3(x3, w21, m1_ref, sh1), al) + x2
        x5 = _prelu(_conv3x3(x4, w22, m1_ref, sh1), al) + x1
        x6 = jnp.tanh(_conv3x3(x5, w23, m1_ref, sh1))
        out_ref[0] = x6 * 0.5 + 0.5

    return kernel


# ---------------------------------------------------------------------------
# Deterministic synthetic parameters (shapes follow PS_decoder.__init__).
# ---------------------------------------------------------------------------
def init_params(key, nf=8, sf=8, nc=4):
    def nxt():
        nonlocal key
        key, sub = jax.random.split(key)
        return sub

    def w3(cin, cout):
        # torch conv weight (Cout, Cin, 3, 3) -> im2col (Cout, 9*Cin),
        # column = (ky*3 + kx)*Cin + cin (tap-major, cin-minor).
        w = 0.05 * jax.random.normal(nxt(), (cout, cin, 3, 3), jnp.float32)
        return (jnp.transpose(w, (0, 2, 3, 1))
                .reshape(cout, 9 * cin).astype(jnp.bfloat16))

    def w1(cin, cout):    # 1x1 / pointwise conv (Cout, Cin)
        return (0.05 * jax.random.normal(nxt(), (cout, cin),
                                         jnp.float32)).astype(jnp.bfloat16)

    def bias(c):          # (C, 1) f32
        return 0.05 * jax.random.normal(nxt(), (c, 1), jnp.float32)

    p = {}
    p["alpha"] = jnp.full((1,), 0.25, jnp.float32)        # shared nn.PReLU()
    # shallow_feat2: conv(2*nf -> nf, bias=False) + PReLU
    p["shallow_w"] = w3(2 * nf, nf)
    # TODO(synk): Encoder/Decoder/conv/Depthwise_ConvBlock class definitions
    # are not in the provided snippet; implemented as standard UNet-style
    # conv+PReLU levels (down = 2x2 avgpool + 1x1 conv, up = nearest 2x +
    # 1x1 conv + skip add) and depthwise-separable blocks.
    p["enc1_w"] = w3(nf, nf)
    p["down12_w"] = w1(nf, nf + sf)
    p["enc2_w"] = w3(nf + sf, nf + sf)
    p["down23_w"] = w1(nf + sf, nf + 2 * sf)
    p["enc3_w"] = w3(nf + 2 * sf, nf + 2 * sf)
    p["dec3_w"] = w3(nf + 2 * sf, nf + 2 * sf)
    p["up32_w"] = w1(nf + 2 * sf, nf + sf)
    p["dec2_w"] = w3(nf + sf, nf + sf)
    p["up21_w"] = w1(nf + sf, nf)
    p["dec1_w"] = w3(nf, nf)
    # dilated convs are plain nn.Conv2d (default bias=True) + PReLU
    for i in (1, 2, 3):
        p[f"dil{i}_w"] = w3(nf, 2 * nf)
        p[f"dil{i}_b"] = bias(2 * nf)
    # body: Depthwise_ConvBlock(7nf -> 4nf), Depthwise_ConvBlock(4nf -> nf)
    p["dw1_w"] = 0.05 * jax.random.normal(nxt(), (9, 7 * nf, 1), jnp.float32)
    p["dw1_b"] = bias(7 * nf)
    p["pw1_w"] = w1(7 * nf, 4 * nf)
    p["pw1_b"] = bias(4 * nf)
    p["dw2_w"] = 0.05 * jax.random.normal(nxt(), (9, 4 * nf, 1), jnp.float32)
    p["dw2_b"] = bias(4 * nf)
    p["pw2_w"] = w1(4 * nf, nf)
    p["pw2_b"] = bias(nf)
    # tail convs (conv(...) helper, bias=False)
    p["c11_w"] = w3(nf, nf)
    p["c12_w"] = w3(nf, 2 * nf)
    p["c13_w"] = w3(2 * nf, 3 * nf)
    p["c21_w"] = w3(3 * nf, 2 * nf)
    p["c22_w"] = w3(2 * nf, nf)
    p["c23_w"] = w3(nf, nc)
    # NOTE: self.up4 (bicubic) and conv_tail3_1/_2 are unused in forward().
    return p


# ---------------------------------------------------------------------------
# PS_decoder forward (single fused pallas_call).
# ---------------------------------------------------------------------------
def ps_decoder_forward(params, feat_ms, feat_pan):
    """feat_ms, feat_pan: (N, n_feat, H, W) float32 (PyTorch NCHW layout)."""
    N, nf, H, W = feat_ms.shape
    M1 = H * W
    nc = params["c23_w"].shape[0]
    alpha = params["alpha"]

    # Small spatial constants (masks O(M); gather mats only at sub-vreg levels).
    m1 = _tap_masks(H, W, 1)
    m2 = _tap_masks(H, W, 2)
    m4 = _tap_masks(H, W, 4)
    g2 = _gather_mats(H // 2, W // 2)
    g3 = _gather_mats(H // 4, W // 4)
    p1t, u21 = _pool_mats(H, W)                 # (M1, M2), (M2, M1)
    p2t, u32 = _pool_mats(H // 2, W // 2)       # (M2, M3), (M3, M2)

    x_in = jnp.concatenate([feat_ms, feat_pan], axis=1).reshape(N, 2 * nf, M1)

    consts = [
        params["shallow_w"], params["enc1_w"], params["down12_w"],
        params["enc2_w"], params["down23_w"], params["enc3_w"],
        params["dec3_w"], params["up32_w"], params["dec2_w"],
        params["up21_w"], params["dec1_w"],
        params["dil1_w"], params["dil1_b"], params["dil2_w"], params["dil2_b"],
        params["dil3_w"], params["dil3_b"],
        params["dw1_w"], params["dw1_b"], params["pw1_w"], params["pw1_b"],
        params["dw2_w"], params["dw2_b"], params["pw2_w"], params["pw2_b"],
        params["c11_w"], params["c12_w"], params["c13_w"],
        params["c21_w"], params["c22_w"], params["c23_w"],
        m1, m2, m4, g2, g3, p1t, p2t, u32, u21,
    ]

    def _const_spec(shape):
        nd = len(shape)
        return pl.BlockSpec(tuple(shape), lambda n, _nd=nd: (0,) * _nd)

    in_specs = ([pl.BlockSpec(memory_space=pltpu.MemorySpace.SMEM),
                 pl.BlockSpec((1, 2 * nf, M1), lambda n: (n, 0, 0))]
                + [_const_spec(c.shape) for c in consts])
    out_spec = pl.BlockSpec((1, nc, M1), lambda n: (n, 0, 0))

    img = pl.pallas_call(
        _make_kernel(H, W),
        grid=(N,),
        in_specs=in_specs,
        out_specs=out_spec,
        out_shape=jax.ShapeDtypeStruct((N, nc, M1), jnp.float32),
        compiler_params=_CPARAMS,
    )(alpha, x_in, *consts)
    return img.reshape(N, nc, H, W)


if __name__ == "__main__":
    nf, sf, nc = 8, 8, 4            # small n_feat / scale_feat / num_channels
    N, H, W = 2, 16, 16
    key = jax.random.PRNGKey(0)
    kp, km, kpan = jax.random.split(key, 3)
    params = init_params(kp, nf=nf, sf=sf, nc=nc)
    feat_ms = jax.random.normal(km, (N, nf, H, W), jnp.float32)
    feat_pan = jax.random.normal(kpan, (N, nf, H, W), jnp.float32)

    out = jax.jit(ps_decoder_forward)(params, feat_ms, feat_pan)
    out = jax.block_until_ready(out)
    assert out.shape == (N, nc, H, W)
    assert bool(jnp.all(jnp.isfinite(out)))
    print("KERNEL_OK")
</pallas_src>

<mosaic_0001>
module attributes {stable_mosaic.version = 11 : i64} {
  func.func @kernel(%arg0: i32, %arg1: memref<1xf32, #tpu.memory_space<smem>>, %arg2: memref<1x16x256xf32, #tpu.memory_space<vmem>>, %arg3: memref<8x144xbf16, #tpu.memory_space<vmem>>, %arg4: memref<8x72xbf16, #tpu.memory_space<vmem>>, %arg5: memref<16x8xbf16, #tpu.memory_space<vmem>>, %arg6: memref<16x144xbf16, #tpu.memory_space<vmem>>, %arg7: memref<24x16xbf16, #tpu.memory_space<vmem>>, %arg8: memref<24x216xbf16, #tpu.memory_space<vmem>>, %arg9: memref<24x216xbf16, #tpu.memory_space<vmem>>, %arg10: memref<16x24xbf16, #tpu.memory_space<vmem>>, %arg11: memref<16x144xbf16, #tpu.memory_space<vmem>>, %arg12: memref<8x16xbf16, #tpu.memory_space<vmem>>, %arg13: memref<8x72xbf16, #tpu.memory_space<vmem>>, %arg14: memref<16x72xbf16, #tpu.memory_space<vmem>>, %arg15: memref<16x1xf32, #tpu.memory_space<vmem>>, %arg16: memref<16x72xbf16, #tpu.memory_space<vmem>>, %arg17: memref<16x1xf32, #tpu.memory_space<vmem>>, %arg18: memref<16x72xbf16, #tpu.memory_space<vmem>>, %arg19: memref<16x1xf32, #tpu.memory_space<vmem>>, %arg20: memref<9x56x1xf32, #tpu.memory_space<vmem>>, %arg21: memref<56x1xf32, #tpu.memory_space<vmem>>, %arg22: memref<32x56xbf16, #tpu.memory_space<vmem>>, %arg23: memref<32x1xf32, #tpu.memory_space<vmem>>, %arg24: memref<9x32x1xf32, #tpu.memory_space<vmem>>, %arg25: memref<32x1xf32, #tpu.memory_space<vmem>>, %arg26: memref<8x32xbf16, #tpu.memory_space<vmem>>, %arg27: memref<8x1xf32, #tpu.memory_space<vmem>>, %arg28: memref<8x72xbf16, #tpu.memory_space<vmem>>, %arg29: memref<16x72xbf16, #tpu.memory_space<vmem>>, %arg30: memref<24x144xbf16, #tpu.memory_space<vmem>>, %arg31: memref<16x216xbf16, #tpu.memory_space<vmem>>, %arg32: memref<8x144xbf16, #tpu.memory_space<vmem>>, %arg33: memref<4x72xbf16, #tpu.memory_space<vmem>>, %arg34: memref<9x1x256xf32, #tpu.memory_space<vmem>>, %arg35: memref<9x1x256xf32, #tpu.memory_space<vmem>>, %arg36: memref<9x1x256xf32, #tpu.memory_space<vmem>>, %arg37: memref<9x64x64xbf16, #tpu.memory_space<vmem>>, %arg38: memref<9x16x16xbf16, #tpu.memory_space<vmem>>, %arg39: memref<256x64xbf16, #tpu.memory_space<vmem>>, %arg40: memref<64x16xbf16, #tpu.memory_space<vmem>>, %arg41: memref<16x64xbf16, #tpu.memory_space<vmem>>, %arg42: memref<64x256xbf16, #tpu.memory_space<vmem>>, %arg43: memref<1x4x256xf32, #tpu.memory_space<vmem>>) attributes {dimension_semantics = [#tpu.dimension_semantics<parallel>], iteration_bounds = array<i64: 2>, scalar_prefetch = 0 : i64, scratch_operands = 0 : i64, tpu.core_type = #tpu.core_type<tc>, window_params = [{transform_indices = @transform_0, window_bounds = array<i64: 1>}, {transform_indices = @transform_1, window_bounds = array<i64: 1, 16, 256>}, {pipeline_mode = #tpu.pipeline_mode<synchronous>, transform_indices = @transform_2, window_bounds = array<i64: 8, 144>}, {pipeline_mode = #tpu.pipeline_mode<synchronous>, transform_indices = @transform_3, window_bounds = array<i64: 8, 72>}, {pipeline_mode = #tpu.pipeline_mode<synchronous>, transform_indices = @transform_4, window_bounds = array<i64: 16, 8>}, {pipeline_mode = #tpu.pipeline_mode<synchronous>, transform_indices = @transform_5, window_bounds = array<i64: 16, 144>}, {pipeline_mode = #tpu.pipeline_mode<synchronous>, transform_indices = @transform_6, window_bounds = array<i64: 24, 16>}, {pipeline_mode = #tpu.pipeline_mode<synchronous>, transform_indices = @transform_7, window_bounds = array<i64: 24, 216>}, {pipeline_mode = #tpu.pipeline_mode<synchronous>, transform_indices = @transform_8, window_bounds = array<i64: 24, 216>}, {pipeline_mode = #tpu.pipeline_mode<synchronous>, transform_indices = @transform_9, window_bounds = array<i64: 16, 24>}, {pipeline_mode = #tpu.pipeline_mode<synchronous>, transform_indices = @transform_10, window_bounds = array<i64: 16, 144>}, {pipeline_mode = #tpu.pipeline_mode<synchronous>, transform_indices = @transform_11, window_bounds = array<i64: 8, 16>}, {pipeline_mode = #tpu.pipeline_mode<synchronous>, transform_indices = @transform_12, window_bounds = array<i64: 8, 72>}, {pipeline_mode = #tpu.pipeline_mode<synchronous>, transform_indices = @transform_13, window_bounds = array<i64: 16, 72>}, {pipeline_mode = #tpu.pipeline_mode<synchronous>, transform_indices = @transform_14, window_bounds = array<i64: 16, 1>}, {pipeline_mode = #tpu.pipeline_mode<synchronous>, transform_indices = @transform_15, window_bounds = array<i64: 16, 72>}, {pipeline_mode = #tpu.pipeline_mode<synchronous>, transform_indices = @transform_16, window_bounds = array<i64: 16, 1>}, {pipeline_mode = #tpu.pipeline_mode<synchronous>, transform_indices = @transform_17, window_bounds = array<i64: 16, 72>}, {pipeline_mode = #tpu.pipeline_mode<synchronous>, transform_indices = @transform_18, window_bounds = array<i64: 16, 1>}, {pipeline_mode = #tpu.pipeline_mode<synchronous>, transform_indices = @transform_19, window_bounds = array<i64: 9, 56, 1>}, {pipeline_mode = #tpu.pipeline_mode<synchronous>, transform_indices = @transform_20, window_bounds = array<i64: 56, 1>}, {pipeline_mode = #tpu.pipeline_mode<synchronous>, transform_indices = @transform_21, window_bounds = array<i64: 32, 56>}, {pipeline_mode = #tpu.pipeline_mode<synchronous>, transform_indices = @transform_22, window_bounds = array<i64: 32, 1>}, {pipeline_mode = #tpu.pipeline_mode<synchronous>, transform_indices = @transform_23, window_bounds = array<i64: 9, 32, 1>}, {pipeline_mode = #tpu.pipeline_mode<synchronous>, transform_indices = @transform_24, window_bounds = array<i64: 32, 1>}, {pipeline_mode = #tpu.pipeline_mode<synchronous>, transform_indices = @transform_25, window_bounds = array<i64: 8, 32>}, {pipeline_mode = #tpu.pipeline_mode<synchronous>, transform_indices = @transform_26, window_bounds = array<i64: 8, 1>}, {pipeline_mode = #tpu.pipeline_mode<synchronous>, transform_indices = @transform_27, window_bounds = array<i64: 8, 72>}, {pipeline_mode = #tpu.pipeline_mode<synchronous>, transform_indices = @transform_28, window_bounds = array<i64: 16, 72>}, {pipeline_mode = #tpu.pipeline_mode<synchronous>, transform_indices = @transform_29, window_bounds = array<i64: 24, 144>}, {pipeline_mode = #tpu.pipeline_mode<synchronous>, transform_indices = @transform_30, window_bounds = array<i64: 16, 216>}, {pipeline_mode = #tpu.pipeline_mode<synchronous>, transform_indices = @transform_31, window_bounds = array<i64: 8, 144>}, {pipeline_mode = #tpu.pipeline_mode<synchronous>, transform_indices = @transform_32, window_bounds = array<i64: 4, 72>}, {pipeline_mode = #tpu.pipeline_mode<synchronous>, transform_indices = @transform_33, window_bounds = array<i64: 9, 1, 256>}, {pipeline_mode = #tpu.pipeline_mode<synchronous>, transform_indices = @transform_34, window_bounds = array<i64: 9, 1, 256>}, {pipeline_mode = #tpu.pipeline_mode<synchronous>, transform_indices = @transform_35, window_bounds = array<i64: 9, 1, 256>}, {pipeline_mode = #tpu.pipeline_mode<synchronous>, transform_indices = @transform_36, window_bounds = array<i64: 9, 64, 64>}, {pipeline_mode = #tpu.pipeline_mode<synchronous>, transform_indices = @transform_37, window_bounds = array<i64: 9, 16, 16>}, {pipeline_mode = #tpu.pipeline_mode<synchronous>, transform_indices = @transform_38, window_bounds = array<i64: 256, 64>}, {pipeline_mode = #tpu.pipeline_mode<synchronous>, transform_indices = @transform_39, window_bounds = array<i64: 64, 16>}, {pipeline_mode = #tpu.pipeline_mode<synchronous>, transform_indices = @transform_40, window_bounds = array<i64: 16, 64>}, {pipeline_mode = #tpu.pipeline_mode<synchronous>, transform_indices = @transform_41, window_bounds = array<i64: 64, 256>}, {transform_indices = @transform_42, window_bounds = array<i64: 1, 4, 256>}]} {
    %c0 = arith.constant 0 : index
    %0 = memref.load %arg1[%c0] : memref<1xf32, #tpu.memory_space<smem>>
    %c0_0 = arith.constant 0 : index
    %c0_1 = arith.constant 0 : index
    %c0_2 = arith.constant 0 : index
    %1 = vector.load %arg2[%c0_0, %c0_1, %c0_2] : memref<1x16x256xf32, #tpu.memory_space<vmem>>, vector<1x16x256xf32>
    %2 = vector.shape_cast %1 : vector<1x16x256xf32> to vector<16x256xf32>
    %c17_i32 = arith.constant 17 : i32
    %3 = tpu.dynamic_rotate %2 by %c17_i32 dim 1 : vector<16x256xf32>, i32 -> vector<16x256xf32>
    %c0_3 = arith.constant 0 : index
    %c0_4 = arith.constant 0 : index
    %c0_5 = arith.constant 0 : index
    %4 = vector.load %arg34[%c0_3, %c0_4, %c0_5] : memref<9x1x256xf32, #tpu.memory_space<vmem>>, vector<1x1x256xf32>
    %5 = vector.shape_cast %4 : vector<1x1x256xf32> to vector<1x256xf32>
    %6 = vector.broadcast %5 : vector<1x256xf32> to vector<16x256xf32>
    %7 = arith.mulf %3, %6 : vector<16x256xf32>
    %c16_i32 = arith.constant 16 : i32
    %8 = tpu.dynamic_rotate %2 by %c16_i32 dim 1 : vector<16x256xf32>, i32 -> vector<16x256xf32>
    %c1 = arith.constant 1 : index
    %c0_6 = arith.constant 0 : index
    %c0_7 = arith.constant 0 : index
    %9 = vector.load %arg34[%c1, %c0_6, %c0_7] : memref<9x1x256xf32, #tpu.memory_space<vmem>>, vector<1x1x256xf32>
    %10 = vector.shape_cast %9 : vector<1x1x256xf32> to vector<1x256xf32>
    %11 = vector.broadcast %10 : vector<1x256xf32> to vector<16x256xf32>
    %12 = arith.mulf %8, %11 : vector<16x256xf32>
    %c15_i32 = arith.constant 15 : i32
    %13 = tpu.dynamic_rotate %2 by %c15_i32 dim 1 : vector<16x256xf32>, i32 -> vector<16x256xf32>
    %c2 = arith.constant 2 : index
    %c0_8 = arith.constant 0 : index
    %c0_9 = arith.constant 0 : index
    %14 = vector.load %arg34[%c2, %c0_8, %c0_9] : memref<9x1x256xf32, #tpu.memory_space<vmem>>, vector<1x1x256xf32>
    %15 = vector.shape_cast %14 : vector<1x1x256xf32> to vector<1x256xf32>
    %16 = vector.broadcast %15 : vector<1x256xf32> to vector<16x256xf32>
    %17 = arith.mulf %13, %16 : vector<16x256xf32>
    %c1_i32 = arith.constant 1 : i32
    %18 = tpu.dynamic_rotate %2 by %c1_i32 dim 1 : vector<16x256xf32>, i32 -> vector<16x256xf32>
    %c3 = arith.constant 3 : index
    %c0_10 = arith.constant 0 : index
    %c0_11 = arith.constant 0 : index
    %19 = vector.load %arg34[%c3, %c0_10, %c0_11] : memref<9x1x256xf32, #tpu.memory_space<vmem>>, vector<1x1x256xf32>
    %20 = vector.shape_cast %19 : vector<1x1x256xf32> to vector<1x256xf32>
    %21 = vector.broadcast %20 : vector<1x256xf32> to vector<16x256xf32>
    %22 = arith.mulf %18, %21 : vector<16x256xf32>
    %c255_i32 = arith.constant 255 : i32
    %23 = tpu.dynamic_rotate %2 by %c255_i32 dim 1 : vector<16x256xf32>, i32 -> vector<16x256xf32>
    %c5 = arith.constant 5 : index
    %c0_12 = arith.constant 0 : index
    %c0_13 = arith.constant 0 : index
    %24 = vector.load %arg34[%c5, %c0_12, %c0_13] : memref<9x1x256xf32, #tpu.memory_space<vmem>>, vector<1x1x256xf32>
    %25 = vector.shape_cast %24 : vector<1x1x256xf32> to vector<1x256xf32>
    %26 = vector.broadcast %25 : vector<1x256xf32> to vector<16x256xf32>
    %27 = arith.mulf %23, %26 : vector<16x256xf32>
    %c241_i32 = arith.constant 241 : i32
    %28 = tpu.dynamic_rotate %2 by %c241_i32 dim 1 : vector<16x256xf32>, i32 -> vector<16x256xf32>
    %c6 = arith.constant 6 : index
    %c0_14 = arith.constant 0 : index
    %c0_15 = arith.constant 0 : index
    %29 = vector.load %arg34[%c6, %c0_14, %c0_15] : memref<9x1x256xf32, #tpu.memory_space<vmem>>, vector<1x1x256xf32>
    %30 = vector.shape_cast %29 : vector<1x1x256xf32> to vector<1x256xf32>
    %31 = vector.broadcast %30 : vector<1x256xf32> to vector<16x256xf32>
    %32 = arith.mulf %28, %31 : vector<16x256xf32>
    %c240_i32 = arith.constant 240 : i32
    %33 = tpu.dynamic_rotate %2 by %c240_i32 dim 1 : vector<16x256xf32>, i32 -> vector<16x256xf32>
    %c7 = arith.constant 7 : index
    %c0_16 = arith.constant 0 : index
    %c0_17 = arith.constant 0 : index
    %34 = vector.load %arg34[%c7, %c0_16, %c0_17] : memref<9x1x256xf32, #tpu.memory_space<vmem>>, vector<1x1x256xf32>
    %35 = vector.shape_cast %34 : vector<1x1x256xf32> to vector<1x256xf32>
    %36 = vector.broadcast %35 : vector<1x256xf32> to vector<16x256xf32>
    %37 = arith.mulf %33, %36 : vector<16x256xf32>
    %c239_i32 = arith.constant 239 : i32
    %38 = tpu.dynamic_rotate %2 by %c239_i32 dim 1 : vector<16x256xf32>, i32 -> vector<16x256xf32>
    %c8 = arith.constant 8 : index
    %c0_18 = arith.constant 0 : index
    %c0_19 = arith.constant 0 : index
    %39 = vector.load %arg34[%c8, %c0_18, %c0_19] : memref<9x1x256xf32, #tpu.memory_space<vmem>>, vector<1x1x256xf32>
    %40 = vector.shape_cast %39 : vector<1x1x256xf32> to vector<1x256xf32>
    %41 = vector.broadcast %40 : vector<1x256xf32> to vector<16x256xf32>
    %42 = arith.mulf %38, %41 : vector<16x256xf32>
    %43 = tpu.concatenate %7, %12, %17, %22, %2, %27, %32, %37, %42 in 0 : vector<16x256xf32>, vector<16x256xf32>, vector<16x256xf32>, vector<16x256xf32>, vector<16x256xf32>, vector<16x256xf32>, vector<16x256xf32>, vector<16x256xf32>, vector<16x256xf32> -> vector<144x256xf32>
    %44 = arith.truncf %43 : vector<144x256xf32> to vector<144x256xbf16>
    %c0_20 = arith.constant 0 : index
    %c0_21 = arith.constant 0 : index
    %45 = vector.load %arg3[%c0_20, %c0_21] : memref<8x144xbf16, #tpu.memory_space<vmem>>, vector<8x144xbf16>
    %cst = arith.constant dense<0.000000e+00> : vector<8x256xf32>
    %46 = tpu.matmul %45, %44, %cst {dimension_numbers = #tpu.dot_dimension_numbers<[1], [0], [0], [1], [0, 0, 1, 1], [], []>} : vector<8x144xbf16>, vector<144x256xbf16>, vector<8x256xf32> -> vector<8x256xf32>
    %cst_22 = arith.constant 0.000000e+00 : f32
    %47 = vector.broadcast %cst_22 : f32 to vector<8x256xf32>
    %48 = arith.cmpf oge, %46, %47 : vector<8x256xf32>
    %49 = vector.broadcast %0 : f32 to vector<8x256xf32>
    %50 = arith.mulf %49, %46 : vector<8x256xf32>
    %51 = arith.select %48, %46, %50 : vector<8x256xi1>, vector<8x256xf32>
    %c17_i32_23 = arith.constant 17 : i32
    %52 = tpu.dynamic_rotate %51 by %c17_i32_23 dim 1 : vector<8x256xf32>, i32 -> vector<8x256xf32>
    %c0_24 = arith.constant 0 : index
    %c0_25 = arith.constant 0 : index
    %c0_26 = arith.constant 0 : index
    %53 = vector.load %arg34[%c0_24, %c0_25, %c0_26] : memref<9x1x256xf32, #tpu.memory_space<vmem>>, vector<1x1x256xf32>
    %54 = vector.shape_cast %53 : vector<1x1x256xf32> to vector<1x256xf32>
    %55 = vector.broadcast %54 : vector<1x256xf32> to vector<8x256xf32>
    %56 = arith.mulf %52, %55 : vector<8x256xf32>
    %c16_i32_27 = arith.constant 16 : i32
    %57 = tpu.dynamic_rotate %51 by %c16_i32_27 dim 1 : vector<8x256xf32>, i32 -> vector<8x256xf32>
    %c1_28 = arith.constant 1 : index
    %c0_29 = arith.constant 0 : index
    %c0_30 = arith.constant 0 : index
    %58 = vector.load %arg34[%c1_28, %c0_29, %c0_30] : memref<9x1x256xf32, #tpu.memory_space<vmem>>, vector<1x1x256xf32>
    %59 = vector.shape_cast %58 : vector<1x1x256xf32> to vector<1x256xf32>
    %60 = vector.broadcast %59 : vector<1x256xf32> to vector<8x256xf32>
    %61 = arith.mulf %57, %60 : vector<8x256xf32>
    %c15_i32_31 = arith.constant 15 : i32
    %62 = tpu.dynamic_rotate %51 by %c15_i32_31 dim 1 : vector<8x256xf32>, i32 -> vector<8x256xf32>
    %c2_32 = arith.constant 2 : index
    %c0_33 = arith.constant 0 : index
    %c0_34 = arith.constant 0 : index
    %63 = vector.load %arg34[%c2_32, %c0_33, %c0_34] : memref<9x1x256xf32, #tpu.memory_space<vmem>>, vector<1x1x256xf32>
    %64 = vector.shape_cast %63 : vector<1x1x256xf32> to vector<1x256xf32>
    %65 = vector.broadcast %64 : vector<1x256xf32> to vector<8x256xf32>
    %66 = arith.mulf %62, %65 : vector<8x256xf32>
    %c1_i32_35 = arith.constant 1 : i32
    %67 = tpu.dynamic_rotate %51 by %c1_i32_35 dim 1 : vector<8x256xf32>, i32 -> vector<8x256xf32>
    %c3_36 = arith.constant 3 : index
    %c0_37 = arith.constant 0 : index
    %c0_38 = arith.constant 0 : index
    %68 = vector.load %arg34[%c3_36, %c0_37, %c0_38] : memref<9x1x256xf32, #tpu.memory_space<vmem>>, vector<1x1x256xf32>
    %69 = vector.shape_cast %68 : vector<1x1x256xf32> to vector<1x256xf32>
    %70 = vector.broadcast %69 : vector<1x256xf32> to vector<8x256xf32>
    %71 = arith.mulf %67, %70 : vector<8x256xf32>
    %c255_i32_39 = arith.constant 255 : i32
    %72 = tpu.dynamic_rotate %51 by %c255_i32_39 dim 1 : vector<8x256xf32>, i32 -> vector<8x256xf32>
    %c5_40 = arith.constant 5 : index
    %c0_41 = arith.constant 0 : index
    %c0_42 = arith.constant 0 : index
    %73 = vector.load %arg34[%c5_40, %c0_41, %c0_42] : memref<9x1x256xf32, #tpu.memory_space<vmem>>, vector<1x1x256xf32>
    %74 = vector.shape_cast %73 : vector<1x1x256xf32> to vector<1x256xf32>
    %75 = vector.broadcast %74 : vector<1x256xf32> to vector<8x256xf32>
    %76 = arith.mulf %72, %75 : vector<8x256xf32>
    %c241_i32_43 = arith.constant 241 : i32
    %77 = tpu.dynamic_rotate %51 by %c241_i32_43 dim 1 : vector<8x256xf32>, i32 -> vector<8x256xf32>
    %c6_44 = arith.constant 6 : index
    %c0_45 = arith.constant 0 : index
    %c0_46 = arith.constant 0 : index
    %78 = vector.load %arg34[%c6_44, %c0_45, %c0_46] : memref<9x1x256xf32, #tpu.memory_space<vmem>>, vector<1x1x256xf32>
    %79 = vector.shape_cast %78 : vector<1x1x256xf32> to vector<1x256xf32>
    %80 = vector.broadcast %79 : vector<1x256xf32> to vector<8x256xf32>
    %81 = arith.mulf %77, %80 : vector<8x256xf32>
    %c240_i32_47 = arith.constant 240 : i32
    %82 = tpu.dynamic_rotate %51 by %c240_i32_47 dim 1 : vector<8x256xf32>, i32 -> vector<8x256xf32>
    %c7_48 = arith.constant 7 : index
    %c0_49 = arith.constant 0 : index
    %c0_50 = arith.constant 0 : index
    %83 = vector.load %arg34[%c7_48, %c0_49, %c0_50] : memref<9x1x256xf32, #tpu.memory_space<vmem>>, vector<1x1x256xf32>
    %84 = vector.shape_cast %83 : vector<1x1x256xf32> to vector<1x256xf32>
    %85 = vector.broadcast %84 : vector<1x256xf32> to vector<8x256xf32>
    %86 = arith.mulf %82, %85 : vector<8x256xf32>
    %c239_i32_51 = arith.constant 239 : i32
    %87 = tpu.dynamic_rotate %51 by %c239_i32_51 dim 1 : vector<8x256xf32>, i32 -> vector<8x256xf32>
    %c8_52 = arith.constant 8 : index
    %c0_53 = arith.constant 0 : index
    %c0_54 = arith.constant 0 : index
    %88 = vector.load %arg34[%c8_52, %c0_53, %c0_54] : memref<9x1x256xf32, #tpu.memory_space<vmem>>, vector<1x1x256xf32>
    %89 = vector.shape_cast %88 : vector<1x1x256xf32> to vector<1x256xf32>
    %90 = vector.broadcast %89 : vector<1x256xf32> to vector<8x256xf32>
    %91 = arith.mulf %87, %90 : vector<8x256xf32>
    %92 = tpu.concatenate %56, %61, %66, %71, %51, %76, %81, %86, %91 in 0 : vector<8x256xf32>, vector<8x256xf32>, vector<8x256xf32>, vector<8x256xf32>, vector<8x256xf32>, vector<8x256xf32>, vector<8x256xf32>, vector<8x256xf32>, vector<8x256xf32> -> vector<72x256xf32>
    %93 = arith.truncf %92 : vector<72x256xf32> to vector<72x256xbf16>
    %c0_55 = arith.constant 0 : index
    %c0_56 = arith.constant 0 : index
    %94 = vector.load %arg4[%c0_55, %c0_56] : memref<8x72xbf16, #tpu.memory_space<vmem>>, vector<8x72xbf16>
    %cst_57 = arith.constant dense<0.000000e+00> : vector<8x256xf32>
    %95 = tpu.matmul %94, %93, %cst_57 {dimension_numbers = #tpu.dot_dimension_numbers<[1], [0], [0], [1], [0, 0, 1, 1], [], []>} : vector<8x72xbf16>, vector<72x256xbf16>, vector<8x256xf32> -> vector<8x256xf32>
    %cst_58 = arith.constant 0.000000e+00 : f32
    %96 = vector.broadcast %cst_58 : f32 to vector<8x256xf32>
    %97 = arith.cmpf oge, %95, %96 : vector<8x256xf32>
    %98 = vector.broadcast %0 : f32 to vector<8x256xf32>
    %99 = arith.mulf %98, %95 : vector<8x256xf32>
    %100 = arith.select %97, %95, %99 : vector<8x256xi1>, vector<8x256xf32>
    %101 = arith.truncf %100 : vector<8x256xf32> to vector<8x256xbf16>
    %c0_59 = arith.constant 0 : index
    %c0_60 = arith.constant 0 : index
    %102 = vector.load %arg39[%c0_59, %c0_60] : memref<256x64xbf16, #tpu.memory_space<vmem>>, vector<256x64xbf16>
    %cst_61 = arith.constant dense<0.000000e+00> : vector<8x64xf32>
    %103 = tpu.matmul %101, %102, %cst_61 {dimension_numbers = #tpu.dot_dimension_numbers<[1], [0], [0], [1], [0, 0, 1, 1], [], []>} : vector<8x256xbf16>, vector<256x64xbf16>, vector<8x64xf32> -> vector<8x64xf32>
    %c0_62 = arith.constant 0 : index
    %c0_63 = arith.constant 0 : index
    %104 = vector.load %arg5[%c0_62, %c0_63] : memref<16x8xbf16, #tpu.memory_space<vmem>>, vector<16x8xbf16>
    %105 = arith.truncf %103 : vector<8x64xf32> to vector<8x64xbf16>
    %cst_64 = arith.constant dense<0.000000e+00> : vector<16x64xf32>
    %106 = tpu.matmul %104, %105, %cst_64 {dimension_numbers = #tpu.dot_dimension_numbers<[1], [0], [0], [1], [0, 0, 1, 1], [], []>} : vector<16x8xbf16>, vector<8x64xbf16>, vector<16x64xf32> -> vector<16x64xf32>
    %107 = arith.truncf %106 : vector<16x64xf32> to vector<16x64xbf16>
    %c0_65 = arith.constant 0 : index
    %c0_66 = arith.constant 0 : index
    %c0_67 = arith.constant 0 : index
    %108 = vector.load %arg37[%c0_65, %c0_66, %c0_67] : memref<9x64x64xbf16, #tpu.memory_space<vmem>>, vector<1x64x64xbf16>
    %109 = vector.shape_cast %108 : vector<1x64x64xbf16> to vector<64x64xbf16>
    %cst_68 = arith.constant dense<0.000000e+00> : vector<16x64xf32>
    %110 = tpu.matmul %107, %109, %cst_68 {dimension_numbers = #tpu.dot_dimension_numbers<[1], [0], [0], [1], [0, 0, 1, 1], [], []>} : vector<16x64xbf16>, vector<64x64xbf16>, vector<16x64xf32> -> vector<16x64xf32>
    %c1_69 = arith.constant 1 : index
    %c0_70 = arith.constant 0 : index
    %c0_71 = arith.constant 0 : index
    %111 = vector.load %arg37[%c1_69, %c0_70, %c0_71] : memref<9x64x64xbf16, #tpu.memory_space<vmem>>, vector<1x64x64xbf16>
    %112 = vector.shape_cast %111 : vector<1x64x64xbf16> to vector<64x64xbf16>
    %cst_72 = arith.constant dense<0.000000e+00> : vector<16x64xf32>
    %113 = tpu.matmul %107, %112, %cst_72 {dimension_numbers = #tpu.dot_dimension_numbers<[1], [0], [0], [1], [0, 0, 1, 1], [], []>} : vector<16x64xbf16>, vector<64x64xbf16>, vector<16x64xf32> -> vector<16x64xf32>
    %c2_73 = arith.constant 2 : index
    %c0_74 = arith.constant 0 : index
    %c0_75 = arith.constant 0 : index
    %114 = vector.load %arg37[%c2_73, %c0_74, %c0_75] : memref<9x64x64xbf16, #tpu.memory_space<vmem>>, vector<1x64x64xbf16>
    %115 = vector.shape_cast %114 : vector<1x64x64xbf16> to vector<64x64xbf16>
    %cst_76 = arith.constant dense<0.000000e+00> : vector<16x64xf32>
    %116 = tpu.matmul %107, %115, %cst_76 {dimension_numbers = #tpu.dot_dimension_numbers<[1], [0], [0], [1], [0, 0, 1, 1], [], []>} : vector<16x64xbf16>, vector<64x64xbf16>, vector<16x64xf32> -> vector<16x64xf32>
    %c3_77 = arith.constant 3 : index
    %c0_78 = arith.constant 0 : index
    %c0_79 = arith.constant 0 : index
    %117 = vector.load %arg37[%c3_77, %c0_78, %c0_79] : memref<9x64x64xbf16, #tpu.memory_space<vmem>>, vector<1x64x64xbf16>
    %118 = vector.shape_cast %117 : vector<1x64x64xbf16> to vector<64x64xbf16>
    %cst_80 = arith.constant dense<0.000000e+00> : vector<16x64xf32>
    %119 = tpu.matmul %107, %118, %cst_80 {dimension_numbers = #tpu.dot_dimension_numbers<[1], [0], [0], [1], [0, 0, 1, 1], [], []>} : vector<16x64xbf16>, vector<64x64xbf16>, vector<16x64xf32> -> vector<16x64xf32>
    %c5_81 = arith.constant 5 : index
    %c0_82 = arith.constant 0 : index
    %c0_83 = arith.constant 0 : index
    %120 = vector.load %arg37[%c5_81, %c0_82, %c0_83] : memref<9x64x64xbf16, #tpu.memory_space<vmem>>, vector<1x64x64xbf16>
    %121 = vector.shape_cast %120 : vector<1x64x64xbf16> to vector<64x64xbf16>
    %cst_84 = arith.constant dense<0.000000e+00> : vector<16x64xf32>
    %122 = tpu.matmul %107, %121, %cst_84 {dimension_numbers = #tpu.dot_dimension_numbers<[1], [0], [0], [1], [0, 0, 1, 1], [], []>} : vector<16x64xbf16>, vector<64x64xbf16>, vector<16x64xf32> -> vector<16x64xf32>
    %c6_85 = arith.constant 6 : index
    %c0_86 = arith.constant 0 : index
    %c0_87 = arith.constant 0 : index
    %123 = vector.load %arg37[%c6_85, %c0_86, %c0_87] : memref<9x64x64xbf16, #tpu.memory_space<vmem>>, vector<1x64x64xbf16>
    %124 = vector.shape_cast %123 : vector<1x64x64xbf16> to vector<64x64xbf16>
    %cst_88 = arith.constant dense<0.000000e+00> : vector<16x64xf32>
    %125 = tpu.matmul %107, %124, %cst_88 {dimension_numbers = #tpu.dot_dimension_numbers<[1], [0], [0], [1], [0, 0, 1, 1], [], []>} : vector<16x64xbf16>, vector<64x64xbf16>, vector<16x64xf32> -> vector<16x64xf32>
    %c7_89 = arith.constant 7 : index
    %c0_90 = arith.constant 0 : index
    %c0_91 = arith.constant 0 : index
    %126 = vector.load %arg37[%c7_89, %c0_90, %c0_91] : memref<9x64x64xbf16, #tpu.memory_space<vmem>>, vector<1x64x64xbf16>
    %127 = vector.shape_cast %126 : vector<1x64x64xbf16> to vector<64x64xbf16>
    %cst_92 = arith.constant dense<0.000000e+00> : vector<16x64xf32>
    %128 = tpu.matmul %107, %127, %cst_92 {dimension_numbers = #tpu.dot_dimension_numbers<[1], [0], [0], [1], [0, 0, 1, 1], [], []>} : vector<16x64xbf16>, vector<64x64xbf16>, vector<16x64xf32> -> vector<16x64xf32>
    %c8_93 = arith.constant 8 : index
    %c0_94 = arith.constant 0 : index
    %c0_95 = arith.constant 0 : index
    %129 = vector.load %arg37[%c8_93, %c0_94, %c0_95] : memref<9x64x64xbf16, #tpu.memory_space<vmem>>, vector<1x64x64xbf16>
    %130 = vector.shape_cast %129 : vector<1x64x64xbf16> to vector<64x64xbf16>
    %cst_96 = arith.constant dense<0.000000e+00> : vector<16x64xf32>
    %131 = tpu.matmul %107, %130, %cst_96 {dimension_numbers = #tpu.dot_dimension_numbers<[1], [0], [0], [1], [0, 0, 1, 1], [], []>} : vector<16x64xbf16>, vector<64x64xbf16>, vector<16x64xf32> -> vector<16x64xf32>
    %132 = tpu.concatenate %110, %113, %116, %119, %106, %122, %125, %128, %131 in 0 : vector<16x64xf32>, vector<16x64xf32>, vector<16x64xf32>, vector<16x64xf32>, vector<16x64xf32>, vector<16x64xf32>, vector<16x64xf32>, vector<16x64xf32>, vector<16x64xf32> -> vector<144x64xf32>
    %133 = arith.truncf %132 : vector<144x64xf32> to vector<144x64xbf16>
    %c0_97 = arith.constant 0 : index
    %c0_98 = arith.constant 0 : index
    %134 = vector.load %arg6[%c0_97, %c0_98] : memref<16x144xbf16, #tpu.memory_space<vmem>>, vector<16x144xbf16>
    %cst_99 = arith.constant dense<0.000000e+00> : vector<16x64xf32>
    %135 = tpu.matmul %134, %133, %cst_99 {dimension_numbers = #tpu.dot_dimension_numbers<[1], [0], [0], [1], [0, 0, 1, 1], [], []>} : vector<16x144xbf16>, vector<144x64xbf16>, vector<16x64xf32> -> vector<16x64xf32>
    %cst_100 = arith.constant 0.000000e+00 : f32
    %136 = vector.broadcast %cst_100 : f32 to vector<16x64xf32>
    %137 = arith.cmpf oge, %135, %136 : vector<16x64xf32>
    %138 = vector.broadcast %0 : f32 to vector<16x64xf32>
    %139 = arith.mulf %138, %135 : vector<16x64xf32>
    %140 = arith.select %137, %135, %139 : vector<16x64xi1>, vector<16x64xf32>
    %141 = arith.truncf %140 : vector<16x64xf32> to vector<16x64xbf16>
    %c0_101 = arith.constant 0 : index
    %c0_102 = arith.constant 0 : index
    %142 = vector.load %arg40[%c0_101, %c0_102] : memref<64x16xbf16, #tpu.memory_space<vmem>>, vector<64x16xbf16>
    %cst_103 = arith.constant dense<0.000000e+00> : vector<16x16xf32>
    %143 = tpu.matmul %141, %142, %cst_103 {dimension_numbers = #tpu.dot_dimension_numbers<[1], [0], [0], [1], [0, 0, 1, 1], [], []>} : vector<16x64xbf16>, vector<64x16xbf16>, vector<16x16xf32> -> vector<16x16xf32>
    %c0_104 = arith.constant 0 : index
    %c0_105 = arith.constant 0 : index
    %144 = vector.load %arg7[%c0_104, %c0_105] : memref<24x16xbf16, #tpu.memory_space<vmem>>, vector<24x16xbf16>
    %145 = arith.truncf %143 : vector<16x16xf32> to vector<16x16xbf16>
    %cst_106 = arith.constant dense<0.000000e+00> : vector<24x16xf32>
    %146 = tpu.matmul %144, %145, %cst_106 {dimension_numbers = #tpu.dot_dimension_numbers<[1], [0], [0], [1], [0, 0, 1, 1], [], []>} : vector<24x16xbf16>, vector<16x16xbf16>, vector<24x16xf32> -> vector<24x16xf32>
    %147 = arith.truncf %146 : vector<24x16xf32> to vector<24x16xbf16>
    %c0_107 = arith.constant 0 : index
    %c0_108 = arith.constant 0 : index
    %c0_109 = arith.constant 0 : index
    %148 = vector.load %arg38[%c0_107, %c0_108, %c0_109] : memref<9x16x16xbf16, #tpu.memory_space<vmem>>, vector<1x16x16xbf16>
    %149 = vector.shape_cast %148 : vector<1x16x16xbf16> to vector<16x16xbf16>
    %cst_110 = arith.constant dense<0.000000e+00> : vector<24x16xf32>
    %150 = tpu.matmul %147, %149, %cst_110 {dimension_numbers = #tpu.dot_dimension_numbers<[1], [0], [0], [1], [0, 0, 1, 1], [], []>} : vector<24x16xbf16>, vector<16x16xbf16>, vector<24x16xf32> -> vector<24x16xf32>
    %c1_111 = arith.constant 1 : index
    %c0_112 = arith.constant 0 : index
    %c0_113 = arith.constant 0 : index
    %151 = vector.load %arg38[%c1_111, %c0_112, %c0_113] : memref<9x16x16xbf16, #tpu.memory_space<vmem>>, vector<1x16x16xbf16>
    %152 = vector.shape_cast %151 : vector<1x16x16xbf16> to vector<16x16xbf16>
    %cst_114 = arith.constant dense<0.000000e+00> : vector<24x16xf32>
    %153 = tpu.matmul %147, %152, %cst_114 {dimension_numbers = #tpu.dot_dimension_numbers<[1], [0], [0], [1], [0, 0, 1, 1], [], []>} : vector<24x16xbf16>, vector<16x16xbf16>, vector<24x16xf32> -> vector<24x16xf32>
    %c2_115 = arith.constant 2 : index
    %c0_116 = arith.constant 0 : index
    %c0_117 = arith.constant 0 : index
    %154 = vector.load %arg38[%c2_115, %c0_116, %c0_117] : memref<9x16x16xbf16, #tpu.memory_space<vmem>>, vector<1x16x16xbf16>
    %155 = vector.shape_cast %154 : vector<1x16x16xbf16> to vector<16x16xbf16>
    %cst_118 = arith.constant dense<0.000000e+00> : vector<24x16xf32>
    %156 = tpu.matmul %147, %155, %cst_118 {dimension_numbers = #tpu.dot_dimension_numbers<[1], [0], [0], [1], [0, 0, 1, 1], [], []>} : vector<24x16xbf16>, vector<16x16xbf16>, vector<24x16xf32> -> vector<24x16xf32>
    %c3_119 = arith.constant 3 : index
    %c0_120 = arith.constant 0 : index
    %c0_121 = arith.constant 0 : index
    %157 = vector.load %arg38[%c3_119, %c0_120, %c0_121] : memref<9x16x16xbf16, #tpu.memory_space<vmem>>, vector<1x16x16xbf16>
    %158 = vector.shape_cast %157 : vector<1x16x16xbf16> to vector<16x16xbf16>
    %cst_122 = arith.constant dense<0.000000e+00> : vector<24x16xf32>
    %159 = tpu.matmul %147, %158, %cst_122 {dimension_numbers = #tpu.dot_dimension_numbers<[1], [0], [0], [1], [0, 0, 1, 1], [], []>} : vector<24x16xbf16>, vector<16x16xbf16>, vector<24x16xf32> -> vector<24x16xf32>
    %c5_123 = arith.constant 5 : index
    %c0_124 = arith.constant 0 : index
    %c0_125 = arith.constant 0 : index
    %160 = vector.load %arg38[%c5_123, %c0_124, %c0_125] : memref<9x16x16xbf16, #tpu.memory_space<vmem>>, vector<1x16x16xbf16>
    %161 = vector.shape_cast %160 : vector<1x16x16xbf16> to vector<16x16xbf16>
    %cst_126 = arith.constant dense<0.000000e+00> : vector<24x16xf32>
    %162 = tpu.matmul %147, %161, %cst_126 {dimension_numbers = #tpu.dot_dimension_numbers<[1], [0], [0], [1], [0, 0, 1, 1], [], []>} : vector<24x16xbf16>, vector<16x16xbf16>, vector<24x16xf32> -> vector<24x16xf32>
    %c6_127 = arith.constant 6 : index
    %c0_128 = arith.constant 0 : index
    %c0_129 = arith.constant 0 : index
    %163 = vector.load %arg38[%c6_127, %c0_128, %c0_129] : memref<9x16x16xbf16, #tpu.memory_space<vmem>>, vector<1x16x16xbf16>
    %164 = vector.shape_cast %163 : vector<1x16x16xbf16> to vector<16x16xbf16>
    %cst_130 = arith.constant dense<0.000000e+00> : vector<24x16xf32>
    %165 = tpu.matmul %147, %164, %cst_130 {dimension_numbers = #tpu.dot_dimension_numbers<[1], [0], [0], [1], [0, 0, 1, 1], [], []>} : vector<24x16xbf16>, vector<16x16xbf16>, vector<24x16xf32> -> vector<24x16xf32>
    %c7_131 = arith.constant 7 : index
    %c0_132 = arith.constant 0 : index
    %c0_133 = arith.constant 0 : index
    %166 = vector.load %arg38[%c7_131, %c0_132, %c0_133] : memref<9x16x16xbf16, #tpu.memory_space<vmem>>, vector<1x16x16xbf16>
    %167 = vector.shape_cast %166 : vector<1x16x16xbf16> to vector<16x16xbf16>
    %cst_134 = arith.constant dense<0.000000e+00> : vector<24x16xf32>
    %168 = tpu.matmul %147, %167, %cst_134 {dimension_numbers = #tpu.dot_dimension_numbers<[1], [0], [0], [1], [0, 0, 1, 1], [], []>} : vector<24x16xbf16>, vector<16x16xbf16>, vector<24x16xf32> -> vector<24x16xf32>
    %c8_135 = arith.constant 8 : index
    %c0_136 = arith.constant 0 : index
    %c0_137 = arith.constant 0 : index
    %169 = vector.load %arg38[%c8_135, %c0_136, %c0_137] : memref<9x16x16xbf16, #tpu.memory_space<vmem>>, vector<1x16x16xbf16>
    %170 = vector.shape_cast %169 : vector<1x16x16xbf16> to vector<16x16xbf16>
    %cst_138 = arith.constant dense<0.000000e+00> : vector<24x16xf32>
    %171 = tpu.matmul %147, %170, %cst_138 {dimension_numbers = #tpu.dot_dimension_numbers<[1], [0], [0], [1], [0, 0, 1, 1], [], []>} : vector<24x16xbf16>, vector<16x16xbf16>, vector<24x16xf32> -> vector<24x16xf32>
    %172 = tpu.concatenate %150, %153, %156, %159, %146, %162, %165, %168, %171 in 0 : vector<24x16xf32>, vector<24x16xf32>, vector<24x16xf32>, vector<24x16xf32>, vector<24x16xf32>, vector<24x16xf32>, vector<24x16xf32>, vector<24x16xf32>, vector<24x16xf32> -> vector<216x16xf32>
    %173 = arith.truncf %172 : vector<216x16xf32> to vector<216x16xbf16>
    %c0_139 = arith.constant 0 : index
    %c0_140 = arith.constant 0 : index
    %174 = vector.load %arg8[%c0_139, %c0_140] : memref<24x216xbf16, #tpu.memory_space<vmem>>, vector<24x216xbf16>
    %cst_141 = arith.constant dense<0.000000e+00> : vector<24x16xf32>
    %175 = tpu.matmul %174, %173, %cst_141 {dimension_numbers = #tpu.dot_dimension_numbers<[1], [0], [0], [1], [0, 0, 1, 1], [], []>} : vector<24x216xbf16>, vector<216x16xbf16>, vector<24x16xf32> -> vector<24x16xf32>
    %cst_142 = arith.constant 0.000000e+00 : f32
    %176 = vector.broadcast %cst_142 : f32 to vector<24x16xf32>
    %177 = arith.cmpf oge, %175, %176 : vector<24x16xf32>
    %178 = vector.broadcast %0 : f32 to vector<24x16xf32>
    %179 = arith.mulf %178, %175 : vector<24x16xf32>
    %180 = arith.select %177, %175, %179 : vector<24x16xi1>, vector<24x16xf32>
    %181 = arith.truncf %180 : vector<24x16xf32> to vector<24x16xbf16>
    %c0_143 = arith.constant 0 : index
    %c0_144 = arith.constant 0 : index
    %c0_145 = arith.constant 0 : index
    %182 = vector.load %arg38[%c0_143, %c0_144, %c0_145] : memref<9x16x16xbf16, #tpu.memory_space<vmem>>, vector<1x16x16xbf16>
    %183 = vector.shape_cast %182 : vector<1x16x16xbf16> to vector<16x16xbf16>
    %cst_146 = arith.constant dense<0.000000e+00> : vector<24x16xf32>
    %184 = tpu.matmul %181, %183, %cst_146 {dimension_numbers = #tpu.dot_dimension_numbers<[1], [0], [0], [1], [0, 0, 1, 1], [], []>} : vector<24x16xbf16>, vector<16x16xbf16>, vector<24x16xf32> -> vector<24x16xf32>
    %c1_147 = arith.constant 1 : index
    %c0_148 = arith.constant 0 : index
    %c0_149 = arith.constant 0 : index
    %185 = vector.load %arg38[%c1_147, %c0_148, %c0_149] : memref<9x16x16xbf16, #tpu.memory_space<vmem>>, vector<1x16x16xbf16>
    %186 = vector.shape_cast %185 : vector<1x16x16xbf16> to vector<16x16xbf16>
    %cst_150 = arith.constant dense<0.000000e+00> : vector<24x16xf32>
    %187 = tpu.matmul %181, %186, %cst_150 {dimension_numbers = #tpu.dot_dimension_numbers<[1], [0], [0], [1], [0, 0, 1, 1], [], []>} : vector<24x16xbf16>, vector<16x16xbf16>, vector<24x16xf32> -> vector<24x16xf32>
    %c2_151 = arith.constant 2 : index
    %c0_152 = arith.constant 0 : index
    %c0_153 = arith.constant 0 : index
    %188 = vector.load %arg38[%c2_151, %c0_152, %c0_153] : memref<9x16x16xbf16, #tpu.memory_space<vmem>>, vector<1x16x16xbf16>
    %189 = vector.shape_cast %188 : vector<1x16x16xbf16> to vector<16x16xbf16>
    %cst_154 = arith.constant dense<0.000000e+00> : vector<24x16xf32>
    %190 = tpu.matmul %181, %189, %cst_154 {dimension_numbers = #tpu.dot_dimension_numbers<[1], [0], [0], [1], [0, 0, 1, 1], [], []>} : vector<24x16xbf16>, vector<16x16xbf16>, vector<24x16xf32> -> vector<24x16xf32>
    %c3_155 = arith.constant 3 : index
    %c0_156 = arith.constant 0 : index
    %c0_157 = arith.constant 0 : index
    %191 = vector.load %arg38[%c3_155, %c0_156, %c0_157] : memref<9x16x16xbf16, #tpu.memory_space<vmem>>, vector<1x16x16xbf16>
    %192 = vector.shape_cast %191 : vector<1x16x16xbf16> to vector<16x16xbf16>
    %cst_158 = arith.constant dense<0.000000e+00> : vector<24x16xf32>
    %193 = tpu.matmul %181, %192, %cst_158 {dimension_numbers = #tpu.dot_dimension_numbers<[1], [0], [0], [1], [0, 0, 1, 1], [], []>} : vector<24x16xbf16>, vector<16x16xbf16>, vector<24x16xf32> -> vector<24x16xf32>
    %c5_159 = arith.constant 5 : index
    %c0_160 = arith.constant 0 : index
    %c0_161 = arith.constant 0 : index
    %194 = vector.load %arg38[%c5_159, %c0_160, %c0_161] : memref<9x16x16xbf16, #tpu.memory_space<vmem>>, vector<1x16x16xbf16>
    %195 = vector.shape_cast %194 : vector<1x16x16xbf16> to vector<16x16xbf16>
    %cst_162 = arith.constant dense<0.000000e+00> : vector<24x16xf32>
    %196 = tpu.matmul %181, %195, %cst_162 {dimension_numbers = #tpu.dot_dimension_numbers<[1], [0], [0], [1], [0, 0, 1, 1], [], []>} : vector<24x16xbf16>, vector<16x16xbf16>, vector<24x16xf32> -> vector<24x16xf32>
    %c6_163 = arith.constant 6 : index
    %c0_164 = arith.constant 0 : index
    %c0_165 = arith.constant 0 : index
    %197 = vector.load %arg38[%c6_163, %c0_164, %c0_165] : memref<9x16x16xbf16, #tpu.memory_space<vmem>>, vector<1x16x16xbf16>
    %198 = vector.shape_cast %197 : vector<1x16x16xbf16> to vector<16x16xbf16>
    %cst_166 = arith.constant dense<0.000000e+00> : vector<24x16xf32>
    %199 = tpu.matmul %181, %198, %cst_166 {dimension_numbers = #tpu.dot_dimension_numbers<[1], [0], [0], [1], [0, 0, 1, 1], [], []>} : vector<24x16xbf16>, vector<16x16xbf16>, vector<24x16xf32> -> vector<24x16xf32>
    %c7_167 = arith.constant 7 : index
    %c0_168 = arith.constant 0 : index
    %c0_169 = arith.constant 0 : index
    %200 = vector.load %arg38[%c7_167, %c0_168, %c0_169] : memref<9x16x16xbf16, #tpu.memory_space<vmem>>, vector<1x16x16xbf16>
    %201 = vector.shape_cast %200 : vector<1x16x16xbf16> to vector<16x16xbf16>
    %cst_170 = arith.constant dense<0.000000e+00> : vector<24x16xf32>
    %202 = tpu.matmul %181, %201, %cst_170 {dimension_numbers = #tpu.dot_dimension_numbers<[1], [0], [0], [1], [0, 0, 1, 1], [], []>} : vector<24x16xbf16>, vector<16x16xbf16>, vector<24x16xf32> -> vector<24x16xf32>
    %c8_171 = arith.constant 8 : index
    %c0_172 = arith.constant 0 : index
    %c0_173 = arith.constant 0 : index
    %203 = vector.load %arg38[%c8_171, %c0_172, %c0_173] : memref<9x16x16xbf16, #tpu.memory_space<vmem>>, vector<1x16x16xbf16>
    %204 = vector.shape_cast %203 : vector<1x16x16xbf16> to vector<16x16xbf16>
    %cst_174 = arith.constant dense<0.000000e+00> : vector<24x16xf32>
    %205 = tpu.matmul %181, %204, %cst_174 {dimension_numbers = #tpu.dot_dimension_numbers<[1], [0], [0], [1], [0, 0, 1, 1], [], []>} : vector<24x16xbf16>, vector<16x16xbf16>, vector<24x16xf32> -> vector<24x16xf32>
    %206 = tpu.concatenate %184, %187, %190, %193, %180, %196, %199, %202, %205 in 0 : vector<24x16xf32>, vector<24x16xf32>, vector<24x16xf32>, vector<24x16xf32>, vector<24x16xf32>, vector<24x16xf32>, vector<24x16xf32>, vector<24x16xf32>, vector<24x16xf32> -> vector<216x16xf32>
    %207 = arith.truncf %206 : vector<216x16xf32> to vector<216x16xbf16>
    %c0_175 = arith.constant 0 : index
    %c0_176 = arith.constant 0 : index
    %208 = vector.load %arg9[%c0_175, %c0_176] : memref<24x216xbf16, #tpu.memory_space<vmem>>, vector<24x216xbf16>
    %cst_177 = arith.constant dense<0.000000e+00> : vector<24x16xf32>
    %209 = tpu.matmul %208, %207, %cst_177 {dimension_numbers = #tpu.dot_dimension_numbers<[1], [0], [0], [1], [0, 0, 1, 1], [], []>} : vector<24x216xbf16>, vector<216x16xbf16>, vector<24x16xf32> -> vector<24x16xf32>
    %cst_178 = arith.constant 0.000000e+00 : f32
    %210 = vector.broadcast %cst_178 : f32 to vector<24x16xf32>
    %211 = arith.cmpf oge, %209, %210 : vector<24x16xf32>
    %212 = vector.broadcast %0 : f32 to vector<24x16xf32>
    %213 = arith.mulf %212, %209 : vector<24x16xf32>
    %214 = arith.select %211, %209, %213 : vector<24x16xi1>, vector<24x16xf32>
    %215 = arith.truncf %214 : vector<24x16xf32> to vector<24x16xbf16>
    %c0_179 = arith.constant 0 : index
    %c0_180 = arith.constant 0 : index
    %216 = vector.load %arg41[%c0_179, %c0_180] : memref<16x64xbf16, #tpu.memory_space<vmem>>, vector<16x64xbf16>
    %cst_181 = arith.constant dense<0.000000e+00> : vector<24x64xf32>
    %217 = tpu.matmul %215, %216, %cst_181 {dimension_numbers = #tpu.dot_dimension_numbers<[1], [0], [0], [1], [0, 0, 1, 1], [], []>} : vector<24x16xbf16>, vector<16x64xbf16>, vector<24x64xf32> -> vector<24x64xf32>
    %c0_182 = arith.constant 0 : index
    %c0_183 = arith.constant 0 : index
    %218 = vector.load %arg10[%c0_182, %c0_183] : memref<16x24xbf16, #tpu.memory_space<vmem>>, vector<16x24xbf16>
    %219 = arith.truncf %217 : vector<24x64xf32> to vector<24x64xbf16>
    %cst_184 = arith.constant dense<0.000000e+00> : vector<16x64xf32>
    %220 = tpu.matmul %218, %219, %cst_184 {dimension_numbers = #tpu.dot_dimension_numbers<[1], [0], [0], [1], [0, 0, 1, 1], [], []>} : vector<16x24xbf16>, vector<24x64xbf16>, vector<16x64xf32> -> vector<16x64xf32>
    %221 = arith.addf %220, %140 : vector<16x64xf32>
    %222 = arith.truncf %221 : vector<16x64xf32> to vector<16x64xbf16>
    %c0_185 = arith.constant 0 : index
    %c0_186 = arith.constant 0 : index
    %c0_187 = arith.constant 0 : index
    %223 = vector.load %arg37[%c0_185, %c0_186, %c0_187] : memref<9x64x64xbf16, #tpu.memory_space<vmem>>, vector<1x64x64xbf16>
    %224 = vector.shape_cast %223 : vector<1x64x64xbf16> to vector<64x64xbf16>
    %cst_188 = arith.constant dense<0.000000e+00> : vector<16x64xf32>
    %225 = tpu.matmul %222, %224, %cst_188 {dimension_numbers = #tpu.dot_dimension_numbers<[1], [0], [0], [1], [0, 0, 1, 1], [], []>} : vector<16x64xbf16>, vector<64x64xbf16>, vector<16x64xf32> -> vector<16x64xf32>
    %c1_189 = arith.constant 1 : index
    %c0_190 = arith.constant 0 : index
    %c0_191 = arith.constant 0 : index
    %226 = vector.load %arg37[%c1_189, %c0_190, %c0_191] : memref<9x64x64xbf16, #tpu.memory_space<vmem>>, vector<1x64x64xbf16>
    %227 = vector.shape_cast %226 : vector<1x64x64xbf16> to vector<64x64xbf16>
    %cst_192 = arith.constant dense<0.000000e+00> : vector<16x64xf32>
    %228 = tpu.matmul %222, %227, %cst_192 {dimension_numbers = #tpu.dot_dimension_numbers<[1], [0], [0], [1], [0, 0, 1, 1], [], []>} : vector<16x64xbf16>, vector<64x64xbf16>, vector<16x64xf32> -> vector<16x64xf32>
    %c2_193 = arith.constant 2 : index
    %c0_194 = arith.constant 0 : index
    %c0_195 = arith.constant 0 : index
    %229 = vector.load %arg37[%c2_193, %c0_194, %c0_195] : memref<9x64x64xbf16, #tpu.memory_space<vmem>>, vector<1x64x64xbf16>
    %230 = vector.shape_cast %229 : vector<1x64x64xbf16> to vector<64x64xbf16>
    %cst_196 = arith.constant dense<0.000000e+00> : vector<16x64xf32>
    %231 = tpu.matmul %222, %230, %cst_196 {dimension_numbers = #tpu.dot_dimension_numbers<[1], [0], [0], [1], [0, 0, 1, 1], [], []>} : vector<16x64xbf16>, vector<64x64xbf16>, vector<16x64xf32> -> vector<16x64xf32>
    %c3_197 = arith.constant 3 : index
    %c0_198 = arith.constant 0 : index
    %c0_199 = arith.constant 0 : index
    %232 = vector.load %arg37[%c3_197, %c0_198, %c0_199] : memref<9x64x64xbf16, #tpu.memory_space<vmem>>, vector<1x64x64xbf16>
    %233 = vector.shape_cast %232 : vector<1x64x64xbf16> to vector<64x64xbf16>
    %cst_200 = arith.constant dense<0.000000e+00> : vector<16x64xf32>
    %234 = tpu.matmul %222, %233, %cst_200 {dimension_numbers = #tpu.dot_dimension_numbers<[1], [0], [0], [1], [0, 0, 1, 1], [], []>} : vector<16x64xbf16>, vector<64x64xbf16>, vector<16x64xf32> -> vector<16x64xf32>
    %c5_201 = arith.constant 5 : index
    %c0_202 = arith.constant 0 : index
    %c0_203 = arith.constant 0 : index
    %235 = vector.load %arg37[%c5_201, %c0_202, %c0_203] : memref<9x64x64xbf16, #tpu.memory_space<vmem>>, vector<1x64x64xbf16>
    %236 = vector.shape_cast %235 : vector<1x64x64xbf16> to vector<64x64xbf16>
    %cst_204 = arith.constant dense<0.000000e+00> : vector<16x64xf32>
    %237 = tpu.matmul %222, %236, %cst_204 {dimension_numbers = #tpu.dot_dimension_numbers<[1], [0], [0], [1], [0, 0, 1, 1], [], []>} : vector<16x64xbf16>, vector<64x64xbf16>, vector<16x64xf32> -> vector<16x64xf32>
    %c6_205 = arith.constant 6 : index
    %c0_206 = arith.constant 0 : index
    %c0_207 = arith.constant 0 : index
    %238 = vector.load %arg37[%c6_205, %c0_206, %c0_207] : memref<9x64x64xbf16, #tpu.memory_space<vmem>>, vector<1x64x64xbf16>
    %239 = vector.shape_cast %238 : vector<1x64x64xbf16> to vector<64x64xbf16>
    %cst_208 = arith.constant dense<0.000000e+00> : vector<16x64xf32>
    %240 = tpu.matmul %222, %239, %cst_208 {dimension_numbers = #tpu.dot_dimension_numbers<[1], [0], [0], [1], [0, 0, 1, 1], [], []>} : vector<16x64xbf16>, vector<64x64xbf16>, vector<16x64xf32> -> vector<16x64xf32>
    %c7_209 = arith.constant 7 : index
    %c0_210 = arith.constant 0 : index
    %c0_211 = arith.constant 0 : index
    %241 = vector.load %arg37[%c7_209, %c0_210, %c0_211] : memref<9x64x64xbf16, #tpu.memory_space<vmem>>, vector<1x64x64xbf16>
    %242 = vector.shape_cast %241 : vector<1x64x64xbf16> to vector<64x64xbf16>
    %cst_212 = arith.constant dense<0.000000e+00> : vector<16x64xf32>
    %243 = tpu.matmul %222, %242, %cst_212 {dimension_numbers = #tpu.dot_dimension_numbers<[1], [0], [0], [1], [0, 0, 1, 1], [], []>} : vector<16x64xbf16>, vector<64x64xbf16>, vector<16x64xf32> -> vector<16x64xf32>
    %c8_213 = arith.constant 8 : index
    %c0_214 = arith.constant 0 : index
    %c0_215 = arith.constant 0 : index
    %244 = vector.load %arg37[%c8_213, %c0_214, %c0_215] : memref<9x64x64xbf16, #tpu.memory_space<vmem>>, vector<1x64x64xbf16>
    %245 = vector.shape_cast %244 : vector<1x64x64xbf16> to vector<64x64xbf16>
    %cst_216 = arith.constant dense<0.000000e+00> : vector<16x64xf32>
    %246 = tpu.matmul %222, %245, %cst_216 {dimension_numbers = #tpu.dot_dimension_numbers<[1], [0], [0], [1], [0, 0, 1, 1], [], []>} : vector<16x64xbf16>, vector<64x64xbf16>, vector<16x64xf32> -> vector<16x64xf32>
    %247 = tpu.concatenate %225, %228, %231, %234, %221, %237, %240, %243, %246 in 0 : vector<16x64xf32>, vector<16x64xf32>, vector<16x64xf32>, vector<16x64xf32>, vector<16x64xf32>, vector<16x64xf32>, vector<16x64xf32>, vector<16x64xf32>, vector<16x64xf32> -> vector<144x64xf32>
    %248 = arith.truncf %247 : vector<144x64xf32> to vector<144x64xbf16>
    %c0_217 = arith.constant 0 : index
    %c0_218 = arith.constant 0 : index
    %249 = vector.load %arg11[%c0_217, %c0_218] : memref<16x144xbf16, #tpu.memory_space<vmem>>, vector<16x144xbf16>
    %cst_219 = arith.constant dense<0.000000e+00> : vector<16x64xf32>
    %250 = tpu.matmul %249, %248, %cst_219 {dimension_numbers = #tpu.dot_dimension_numbers<[1], [0], [0], [1], [0, 0, 1, 1], [], []>} : vector<16x144xbf16>, vector<144x64xbf16>, vector<16x64xf32> -> vector<16x64xf32>
    %cst_220 = arith.constant 0.000000e+00 : f32
    %251 = vector.broadcast %cst_220 : f32 to vector<16x64xf32>
    %252 = arith.cmpf oge, %250, %251 : vector<16x64xf32>
    %253 = vector.broadcast %0 : f32 to vector<16x64xf32>
    %254 = arith.mulf %253, %250 : vector<16x64xf32>
    %255 = arith.select %252, %250, %254 : vector<16x64xi1>, vector<16x64xf32>
    %256 = arith.truncf %255 : vector<16x64xf32> to vector<16x64xbf16>
    %c0_221 = arith.constant 0 : index
    %c0_222 = arith.constant 0 : index
    %257 = vector.load %arg42[%c0_221, %c0_222] : memref<64x256xbf16, #tpu.memory_space<vmem>>, vector<64x256xbf16>
    %cst_223 = arith.constant dense<0.000000e+00> : vector<16x256xf32>
    %258 = tpu.matmul %256, %257, %cst_223 {dimension_numbers = #tpu.dot_dimension_numbers<[1], [0], [0], [1], [0, 0, 1, 1], [], []>} : vector<16x64xbf16>, vector<64x256xbf16>, vector<16x256xf32> -> vector<16x256xf32>
    %c0_224 = arith.constant 0 : index
    %c0_225 = arith.constant 0 : index
    %259 = vector.load %arg12[%c0_224, %c0_225] : memref<8x16xbf16, #tpu.memory_space<vmem>>, vector<8x16xbf16>
    %260 = arith.truncf %258 : vector<16x256xf32> to vector<16x256xbf16>
    %cst_226 = arith.constant dense<0.000000e+00> : vector<8x256xf32>
    %261 = tpu.matmul %259, %260, %cst_226 {dimension_numbers = #tpu.dot_dimension_numbers<[1], [0], [0], [1], [0, 0, 1, 1], [], []>} : vector<8x16xbf16>, vector<16x256xbf16>, vector<8x256xf32> -> vector<8x256xf32>
    %262 = arith.addf %261, %100 : vector<8x256xf32>
    %c17_i32_227 = arith.constant 17 : i32
    %263 = tpu.dynamic_rotate %262 by %c17_i32_227 dim 1 : vector<8x256xf32>, i32 -> vector<8x256xf32>
    %c0_228 = arith.constant 0 : index
    %c0_229 = arith.constant 0 : index
    %c0_230 = arith.constant 0 : index
    %264 = vector.load %arg34[%c0_228, %c0_229, %c0_230] : memref<9x1x256xf32, #tpu.memory_space<vmem>>, vector<1x1x256xf32>
    %265 = vector.shape_cast %264 : vector<1x1x256xf32> to vector<1x256xf32>
    %266 = vector.broadcast %265 : vector<1x256xf32> to vector<8x256xf32>
    %267 = arith.mulf %263, %266 : vector<8x256xf32>
    %c16_i32_231 = arith.constant 16 : i32
    %268 = tpu.dynamic_rotate %262 by %c16_i32_231 dim 1 : vector<8x256xf32>, i32 -> vector<8x256xf32>
    %c1_232 = arith.constant 1 : index
    %c0_233 = arith.constant 0 : index
    %c0_234 = arith.constant 0 : index
    %269 = vector.load %arg34[%c1_232, %c0_233, %c0_234] : memref<9x1x256xf32, #tpu.memory_space<vmem>>, vector<1x1x256xf32>
    %270 = vector.shape_cast %269 : vector<1x1x256xf32> to vector<1x256xf32>
    %271 = vector.broadcast %270 : vector<1x256xf32> to vector<8x256xf32>
    %272 = arith.mulf %268, %271 : vector<8x256xf32>
    %c15_i32_235 = arith.constant 15 : i32
    %273 = tpu.dynamic_rotate %262 by %c15_i32_235 dim 1 : vector<8x256xf32>, i32 -> vector<8x256xf32>
    %c2_236 = arith.constant 2 : index
    %c0_237 = arith.constant 0 : index
    %c0_238 = arith.constant 0 : index
    %274 = vector.load %arg34[%c2_236, %c0_237, %c0_238] : memref<9x1x256xf32, #tpu.memory_space<vmem>>, vector<1x1x256xf32>
    %275 = vector.shape_cast %274 : vector<1x1x256xf32> to vector<1x256xf32>
    %276 = vector.broadcast %275 : vector<1x256xf32> to vector<8x256xf32>
    %277 = arith.mulf %273, %276 : vector<8x256xf32>
    %c1_i32_239 = arith.constant 1 : i32
    %278 = tpu.dynamic_rotate %262 by %c1_i32_239 dim 1 : vector<8x256xf32>, i32 -> vector<8x256xf32>
    %c3_240 = arith.constant 3 : index
    %c0_241 = arith.constant 0 : index
    %c0_242 = arith.constant 0 : index
    %279 = vector.load %arg34[%c3_240, %c0_241, %c0_242] : memref<9x1x256xf32, #tpu.memory_space<vmem>>, vector<1x1x256xf32>
    %280 = vector.shape_cast %279 : vector<1x1x256xf32> to vector<1x256xf32>
    %281 = vector.broadcast %280 : vector<1x256xf32> to vector<8x256xf32>
    %282 = arith.mulf %278, %281 : vector<8x256xf32>
    %c255_i32_243 = arith.constant 255 : i32
    %283 = tpu.dynamic_rotate %262 by %c255_i32_243 dim 1 : vector<8x256xf32>, i32 -> vector<8x256xf32>
    %c5_244 = arith.constant 5 : index
    %c0_245 = arith.constant 0 : index
    %c0_246 = arith.constant 0 : index
    %284 = vector.load %arg34[%c5_244, %c0_245, %c0_246] : memref<9x1x256xf32, #tpu.memory_space<vmem>>, vector<1x1x256xf32>
    %285 = vector.shape_cast %284 : vector<1x1x256xf32> to vector<1x256xf32>
    %286 = vector.broadcast %285 : vector<1x256xf32> to vector<8x256xf32>
    %287 = arith.mulf %283, %286 : vector<8x256xf32>
    %c241_i32_247 = arith.constant 241 : i32
    %288 = tpu.dynamic_rotate %262 by %c241_i32_247 dim 1 : vector<8x256xf32>, i32 -> vector<8x256xf32>
    %c6_248 = arith.constant 6 : index
    %c0_249 = arith.constant 0 : index
    %c0_250 = arith.constant 0 : index
    %289 = vector.load %arg34[%c6_248, %c0_249, %c0_250] : memref<9x1x256xf32, #tpu.memory_space<vmem>>, vector<1x1x256xf32>
    %290 = vector.shape_cast %289 : vector<1x1x256xf32> to vector<1x256xf32>
    %291 = vector.broadcast %290 : vector<1x256xf32> to vector<8x256xf32>
    %292 = arith.mulf %288, %291 : vector<8x256xf32>
    %c240_i32_251 = arith.constant 240 : i32
    %293 = tpu.dynamic_rotate %262 by %c240_i32_251 dim 1 : vector<8x256xf32>, i32 -> vector<8x256xf32>
    %c7_252 = arith.constant 7 : index
    %c0_253 = arith.constant 0 : index
    %c0_254 = arith.constant 0 : index
    %294 = vector.load %arg34[%c7_252, %c0_253, %c0_254] : memref<9x1x256xf32, #tpu.memory_space<vmem>>, vector<1x1x256xf32>
    %295 = vector.shape_cast %294 : vector<1x1x256xf32> to vector<1x256xf32>
    %296 = vector.broadcast %295 : vector<1x256xf32> to vector<8x256xf32>
    %297 = arith.mulf %293, %296 : vector<8x256xf32>
    %c239_i32_255 = arith.constant 239 : i32
    %298 = tpu.dynamic_rotate %262 by %c239_i32_255 dim 1 : vector<8x256xf32>, i32 -> vector<8x256xf32>
    %c8_256 = arith.constant 8 : index
    %c0_257 = arith.constant 0 : index
    %c0_258 = arith.constant 0 : index
    %299 = vector.load %arg34[%c8_256, %c0_257, %c0_258] : memref<9x1x256xf32, #tpu.memory_space<vmem>>, vector<1x1x256xf32>
    %300 = vector.shape_cast %299 : vector<1x1x256xf32> to vector<1x256xf32>
    %301 = vector.broadcast %300 : vector<1x256xf32> to vector<8x256xf32>
    %302 = arith.mulf %298, %301 : vector<8x256xf32>
    %303 = tpu.concatenate %267, %272, %277, %282, %262, %287, %292, %297, %302 in 0 : vector<8x256xf32>, vector<8x256xf32>, vector<8x256xf32>, vector<8x256xf32>, vector<8x256xf32>, vector<8x256xf32>, vector<8x256xf32>, vector<8x256xf32>, vector<8x256xf32> -> vector<72x256xf32>
    %304 = arith.truncf %303 : vector<72x256xf32> to vector<72x256xbf16>
    %c0_259 = arith.constant 0 : index
    %c0_260 = arith.constant 0 : index
    %305 = vector.load %arg13[%c0_259, %c0_260] : memref<8x72xbf16, #tpu.memory_space<vmem>>, vector<8x72xbf16>
    %cst_261 = arith.constant dense<0.000000e+00> : vector<8x256xf32>
    %306 = tpu.matmul %305, %304, %cst_261 {dimension_numbers = #tpu.dot_dimension_numbers<[1], [0], [0], [1], [0, 0, 1, 1], [], []>} : vector<8x72xbf16>, vector<72x256xbf16>, vector<8x256xf32> -> vector<8x256xf32>
    %cst_262 = arith.constant 0.000000e+00 : f32
    %307 = vector.broadcast %cst_262 : f32 to vector<8x256xf32>
    %308 = arith.cmpf oge, %306, %307 : vector<8x256xf32>
    %309 = vector.broadcast %0 : f32 to vector<8x256xf32>
    %310 = arith.mulf %309, %306 : vector<8x256xf32>
    %311 = arith.select %308, %306, %310 : vector<8x256xi1>, vector<8x256xf32>
    %c17_i32_263 = arith.constant 17 : i32
    %312 = tpu.dynamic_rotate %311 by %c17_i32_263 dim 1 : vector<8x256xf32>, i32 -> vector<8x256xf32>
    %c0_264 = arith.constant 0 : index
    %c0_265 = arith.constant 0 : index
    %c0_266 = arith.constant 0 : index
    %313 = vector.load %arg34[%c0_264, %c0_265, %c0_266] : memref<9x1x256xf32, #tpu.memory_space<vmem>>, vector<1x1x256xf32>
    %314 = vector.shape_cast %313 : vector<1x1x256xf32> to vector<1x256xf32>
    %315 = vector.broadcast %314 : vector<1x256xf32> to vector<8x256xf32>
    %316 = arith.mulf %312, %315 : vector<8x256xf32>
    %c16_i32_267 = arith.constant 16 : i32
    %317 = tpu.dynamic_rotate %311 by %c16_i32_267 dim 1 : vector<8x256xf32>, i32 -> vector<8x256xf32>
    %c1_268 = arith.constant 1 : index
    %c0_269 = arith.constant 0 : index
    %c0_270 = arith.constant 0 : index
    %318 = vector.load %arg34[%c1_268, %c0_269, %c0_270] : memref<9x1x256xf32, #tpu.memory_space<vmem>>, vector<1x1x256xf32>
    %319 = vector.shape_cast %318 : vector<1x1x256xf32> to vector<1x256xf32>
    %320 = vector.broadcast %319 : vector<1x256xf32> to vector<8x256xf32>
    %321 = arith.mulf %317, %320 : vector<8x256xf32>
    %c15_i32_271 = arith.constant 15 : i32
    %322 = tpu.dynamic_rotate %311 by %c15_i32_271 dim 1 : vector<8x256xf32>, i32 -> vector<8x256xf32>
    %c2_272 = arith.constant 2 : index
    %c0_273 = arith.constant 0 : index
    %c0_274 = arith.constant 0 : index
    %323 = vector.load %arg34[%c2_272, %c0_273, %c0_274] : memref<9x1x256xf32, #tpu.memory_space<vmem>>, vector<1x1x256xf32>
    %324 = vector.shape_cast %323 : vector<1x1x256xf32> to vector<1x256xf32>
    %325 = vector.broadcast %324 : vector<1x256xf32> to vector<8x256xf32>
    %326 = arith.mulf %322, %325 : vector<8x256xf32>
    %c1_i32_275 = arith.constant 1 : i32
    %327 = tpu.dynamic_rotate %311 by %c1_i32_275 dim 1 : vector<8x256xf32>, i32 -> vector<8x256xf32>
    %c3_276 = arith.constant 3 : index
    %c0_277 = arith.constant 0 : index
    %c0_278 = arith.constant 0 : index
    %328 = vector.load %arg34[%c3_276, %c0_277, %c0_278] : memref<9x1x256xf32, #tpu.memory_space<vmem>>, vector<1x1x256xf32>
    %329 = vector.shape_cast %328 : vector<1x1x256xf32> to vector<1x256xf32>
    %330 = vector.broadcast %329 : vector<1x256xf32> to vector<8x256xf32>
    %331 = arith.mulf %327, %330 : vector<8x256xf32>
    %c255_i32_279 = arith.constant 255 : i32
    %332 = tpu.dynamic_rotate %311 by %c255_i32_279 dim 1 : vector<8x256xf32>, i32 -> vector<8x256xf32>
    %c5_280 = arith.constant 5 : index
    %c0_281 = arith.constant 0 : index
    %c0_282 = arith.constant 0 : index
    %333 = vector.load %arg34[%c5_280, %c0_281, %c0_282] : memref<9x1x256xf32, #tpu.memory_space<vmem>>, vector<1x1x256xf32>
    %334 = vector.shape_cast %333 : vector<1x1x256xf32> to vector<1x256xf32>
    %335 = vector.broadcast %334 : vector<1x256xf32> to vector<8x256xf32>
    %336 = arith.mulf %332, %335 : vector<8x256xf32>
    %c241_i32_283 = arith.constant 241 : i32
    %337 = tpu.dynamic_rotate %311 by %c241_i32_283 dim 1 : vector<8x256xf32>, i32 -> vector<8x256xf32>
    %c6_284 = arith.constant 6 : index
    %c0_285 = arith.constant 0 : index
    %c0_286 = arith.constant 0 : index
    %338 = vector.load %arg34[%c6_284, %c0_285, %c0_286] : memref<9x1x256xf32, #tpu.memory_space<vmem>>, vector<1x1x256xf32>
    %339 = vector.shape_cast %338 : vector<1x1x256xf32> to vector<1x256xf32>
    %340 = vector.broadcast %339 : vector<1x256xf32> to vector<8x256xf32>
    %341 = arith.mulf %337, %340 : vector<8x256xf32>
    %c240_i32_287 = arith.constant 240 : i32
    %342 = tpu.dynamic_rotate %311 by %c240_i32_287 dim 1 : vector<8x256xf32>, i32 -> vector<8x256xf32>
    %c7_288 = arith.constant 7 : index
    %c0_289 = arith.constant 0 : index
    %c0_290 = arith.constant 0 : index
    %343 = vector.load %arg34[%c7_288, %c0_289, %c0_290] : memref<9x1x256xf32, #tpu.memory_space<vmem>>, vector<1x1x256xf32>
    %344 = vector.shape_cast %343 : vector<1x1x256xf32> to vector<1x256xf32>
    %345 = vector.broadcast %344 : vector<1x256xf32> to vector<8x256xf32>
    %346 = arith.mulf %342, %345 : vector<8x256xf32>
    %c239_i32_291 = arith.constant 239 : i32
    %347 = tpu.dynamic_rotate %311 by %c239_i32_291 dim 1 : vector<8x256xf32>, i32 -> vector<8x256xf32>
    %c8_292 = arith.constant 8 : index
    %c0_293 = arith.constant 0 : index
    %c0_294 = arith.constant 0 : index
    %348 = vector.load %arg34[%c8_292, %c0_293, %c0_294] : memref<9x1x256xf32, #tpu.memory_space<vmem>>, vector<1x1x256xf32>
    %349 = vector.shape_cast %348 : vector<1x1x256xf32> to vector<1x256xf32>
    %350 = vector.broadcast %349 : vector<1x256xf32> to vector<8x256xf32>
    %351 = arith.mulf %347, %350 : vector<8x256xf32>
    %352 = tpu.concatenate %316, %321, %326, %331, %311, %336, %341, %346, %351 in 0 : vector<8x256xf32>, vector<8x256xf32>, vector<8x256xf32>, vector<8x256xf32>, vector<8x256xf32>, vector<8x256xf32>, vector<8x256xf32>, vector<8x256xf32>, vector<8x256xf32> -> vector<72x256xf32>
    %353 = arith.truncf %352 : vector<72x256xf32> to vector<72x256xbf16>
    %c0_295 = arith.constant 0 : index
    %c0_296 = arith.constant 0 : index
    %354 = vector.load %arg14[%c0_295, %c0_296] : memref<16x72xbf16, #tpu.memory_space<vmem>>, vector<16x72xbf16>
    %cst_297 = arith.constant dense<0.000000e+00> : vector<16x256xf32>
    %355 = tpu.matmul %354, %353, %cst_297 {dimension_numbers = #tpu.dot_dimension_numbers<[1], [0], [0], [1], [0, 0, 1, 1], [], []>} : vector<16x72xbf16>, vector<72x256xbf16>, vector<16x256xf32> -> vector<16x256xf32>
    %c0_298 = arith.constant 0 : index
    %c0_299 = arith.constant 0 : index
    %356 = vector.load %arg15[%c0_298, %c0_299] : memref<16x1xf32, #tpu.memory_space<vmem>>, vector<16x1xf32>
    %357 = vector.broadcast %356 : vector<16x1xf32> to vector<16x256xf32>
    %358 = arith.addf %355, %357 : vector<16x256xf32>
    %cst_300 = arith.constant 0.000000e+00 : f32
    %359 = vector.broadcast %cst_300 : f32 to vector<16x256xf32>
    %360 = arith.cmpf oge, %358, %359 : vector<16x256xf32>
    %361 = vector.broadcast %0 : f32 to vector<16x256xf32>
    %362 = arith.mulf %361, %358 : vector<16x256xf32>
    %363 = arith.select %360, %358, %362 : vector<16x256xi1>, vector<16x256xf32>
    %c34_i32 = arith.constant 34 : i32
    %364 = tpu.dynamic_rotate %311 by %c34_i32 dim 1 : vector<8x256xf32>, i32 -> vector<8x256xf32>
    %c0_301 = arith.constant 0 : index
    %c0_302 = arith.constant 0 : index
    %c0_303 = arith.constant 0 : index
    %365 = vector.load %arg35[%c0_301, %c0_302, %c0_303] : memref<9x1x256xf32, #tpu.memory_space<vmem>>, vector<1x1x256xf32>
    %366 = vector.shape_cast %365 : vector<1x1x256xf32> to vector<1x256xf32>
    %367 = vector.broadcast %366 : vector<1x256xf32> to vector<8x256xf32>
    %368 = arith.mulf %364, %367 : vector<8x256xf32>
    %c32_i32 = arith.constant 32 : i32
    %369 = tpu.dynamic_rotate %311 by %c32_i32 dim 1 : vector<8x256xf32>, i32 -> vector<8x256xf32>
    %c1_304 = arith.constant 1 : index
    %c0_305 = arith.constant 0 : index
    %c0_306 = arith.constant 0 : index
    %370 = vector.load %arg35[%c1_304, %c0_305, %c0_306] : memref<9x1x256xf32, #tpu.memory_space<vmem>>, vector<1x1x256xf32>
    %371 = vector.shape_cast %370 : vector<1x1x256xf32> to vector<1x256xf32>
    %372 = vector.broadcast %371 : vector<1x256xf32> to vector<8x256xf32>
    %373 = arith.mulf %369, %372 : vector<8x256xf32>
    %c30_i32 = arith.constant 30 : i32
    %374 = tpu.dynamic_rotate %311 by %c30_i32 dim 1 : vector<8x256xf32>, i32 -> vector<8x256xf32>
    %c2_307 = arith.constant 2 : index
    %c0_308 = arith.constant 0 : index
    %c0_309 = arith.constant 0 : index
    %375 = vector.load %arg35[%c2_307, %c0_308, %c0_309] : memref<9x1x256xf32, #tpu.memory_space<vmem>>, vector<1x1x256xf32>
    %376 = vector.shape_cast %375 : vector<1x1x256xf32> to vector<1x256xf32>
    %377 = vector.broadcast %376 : vector<1x256xf32> to vector<8x256xf32>
    %378 = arith.mulf %374, %377 : vector<8x256xf32>
    %c2_i32 = arith.constant 2 : i32
    %379 = tpu.dynamic_rotate %311 by %c2_i32 dim 1 : vector<8x256xf32>, i32 -> vector<8x256xf32>
    %c3_310 = arith.constant 3 : index
    %c0_311 = arith.constant 0 : index
    %c0_312 = arith.constant 0 : index
    %380 = vector.load %arg35[%c3_310, %c0_311, %c0_312] : memref<9x1x256xf32, #tpu.memory_space<vmem>>, vector<1x1x256xf32>
    %381 = vector.shape_cast %380 : vector<1x1x256xf32> to vector<1x256xf32>
    %382 = vector.broadcast %381 : vector<1x256xf32> to vector<8x256xf32>
    %383 = arith.mulf %379, %382 : vector<8x256xf32>
    %c254_i32 = arith.constant 254 : i32
    %384 = tpu.dynamic_rotate %311 by %c254_i32 dim 1 : vector<8x256xf32>, i32 -> vector<8x256xf32>
    %c5_313 = arith.constant 5 : index
    %c0_314 = arith.constant 0 : index
    %c0_315 = arith.constant 0 : index
    %385 = vector.load %arg35[%c5_313, %c0_314, %c0_315] : memref<9x1x256xf32, #tpu.memory_space<vmem>>, vector<1x1x256xf32>
    %386 = vector.shape_cast %385 : vector<1x1x256xf32> to vector<1x256xf32>
    %387 = vector.broadcast %386 : vector<1x256xf32> to vector<8x256xf32>
    %388 = arith.mulf %384, %387 : vector<8x256xf32>
    %c226_i32 = arith.constant 226 : i32
    %389 = tpu.dynamic_rotate %311 by %c226_i32 dim 1 : vector<8x256xf32>, i32 -> vector<8x256xf32>
    %c6_316 = arith.constant 6 : index
    %c0_317 = arith.constant 0 : index
    %c0_318 = arith.constant 0 : index
    %390 = vector.load %arg35[%c6_316, %c0_317, %c0_318] : memref<9x1x256xf32, #tpu.memory_space<vmem>>, vector<1x1x256xf32>
    %391 = vector.shape_cast %390 : vector<1x1x256xf32> to vector<1x256xf32>
    %392 = vector.broadcast %391 : vector<1x256xf32> to vector<8x256xf32>
    %393 = arith.mulf %389, %392 : vector<8x256xf32>
    %c224_i32 = arith.constant 224 : i32
    %394 = tpu.dynamic_rotate %311 by %c224_i32 dim 1 : vector<8x256xf32>, i32 -> vector<8x256xf32>
    %c7_319 = arith.constant 7 : index
    %c0_320 = arith.constant 0 : index
    %c0_321 = arith.constant 0 : index
    %395 = vector.load %arg35[%c7_319, %c0_320, %c0_321] : memref<9x1x256xf32, #tpu.memory_space<vmem>>, vector<1x1x256xf32>
    %396 = vector.shape_cast %395 : vector<1x1x256xf32> to vector<1x256xf32>
    %397 = vector.broadcast %396 : vector<1x256xf32> to vector<8x256xf32>
    %398 = arith.mulf %394, %397 : vector<8x256xf32>
    %c222_i32 = arith.constant 222 : i32
    %399 = tpu.dynamic_rotate %311 by %c222_i32 dim 1 : vector<8x256xf32>, i32 -> vector<8x256xf32>
    %c8_322 = arith.constant 8 : index
    %c0_323 = arith.constant 0 : index
    %c0_324 = arith.constant 0 : index
    %400 = vector.load %arg35[%c8_322, %c0_323, %c0_324] : memref<9x1x256xf32, #tpu.memory_space<vmem>>, vector<1x1x256xf32>
    %401 = vector.shape_cast %400 : vector<1x1x256xf32> to vector<1x256xf32>
    %402 = vector.broadcast %401 : vector<1x256xf32> to vector<8x256xf32>
    %403 = arith.mulf %399, %402 : vector<8x256xf32>
    %404 = tpu.concatenate %368, %373, %378, %383, %311, %388, %393, %398, %403 in 0 : vector<8x256xf32>, vector<8x256xf32>, vector<8x256xf32>, vector<8x256xf32>, vector<8x256xf32>, vector<8x256xf32>, vector<8x256xf32>, vector<8x256xf32>, vector<8x256xf32> -> vector<72x256xf32>
    %405 = arith.truncf %404 : vector<72x256xf32> to vector<72x256xbf16>
    %c0_325 = arith.constant 0 : index
    %c0_326 = arith.constant 0 : index
    %406 = vector.load %arg16[%c0_325, %c0_326] : memref<16x72xbf16, #tpu.memory_space<vmem>>, vector<16x72xbf16>
    %cst_327 = arith.constant dense<0.000000e+00> : vector<16x256xf32>
    %407 = tpu.matmul %406, %405, %cst_327 {dimension_numbers = #tpu.dot_dimension_numbers<[1], [0], [0], [1], [0, 0, 1, 1], [], []>} : vector<16x72xbf16>, vector<72x256xbf16>, vector<16x256xf32> -> vector<16x256xf32>
    %c0_328 = arith.constant 0 : index
    %c0_329 = arith.constant 0 : index
    %408 = vector.load %arg17[%c0_328, %c0_329] : memref<16x1xf32, #tpu.memory_space<vmem>>, vector<16x1xf32>
    %409 = vector.broadcast %408 : vector<16x1xf32> to vector<16x256xf32>
    %410 = arith.addf %407, %409 : vector<16x256xf32>
    %cst_330 = arith.constant 0.000000e+00 : f32
    %411 = vector.broadcast %cst_330 : f32 to vector<16x256xf32>
    %412 = arith.cmpf oge, %410, %411 : vector<16x256xf32>
    %413 = vector.broadcast %0 : f32 to vector<16x256xf32>
    %414 = arith.mulf %413, %410 : vector<16x256xf32>
    %415 = arith.select %412, %410, %414 : vector<16x256xi1>, vector<16x256xf32>
    %c68_i32 = arith.constant 68 : i32
    %416 = tpu.dynamic_rotate %311 by %c68_i32 dim 1 : vector<8x256xf32>, i32 -> vector<8x256xf32>
    %c0_331 = arith.constant 0 : index
    %c0_332 = arith.constant 0 : index
    %c0_333 = arith.constant 0 : index
    %417 = vector.load %arg36[%c0_331, %c0_332, %c0_333] : memref<9x1x256xf32, #tpu.memory_space<vmem>>, vector<1x1x256xf32>
    %418 = vector.shape_cast %417 : vector<1x1x256xf32> to vector<1x256xf32>
    %419 = vector.broadcast %418 : vector<1x256xf32> to vector<8x256xf32>
    %420 = arith.mulf %416, %419 : vector<8x256xf32>
    %c64_i32 = arith.constant 64 : i32
    %421 = tpu.dynamic_rotate %311 by %c64_i32 dim 1 : vector<8x256xf32>, i32 -> vector<8x256xf32>
    %c1_334 = arith.constant 1 : index
    %c0_335 = arith.constant 0 : index
    %c0_336 = arith.constant 0 : index
    %422 = vector.load %arg36[%c1_334, %c0_335, %c0_336] : memref<9x1x256xf32, #tpu.memory_space<vmem>>, vector<1x1x256xf32>
    %423 = vector.shape_cast %422 : vector<1x1x256xf32> to vector<1x256xf32>
    %424 = vector.broadcast %423 : vector<1x256xf32> to vector<8x256xf32>
    %425 = arith.mulf %421, %424 : vector<8x256xf32>
    %c60_i32 = arith.constant 60 : i32
    %426 = tpu.dynamic_rotate %311 by %c60_i32 dim 1 : vector<8x256xf32>, i32 -> vector<8x256xf32>
    %c2_337 = arith.constant 2 : index
    %c0_338 = arith.constant 0 : index
    %c0_339 = arith.constant 0 : index
    %427 = vector.load %arg36[%c2_337, %c0_338, %c0_339] : memref<9x1x256xf32, #tpu.memory_space<vmem>>, vector<1x1x256xf32>
    %428 = vector.shape_cast %427 : vector<1x1x256xf32> to vector<1x256xf32>
    %429 = vector.broadcast %428 : vector<1x256xf32> to vector<8x256xf32>
    %430 = arith.mulf %426, %429 : vector<8x256xf32>
    %c4_i32 = arith.constant 4 : i32
    %431 = tpu.dynamic_rotate %311 by %c4_i32 dim 1 : vector<8x256xf32>, i32 -> vector<8x256xf32>
    %c3_340 = arith.constant 3 : index
    %c0_341 = arith.constant 0 : index
    %c0_342 = arith.constant 0 : index
    %432 = vector.load %arg36[%c3_340, %c0_341, %c0_342] : memref<9x1x256xf32, #tpu.memory_space<vmem>>, vector<1x1x256xf32>
    %433 = vector.shape_cast %432 : vector<1x1x256xf32> to vector<1x256xf32>
    %434 = vector.broadcast %433 : vector<1x256xf32> to vector<8x256xf32>
    %435 = arith.mulf %431, %434 : vector<8x256xf32>
    %c252_i32 = arith.constant 252 : i32
    %436 = tpu.dynamic_rotate %311 by %c252_i32 dim 1 : vector<8x256xf32>, i32 -> vector<8x256xf32>
    %c5_343 = arith.constant 5 : index
    %c0_344 = arith.constant 0 : index
    %c0_345 = arith.constant 0 : index
    %437 = vector.load %arg36[%c5_343, %c0_344, %c0_345] : memref<9x1x256xf32, #tpu.memory_space<vmem>>, vector<1x1x256xf32>
    %438 = vector.shape_cast %437 : vector<1x1x256xf32> to vector<1x256xf32>
    %439 = vector.broadcast %438 : vector<1x256xf32> to vector<8x256xf32>
    %440 = arith.mulf %436, %439 : vector<8x256xf32>
    %c196_i32 = arith.constant 196 : i32
    %441 = tpu.dynamic_rotate %311 by %c196_i32 dim 1 : vector<8x256xf32>, i32 -> vector<8x256xf32>
    %c6_346 = arith.constant 6 : index
    %c0_347 = arith.constant 0 : index
    %c0_348 = arith.constant 0 : index
    %442 = vector.load %arg36[%c6_346, %c0_347, %c0_348] : memref<9x1x256xf32, #tpu.memory_space<vmem>>, vector<1x1x256xf32>
    %443 = vector.shape_cast %442 : vector<1x1x256xf32> to vector<1x256xf32>
    %444 = vector.broadcast %443 : vector<1x256xf32> to vector<8x256xf32>
    %445 = arith.mulf %441, %444 : vector<8x256xf32>
    %c192_i32 = arith.constant 192 : i32
    %446 = tpu.dynamic_rotate %311 by %c192_i32 dim 1 : vector<8x256xf32>, i32 -> vector<8x256xf32>
    %c7_349 = arith.constant 7 : index
    %c0_350 = arith.constant 0 : index
    %c0_351 = arith.constant 0 : index
    %447 = vector.load %arg36[%c7_349, %c0_350, %c0_351] : memref<9x1x256xf32, #tpu.memory_space<vmem>>, vector<1x1x256xf32>
    %448 = vector.shape_cast %447 : vector<1x1x256xf32> to vector<1x256xf32>
    %449 = vector.broadcast %448 : vector<1x256xf32> to vector<8x256xf32>
    %450 = arith.mulf %446, %449 : vector<8x256xf32>
    %c188_i32 = arith.constant 188 : i32
    %451 = tpu.dynamic_rotate %311 by %c188_i32 dim 1 : vector<8x256xf32>, i32 -> vector<8x256xf32>
    %c8_352 = arith.constant 8 : index
    %c0_353 = arith.constant 0 : index
    %c0_354 = arith.constant 0 : index
    %452 = vector.load %arg36[%c8_352, %c0_353, %c0_354] : memref<9x1x256xf32, #tpu.memory_space<vmem>>, vector<1x1x256xf32>
    %453 = vector.shape_cast %452 : vector<1x1x256xf32> to vector<1x256xf32>
    %454 = vector.broadcast %453 : vector<1x256xf32> to vector<8x256xf32>
    %455 = arith.mulf %451, %454 : vector<8x256xf32>
    %456 = tpu.concatenate %420, %425, %430, %435, %311, %440, %445, %450, %455 in 0 : vector<8x256xf32>, vector<8x256xf32>, vector<8x256xf32>, vector<8x256xf32>, vector<8x256xf32>, vector<8x256xf32>, vector<8x256xf32>, vector<8x256xf32>, vector<8x256xf32> -> vector<72x256xf32>
    %457 = arith.truncf %456 : vector<72x256xf32> to vector<72x256xbf16>
    %c0_355 = arith.constant 0 : index
    %c0_356 = arith.constant 0 : index
    %458 = vector.load %arg18[%c0_355, %c0_356] : memref<16x72xbf16, #tpu.memory_space<vmem>>, vector<16x72xbf16>
    %cst_357 = arith.constant dense<0.000000e+00> : vector<16x256xf32>
    %459 = tpu.matmul %458, %457, %cst_357 {dimension_numbers = #tpu.dot_dimension_numbers<[1], [0], [0], [1], [0, 0, 1, 1], [], []>} : vector<16x72xbf16>, vector<72x256xbf16>, vector<16x256xf32> -> vector<16x256xf32>
    %c0_358 = arith.constant 0 : index
    %c0_359 = arith.constant 0 : index
    %460 = vector.load %arg19[%c0_358, %c0_359] : memref<16x1xf32, #tpu.memory_space<vmem>>, vector<16x1xf32>
    %461 = vector.broadcast %460 : vector<16x1xf32> to vector<16x256xf32>
    %462 = arith.addf %459, %461 : vector<16x256xf32>
    %cst_360 = arith.constant 0.000000e+00 : f32
    %463 = vector.broadcast %cst_360 : f32 to vector<16x256xf32>
    %464 = arith.cmpf oge, %462, %463 : vector<16x256xf32>
    %465 = vector.broadcast %0 : f32 to vector<16x256xf32>
    %466 = arith.mulf %465, %462 : vector<16x256xf32>
    %467 = arith.select %464, %462, %466 : vector<16x256xi1>, vector<16x256xf32>
    %468 = tpu.concatenate %311, %363, %415, %467 in 0 : vector<8x256xf32>, vector<16x256xf32>, vector<16x256xf32>, vector<16x256xf32> -> vector<56x256xf32>
    %c17_i32_361 = arith.constant 17 : i32
    %469 = tpu.dynamic_rotate %468 by %c17_i32_361 dim 1 : vector<56x256xf32>, i32 -> vector<56x256xf32>
    %c0_362 = arith.constant 0 : index
    %c0_363 = arith.constant 0 : index
    %c0_364 = arith.constant 0 : index
    %470 = vector.load %arg34[%c0_362, %c0_363, %c0_364] : memref<9x1x256xf32, #tpu.memory_space<vmem>>, vector<1x1x256xf32>
    %471 = vector.shape_cast %470 : vector<1x1x256xf32> to vector<1x256xf32>
    %472 = vector.broadcast %471 : vector<1x256xf32> to vector<56x256xf32>
    %473 = arith.mulf %469, %472 : vector<56x256xf32>
    %c0_365 = arith.constant 0 : index
    %c0_366 = arith.constant 0 : index
    %c0_367 = arith.constant 0 : index
    %474 = vector.load %arg20[%c0_365, %c0_366, %c0_367] : memref<9x56x1xf32, #tpu.memory_space<vmem>>, vector<1x56x1xf32>
    %475 = vector.shape_cast %474 : vector<1x56x1xf32> to vector<56x1xf32>
    %476 = vector.broadcast %475 : vector<56x1xf32> to vector<56x256xf32>
    %477 = arith.mulf %476, %473 : vector<56x256xf32>
    %c16_i32_368 = arith.constant 16 : i32
    %478 = tpu.dynamic_rotate %468 by %c16_i32_368 dim 1 : vector<56x256xf32>, i32 -> vector<56x256xf32>
    %c1_369 = arith.constant 1 : index
    %c0_370 = arith.constant 0 : index
    %c0_371 = arith.constant 0 : index
    %479 = vector.load %arg34[%c1_369, %c0_370, %c0_371] : memref<9x1x256xf32, #tpu.memory_space<vmem>>, vector<1x1x256xf32>
    %480 = vector.shape_cast %479 : vector<1x1x256xf32> to vector<1x256xf32>
    %481 = vector.broadcast %480 : vector<1x256xf32> to vector<56x256xf32>
    %482 = arith.mulf %478, %481 : vector<56x256xf32>
    %c1_372 = arith.constant 1 : index
    %c0_373 = arith.constant 0 : index
    %c0_374 = arith.constant 0 : index
    %483 = vector.load %arg20[%c1_372, %c0_373, %c0_374] : memref<9x56x1xf32, #tpu.memory_space<vmem>>, vector<1x56x1xf32>
    %484 = vector.shape_cast %483 : vector<1x56x1xf32> to vector<56x1xf32>
    %485 = vector.broadcast %484 : vector<56x1xf32> to vector<56x256xf32>
    %486 = arith.mulf %485, %482 : vector<56x256xf32>
    %487 = arith.addf %477, %486 : vector<56x256xf32>
    %c15_i32_375 = arith.constant 15 : i32
    %488 = tpu.dynamic_rotate %468 by %c15_i32_375 dim 1 : vector<56x256xf32>, i32 -> vector<56x256xf32>
    %c2_376 = arith.constant 2 : index
    %c0_377 = arith.constant 0 : index
    %c0_378 = arith.constant 0 : index
    %489 = vector.load %arg34[%c2_376, %c0_377, %c0_378] : memref<9x1x256xf32, #tpu.memory_space<vmem>>, vector<1x1x256xf32>
    %490 = vector.shape_cast %489 : vector<1x1x256xf32> to vector<1x256xf32>
    %491 = vector.broadcast %490 : vector<1x256xf32> to vector<56x256xf32>
    %492 = arith.mulf %488, %491 : vector<56x256xf32>
    %c2_379 = arith.constant 2 : index
    %c0_380 = arith.constant 0 : index
    %c0_381 = arith.constant 0 : index
    %493 = vector.load %arg20[%c2_379, %c0_380, %c0_381] : memref<9x56x1xf32, #tpu.memory_space<vmem>>, vector<1x56x1xf32>
    %494 = vector.shape_cast %493 : vector<1x56x1xf32> to vector<56x1xf32>
    %495 = vector.broadcast %494 : vector<56x1xf32> to vector<56x256xf32>
    %496 = arith.mulf %495, %492 : vector<56x256xf32>
    %497 = arith.addf %487, %496 : vector<56x256xf32>
    %c1_i32_382 = arith.constant 1 : i32
    %498 = tpu.dynamic_rotate %468 by %c1_i32_382 dim 1 : vector<56x256xf32>, i32 -> vector<56x256xf32>
    %c3_383 = arith.constant 3 : index
    %c0_384 = arith.constant 0 : index
    %c0_385 = arith.constant 0 : index
    %499 = vector.load %arg34[%c3_383, %c0_384, %c0_385] : memref<9x1x256xf32, #tpu.memory_space<vmem>>, vector<1x1x256xf32>
    %500 = vector.shape_cast %499 : vector<1x1x256xf32> to vector<1x256xf32>
    %501 = vector.broadcast %500 : vector<1x256xf32> to vector<56x256xf32>
    %502 = arith.mulf %498, %501 : vector<56x256xf32>
    %c3_386 = arith.constant 3 : index
    %c0_387 = arith.constant 0 : index
    %c0_388 = arith.constant 0 : index
    %503 = vector.load %arg20[%c3_386, %c0_387, %c0_388] : memref<9x56x1xf32, #tpu.memory_space<vmem>>, vector<1x56x1xf32>
    %504 = vector.shape_cast %503 : vector<1x56x1xf32> to vector<56x1xf32>
    %505 = vector.broadcast %504 : vector<56x1xf32> to vector<56x256xf32>
    %506 = arith.mulf %505, %502 : vector<56x256xf32>
    %507 = arith.addf %497, %506 : vector<56x256xf32>
    %c4 = arith.constant 4 : index
    %c0_389 = arith.constant 0 : index
    %c0_390 = arith.constant 0 : index
    %508 = vector.load %arg20[%c4, %c0_389, %c0_390] : memref<9x56x1xf32, #tpu.memory_space<vmem>>, vector<1x56x1xf32>
    %509 = vector.shape_cast %508 : vector<1x56x1xf32> to vector<56x1xf32>
    %510 = vector.broadcast %509 : vector<56x1xf32> to vector<56x256xf32>
    %511 = arith.mulf %510, %468 : vector<56x256xf32>
    %512 = arith.addf %507, %511 : vector<56x256xf32>
    %c255_i32_391 = arith.constant 255 : i32
    %513 = tpu.dynamic_rotate %468 by %c255_i32_391 dim 1 : vector<56x256xf32>, i32 -> vector<56x256xf32>
    %c5_392 = arith.constant 5 : index
    %c0_393 = arith.constant 0 : index
    %c0_394 = arith.constant 0 : index
    %514 = vector.load %arg34[%c5_392, %c0_393, %c0_394] : memref<9x1x256xf32, #tpu.memory_space<vmem>>, vector<1x1x256xf32>
    %515 = vector.shape_cast %514 : vector<1x1x256xf32> to vector<1x256xf32>
    %516 = vector.broadcast %515 : vector<1x256xf32> to vector<56x256xf32>
    %517 = arith.mulf %513, %516 : vector<56x256xf32>
    %c5_395 = arith.constant 5 : index
    %c0_396 = arith.constant 0 : index
    %c0_397 = arith.constant 0 : index
    %518 = vector.load %arg20[%c5_395, %c0_396, %c0_397] : memref<9x56x1xf32, #tpu.memory_space<vmem>>, vector<1x56x1xf32>
    %519 = vector.shape_cast %518 : vector<1x56x1xf32> to vector<56x1xf32>
    %520 = vector.broadcast %519 : vector<56x1xf32> to vector<56x256xf32>
    %521 = arith.mulf %520, %517 : vector<56x256xf32>
    %522 = arith.addf %512, %521 : vector<56x256xf32>
    %c241_i32_398 = arith.constant 241 : i32
    %523 = tpu.dynamic_rotate %468 by %c241_i32_398 dim 1 : vector<56x256xf32>, i32 -> vector<56x256xf32>
    %c6_399 = arith.constant 6 : index
    %c0_400 = arith.constant 0 : index
    %c0_401 = arith.constant 0 : index
    %524 = vector.load %arg34[%c6_399, %c0_400, %c0_401] : memref<9x1x256xf32, #tpu.memory_space<vmem>>, vector<1x1x256xf32>
    %525 = vector.shape_cast %524 : vector<1x1x256xf32> to vector<1x256xf32>
    %526 = vector.broadcast %525 : vector<1x256xf32> to vector<56x256xf32>
    %527 = arith.mulf %523, %526 : vector<56x256xf32>
    %c6_402 = arith.constant 6 : index
    %c0_403 = arith.constant 0 : index
    %c0_404 = arith.constant 0 : index
    %528 = vector.load %arg20[%c6_402, %c0_403, %c0_404] : memref<9x56x1xf32, #tpu.memory_space<vmem>>, vector<1x56x1xf32>
    %529 = vector.shape_cast %528 : vector<1x56x1xf32> to vector<56x1xf32>
    %530 = vector.broadcast %529 : vector<56x1xf32> to vector<56x256xf32>
    %531 = arith.mulf %530, %527 : vector<56x256xf32>
    %532 = arith.addf %522, %531 : vector<56x256xf32>
    %c240_i32_405 = arith.constant 240 : i32
    %533 = tpu.dynamic_rotate %468 by %c240_i32_405 dim 1 : vector<56x256xf32>, i32 -> vector<56x256xf32>
    %c7_406 = arith.constant 7 : index
    %c0_407 = arith.constant 0 : index
    %c0_408 = arith.constant 0 : index
    %534 = vector.load %arg34[%c7_406, %c0_407, %c0_408] : memref<9x1x256xf32, #tpu.memory_space<vmem>>, vector<1x1x256xf32>
    %535 = vector.shape_cast %534 : vector<1x1x256xf32> to vector<1x256xf32>
    %536 = vector.broadcast %535 : vector<1x256xf32> to vector<56x256xf32>
    %537 = arith.mulf %533, %536 : vector<56x256xf32>
    %c7_409 = arith.constant 7 : index
    %c0_410 = arith.constant 0 : index
    %c0_411 = arith.constant 0 : index
    %538 = vector.load %arg20[%c7_409, %c0_410, %c0_411] : memref<9x56x1xf32, #tpu.memory_space<vmem>>, vector<1x56x1xf32>
    %539 = vector.shape_cast %538 : vector<1x56x1xf32> to vector<56x1xf32>
    %540 = vector.broadcast %539 : vector<56x1xf32> to vector<56x256xf32>
    %541 = arith.mulf %540, %537 : vector<56x256xf32>
    %542 = arith.addf %532, %541 : vector<56x256xf32>
    %c239_i32_412 = arith.constant 239 : i32
    %543 = tpu.dynamic_rotate %468 by %c239_i32_412 dim 1 : vector<56x256xf32>, i32 -> vector<56x256xf32>
    %c8_413 = arith.constant 8 : index
    %c0_414 = arith.constant 0 : index
    %c0_415 = arith.constant 0 : index
    %544 = vector.load %arg34[%c8_413, %c0_414, %c0_415] : memref<9x1x256xf32, #tpu.memory_space<vmem>>, vector<1x1x256xf32>
    %545 = vector.shape_cast %544 : vector<1x1x256xf32> to vector<1x256xf32>
    %546 = vector.broadcast %545 : vector<1x256xf32> to vector<56x256xf32>
    %547 = arith.mulf %543, %546 : vector<56x256xf32>
    %c8_416 = arith.constant 8 : index
    %c0_417 = arith.constant 0 : index
    %c0_418 = arith.constant 0 : index
    %548 = vector.load %arg20[%c8_416, %c0_417, %c0_418] : memref<9x56x1xf32, #tpu.memory_space<vmem>>, vector<1x56x1xf32>
    %549 = vector.shape_cast %548 : vector<1x56x1xf32> to vector<56x1xf32>
    %550 = vector.broadcast %549 : vector<56x1xf32> to vector<56x256xf32>
    %551 = arith.mulf %550, %547 : vector<56x256xf32>
    %552 = arith.addf %542, %551 : vector<56x256xf32>
    %c0_419 = arith.constant 0 : index
    %c0_420 = arith.constant 0 : index
    %553 = vector.load %arg21[%c0_419, %c0_420] : memref<56x1xf32, #tpu.memory_space<vmem>>, vector<56x1xf32>
    %554 = vector.broadcast %553 : vector<56x1xf32> to vector<56x256xf32>
    %555 = arith.addf %552, %554 : vector<56x256xf32>
    %c0_421 = arith.constant 0 : index
    %c0_422 = arith.constant 0 : index
    %556 = vector.load %arg22[%c0_421, %c0_422] : memref<32x56xbf16, #tpu.memory_space<vmem>>, vector<32x56xbf16>
    %557 = arith.truncf %555 : vector<56x256xf32> to vector<56x256xbf16>
    %cst_423 = arith.constant dense<0.000000e+00> : vector<32x256xf32>
    %558 = tpu.matmul %556, %557, %cst_423 {dimension_numbers = #tpu.dot_dimension_numbers<[1], [0], [0], [1], [0, 0, 1, 1], [], []>} : vector<32x56xbf16>, vector<56x256xbf16>, vector<32x256xf32> -> vector<32x256xf32>
    %c0_424 = arith.constant 0 : index
    %c0_425 = arith.constant 0 : index
    %559 = vector.load %arg23[%c0_424, %c0_425] : memref<32x1xf32, #tpu.memory_space<vmem>>, vector<32x1xf32>
    %560 = vector.broadcast %559 : vector<32x1xf32> to vector<32x256xf32>
    %561 = arith.addf %558, %560 : vector<32x256xf32>
    %cst_426 = arith.constant 0.000000e+00 : f32
    %562 = vector.broadcast %cst_426 : f32 to vector<32x256xf32>
    %563 = arith.cmpf oge, %561, %562 : vector<32x256xf32>
    %564 = vector.broadcast %0 : f32 to vector<32x256xf32>
    %565 = arith.mulf %564, %561 : vector<32x256xf32>
    %566 = arith.select %563, %561, %565 : vector<32x256xi1>, vector<32x256xf32>
    %c17_i32_427 = arith.constant 17 : i32
    %567 = tpu.dynamic_rotate %566 by %c17_i32_427 dim 1 : vector<32x256xf32>, i32 -> vector<32x256xf32>
    %c0_428 = arith.constant 0 : index
    %c0_429 = arith.constant 0 : index
    %c0_430 = arith.constant 0 : index
    %568 = vector.load %arg34[%c0_428, %c0_429, %c0_430] : memref<9x1x256xf32, #tpu.memory_space<vmem>>, vector<1x1x256xf32>
    %569 = vector.shape_cast %568 : vector<1x1x256xf32> to vector<1x256xf32>
    %570 = vector.broadcast %569 : vector<1x256xf32> to vector<32x256xf32>
    %571 = arith.mulf %567, %570 : vector<32x256xf32>
    %c0_431 = arith.constant 0 : index
    %c0_432 = arith.constant 0 : index
    %c0_433 = arith.constant 0 : index
    %572 = vector.load %arg24[%c0_431, %c0_432, %c0_433] : memref<9x32x1xf32, #tpu.memory_space<vmem>>, vector<1x32x1xf32>
    %573 = vector.shape_cast %572 : vector<1x32x1xf32> to vector<32x1xf32>
    %574 = vector.broadcast %573 : vector<32x1xf32> to vector<32x256xf32>
    %575 = arith.mulf %574, %571 : vector<32x256xf32>
    %c16_i32_434 = arith.constant 16 : i32
    %576 = tpu.dynamic_rotate %566 by %c16_i32_434 dim 1 : vector<32x256xf32>, i32 -> vector<32x256xf32>
    %c1_435 = arith.constant 1 : index
    %c0_436 = arith.constant 0 : index
    %c0_437 = arith.constant 0 : index
    %577 = vector.load %arg34[%c1_435, %c0_436, %c0_437] : memref<9x1x256xf32, #tpu.memory_space<vmem>>, vector<1x1x256xf32>
    %578 = vector.shape_cast %577 : vector<1x1x256xf32> to vector<1x256xf32>
    %579 = vector.broadcast %578 : vector<1x256xf32> to vector<32x256xf32>
    %580 = arith.mulf %576, %579 : vector<32x256xf32>
    %c1_438 = arith.constant 1 : index
    %c0_439 = arith.constant 0 : index
    %c0_440 = arith.constant 0 : index
    %581 = vector.load %arg24[%c1_438, %c0_439, %c0_440] : memref<9x32x1xf32, #tpu.memory_space<vmem>>, vector<1x32x1xf32>
    %582 = vector.shape_cast %581 : vector<1x32x1xf32> to vector<32x1xf32>
    %583 = vector.broadcast %582 : vector<32x1xf32> to vector<32x256xf32>
    %584 = arith.mulf %583, %580 : vector<32x256xf32>
    %585 = arith.addf %575, %584 : vector<32x256xf32>
    %c15_i32_441 = arith.constant 15 : i32
    %586 = tpu.dynamic_rotate %566 by %c15_i32_441 dim 1 : vector<32x256xf32>, i32 -> vector<32x256xf32>
    %c2_442 = arith.constant 2 : index
    %c0_443 = arith.constant 0 : index
    %c0_444 = arith.constant 0 : index
    %587 = vector.load %arg34[%c2_442, %c0_443, %c0_444] : memref<9x1x256xf32, #tpu.memory_space<vmem>>, vector<1x1x256xf32>
    %588 = vector.shape_cast %587 : vector<1x1x256xf32> to vector<1x256xf32>
    %589 = vector.broadcast %588 : vector<1x256xf32> to vector<32x256xf32>
    %590 = arith.mulf %586, %589 : vector<32x256xf32>
    %c2_445 = arith.constant 2 : index
    %c0_446 = arith.constant 0 : index
    %c0_447 = arith.constant 0 : index
    %591 = vector.load %arg24[%c2_445, %c0_446, %c0_447] : memref<9x32x1xf32, #tpu.memory_space<vmem>>, vector<1x32x1xf32>
    %592 = vector.shape_cast %591 : vector<1x32x1xf32> to vector<32x1xf32>
    %593 = vector.broadcast %592 : vector<32x1xf32> to vector<32x256xf32>
    %594 = arith.mulf %593, %590 : vector<32x256xf32>
    %595 = arith.addf %585, %594 : vector<32x256xf32>
    %c1_i32_448 = arith.constant 1 : i32
    %596 = tpu.dynamic_rotate %566 by %c1_i32_448 dim 1 : vector<32x256xf32>, i32 -> vector<32x256xf32>
    %c3_449 = arith.constant 3 : index
    %c0_450 = arith.constant 0 : index
    %c0_451 = arith.constant 0 : index
    %597 = vector.load %arg34[%c3_449, %c0_450, %c0_451] : memref<9x1x256xf32, #tpu.memory_space<vmem>>, vector<1x1x256xf32>
    %598 = vector.shape_cast %597 : vector<1x1x256xf32> to vector<1x256xf32>
    %599 = vector.broadcast %598 : vector<1x256xf32> to vector<32x256xf32>
    %600 = arith.mulf %596, %599 : vector<32x256xf32>
    %c3_452 = arith.constant 3 : index
    %c0_453 = arith.constant 0 : index
    %c0_454 = arith.constant 0 : index
    %601 = vector.load %arg24[%c3_452, %c0_453, %c0_454] : memref<9x32x1xf32, #tpu.memory_space<vmem>>, vector<1x32x1xf32>
    %602 = vector.shape_cast %601 : vector<1x32x1xf32> to vector<32x1xf32>
    %603 = vector.broadcast %602 : vector<32x1xf32> to vector<32x256xf32>
    %604 = arith.mulf %603, %600 : vector<32x256xf32>
    %605 = arith.addf %595, %604 : vector<32x256xf32>
    %c4_455 = arith.constant 4 : index
    %c0_456 = arith.constant 0 : index
    %c0_457 = arith.constant 0 : index
    %606 = vector.load %arg24[%c4_455, %c0_456, %c0_457] : memref<9x32x1xf32, #tpu.memory_space<vmem>>, vector<1x32x1xf32>
    %607 = vector.shape_cast %606 : vector<1x32x1xf32> to vector<32x1xf32>
    %608 = vector.broadcast %607 : vector<32x1xf32> to vector<32x256xf32>
    %609 = arith.mulf %608, %566 : vector<32x256xf32>
    %610 = arith.addf %605, %609 : vector<32x256xf32>
    %c255_i32_458 = arith.constant 255 : i32
    %611 = tpu.dynamic_rotate %566 by %c255_i32_458 dim 1 : vector<32x256xf32>, i32 -> vector<32x256xf32>
    %c5_459 = arith.constant 5 : index
    %c0_460 = arith.constant 0 : index
    %c0_461 = arith.constant 0 : index
    %612 = vector.load %arg34[%c5_459, %c0_460, %c0_461] : memref<9x1x256xf32, #tpu.memory_space<vmem>>, vector<1x1x256xf32>
    %613 = vector.shape_cast %612 : vector<1x1x256xf32> to vector<1x256xf32>
    %614 = vector.broadcast %613 : vector<1x256xf32> to vector<32x256xf32>
    %615 = arith.mulf %611, %614 : vector<32x256xf32>
    %c5_462 = arith.constant 5 : index
    %c0_463 = arith.constant 0 : index
    %c0_464 = arith.constant 0 : index
    %616 = vector.load %arg24[%c5_462, %c0_463, %c0_464] : memref<9x32x1xf32, #tpu.memory_space<vmem>>, vector<1x32x1xf32>
    %617 = vector.shape_cast %616 : vector<1x32x1xf32> to vector<32x1xf32>
    %618 = vector.broadcast %617 : vector<32x1xf32> to vector<32x256xf32>
    %619 = arith.mulf %618, %615 : vector<32x256xf32>
    %620 = arith.addf %610, %619 : vector<32x256xf32>
    %c241_i32_465 = arith.constant 241 : i32
    %621 = tpu.dynamic_rotate %566 by %c241_i32_465 dim 1 : vector<32x256xf32>, i32 -> vector<32x256xf32>
    %c6_466 = arith.constant 6 : index
    %c0_467 = arith.constant 0 : index
    %c0_468 = arith.constant 0 : index
    %622 = vector.load %arg34[%c6_466, %c0_467, %c0_468] : memref<9x1x256xf32, #tpu.memory_space<vmem>>, vector<1x1x256xf32>
    %623 = vector.shape_cast %622 : vector<1x1x256xf32> to vector<1x256xf32>
    %624 = vector.broadcast %623 : vector<1x256xf32> to vector<32x256xf32>
    %625 = arith.mulf %621, %624 : vector<32x256xf32>
    %c6_469 = arith.constant 6 : index
    %c0_470 = arith.constant 0 : index
    %c0_471 = arith.constant 0 : index
    %626 = vector.load %arg24[%c6_469, %c0_470, %c0_471] : memref<9x32x1xf32, #tpu.memory_space<vmem>>, vector<1x32x1xf32>
    %627 = vector.shape_cast %626 : vector<1x32x1xf32> to vector<32x1xf32>
    %628 = vector.broadcast %627 : vector<32x1xf32> to vector<32x256xf32>
    %629 = arith.mulf %628, %625 : vector<32x256xf32>
    %630 = arith.addf %620, %629 : vector<32x256xf32>
    %c240_i32_472 = arith.constant 240 : i32
    %631 = tpu.dynamic_rotate %566 by %c240_i32_472 dim 1 : vector<32x256xf32>, i32 -> vector<32x256xf32>
    %c7_473 = arith.constant 7 : index
    %c0_474 = arith.constant 0 : index
    %c0_475 = arith.constant 0 : index
    %632 = vector.load %arg34[%c7_473, %c0_474, %c0_475] : memref<9x1x256xf32, #tpu.memory_space<vmem>>, vector<1x1x256xf32>
    %633 = vector.shape_cast %632 : vector<1x1x256xf32> to vector<1x256xf32>
    %634 = vector.broadcast %633 : vector<1x256xf32> to vector<32x256xf32>
    %635 = arith.mulf %631, %634 : vector<32x256xf32>
    %c7_476 = arith.constant 7 : index
    %c0_477 = arith.constant 0 : index
    %c0_478 = arith.constant 0 : index
    %636 = vector.load %arg24[%c7_476, %c0_477, %c0_478] : memref<9x32x1xf32, #tpu.memory_space<vmem>>, vector<1x32x1xf32>
    %637 = vector.shape_cast %636 : vector<1x32x1xf32> to vector<32x1xf32>
    %638 = vector.broadcast %637 : vector<32x1xf32> to vector<32x256xf32>
    %639 = arith.mulf %638, %635 : vector<32x256xf32>
    %640 = arith.addf %630, %639 : vector<32x256xf32>
    %c239_i32_479 = arith.constant 239 : i32
    %641 = tpu.dynamic_rotate %566 by %c239_i32_479 dim 1 : vector<32x256xf32>, i32 -> vector<32x256xf32>
    %c8_480 = arith.constant 8 : index
    %c0_481 = arith.constant 0 : index
    %c0_482 = arith.constant 0 : index
    %642 = vector.load %arg34[%c8_480, %c0_481, %c0_482] : memref<9x1x256xf32, #tpu.memory_space<vmem>>, vector<1x1x256xf32>
    %643 = vector.shape_cast %642 : vector<1x1x256xf32> to vector<1x256xf32>
    %644 = vector.broadcast %643 : vector<1x256xf32> to vector<32x256xf32>
    %645 = arith.mulf %641, %644 : vector<32x256xf32>
    %c8_483 = arith.constant 8 : index
    %c0_484 = arith.constant 0 : index
    %c0_485 = arith.constant 0 : index
    %646 = vector.load %arg24[%c8_483, %c0_484, %c0_485] : memref<9x32x1xf32, #tpu.memory_space<vmem>>, vector<1x32x1xf32>
    %647 = vector.shape_cast %646 : vector<1x32x1xf32> to vector<32x1xf32>
    %648 = vector.broadcast %647 : vector<32x1xf32> to vector<32x256xf32>
    %649 = arith.mulf %648, %645 : vector<32x256xf32>
    %650 = arith.addf %640, %649 : vector<32x256xf32>
    %c0_486 = arith.constant 0 : index
    %c0_487 = arith.constant 0 : index
    %651 = vector.load %arg25[%c0_486, %c0_487] : memref<32x1xf32, #tpu.memory_space<vmem>>, vector<32x1xf32>
    %652 = vector.broadcast %651 : vector<32x1xf32> to vector<32x256xf32>
    %653 = arith.addf %650, %652 : vector<32x256xf32>
    %c0_488 = arith.constant 0 : index
    %c0_489 = arith.constant 0 : index
    %654 = vector.load %arg26[%c0_488, %c0_489] : memref<8x32xbf16, #tpu.memory_space<vmem>>, vector<8x32xbf16>
    %655 = arith.truncf %653 : vector<32x256xf32> to vector<32x256xbf16>
    %cst_490 = arith.constant dense<0.000000e+00> : vector<8x256xf32>
    %656 = tpu.matmul %654, %655, %cst_490 {dimension_numbers = #tpu.dot_dimension_numbers<[1], [0], [0], [1], [0, 0, 1, 1], [], []>} : vector<8x32xbf16>, vector<32x256xbf16>, vector<8x256xf32> -> vector<8x256xf32>
    %c0_491 = arith.constant 0 : index
    %c0_492 = arith.constant 0 : index
    %657 = vector.load %arg27[%c0_491, %c0_492] : memref<8x1xf32, #tpu.memory_space<vmem>>, vector<8x1xf32>
    %658 = vector.broadcast %657 : vector<8x1xf32> to vector<8x256xf32>
    %659 = arith.addf %656, %658 : vector<8x256xf32>
    %cst_493 = arith.constant 0.000000e+00 : f32
    %660 = vector.broadcast %cst_493 : f32 to vector<8x256xf32>
    %661 = arith.cmpf oge, %659, %660 : vector<8x256xf32>
    %662 = vector.broadcast %0 : f32 to vector<8x256xf32>
    %663 = arith.mulf %662, %659 : vector<8x256xf32>
    %664 = arith.select %661, %659, %663 : vector<8x256xi1>, vector<8x256xf32>
    %c17_i32_494 = arith.constant 17 : i32
    %665 = tpu.dynamic_rotate %664 by %c17_i32_494 dim 1 : vector<8x256xf32>, i32 -> vector<8x256xf32>
    %c0_495 = arith.constant 0 : index
    %c0_496 = arith.constant 0 : index
    %c0_497 = arith.constant 0 : index
    %666 = vector.load %arg34[%c0_495, %c0_496, %c0_497] : memref<9x1x256xf32, #tpu.memory_space<vmem>>, vector<1x1x256xf32>
    %667 = vector.shape_cast %666 : vector<1x1x256xf32> to vector<1x256xf32>
    %668 = vector.broadcast %667 : vector<1x256xf32> to vector<8x256xf32>
    %669 = arith.mulf %665, %668 : vector<8x256xf32>
    %c16_i32_498 = arith.constant 16 : i32
    %670 = tpu.dynamic_rotate %664 by %c16_i32_498 dim 1 : vector<8x256xf32>, i32 -> vector<8x256xf32>
    %c1_499 = arith.constant 1 : index
    %c0_500 = arith.constant 0 : index
    %c0_501 = arith.constant 0 : index
    %671 = vector.load %arg34[%c1_499, %c0_500, %c0_501] : memref<9x1x256xf32, #tpu.memory_space<vmem>>, vector<1x1x256xf32>
    %672 = vector.shape_cast %671 : vector<1x1x256xf32> to vector<1x256xf32>
    %673 = vector.broadcast %672 : vector<1x256xf32> to vector<8x256xf32>
    %674 = arith.mulf %670, %673 : vector<8x256xf32>
    %c15_i32_502 = arith.constant 15 : i32
    %675 = tpu.dynamic_rotate %664 by %c15_i32_502 dim 1 : vector<8x256xf32>, i32 -> vector<8x256xf32>
    %c2_503 = arith.constant 2 : index
    %c0_504 = arith.constant 0 : index
    %c0_505 = arith.constant 0 : index
    %676 = vector.load %arg34[%c2_503, %c0_504, %c0_505] : memref<9x1x256xf32, #tpu.memory_space<vmem>>, vector<1x1x256xf32>
    %677 = vector.shape_cast %676 : vector<1x1x256xf32> to vector<1x256xf32>
    %678 = vector.broadcast %677 : vector<1x256xf32> to vector<8x256xf32>
    %679 = arith.mulf %675, %678 : vector<8x256xf32>
    %c1_i32_506 = arith.constant 1 : i32
    %680 = tpu.dynamic_rotate %664 by %c1_i32_506 dim 1 : vector<8x256xf32>, i32 -> vector<8x256xf32>
    %c3_507 = arith.constant 3 : index
    %c0_508 = arith.constant 0 : index
    %c0_509 = arith.constant 0 : index
    %681 = vector.load %arg34[%c3_507, %c0_508, %c0_509] : memref<9x1x256xf32, #tpu.memory_space<vmem>>, vector<1x1x256xf32>
    %682 = vector.shape_cast %681 : vector<1x1x256xf32> to vector<1x256xf32>
    %683 = vector.broadcast %682 : vector<1x256xf32> to vector<8x256xf32>
    %684 = arith.mulf %680, %683 : vector<8x256xf32>
    %c255_i32_510 = arith.constant 255 : i32
    %685 = tpu.dynamic_rotate %664 by %c255_i32_510 dim 1 : vector<8x256xf32>, i32 -> vector<8x256xf32>
    %c5_511 = arith.constant 5 : index
    %c0_512 = arith.constant 0 : index
    %c0_513 = arith.constant 0 : index
    %686 = vector.load %arg34[%c5_511, %c0_512, %c0_513] : memref<9x1x256xf32, #tpu.memory_space<vmem>>, vector<1x1x256xf32>
    %687 = vector.shape_cast %686 : vector<1x1x256xf32> to vector<1x256xf32>
    %688 = vector.broadcast %687 : vector<1x256xf32> to vector<8x256xf32>
    %689 = arith.mulf %685, %688 : vector<8x256xf32>
    %c241_i32_514 = arith.constant 241 : i32
    %690 = tpu.dynamic_rotate %664 by %c241_i32_514 dim 1 : vector<8x256xf32>, i32 -> vector<8x256xf32>
    %c6_515 = arith.constant 6 : index
    %c0_516 = arith.constant 0 : index
    %c0_517 = arith.constant 0 : index
    %691 = vector.load %arg34[%c6_515, %c0_516, %c0_517] : memref<9x1x256xf32, #tpu.memory_space<vmem>>, vector<1x1x256xf32>
    %692 = vector.shape_cast %691 : vector<1x1x256xf32> to vector<1x256xf32>
    %693 = vector.broadcast %692 : vector<1x256xf32> to vector<8x256xf32>
    %694 = arith.mulf %690, %693 : vector<8x256xf32>
    %c240_i32_518 = arith.constant 240 : i32
    %695 = tpu.dynamic_rotate %664 by %c240_i32_518 dim 1 : vector<8x256xf32>, i32 -> vector<8x256xf32>
    %c7_519 = arith.constant 7 : index
    %c0_520 = arith.constant 0 : index
    %c0_521 = arith.constant 0 : index
    %696 = vector.load %arg34[%c7_519, %c0_520, %c0_521] : memref<9x1x256xf32, #tpu.memory_space<vmem>>, vector<1x1x256xf32>
    %697 = vector.shape_cast %696 : vector<1x1x256xf32> to vector<1x256xf32>
    %698 = vector.broadcast %697 : vector<1x256xf32> to vector<8x256xf32>
    %699 = arith.mulf %695, %698 : vector<8x256xf32>
    %c239_i32_522 = arith.constant 239 : i32
    %700 = tpu.dynamic_rotate %664 by %c239_i32_522 dim 1 : vector<8x256xf32>, i32 -> vector<8x256xf32>
    %c8_523 = arith.constant 8 : index
    %c0_524 = arith.constant 0 : index
    %c0_525 = arith.constant 0 : index
    %701 = vector.load %arg34[%c8_523, %c0_524, %c0_525] : memref<9x1x256xf32, #tpu.memory_space<vmem>>, vector<1x1x256xf32>
    %702 = vector.shape_cast %701 : vector<1x1x256xf32> to vector<1x256xf32>
    %703 = vector.broadcast %702 : vector<1x256xf32> to vector<8x256xf32>
    %704 = arith.mulf %700, %703 : vector<8x256xf32>
    %705 = tpu.concatenate %669, %674, %679, %684, %664, %689, %694, %699, %704 in 0 : vector<8x256xf32>, vector<8x256xf32>, vector<8x256xf32>, vector<8x256xf32>, vector<8x256xf32>, vector<8x256xf32>, vector<8x256xf32>, vector<8x256xf32>, vector<8x256xf32> -> vector<72x256xf32>
    %706 = arith.truncf %705 : vector<72x256xf32> to vector<72x256xbf16>
    %c0_526 = arith.constant 0 : index
    %c0_527 = arith.constant 0 : index
    %707 = vector.load %arg28[%c0_526, %c0_527] : memref<8x72xbf16, #tpu.memory_space<vmem>>, vector<8x72xbf16>
    %cst_528 = arith.constant dense<0.000000e+00> : vector<8x256xf32>
    %708 = tpu.matmul %707, %706, %cst_528 {dimension_numbers = #tpu.dot_dimension_numbers<[1], [0], [0], [1], [0, 0, 1, 1], [], []>} : vector<8x72xbf16>, vector<72x256xbf16>, vector<8x256xf32> -> vector<8x256xf32>
    %cst_529 = arith.constant 0.000000e+00 : f32
    %709 = vector.broadcast %cst_529 : f32 to vector<8x256xf32>
    %710 = arith.cmpf oge, %708, %709 : vector<8x256xf32>
    %711 = vector.broadcast %0 : f32 to vector<8x256xf32>
    %712 = arith.mulf %711, %708 : vector<8x256xf32>
    %713 = arith.select %710, %708, %712 : vector<8x256xi1>, vector<8x256xf32>
    %714 = arith.addf %713, %51 : vector<8x256xf32>
    %c17_i32_530 = arith.constant 17 : i32
    %715 = tpu.dynamic_rotate %714 by %c17_i32_530 dim 1 : vector<8x256xf32>, i32 -> vector<8x256xf32>
    %c0_531 = arith.constant 0 : index
    %c0_532 = arith.constant 0 : index
    %c0_533 = arith.constant 0 : index
    %716 = vector.load %arg34[%c0_531, %c0_532, %c0_533] : memref<9x1x256xf32, #tpu.memory_space<vmem>>, vector<1x1x256xf32>
    %717 = vector.shape_cast %716 : vector<1x1x256xf32> to vector<1x256xf32>
    %718 = vector.broadcast %717 : vector<1x256xf32> to vector<8x256xf32>
    %719 = arith.mulf %715, %718 : vector<8x256xf32>
    %c16_i32_534 = arith.constant 16 : i32
    %720 = tpu.dynamic_rotate %714 by %c16_i32_534 dim 1 : vector<8x256xf32>, i32 -> vector<8x256xf32>
    %c1_535 = arith.constant 1 : index
    %c0_536 = arith.constant 0 : index
    %c0_537 = arith.constant 0 : index
    %721 = vector.load %arg34[%c1_535, %c0_536, %c0_537] : memref<9x1x256xf32, #tpu.memory_space<vmem>>, vector<1x1x256xf32>
    %722 = vector.shape_cast %721 : vector<1x1x256xf32> to vector<1x256xf32>
    %723 = vector.broadcast %722 : vector<1x256xf32> to vector<8x256xf32>
    %724 = arith.mulf %720, %723 : vector<8x256xf32>
    %c15_i32_538 = arith.constant 15 : i32
    %725 = tpu.dynamic_rotate %714 by %c15_i32_538 dim 1 : vector<8x256xf32>, i32 -> vector<8x256xf32>
    %c2_539 = arith.constant 2 : index
    %c0_540 = arith.constant 0 : index
    %c0_541 = arith.constant 0 : index
    %726 = vector.load %arg34[%c2_539, %c0_540, %c0_541] : memref<9x1x256xf32, #tpu.memory_space<vmem>>, vector<1x1x256xf32>
    %727 = vector.shape_cast %726 : vector<1x1x256xf32> to vector<1x256xf32>
    %728 = vector.broadcast %727 : vector<1x256xf32> to vector<8x256xf32>
    %729 = arith.mulf %725, %728 : vector<8x256xf32>
    %c1_i32_542 = arith.constant 1 : i32
    %730 = tpu.dynamic_rotate %714 by %c1_i32_542 dim 1 : vector<8x256xf32>, i32 -> vector<8x256xf32>
    %c3_543 = arith.constant 3 : index
    %c0_544 = arith.constant 0 : index
    %c0_545 = arith.constant 0 : index
    %731 = vector.load %arg34[%c3_543, %c0_544, %c0_545] : memref<9x1x256xf32, #tpu.memory_space<vmem>>, vector<1x1x256xf32>
    %732 = vector.shape_cast %731 : vector<1x1x256xf32> to vector<1x256xf32>
    %733 = vector.broadcast %732 : vector<1x256xf32> to vector<8x256xf32>
    %734 = arith.mulf %730, %733 : vector<8x256xf32>
    %c255_i32_546 = arith.constant 255 : i32
    %735 = tpu.dynamic_rotate %714 by %c255_i32_546 dim 1 : vector<8x256xf32>, i32 -> vector<8x256xf32>
    %c5_547 = arith.constant 5 : index
    %c0_548 = arith.constant 0 : index
    %c0_549 = arith.constant 0 : index
    %736 = vector.load %arg34[%c5_547, %c0_548, %c0_549] : memref<9x1x256xf32, #tpu.memory_space<vmem>>, vector<1x1x256xf32>
    %737 = vector.shape_cast %736 : vector<1x1x256xf32> to vector<1x256xf32>
    %738 = vector.broadcast %737 : vector<1x256xf32> to vector<8x256xf32>
    %739 = arith.mulf %735, %738 : vector<8x256xf32>
    %c241_i32_550 = arith.constant 241 : i32
    %740 = tpu.dynamic_rotate %714 by %c241_i32_550 dim 1 : vector<8x256xf32>, i32 -> vector<8x256xf32>
    %c6_551 = arith.constant 6 : index
    %c0_552 = arith.constant 0 : index
    %c0_553 = arith.constant 0 : index
    %741 = vector.load %arg34[%c6_551, %c0_552, %c0_553] : memref<9x1x256xf32, #tpu.memory_space<vmem>>, vector<1x1x256xf32>
    %742 = vector.shape_cast %741 : vector<1x1x256xf32> to vector<1x256xf32>
    %743 = vector.broadcast %742 : vector<1x256xf32> to vector<8x256xf32>
    %744 = arith.mulf %740, %743 : vector<8x256xf32>
    %c240_i32_554 = arith.constant 240 : i32
    %745 = tpu.dynamic_rotate %714 by %c240_i32_554 dim 1 : vector<8x256xf32>, i32 -> vector<8x256xf32>
    %c7_555 = arith.constant 7 : index
    %c0_556 = arith.constant 0 : index
    %c0_557 = arith.constant 0 : index
    %746 = vector.load %arg34[%c7_555, %c0_556, %c0_557] : memref<9x1x256xf32, #tpu.memory_space<vmem>>, vector<1x1x256xf32>
    %747 = vector.shape_cast %746 : vector<1x1x256xf32> to vector<1x256xf32>
    %748 = vector.broadcast %747 : vector<1x256xf32> to vector<8x256xf32>
    %749 = arith.mulf %745, %748 : vector<8x256xf32>
    %c239_i32_558 = arith.constant 239 : i32
    %750 = tpu.dynamic_rotate %714 by %c239_i32_558 dim 1 : vector<8x256xf32>, i32 -> vector<8x256xf32>
    %c8_559 = arith.constant 8 : index
    %c0_560 = arith.constant 0 : index
    %c0_561 = arith.constant 0 : index
    %751 = vector.load %arg34[%c8_559, %c0_560, %c0_561] : memref<9x1x256xf32, #tpu.memory_space<vmem>>, vector<1x1x256xf32>
    %752 = vector.shape_cast %751 : vector<1x1x256xf32> to vector<1x256xf32>
    %753 = vector.broadcast %752 : vector<1x256xf32> to vector<8x256xf32>
    %754 = arith.mulf %750, %753 : vector<8x256xf32>
    %755 = tpu.concatenate %719, %724, %729, %734, %714, %739, %744, %749, %754 in 0 : vector<8x256xf32>, vector<8x256xf32>, vector<8x256xf32>, vector<8x256xf32>, vector<8x256xf32>, vector<8x256xf32>, vector<8x256xf32>, vector<8x256xf32>, vector<8x256xf32> -> vector<72x256xf32>
    %756 = arith.truncf %755 : vector<72x256xf32> to vector<72x256xbf16>
    %c0_562 = arith.constant 0 : index
    %c0_563 = arith.constant 0 : index
    %757 = vector.load %arg29[%c0_562, %c0_563] : memref<16x72xbf16, #tpu.memory_space<vmem>>, vector<16x72xbf16>
    %cst_564 = arith.constant dense<0.000000e+00> : vector<16x256xf32>
    %758 = tpu.matmul %757, %756, %cst_564 {dimension_numbers = #tpu.dot_dimension_numbers<[1], [0], [0], [1], [0, 0, 1, 1], [], []>} : vector<16x72xbf16>, vector<72x256xbf16>, vector<16x256xf32> -> vector<16x256xf32>
    %cst_565 = arith.constant 0.000000e+00 : f32
    %759 = vector.broadcast %cst_565 : f32 to vector<16x256xf32>
    %760 = arith.cmpf oge, %758, %759 : vector<16x256xf32>
    %761 = vector.broadcast %0 : f32 to vector<16x256xf32>
    %762 = arith.mulf %761, %758 : vector<16x256xf32>
    %763 = arith.select %760, %758, %762 : vector<16x256xi1>, vector<16x256xf32>
    %c17_i32_566 = arith.constant 17 : i32
    %764 = tpu.dynamic_rotate %763 by %c17_i32_566 dim 1 : vector<16x256xf32>, i32 -> vector<16x256xf32>
    %c0_567 = arith.constant 0 : index
    %c0_568 = arith.constant 0 : index
    %c0_569 = arith.constant 0 : index
    %765 = vector.load %arg34[%c0_567, %c0_568, %c0_569] : memref<9x1x256xf32, #tpu.memory_space<vmem>>, vector<1x1x256xf32>
    %766 = vector.shape_cast %765 : vector<1x1x256xf32> to vector<1x256xf32>
    %767 = vector.broadcast %766 : vector<1x256xf32> to vector<16x256xf32>
    %768 = arith.mulf %764, %767 : vector<16x256xf32>
    %c16_i32_570 = arith.constant 16 : i32
    %769 = tpu.dynamic_rotate %763 by %c16_i32_570 dim 1 : vector<16x256xf32>, i32 -> vector<16x256xf32>
    %c1_571 = arith.constant 1 : index
    %c0_572 = arith.constant 0 : index
    %c0_573 = arith.constant 0 : index
    %770 = vector.load %arg34[%c1_571, %c0_572, %c0_573] : memref<9x1x256xf32, #tpu.memory_space<vmem>>, vector<1x1x256xf32>
    %771 = vector.shape_cast %770 : vector<1x1x256xf32> to vector<1x256xf32>
    %772 = vector.broadcast %771 : vector<1x256xf32> to vector<16x256xf32>
    %773 = arith.mulf %769, %772 : vector<16x256xf32>
    %c15_i32_574 = arith.constant 15 : i32
    %774 = tpu.dynamic_rotate %763 by %c15_i32_574 dim 1 : vector<16x256xf32>, i32 -> vector<16x256xf32>
    %c2_575 = arith.constant 2 : index
    %c0_576 = arith.constant 0 : index
    %c0_577 = arith.constant 0 : index
    %775 = vector.load %arg34[%c2_575, %c0_576, %c0_577] : memref<9x1x256xf32, #tpu.memory_space<vmem>>, vector<1x1x256xf32>
    %776 = vector.shape_cast %775 : vector<1x1x256xf32> to vector<1x256xf32>
    %777 = vector.broadcast %776 : vector<1x256xf32> to vector<16x256xf32>
    %778 = arith.mulf %774, %777 : vector<16x256xf32>
    %c1_i32_578 = arith.constant 1 : i32
    %779 = tpu.dynamic_rotate %763 by %c1_i32_578 dim 1 : vector<16x256xf32>, i32 -> vector<16x256xf32>
    %c3_579 = arith.constant 3 : index
    %c0_580 = arith.constant 0 : index
    %c0_581 = arith.constant 0 : index
    %780 = vector.load %arg34[%c3_579, %c0_580, %c0_581] : memref<9x1x256xf32, #tpu.memory_space<vmem>>, vector<1x1x256xf32>
    %781 = vector.shape_cast %780 : vector<1x1x256xf32> to vector<1x256xf32>
    %782 = vector.broadcast %781 : vector<1x256xf32> to vector<16x256xf32>
    %783 = arith.mulf %779, %782 : vector<16x256xf32>
    %c255_i32_582 = arith.constant 255 : i32
    %784 = tpu.dynamic_rotate %763 by %c255_i32_582 dim 1 : vector<16x256xf32>, i32 -> vector<16x256xf32>
    %c5_583 = arith.constant 5 : index
    %c0_584 = arith.constant 0 : index
    %c0_585 = arith.constant 0 : index
    %785 = vector.load %arg34[%c5_583, %c0_584, %c0_585] : memref<9x1x256xf32, #tpu.memory_space<vmem>>, vector<1x1x256xf32>
    %786 = vector.shape_cast %785 : vector<1x1x256xf32> to vector<1x256xf32>
    %787 = vector.broadcast %786 : vector<1x256xf32> to vector<16x256xf32>
    %788 = arith.mulf %784, %787 : vector<16x256xf32>
    %c241_i32_586 = arith.constant 241 : i32
    %789 = tpu.dynamic_rotate %763 by %c241_i32_586 dim 1 : vector<16x256xf32>, i32 -> vector<16x256xf32>
    %c6_587 = arith.constant 6 : index
    %c0_588 = arith.constant 0 : index
    %c0_589 = arith.constant 0 : index
    %790 = vector.load %arg34[%c6_587, %c0_588, %c0_589] : memref<9x1x256xf32, #tpu.memory_space<vmem>>, vector<1x1x256xf32>
    %791 = vector.shape_cast %790 : vector<1x1x256xf32> to vector<1x256xf32>
    %792 = vector.broadcast %791 : vector<1x256xf32> to vector<16x256xf32>
    %793 = arith.mulf %789, %792 : vector<16x256xf32>
    %c240_i32_590 = arith.constant 240 : i32
    %794 = tpu.dynamic_rotate %763 by %c240_i32_590 dim 1 : vector<16x256xf32>, i32 -> vector<16x256xf32>
    %c7_591 = arith.constant 7 : index
    %c0_592 = arith.constant 0 : index
    %c0_593 = arith.constant 0 : index
    %795 = vector.load %arg34[%c7_591, %c0_592, %c0_593] : memref<9x1x256xf32, #tpu.memory_space<vmem>>, vector<1x1x256xf32>
    %796 = vector.shape_cast %795 : vector<1x1x256xf32> to vector<1x256xf32>
    %797 = vector.broadcast %796 : vector<1x256xf32> to vector<16x256xf32>
    %798 = arith.mulf %794, %797 : vector<16x256xf32>
    %c239_i32_594 = arith.constant 239 : i32
    %799 = tpu.dynamic_rotate %763 by %c239_i32_594 dim 1 : vector<16x256xf32>, i32 -> vector<16x256xf32>
    %c8_595 = arith.constant 8 : index
    %c0_596 = arith.constant 0 : index
    %c0_597 = arith.constant 0 : index
    %800 = vector.load %arg34[%c8_595, %c0_596, %c0_597] : memref<9x1x256xf32, #tpu.memory_space<vmem>>, vector<1x1x256xf32>
    %801 = vector.shape_cast %800 : vector<1x1x256xf32> to vector<1x256xf32>
    %802 = vector.broadcast %801 : vector<1x256xf32> to vector<16x256xf32>
    %803 = arith.mulf %799, %802 : vector<16x256xf32>
    %804 = tpu.concatenate %768, %773, %778, %783, %763, %788, %793, %798, %803 in 0 : vector<16x256xf32>, vector<16x256xf32>, vector<16x256xf32>, vector<16x256xf32>, vector<16x256xf32>, vector<16x256xf32>, vector<16x256xf32>, vector<16x256xf32>, vector<16x256xf32> -> vector<144x256xf32>
    %805 = arith.truncf %804 : vector<144x256xf32> to vector<144x256xbf16>
    %c0_598 = arith.constant 0 : index
    %c0_599 = arith.constant 0 : index
    %806 = vector.load %arg30[%c0_598, %c0_599] : memref<24x144xbf16, #tpu.memory_space<vmem>>, vector<24x144xbf16>
    %cst_600 = arith.constant dense<0.000000e+00> : vector<24x256xf32>
    %807 = tpu.matmul %806, %805, %cst_600 {dimension_numbers = #tpu.dot_dimension_numbers<[1], [0], [0], [1], [0, 0, 1, 1], [], []>} : vector<24x144xbf16>, vector<144x256xbf16>, vector<24x256xf32> -> vector<24x256xf32>
    %cst_601 = arith.constant 0.000000e+00 : f32
    %808 = vector.broadcast %cst_601 : f32 to vector<24x256xf32>
    %809 = arith.cmpf oge, %807, %808 : vector<24x256xf32>
    %810 = vector.broadcast %0 : f32 to vector<24x256xf32>
    %811 = arith.mulf %810, %807 : vector<24x256xf32>
    %812 = arith.select %809, %807, %811 : vector<24x256xi1>, vector<24x256xf32>
    %c17_i32_602 = arith.constant 17 : i32
    %813 = tpu.dynamic_rotate %812 by %c17_i32_602 dim 1 : vector<24x256xf32>, i32 -> vector<24x256xf32>
    %c0_603 = arith.constant 0 : index
    %c0_604 = arith.constant 0 : index
    %c0_605 = arith.constant 0 : index
    %814 = vector.load %arg34[%c0_603, %c0_604, %c0_605] : memref<9x1x256xf32, #tpu.memory_space<vmem>>, vector<1x1x256xf32>
    %815 = vector.shape_cast %814 : vector<1x1x256xf32> to vector<1x256xf32>
    %816 = vector.broadcast %815 : vector<1x256xf32> to vector<24x256xf32>
    %817 = arith.mulf %813, %816 : vector<24x256xf32>
    %c16_i32_606 = arith.constant 16 : i32
    %818 = tpu.dynamic_rotate %812 by %c16_i32_606 dim 1 : vector<24x256xf32>, i32 -> vector<24x256xf32>
    %c1_607 = arith.constant 1 : index
    %c0_608 = arith.constant 0 : index
    %c0_609 = arith.constant 0 : index
    %819 = vector.load %arg34[%c1_607, %c0_608, %c0_609] : memref<9x1x256xf32, #tpu.memory_space<vmem>>, vector<1x1x256xf32>
    %820 = vector.shape_cast %819 : vector<1x1x256xf32> to vector<1x256xf32>
    %821 = vector.broadcast %820 : vector<1x256xf32> to vector<24x256xf32>
    %822 = arith.mulf %818, %821 : vector<24x256xf32>
    %c15_i32_610 = arith.constant 15 : i32
    %823 = tpu.dynamic_rotate %812 by %c15_i32_610 dim 1 : vector<24x256xf32>, i32 -> vector<24x256xf32>
    %c2_611 = arith.constant 2 : index
    %c0_612 = arith.constant 0 : index
    %c0_613 = arith.constant 0 : index
    %824 = vector.load %arg34[%c2_611, %c0_612, %c0_613] : memref<9x1x256xf32, #tpu.memory_space<vmem>>, vector<1x1x256xf32>
    %825 = vector.shape_cast %824 : vector<1x1x256xf32> to vector<1x256xf32>
    %826 = vector.broadcast %825 : vector<1x256xf32> to vector<24x256xf32>
    %827 = arith.mulf %823, %826 : vector<24x256xf32>
    %c1_i32_614 = arith.constant 1 : i32
    %828 = tpu.dynamic_rotate %812 by %c1_i32_614 dim 1 : vector<24x256xf32>, i32 -> vector<24x256xf32>
    %c3_615 = arith.constant 3 : index
    %c0_616 = arith.constant 0 : index
    %c0_617 = arith.constant 0 : index
    %829 = vector.load %arg34[%c3_615, %c0_616, %c0_617] : memref<9x1x256xf32, #tpu.memory_space<vmem>>, vector<1x1x256xf32>
    %830 = vector.shape_cast %829 : vector<1x1x256xf32> to vector<1x256xf32>
    %831 = vector.broadcast %830 : vector<1x256xf32> to vector<24x256xf32>
    %832 = arith.mulf %828, %831 : vector<24x256xf32>
    %c255_i32_618 = arith.constant 255 : i32
    %833 = tpu.dynamic_rotate %812 by %c255_i32_618 dim 1 : vector<24x256xf32>, i32 -> vector<24x256xf32>
    %c5_619 = arith.constant 5 : index
    %c0_620 = arith.constant 0 : index
    %c0_621 = arith.constant 0 : index
    %834 = vector.load %arg34[%c5_619, %c0_620, %c0_621] : memref<9x1x256xf32, #tpu.memory_space<vmem>>, vector<1x1x256xf32>
    %835 = vector.shape_cast %834 : vector<1x1x256xf32> to vector<1x256xf32>
    %836 = vector.broadcast %835 : vector<1x256xf32> to vector<24x256xf32>
    %837 = arith.mulf %833, %836 : vector<24x256xf32>
    %c241_i32_622 = arith.constant 241 : i32
    %838 = tpu.dynamic_rotate %812 by %c241_i32_622 dim 1 : vector<24x256xf32>, i32 -> vector<24x256xf32>
    %c6_623 = arith.constant 6 : index
    %c0_624 = arith.constant 0 : index
    %c0_625 = arith.constant 0 : index
    %839 = vector.load %arg34[%c6_623, %c0_624, %c0_625] : memref<9x1x256xf32, #tpu.memory_space<vmem>>, vector<1x1x256xf32>
    %840 = vector.shape_cast %839 : vector<1x1x256xf32> to vector<1x256xf32>
    %841 = vector.broadcast %840 : vector<1x256xf32> to vector<24x256xf32>
    %842 = arith.mulf %838, %841 : vector<24x256xf32>
    %c240_i32_626 = arith.constant 240 : i32
    %843 = tpu.dynamic_rotate %812 by %c240_i32_626 dim 1 : vector<24x256xf32>, i32 -> vector<24x256xf32>
    %c7_627 = arith.constant 7 : index
    %c0_628 = arith.constant 0 : index
    %c0_629 = arith.constant 0 : index
    %844 = vector.load %arg34[%c7_627, %c0_628, %c0_629] : memref<9x1x256xf32, #tpu.memory_space<vmem>>, vector<1x1x256xf32>
    %845 = vector.shape_cast %844 : vector<1x1x256xf32> to vector<1x256xf32>
    %846 = vector.broadcast %845 : vector<1x256xf32> to vector<24x256xf32>
    %847 = arith.mulf %843, %846 : vector<24x256xf32>
    %c239_i32_630 = arith.constant 239 : i32
    %848 = tpu.dynamic_rotate %812 by %c239_i32_630 dim 1 : vector<24x256xf32>, i32 -> vector<24x256xf32>
    %c8_631 = arith.constant 8 : index
    %c0_632 = arith.constant 0 : index
    %c0_633 = arith.constant 0 : index
    %849 = vector.load %arg34[%c8_631, %c0_632, %c0_633] : memref<9x1x256xf32, #tpu.memory_space<vmem>>, vector<1x1x256xf32>
    %850 = vector.shape_cast %849 : vector<1x1x256xf32> to vector<1x256xf32>
    %851 = vector.broadcast %850 : vector<1x256xf32> to vector<24x256xf32>
    %852 = arith.mulf %848, %851 : vector<24x256xf32>
    %853 = tpu.concatenate %817, %822, %827, %832, %812, %837, %842, %847, %852 in 0 : vector<24x256xf32>, vector<24x256xf32>, vector<24x256xf32>, vector<24x256xf32>, vector<24x256xf32>, vector<24x256xf32>, vector<24x256xf32>, vector<24x256xf32>, vector<24x256xf32> -> vector<216x256xf32>
    %854 = arith.truncf %853 : vector<216x256xf32> to vector<216x256xbf16>
    %c0_634 = arith.constant 0 : index
    %c0_635 = arith.constant 0 : index
    %855 = vector.load %arg31[%c0_634, %c0_635] : memref<16x216xbf16, #tpu.memory_space<vmem>>, vector<16x216xbf16>
    %cst_636 = arith.constant dense<0.000000e+00> : vector<16x256xf32>
    %856 = tpu.matmul %855, %854, %cst_636 {dimension_numbers = #tpu.dot_dimension_numbers<[1], [0], [0], [1], [0, 0, 1, 1], [], []>} : vector<16x216xbf16>, vector<216x256xbf16>, vector<16x256xf32> -> vector<16x256xf32>
    %cst_637 = arith.constant 0.000000e+00 : f32
    %857 = vector.broadcast %cst_637 : f32 to vector<16x256xf32>
    %858 = arith.cmpf oge, %856, %857 : vector<16x256xf32>
    %859 = vector.broadcast %0 : f32 to vector<16x256xf32>
    %860 = arith.mulf %859, %856 : vector<16x256xf32>
    %861 = arith.select %858, %856, %860 : vector<16x256xi1>, vector<16x256xf32>
    %862 = arith.addf %861, %763 : vector<16x256xf32>
    %c17_i32_638 = arith.constant 17 : i32
    %863 = tpu.dynamic_rotate %862 by %c17_i32_638 dim 1 : vector<16x256xf32>, i32 -> vector<16x256xf32>
    %c0_639 = arith.constant 0 : index
    %c0_640 = arith.constant 0 : index
    %c0_641 = arith.constant 0 : index
    %864 = vector.load %arg34[%c0_639, %c0_640, %c0_641] : memref<9x1x256xf32, #tpu.memory_space<vmem>>, vector<1x1x256xf32>
    %865 = vector.shape_cast %864 : vector<1x1x256xf32> to vector<1x256xf32>
    %866 = vector.broadcast %865 : vector<1x256xf32> to vector<16x256xf32>
    %867 = arith.mulf %863, %866 : vector<16x256xf32>
    %c16_i32_642 = arith.constant 16 : i32
    %868 = tpu.dynamic_rotate %862 by %c16_i32_642 dim 1 : vector<16x256xf32>, i32 -> vector<16x256xf32>
    %c1_643 = arith.constant 1 : index
    %c0_644 = arith.constant 0 : index
    %c0_645 = arith.constant 0 : index
    %869 = vector.load %arg34[%c1_643, %c0_644, %c0_645] : memref<9x1x256xf32, #tpu.memory_space<vmem>>, vector<1x1x256xf32>
    %870 = vector.shape_cast %869 : vector<1x1x256xf32> to vector<1x256xf32>
    %871 = vector.broadcast %870 : vector<1x256xf32> to vector<16x256xf32>
    %872 = arith.mulf %868, %871 : vector<16x256xf32>
    %c15_i32_646 = arith.constant 15 : i32
    %873 = tpu.dynamic_rotate %862 by %c15_i32_646 dim 1 : vector<16x256xf32>, i32 -> vector<16x256xf32>
    %c2_647 = arith.constant 2 : index
    %c0_648 = arith.constant 0 : index
    %c0_649 = arith.constant 0 : index
    %874 = vector.load %arg34[%c2_647, %c0_648, %c0_649] : memref<9x1x256xf32, #tpu.memory_space<vmem>>, vector<1x1x256xf32>
    %875 = vector.shape_cast %874 : vector<1x1x256xf32> to vector<1x256xf32>
    %876 = vector.broadcast %875 : vector<1x256xf32> to vector<16x256xf32>
    %877 = arith.mulf %873, %876 : vector<16x256xf32>
    %c1_i32_650 = arith.constant 1 : i32
    %878 = tpu.dynamic_rotate %862 by %c1_i32_650 dim 1 : vector<16x256xf32>, i32 -> vector<16x256xf32>
    %c3_651 = arith.constant 3 : index
    %c0_652 = arith.constant 0 : index
    %c0_653 = arith.constant 0 : index
    %879 = vector.load %arg34[%c3_651, %c0_652, %c0_653] : memref<9x1x256xf32, #tpu.memory_space<vmem>>, vector<1x1x256xf32>
    %880 = vector.shape_cast %879 : vector<1x1x256xf32> to vector<1x256xf32>
    %881 = vector.broadcast %880 : vector<1x256xf32> to vector<16x256xf32>
    %882 = arith.mulf %878, %881 : vector<16x256xf32>
    %c255_i32_654 = arith.constant 255 : i32
    %883 = tpu.dynamic_rotate %862 by %c255_i32_654 dim 1 : vector<16x256xf32>, i32 -> vector<16x256xf32>
    %c5_655 = arith.constant 5 : index
    %c0_656 = arith.constant 0 : index
    %c0_657 = arith.constant 0 : index
    %884 = vector.load %arg34[%c5_655, %c0_656, %c0_657] : memref<9x1x256xf32, #tpu.memory_space<vmem>>, vector<1x1x256xf32>
    %885 = vector.shape_cast %884 : vector<1x1x256xf32> to vector<1x256xf32>
    %886 = vector.broadcast %885 : vector<1x256xf32> to vector<16x256xf32>
    %887 = arith.mulf %883, %886 : vector<16x256xf32>
    %c241_i32_658 = arith.constant 241 : i32
    %888 = tpu.dynamic_rotate %862 by %c241_i32_658 dim 1 : vector<16x256xf32>, i32 -> vector<16x256xf32>
    %c6_659 = arith.constant 6 : index
    %c0_660 = arith.constant 0 : index
    %c0_661 = arith.constant 0 : index
    %889 = vector.load %arg34[%c6_659, %c0_660, %c0_661] : memref<9x1x256xf32, #tpu.memory_space<vmem>>, vector<1x1x256xf32>
    %890 = vector.shape_cast %889 : vector<1x1x256xf32> to vector<1x256xf32>
    %891 = vector.broadcast %890 : vector<1x256xf32> to vector<16x256xf32>
    %892 = arith.mulf %888, %891 : vector<16x256xf32>
    %c240_i32_662 = arith.constant 240 : i32
    %893 = tpu.dynamic_rotate %862 by %c240_i32_662 dim 1 : vector<16x256xf32>, i32 -> vector<16x256xf32>
    %c7_663 = arith.constant 7 : index
    %c0_664 = arith.constant 0 : index
    %c0_665 = arith.constant 0 : index
    %894 = vector.load %arg34[%c7_663, %c0_664, %c0_665] : memref<9x1x256xf32, #tpu.memory_space<vmem>>, vector<1x1x256xf32>
    %895 = vector.shape_cast %894 : vector<1x1x256xf32> to vector<1x256xf32>
    %896 = vector.broadcast %895 : vector<1x256xf32> to vector<16x256xf32>
    %897 = arith.mulf %893, %896 : vector<16x256xf32>
    %c239_i32_666 = arith.constant 239 : i32
    %898 = tpu.dynamic_rotate %862 by %c239_i32_666 dim 1 : vector<16x256xf32>, i32 -> vector<16x256xf32>
    %c8_667 = arith.constant 8 : index
    %c0_668 = arith.constant 0 : index
    %c0_669 = arith.constant 0 : index
    %899 = vector.load %arg34[%c8_667, %c0_668, %c0_669] : memref<9x1x256xf32, #tpu.memory_space<vmem>>, vector<1x1x256xf32>
    %900 = vector.shape_cast %899 : vector<1x1x256xf32> to vector<1x256xf32>
    %901 = vector.broadcast %900 : vector<1x256xf32> to vector<16x256xf32>
    %902 = arith.mulf %898, %901 : vector<16x256xf32>
    %903 = tpu.concatenate %867, %872, %877, %882, %862, %887, %892, %897, %902 in 0 : vector<16x256xf32>, vector<16x256xf32>, vector<16x256xf32>, vector<16x256xf32>, vector<16x256xf32>, vector<16x256xf32>, vector<16x256xf32>, vector<16x256xf32>, vector<16x256xf32> -> vector<144x256xf32>
    %904 = arith.truncf %903 : vector<144x256xf32> to vector<144x256xbf16>
    %c0_670 = arith.constant 0 : index
    %c0_671 = arith.constant 0 : index
    %905 = vector.load %arg32[%c0_670, %c0_671] : memref<8x144xbf16, #tpu.memory_space<vmem>>, vector<8x144xbf16>
    %cst_672 = arith.constant dense<0.000000e+00> : vector<8x256xf32>
    %906 = tpu.matmul %905, %904, %cst_672 {dimension_numbers = #tpu.dot_dimension_numbers<[1], [0], [0], [1], [0, 0, 1, 1], [], []>} : vector<8x144xbf16>, vector<144x256xbf16>, vector<8x256xf32> -> vector<8x256xf32>
    %cst_673 = arith.constant 0.000000e+00 : f32
    %907 = vector.broadcast %cst_673 : f32 to vector<8x256xf32>
    %908 = arith.cmpf oge, %906, %907 : vector<8x256xf32>
    %909 = vector.broadcast %0 : f32 to vector<8x256xf32>
    %910 = arith.mulf %909, %906 : vector<8x256xf32>
    %911 = arith.select %908, %906, %910 : vector<8x256xi1>, vector<8x256xf32>
    %912 = arith.addf %911, %714 : vector<8x256xf32>
    %c17_i32_674 = arith.constant 17 : i32
    %913 = tpu.dynamic_rotate %912 by %c17_i32_674 dim 1 : vector<8x256xf32>, i32 -> vector<8x256xf32>
    %c0_675 = arith.constant 0 : index
    %c0_676 = arith.constant 0 : index
    %c0_677 = arith.constant 0 : index
    %914 = vector.load %arg34[%c0_675, %c0_676, %c0_677] : memref<9x1x256xf32, #tpu.memory_space<vmem>>, vector<1x1x256xf32>
    %915 = vector.shape_cast %914 : vector<1x1x256xf32> to vector<1x256xf32>
    %916 = vector.broadcast %915 : vector<1x256xf32> to vector<8x256xf32>
    %917 = arith.mulf %913, %916 : vector<8x256xf32>
    %c16_i32_678 = arith.constant 16 : i32
    %918 = tpu.dynamic_rotate %912 by %c16_i32_678 dim 1 : vector<8x256xf32>, i32 -> vector<8x256xf32>
    %c1_679 = arith.constant 1 : index
    %c0_680 = arith.constant 0 : index
    %c0_681 = arith.constant 0 : index
    %919 = vector.load %arg34[%c1_679, %c0_680, %c0_681] : memref<9x1x256xf32, #tpu.memory_space<vmem>>, vector<1x1x256xf32>
    %920 = vector.shape_cast %919 : vector<1x1x256xf32> to vector<1x256xf32>
    %921 = vector.broadcast %920 : vector<1x256xf32> to vector<8x256xf32>
    %922 = arith.mulf %918, %921 : vector<8x256xf32>
    %c15_i32_682 = arith.constant 15 : i32
    %923 = tpu.dynamic_rotate %912 by %c15_i32_682 dim 1 : vector<8x256xf32>, i32 -> vector<8x256xf32>
    %c2_683 = arith.constant 2 : index
    %c0_684 = arith.constant 0 : index
    %c0_685 = arith.constant 0 : index
    %924 = vector.load %arg34[%c2_683, %c0_684, %c0_685] : memref<9x1x256xf32, #tpu.memory_space<vmem>>, vector<1x1x256xf32>
    %925 = vector.shape_cast %924 : vector<1x1x256xf32> to vector<1x256xf32>
    %926 = vector.broadcast %925 : vector<1x256xf32> to vector<8x256xf32>
    %927 = arith.mulf %923, %926 : vector<8x256xf32>
    %c1_i32_686 = arith.constant 1 : i32
    %928 = tpu.dynamic_rotate %912 by %c1_i32_686 dim 1 : vector<8x256xf32>, i32 -> vector<8x256xf32>
    %c3_687 = arith.constant 3 : index
    %c0_688 = arith.constant 0 : index
    %c0_689 = arith.constant 0 : index
    %929 = vector.load %arg34[%c3_687, %c0_688, %c0_689] : memref<9x1x256xf32, #tpu.memory_space<vmem>>, vector<1x1x256xf32>
    %930 = vector.shape_cast %929 : vector<1x1x256xf32> to vector<1x256xf32>
    %931 = vector.broadcast %930 : vector<1x256xf32> to vector<8x256xf32>
    %932 = arith.mulf %928, %931 : vector<8x256xf32>
    %c255_i32_690 = arith.constant 255 : i32
    %933 = tpu.dynamic_rotate %912 by %c255_i32_690 dim 1 : vector<8x256xf32>, i32 -> vector<8x256xf32>
    %c5_691 = arith.constant 5 : index
    %c0_692 = arith.constant 0 : index
    %c0_693 = arith.constant 0 : index
    %934 = vector.load %arg34[%c5_691, %c0_692, %c0_693] : memref<9x1x256xf32, #tpu.memory_space<vmem>>, vector<1x1x256xf32>
    %935 = vector.shape_cast %934 : vector<1x1x256xf32> to vector<1x256xf32>
    %936 = vector.broadcast %935 : vector<1x256xf32> to vector<8x256xf32>
    %937 = arith.mulf %933, %936 : vector<8x256xf32>
    %c241_i32_694 = arith.constant 241 : i32
    %938 = tpu.dynamic_rotate %912 by %c241_i32_694 dim 1 : vector<8x256xf32>, i32 -> vector<8x256xf32>
    %c6_695 = arith.constant 6 : index
    %c0_696 = arith.constant 0 : index
    %c0_697 = arith.constant 0 : index
    %939 = vector.load %arg34[%c6_695, %c0_696, %c0_697] : memref<9x1x256xf32, #tpu.memory_space<vmem>>, vector<1x1x256xf32>
    %940 = vector.shape_cast %939 : vector<1x1x256xf32> to vector<1x256xf32>
    %941 = vector.broadcast %940 : vector<1x256xf32> to vector<8x256xf32>
    %942 = arith.mulf %938, %941 : vector<8x256xf32>
    %c240_i32_698 = arith.constant 240 : i32
    %943 = tpu.dynamic_rotate %912 by %c240_i32_698 dim 1 : vector<8x256xf32>, i32 -> vector<8x256xf32>
    %c7_699 = arith.constant 7 : index
    %c0_700 = arith.constant 0 : index
    %c0_701 = arith.constant 0 : index
    %944 = vector.load %arg34[%c7_699, %c0_700, %c0_701] : memref<9x1x256xf32, #tpu.memory_space<vmem>>, vector<1x1x256xf32>
    %945 = vector.shape_cast %944 : vector<1x1x256xf32> to vector<1x256xf32>
    %946 = vector.broadcast %945 : vector<1x256xf32> to vector<8x256xf32>
    %947 = arith.mulf %943, %946 : vector<8x256xf32>
    %c239_i32_702 = arith.constant 239 : i32
    %948 = tpu.dynamic_rotate %912 by %c239_i32_702 dim 1 : vector<8x256xf32>, i32 -> vector<8x256xf32>
    %c8_703 = arith.constant 8 : index
    %c0_704 = arith.constant 0 : index
    %c0_705 = arith.constant 0 : index
    %949 = vector.load %arg34[%c8_703, %c0_704, %c0_705] : memref<9x1x256xf32, #tpu.memory_space<vmem>>, vector<1x1x256xf32>
    %950 = vector.shape_cast %949 : vector<1x1x256xf32> to vector<1x256xf32>
    %951 = vector.broadcast %950 : vector<1x256xf32> to vector<8x256xf32>
    %952 = arith.mulf %948, %951 : vector<8x256xf32>
    %953 = tpu.concatenate %917, %922, %927, %932, %912, %937, %942, %947, %952 in 0 : vector<8x256xf32>, vector<8x256xf32>, vector<8x256xf32>, vector<8x256xf32>, vector<8x256xf32>, vector<8x256xf32>, vector<8x256xf32>, vector<8x256xf32>, vector<8x256xf32> -> vector<72x256xf32>
    %954 = arith.truncf %953 : vector<72x256xf32> to vector<72x256xbf16>
    %c0_706 = arith.constant 0 : index
    %c0_707 = arith.constant 0 : index
    %955 = vector.load %arg33[%c0_706, %c0_707] : memref<4x72xbf16, #tpu.memory_space<vmem>>, vector<4x72xbf16>
    %cst_708 = arith.constant dense<0.000000e+00> : vector<4x256xf32>
    %956 = tpu.matmul %955, %954, %cst_708 {dimension_numbers = #tpu.dot_dimension_numbers<[1], [0], [0], [1], [0, 0, 1, 1], [], []>} : vector<4x72xbf16>, vector<72x256xbf16>, vector<4x256xf32> -> vector<4x256xf32>
    %957 = math.tanh %956 : vector<4x256xf32>
    %cst_709 = arith.constant 5.000000e-01 : f32
    %958 = vector.broadcast %cst_709 : f32 to vector<4x256xf32>
    %959 = arith.mulf %957, %958 : vector<4x256xf32>
    %cst_710 = arith.constant 5.000000e-01 : f32
    %960 = vector.broadcast %cst_710 : f32 to vector<4x256xf32>
    %961 = arith.addf %959, %960 : vector<4x256xf32>
    %c0_711 = arith.constant 0 : index
    %c0_712 = arith.constant 0 : index
    %c0_713 = arith.constant 0 : index
    %962 = vector.load %arg43[%c0_711, %c0_712, %c0_713] : memref<1x4x256xf32, #tpu.memory_space<vmem>>, vector<1x4x256xf32>
    %963 = vector.shape_cast %962 : vector<1x4x256xf32> to vector<4x256xf32>
    %964 = vector.shape_cast %961 : vector<4x256xf32> to vector<1x4x256xf32>
    tpu.vector_store %arg43[%c0_711, %c0_712, %c0_713], %964 {strides = array<i32>} : memref<1x4x256xf32, #tpu.memory_space<vmem>>, vector<1x4x256xf32>,
    return
  }
  func.func @transform_0(%arg0: i32) -> i32 {
    %c0_i32 = arith.constant 0 : i32
    %c0_i32_0 = arith.constant 0 : i32
    return %c0_i32 : i32
  }
  func.func @transform_1(%arg0: i32) -> (i32, i32, i32) {
    %c0_i32 = arith.constant 0 : i32
    %c0_i32_0 = arith.constant 0 : i32
    %c0_i32_1 = arith.constant 0 : i32
    return %arg0, %c0_i32, %c0_i32_0 : i32, i32, i32
  }
  func.func @transform_2(%arg0: i32) -> (i32, i32) {
    %c0_i32 = arith.constant 0 : i32
    %c0_i32_0 = arith.constant 0 : i32
    %c0_i32_1 = arith.constant 0 : i32
    return %c0_i32, %c0_i32_0 : i32, i32
  }
  func.func @transform_3(%arg0: i32) -> (i32, i32) {
    %c0_i32 = arith.constant 0 : i32
    %c0_i32_0 = arith.constant 0 : i32
    %c0_i32_1 = arith.constant 0 : i32
    return %c0_i32, %c0_i32_0 : i32, i32
  }
  func.func @transform_4(%arg0: i32) -> (i32, i32) {
    %c0_i32 = arith.constant 0 : i32
    %c0_i32_0 = arith.constant 0 : i32
    %c0_i32_1 = arith.constant 0 : i32
    return %c0_i32, %c0_i32_0 : i32, i32
  }
  func.func @transform_5(%arg0: i32) -> (i32, i32) {
    %c0_i32 = arith.constant 0 : i32
    %c0_i32_0 = arith.constant 0 : i32
    %c0_i32_1 = arith.constant 0 : i32
    return %c0_i32, %c0_i32_0 : i32, i32
  }
  func.func @transform_6(%arg0: i32) -> (i32, i32) {
    %c0_i32 = arith.constant 0 : i32
    %c0_i32_0 = arith.constant 0 : i32
    %c0_i32_1 = arith.constant 0 : i32
    return %c0_i32, %c0_i32_0 : i32, i32
  }
  func.func @transform_7(%arg0: i32) -> (i32, i32) {
    %c0_i32 = arith.constant 0 : i32
    %c0_i32_0 = arith.constant 0 : i32
    %c0_i32_1 = arith.constant 0 : i32
    return %c0_i32, %c0_i32_0 : i32, i32
  }
  func.func @transform_8(%arg0: i32) -> (i32, i32) {
    %c0_i32 = arith.constant 0 : i32
    %c0_i32_0 = arith.constant 0 : i32
    %c0_i32_1 = arith.constant 0 : i32
    return %c0_i32, %c0_i32_0 : i32, i32
  }
  func.func @transform_9(%arg0: i32) -> (i32, i32) {
    %c0_i32 = arith.constant 0 : i32
    %c0_i32_0 = arith.constant 0 : i32
    %c0_i32_1 = arith.constant 0 : i32
    return %c0_i32, %c0_i32_0 : i32, i32
  }
  func.func @transform_10(%arg0: i32) -> (i32, i32) {
    %c0_i32 = arith.constant 0 : i32
    %c0_i32_0 = arith.constant 0 : i32
    %c0_i32_1 = arith.constant 0 : i32
    return %c0_i32, %c0_i32_0 : i32, i32
  }
  func.func @transform_11(%arg0: i32) -> (i32, i32) {
    %c0_i32 = arith.constant 0 : i32
    %c0_i32_0 = arith.constant 0 : i32
    %c0_i32_1 = arith.constant 0 : i32
    return %c0_i32, %c0_i32_0 : i32, i32
  }
  func.func @transform_12(%arg0: i32) -> (i32, i32) {
    %c0_i32 = arith.constant 0 : i32
    %c0_i32_0 = arith.constant 0 : i32
    %c0_i32_1 = arith.constant 0 : i32
    return %c0_i32, %c0_i32_0 : i32, i32
  }
  func.func @transform_13(%arg0: i32) -> (i32, i32) {
    %c0_i32 = arith.constant 0 : i32
    %c0_i32_0 = arith.constant 0 : i32
    %c0_i32_1 = arith.constant 0 : i32
    return %c0_i32, %c0_i32_0 : i32, i32
  }
  func.func @transform_14(%arg0: i32) -> (i32, i32) {
    %c0_i32 = arith.constant 0 : i32
    %c0_i32_0 = arith.constant 0 : i32
    %c0_i32_1 = arith.constant 0 : i32
    return %c0_i32, %c0_i32_0 : i32, i32
  }
  func.func @transform_15(%arg0: i32) -> (i32, i32) {
    %c0_i32 = arith.constant 0 : i32
    %c0_i32_0 = arith.constant 0 : i32
    %c0_i32_1 = arith.constant 0 : i32
    return %c0_i32, %c0_i32_0 : i32, i32
  }
  func.func @transform_16(%arg0: i32) -> (i32, i32) {
    %c0_i32 = arith.constant 0 : i32
    %c0_i32_0 = arith.constant 0 : i32
    %c0_i32_1 = arith.constant 0 : i32
    return %c0_i32, %c0_i32_0 : i32, i32
  }
  func.func @transform_17(%arg0: i32) -> (i32, i32) {
    %c0_i32 = arith.constant 0 : i32
    %c0_i32_0 = arith.constant 0 : i32
    %c0_i32_1 = arith.constant 0 : i32
    return %c0_i32, %c0_i32_0 : i32, i32
  }
  func.func @transform_18(%arg0: i32) -> (i32, i32) {
    %c0_i32 = arith.constant 0 : i32
    %c0_i32_0 = arith.constant 0 : i32
    %c0_i32_1 = arith.constant 0 : i32
    return %c0_i32, %c0_i32_0 : i32, i32
  }
  func.func @transform_19(%arg0: i32) -> (i32, i32, i32) {
    %c0_i32 = arith.constant 0 : i32
    %c0_i32_0 = arith.constant 0 : i32
    %c0_i32_1 = arith.constant 0 : i32
    %c0_i32_2 = arith.constant 0 : i32
    return %c0_i32, %c0_i32_0, %c0_i32_1 : i32, i32, i32
  }
  func.func @transform_20(%arg0: i32) -> (i32, i32) {
    %c0_i32 = arith.constant 0 : i32
    %c0_i32_0 = arith.constant 0 : i32
    %c0_i32_1 = arith.constant 0 : i32
    return %c0_i32, %c0_i32_0 : i32, i32
  }
  func.func @transform_21(%arg0: i32) -> (i32, i32) {
    %c0_i32 = arith.constant 0 : i32
    %c0_i32_0 = arith.constant 0 : i32
    %c0_i32_1 = arith.constant 0 : i32
    return %c0_i32, %c0_i32_0 : i32, i32
  }
  func.func @transform_22(%arg0: i32) -> (i32, i32) {
    %c0_i32 = arith.constant 0 : i32
    %c0_i32_0 = arith.constant 0 : i32
    %c0_i32_1 = arith.constant 0 : i32
    return %c0_i32, %c0_i32_0 : i32, i32
  }
  func.func @transform_23(%arg0: i32) -> (i32, i32, i32) {
    %c0_i32 = arith.constant 0 : i32
    %c0_i32_0 = arith.constant 0 : i32
    %c0_i32_1 = arith.constant 0 : i32
    %c0_i32_2 = arith.constant 0 : i32
    return %c0_i32, %c0_i32_0, %c0_i32_1 : i32, i32, i32
  }
  func.func @transform_24(%arg0: i32) -> (i32, i32) {
    %c0_i32 = arith.constant 0 : i32
    %c0_i32_0 = arith.constant 0 : i32
    %c0_i32_1 = arith.constant 0 : i32
    return %c0_i32, %c0_i32_0 : i32, i32
  }
  func.func @transform_25(%arg0: i32) -> (i32, i32) {
    %c0_i32 = arith.constant 0 : i32
    %c0_i32_0 = arith.constant 0 : i32
    %c0_i32_1 = arith.constant 0 : i32
    return %c0_i32, %c0_i32_0 : i32, i32
  }
  func.func @transform_26(%arg0: i32) -> (i32, i32) {
    %c0_i32 = arith.constant 0 : i32
    %c0_i32_0 = arith.constant 0 : i32
    %c0_i32_1 = arith.constant 0 : i32
    return %c0_i32, %c0_i32_0 : i32, i32
  }
  func.func @transform_27(%arg0: i32) -> (i32, i32) {
    %c0_i32 = arith.constant 0 : i32
    %c0_i32_0 = arith.constant 0 : i32
    %c0_i32_1 = arith.constant 0 : i32
    return %c0_i32, %c0_i32_0 : i32, i32
  }
  func.func @transform_28(%arg0: i32) -> (i32, i32) {
    %c0_i32 = arith.constant 0 : i32
    %c0_i32_0 = arith.constant 0 : i32
    %c0_i32_1 = arith.constant 0 : i32
    return %c0_i32, %c0_i32_0 : i32, i32
  }
  func.func @transform_29(%arg0: i32) -> (i32, i32) {
    %c0_i32 = arith.constant 0 : i32
    %c0_i32_0 = arith.constant 0 : i32
    %c0_i32_1 = arith.constant 0 : i32
    return %c0_i32, %c0_i32_0 : i32, i32
  }
  func.func @transform_30(%arg0: i32) -> (i32, i32) {
    %c0_i32 = arith.constant 0 : i32
    %c0_i32_0 = arith.constant 0 : i32
    %c0_i32_1 = arith.constant 0 : i32
    return %c0_i32, %c0_i32_0 : i32, i32
  }
  func.func @transform_31(%arg0: i32) -> (i32, i32) {
    %c0_i32 = arith.constant 0 : i32
    %c0_i32_0 = arith.constant 0 : i32
    %c0_i32_1 = arith.constant 0 : i32
    return %c0_i32, %c0_i32_0 : i32, i32
  }
  func.func @transform_32(%arg0: i32) -> (i32, i32) {
    %c0_i32 = arith.constant 0 : i32
    %c0_i32_0 = arith.constant 0 : i32
    %c0_i32_1 = arith.constant 0 : i32
    return %c0_i32, %c0_i32_0 : i32, i32
  }
  func.func @transform_33(%arg0: i32) -> (i32, i32, i32) {
    %c0_i32 = arith.constant 0 : i32
    %c0_i32_0 = arith.constant 0 : i32
    %c0_i32_1 = arith.constant 0 : i32
    %c0_i32_2 = arith.constant 0 : i32
    return %c0_i32, %c0_i32_0, %c0_i32_1 : i32, i32, i32
  }
  func.func @transform_34(%arg0: i32) -> (i32, i32, i32) {
    %c0_i32 = arith.constant 0 : i32
    %c0_i32_0 = arith.constant 0 : i32
    %c0_i32_1 = arith.constant 0 : i32
    %c0_i32_2 = arith.constant 0 : i32
    return %c0_i32, %c0_i32_0, %c0_i32_1 : i32, i32, i32
  }
  func.func @transform_35(%arg0: i32) -> (i32, i32, i32) {
    %c0_i32 = arith.constant 0 : i32
    %c0_i32_0 = arith.constant 0 : i32
    %c0_i32_1 = arith.constant 0 : i32
    %c0_i32_2 = arith.constant 0 : i32
    return %c0_i32, %c0_i32_0, %c0_i32_1 : i32, i32, i32
  }
  func.func @transform_36(%arg0: i32) -> (i32, i32, i32) {
    %c0_i32 = arith.constant 0 : i32
    %c0_i32_0 = arith.constant 0 : i32
    %c0_i32_1 = arith.constant 0 : i32
    %c0_i32_2 = arith.constant 0 : i32
    return %c0_i32, %c0_i32_0, %c0_i32_1 : i32, i32, i32
  }
  func.func @transform_37(%arg0: i32) -> (i32, i32, i32) {
    %c0_i32 = arith.constant 0 : i32
    %c0_i32_0 = arith.constant 0 : i32
    %c0_i32_1 = arith.constant 0 : i32
    %c0_i32_2 = arith.constant 0 : i32
    return %c0_i32, %c0_i32_0, %c0_i32_1 : i32, i32, i32
  }
  func.func @transform_38(%arg0: i32) -> (i32, i32) {
    %c0_i32 = arith.constant 0 : i32
    %c0_i32_0 = arith.constant 0 : i32
    %c0_i32_1 = arith.constant 0 : i32
    return %c0_i32, %c0_i32_0 : i32, i32
  }
  func.func @transform_39(%arg0: i32) -> (i32, i32) {
    %c0_i32 = arith.constant 0 : i32
    %c0_i32_0 = arith.constant 0 : i32
    %c0_i32_1 = arith.constant 0 : i32
    return %c0_i32, %c0_i32_0 : i32, i32
  }
  func.func @transform_40(%arg0: i32) -> (i32, i32) {
    %c0_i32 = arith.constant 0 : i32
    %c0_i32_0 = arith.constant 0 : i32
    %c0_i32_1 = arith.constant 0 : i32
    return %c0_i32, %c0_i32_0 : i32, i32
  }
  func.func @transform_41(%arg0: i32) -> (i32, i32) {
    %c0_i32 = arith.constant 0 : i32
    %c0_i32_0 = arith.constant 0 : i32
    %c0_i32_1 = arith.constant 0 : i32
    return %c0_i32, %c0_i32_0 : i32, i32
  }
  func.func @transform_42(%arg0: i32) -> (i32, i32, i32) {
    %c0_i32 = arith.constant 0 : i32
    %c0_i32_0 = arith.constant 0 : i32
    %c0_i32_1 = arith.constant 0 : i32
    return %arg0, %c0_i32, %c0_i32_0 : i32, i32, i32
  }
}

</mosaic_0001>

<bundles_post_ra>
// kernel: ps_decoder_forward.1
= control target key start
LH: loop header
LB: loop body
LE: loop exit
PB: predicated region body
PF: predicated region fallthrough
CT: control target
= control target key end

     0   :  { %s9529_s6 = smov 1   ;;  %s9530_s10 = smov 2   ;;  %s14168_s0 = inlined_call_operand.smem [shape: u32[43], index: -1, kind: input, shape index: {}] }
   0x1   :  { %s9603_s5 = sld [smem:[%s14168_s0]]   ;;  %s9531_s14 = smov 3  }
   0x2   :  { %s9608_s9 = sld [smem:[%s14168_s0 + %s9529_s6]]   ;;  %s9532_s18 = smov 4  }
   0x3   :  { %s9613_s13 = sld [smem:[%s14168_s0 + %s9530_s10]]   ;;  %s9533_s22 = smov 5  }
   0x4   :  { %s9618_s17 = sld [smem:[%s14168_s0 + %s9531_s14]]   ;;  %s9534_s26 = smov 6  }
   0x5   :  { %s9623_s21 = sld [smem:[%s14168_s0 + %s9532_s18]]   ;;  %s9535_s30 = smov 7  }
   0x6   :  { %s9628_s25 = sld [smem:[%s14168_s0 + %s9533_s22]]   ;;  %s9536_s4 = smov 8  }
   0x7   :  { %s9633_s29 = sld [smem:[%s14168_s0 + %s9534_s26]]   ;;  %s9537_s10 = smov 9  }
   0x8   :  { %s9638_s3 = sld [smem:[%s14168_s0 + %s9535_s30]]   ;;  %s9538_s15 = smov 10  }
   0x9   :  { %s9643_s8 = sld [smem:[%s14168_s0 + %s9536_s4]]   ;;  %s9539_s20 = smov 11  }
   0xa   :  { %s9648_s14 = sld [smem:[%s14168_s0 + %s9537_s10]]   ;;  %s9540_s26 = smov 12  }
   0xb   :  { %s9653_s19 = sld [smem:[%s14168_s0 + %s9538_s15]]   ;;  %s9541_s1 = smov 13  }
   0xc   :  { %s9658_s24 = sld [smem:[%s14168_s0 + %s9539_s20]]   ;;  %s9542_s7 = smov 14  }
   0xd   :  { %s9663_s30 = sld [smem:[%s14168_s0 + %s9540_s26]]   ;;  %s9543_s15 = smov 15  }
   0xe   :  { %14429 = sst [smem:[#allocation3_spill]] %s9638_s3  ;;  %s9544_s22 = smov 16  }
   0xf   :  { %s9668_s6 = sld [smem:[%s14168_s0 + %s9541_s1]]   ;;  %s9545_s28 = smov 17  }
  0x10   :  { %s9673_s12 = sld [smem:[%s14168_s0 + %s9542_s7]]   ;;  %s9546_s7 = smov 18  }
  0x11   :  { %14430 = sst [smem:[#allocation4_spill]] %s9653_s19 }
  0x12   :  { %14431 = sst [smem:[#allocation5_spill]] %s9658_s24 }
  0x13   :  { %14432 = sst [smem:[#allocation6_spill]] %s9663_s30 }
  0x14   :  { %s9678_s20 = sld [smem:[%s14168_s0 + %s9543_s15]]   ;;  %s9547_s15 = smov 19  }
  0x15   :  { %14433 = sst [smem:[#allocation7_spill]] %s9668_s6 }
  0x16   :  { %14434 = sst [smem:[#allocation8_spill]] %s9673_s12 }
  0x17   :  { %s9683_s27 = sld [smem:[%s14168_s0 + %s9544_s22]]   ;;  %s9548_s22 = smov 20  }
  0x18   :  { %s9688_s4 = sld [smem:[%s14168_s0 + %s9545_s28]]   ;;  %s9549_s28 = smov 21  }
  0x19   :  { %s9693_s6 = sld [smem:[%s14168_s0 + %s9546_s7]]   ;;  %s9550_s7 = smov 22  }
  0x1a   :  { %14435 = sst [smem:[#allocation9_spill]] %s9678_s20 }
  0x1b   :  { %s9698_s20 = sld [smem:[%s14168_s0 + %s9547_s15]]   ;;  %s9551_s15 = smov 23  }
  0x1c   :  { %s9703_s30 = sld [smem:[%s14168_s0 + %s9548_s22]]   ;;  %s9552_s22 = smov 24  }
  0x1d   :  { %14436 = sst [smem:[#allocation10_spill]] %s9683_s27 }
  0x1e   :  { %14437 = sst [smem:[#allocation11_spill]] %s9688_s4 }
  0x1f   :  { %14438 = sst [smem:[#allocation12_spill]] %s9693_s6 }
  0x20   :  { %s9708_s4 = sld [smem:[%s14168_s0 + %s9549_s28]]   ;;  %s9553_s28 = smov 25  }
  0x21   :  { %14439 = sst [smem:[#allocation13_spill]] %s9698_s20 }
  0x22   :  { %14440 = sst [smem:[#allocation14_spill]] %s9703_s30 }
  0x23   :  { %s9713_s12 = sld [smem:[%s14168_s0 + %s9550_s7]]   ;;  %s9554_s7 = smov 26  }
  0x24   :  { %s9718_s20 = sld [smem:[%s14168_s0 + %s9551_s15]]   ;;  %s9555_s15 = smov 27  }
  0x25   :  { %s9723_s30 = sld [smem:[%s14168_s0 + %s9552_s22]]   ;;  %s9556_s22 = smov 28  }
  0x26   :  { %14441 = sst [smem:[#allocation15_spill]] %s9708_s4 }
  0x27   :  { %s9728_s4 = sld [smem:[%s14168_s0 + %s9553_s28]]   ;;  %s9557_s28 = smov 29  }
  0x28   :  { %90 = sst [smem:[#allocation2]] %s9603_s5 }
  0x29   :  { %14442 = sst [smem:[#allocation16_spill]] %s9713_s12 }
  0x2a   :  { %14443 = sst [smem:[#allocation17_spill]] %s9718_s20 }
  0x2b   :  { %14444 = sst [smem:[#allocation18_spill]] %s9723_s30 }
  0x2c   :  { %s9733_s12 = sld [smem:[%s14168_s0 + %s9554_s7]]   ;;  %s9558_s7 = smov 30  }
  0x2d   :  { %14445 = sst [smem:[#allocation19_spill]] %s9728_s4 }
  0x2e   :  { %s9738_s20 = sld [smem:[%s14168_s0 + %s9555_s15]]   ;;  %s9559_s15 = smov 31  }
  0x2f   :  { %s9743_s30 = sld [smem:[%s14168_s0 + %s9556_s22]]   ;;  %s9560_s22 = smov 32  }
  0x30   :  { %s9748_s4 = sld [smem:[%s14168_s0 + %s9557_s28]]   ;;  %s9561_s28 = smov 33  }
  0x32   :  { %14446 = sst [smem:[#allocation20_spill]] %s9733_s12 }
  0x33   :  { %s9753_s12 = sld [smem:[%s14168_s0 + %s9558_s7]]   ;;  %s9562_s7 = smov 34  }
  0x34   :  { %14447 = sst [smem:[#allocation21_spill]] %s9738_s20 }
  0x35   :  { %14448 = sst [smem:[#allocation22_spill]] %s9743_s30 }
  0x36   :  { %14449 = sst [smem:[#allocation23_spill]] %s9748_s4 }
  0x37   :  { %s9758_s20 = sld [smem:[%s14168_s0 + %s9559_s15]]   ;;  %s9563_s15 = smov 35  }
  0x38   :  { %s9763_s30 = sld [smem:[%s14168_s0 + %s9560_s22]]   ;;  %s9564_s22 = smov 36  }
  0x39   :  { %14450 = sst [smem:[#allocation24_spill]] %s9753_s12 }
  0x3a   :  { %s9768_s4 = sld [smem:[%s14168_s0 + %s9561_s28]]   ;;  %s9565_s28 = smov 37  }
  0x3b   :  { %s9773_s12 = sld [smem:[%s14168_s0 + %s9562_s7]]   ;;  %s9566_s7 = smov 38  }
  0x3c   :  { %s9778_s23 = sld [smem:[%s14168_s0 + %s9563_s15]]   ;;  %s9567_s15 = smov 39  }
  0x3d   :  { %14451 = sst [smem:[#allocation25_spill]] %s9758_s20  ;;  %s9569_s20 = smov 41  }
  0x3e   :  { %14452 = sst [smem:[#allocation26_spill]] %s9763_s30  ;;  %s9568_s30 = smov 40  }
  0x3f   :  { %s9783_s1 = sld [smem:[%s14168_s0 + %s9564_s22]]  }
  0x40   :  { %14453 = sst [smem:[#allocation27_spill]] %s9768_s4 }
  0x41   :  { %14454 = sst [smem:[#allocation28_spill]] %s9773_s12  ;;  %s9570_s12 = smov 42  }
  0x42   :  { %14455 = sst [smem:[#allocation29_spill]] %s9778_s23  ;;  %s9816_s23 = smov 0  }
  0x43   :  { %s9788_s10 = sld [smem:[%s14168_s0 + %s9565_s28]]  }
  0x44   :  { %s9793_s16 = sld [smem:[%s14168_s0 + %s9566_s7]]  }
  0x45   :  { %14456 = sst [smem:[#allocation30_spill]] %s9783_s1 }
  0x46   :  { %s9798_s27 = sld [smem:[%s14168_s0 + %s9567_s15]]  }
  0x47   :  { %s9803_s6 = sld [smem:[%s14168_s0 + %s9568_s30]]  }
  0x48   :  { %s9808_s24 = sld [smem:[%s14168_s0 + %s9569_s20]]  }
  0x49   :  { %s9813_s19 = sld [smem:[%s14168_s0 + %s9570_s12]]  }
  0x4a LB: > { %s14457_s4 = sld [smem:[#allocation27_spill]]  ;;  %s8440_s15 = sadd.s32 4294967295, %s9527_s23   ;;  %s9527_s23 = sphi %s9816_s23, %s96_s23  }
  0x4b   : > { %s14458_s3 = sld [smem:[#allocation3_spill]]  ;;  %p8444_p0 = scmp.ge.s32.totalorder %s9527_s23, 1 }
  0x4c   : > { %s14459_s1 = sld [smem:[#allocation30_spill]]  ;;  %p1156_p1 = scmp.lt.s32.totalorder %s9527_s23, 3 }
  0x4e   : > { %p1157_p2 = pnand %p8444_p0, %p1156_p1 }
  0x50   : > { %1160 = sbr.rel (%p1157_p2) target bundleno = 8374 (0x20b6), region = 188 }
  0x55   : > { %p1258_p3 = scmp.lt.s32.totalorder %s8440_s15, 1  ;;  %s14220_s18 = smov 112   ;;  %v9897_v6 = vld [vmem:[%s9613_s13] sm:$0xff]  ;;  %vm1540_vm0 = vcmask 130048   ;;  %v1282_v8 = vlaneseq  ;;  %v8454_v13 = vld [vmem:[%s14457_s4 + $0xe] sm:$0x3] }
  0x56   : > { %s14226_s30 = smov 113   ;;  %s14228_s22 = smov 127   ;;  %v8457_v7 = vcombine.high %v9897_v6, %v9897_v6  ;;  %v8453_v28 = vld [vmem:[%s14457_s4 + $0xc] sm:$0x3]  ;;  %v8452_v45 = vld [vmem:[%s14457_s4 + $0xa] sm:$0x3] }
  0x57   : > { %s14911_s15 = smov (!%p1258_p3, %s8440_s15), 1  ;;  %s14230_s26 = smov 1   ;;  %v1292_v9 = vshrl.u32 %v1282_v8, 7  ;;  %v9910_v10 = vand.u32 127, %v1282_v8  ;;  %v8451_v62 = vld [vmem:[%s14457_s4 + $0x6] sm:$0x3] }
  0x58   : > { %s8820_s0 = sshll.u32 %s14911_s15, 5  ;;  %s14267_s20 = smov 15   ;;  %8458 = vmatprep.mubr.msk.bf16.mxu0 %vm1540_vm0, %v8457_v7  ;;  %vm1671_vm11 = vcmask 1043456   ;;  %vm14219_vm12 = vcmask 588800   ;;  %vm9581_vm15 = vmmov 0  }
  0x59   : > { %s1262_s5 = scalar_lea.vmem %s9608_s9, %s8820_s0  ;;  %s14222_s28 = smov 16   ;;  %v9912_v11 = vsub.s32 1, %v1292_v9  ;;  %v9914_v12 = vsub.s32 0, %v1292_v9  ;;  %vm1463_vm1 = vcmp.lt.s32.totalorder %v9910_v10, 112  ;;  %vm1433_vm2 = vcmp.lt.s32.totalorder %v9910_v10, 113 }
  0x5a   : > { %v9828_v0 = vld [vmem:[%s1262_s5 + $0x8] sm:$0xff]  ;;  %v9830_v1 = vld [vmem:[%s1262_s5] sm:$0xff]  ;;  %v9832_v2 = vld [vmem:[%s1262_s5 + $0x18] sm:$0xff]  ;;  %s14232_s2 = smov 17   ;;  %s14224_s12 = smov 111   ;;  %vm1403_vm3 = vcmp.lt.s32.totalorder %v9910_v10, 127 }
  0x5b   : > { %1459 = vrot.lane.b32.xlu1 %v9828_v0, %s14220_s18  ;;  %1455 = vrot.lane.b32.xlu0 %v9830_v1, %s14220_s18  ;;  %v9838_v3 = vld [vmem:[%s1262_s5 + $0x10] sm:$0xff]  ;;  %v1524_v4 = vpack.c.bf16 %v9832_v2, %v9828_v0  ;;  %14460 = vst [vmem:[#allocation31_spill] sm:$0xff] %v9912_v11  ;;  %14461 = vst [vmem:[#allocation32_spill] sm:$0xff] %v9914_v12  ;;  %v9919_v16 = vrot.slane %v8454_v13, %v9912_v11  ;;  %vm1373_vm4 = vcmp.lt.s32.totalorder %v9910_v10, 1  ;;  %s1269_s7 = sld [smem:[#allocation2]] }
  0x5c   : > { %v1523_v5 = vpack.c.bf16 %v9838_v3, %v9830_v1  ;;  %v9922_v17 = vrot.slane %v8454_v13, %v9914_v12  ;;  %v9939_v33 = vrot.slane %v8453_v28, %v9914_v12  ;;  %v9942_v34 = vrot.slane %v8453_v28, %v9912_v11  ;;  %s14483_s11 = sld [smem:[#allocation4_spill]] }
  0x5d   : > { %14462 = vst [vmem:[#allocation33_spill] sm:$0xff] %v9919_v16  ;;  %v9959_v50 = vrot.slane %v8452_v45, %v9914_v12  ;;  %v9962_v51 = vrot.slane %v8452_v45, %v9912_v11  ;;  %v9979_v13 = vrot.slane %v8451_v62, %v9914_v12  ;;  %vm1343_vm5 = vcmp.lt.s32.totalorder %v9910_v10, 15  ;;  %s14484_s0 = sld [smem:[#allocation5_spill]] }
  0x5e   : > { %14463 = vst [vmem:[#allocation34_spill] sm:$0xff] %v9922_v17  ;;  %14464 = vst [vmem:[#allocation35_spill] sm:$0xff] %v9939_v33  ;;  %vm1313_vm6 = vcmp.lt.s32.totalorder %v9910_v10, 16  ;;  %vm1284_vm7 = vcmp.lt.s32.totalorder %v9910_v10, 17  ;;  %vm1493_vm8 = vcmp.lt.s32.totalorder %v9910_v10, 111  ;;  %s14485_s5 = sld [smem:[#allocation12_spill]] }
  0x5f   : > { %1461 = vrot.lane.b32.xlu1 %v9832_v2, %s14220_s18  ;;  %1457 = vrot.lane.b32.xlu0 %v9838_v3, %s14220_s18  ;;  %14465 = vst [vmem:[#allocation36_spill] sm:$0xff] %v9942_v34  ;;  %14466 = vst [vmem:[#allocation37_spill] sm:$0xff] %v9959_v50 }
  0x60   : > { %14467 = vst [vmem:[#allocation38_spill] sm:$0xff] %v9962_v51  ;;  %14468 = vst [vmem:[#allocation39_spill] sm:$0xff] %v9979_v13 }
  0x63   : > { %1427 = vrot.lane.b32.xlu1 %v9838_v3, %s14226_s30  ;;  %1425 = vrot.lane.b32.xlu0 %v9830_v1, %s14226_s30 }
  0x67   : > { %1431 = vrot.lane.b32.xlu1 %v9832_v2, %s14226_s30  ;;  %1429 = vrot.lane.b32.xlu0 %v9828_v0, %s14226_s30 }
  0x6b   : > { %1397 = vrot.lane.b32.xlu1 %v9838_v3, %s14228_s22  ;;  %1395 = vrot.lane.b32.xlu0 %v9830_v1, %s14228_s22 }
  0x6f   : > { %1401 = vrot.lane.b32.xlu1 %v9832_v2, %s14228_s22  ;;  %1399 = vrot.lane.b32.xlu0 %v9828_v0, %s14228_s22 }
  0x73   : > { %1367 = vrot.lane.b32.xlu1 %v9838_v3, %s14230_s26  ;;  %1365 = vrot.lane.b32.xlu0 %v9830_v1, %s14230_s26 }
  0x77   : > { %1371 = vrot.lane.b32.xlu1 %v9832_v2, %s14230_s26  ;;  %1369 = vrot.lane.b32.xlu0 %v9828_v0, %s14230_s26 }
  0x7b   : > { %1337 = vrot.lane.b32.xlu1 %v9838_v3, %s14267_s20  ;;  %1335 = vrot.lane.b32.xlu0 %v9830_v1, %s14267_s20 }
  0x7f   : > { %1341 = vrot.lane.b32.xlu1 %v9832_v2, %s14267_s20  ;;  %1339 = vrot.lane.b32.xlu0 %v9828_v0, %s14267_s20 }
  0x83   : > { %1307 = vrot.lane.b32.xlu1 %v9838_v3, %s14222_s28  ;;  %1305 = vrot.lane.b32.xlu0 %v9830_v1, %s14222_s28 }
  0x87   : > { %1311 = vrot.lane.b32.xlu1 %v9832_v2, %s14222_s28  ;;  %1309 = vrot.lane.b32.xlu0 %v9828_v0, %s14222_s28 }
  0x8b   : > { %1276 = vrot.lane.b32.xlu1 %v9838_v3, %s14232_s2  ;;  %1274 = vrot.lane.b32.xlu0 %v9830_v1, %s14232_s2 }
  0x8f   : > { %1280 = vrot.lane.b32.xlu1 %v9832_v2, %s14232_s2  ;;  %1278 = vrot.lane.b32.xlu0 %v9828_v0, %s14232_s2 }
  0x93   : > { %1487 = vrot.lane.b32.xlu1 %v9838_v3, %s14224_s12  ;;  %1485 = vrot.lane.b32.xlu0 %v9830_v1, %s14224_s12 }
  0x97   : > { %1491 = vrot.lane.b32.xlu1 %v9832_v2, %s14224_s12  ;;  %1489 = vrot.lane.b32.xlu0 %v9828_v0, %s14224_s12  ;;  %v8450_v2 = vld [vmem:[%s14457_s4 + $0x4] sm:$0x3] }
  0xcd   : > { %v1460_v14 = vpop.permute.xlu1 %1459  ;;  %v1456_v15 = vpop.permute.xlu0 %1455 }
  0xce   : > { %v1464_v18 = vsel %vm1463_vm1, %v1456_v15, %v1460_v14  ;;  %v1466_v19 = vsel %vm1463_vm1, %v1460_v14, %v1456_v15  ;;  %v9982_v14 = vrot.slane %v8451_v62, %v9912_v11 }
  0xcf   : > { %v1482_v24 = vmul.f32 %v9919_v16, %v1466_v19  ;;  %v1481_v26 = vmul.f32 %v9922_v17, %v1464_v18 }
  0xd0   : > { %14469 = vst [vmem:[#allocation40_spill] sm:$0xff] %v9982_v14 }
  0xd1   : > { %v1462_v20 = vpop.permute.xlu1 %1461  ;;  %v1458_v21 = vpop.permute.xlu0 %1457 }
  0xd2   : > { %v1465_v22 = vsel %vm1463_vm1, %v1458_v21, %v1462_v20  ;;  %v1467_v23 = vsel %vm1463_vm1, %v1462_v20, %v1458_v21 }
  0xd3   : > { %v1484_v25 = vmul.f32 %v9919_v16, %v1467_v23  ;;  %v1483_v27 = vmul.f32 %v9922_v17, %v1465_v22 }
  0xd5   : > { %v1428_v29 = vpop.permute.xlu1 %1427  ;;  %v1426_v30 = vpop.permute.xlu0 %1425  ;;  %v1530_v31 = vpack.c.bf16 %v1484_v25, %v1482_v24  ;;  %v1529_v32 = vpack.c.bf16 %v1483_v27, %v1481_v26 }
  0xd7   : > { %1544 = vmatprep.subr.bf16.mxu0 %v1530_v31 }
  0xd8   : > { %1545 = vmatpush1.bf16.msra.mxu0 %v1529_v32 }
  0xd9   : > { %v1432_v35 = vpop.permute.xlu1 %1431  ;;  %v1430_v36 = vpop.permute.xlu0 %1429 }
  0xda   : > { %v1435_v37 = vsel %vm1433_vm2, %v1428_v29, %v1432_v35  ;;  %v1437_v38 = vsel %vm1433_vm2, %v1432_v35, %v1428_v29  ;;  %v1434_v39 = vsel %vm1433_vm2, %v1426_v30, %v1430_v36  ;;  %v1436_v40 = vsel %vm1433_vm2, %v1430_v36, %v1426_v30 }
  0xdb   : > { %v1453_v41 = vmul.f32 %v9939_v33, %v1435_v37  ;;  %v1454_v42 = vmul.f32 %v9942_v34, %v1437_v38  ;;  %v1451_v43 = vmul.f32 %v9939_v33, %v1434_v39  ;;  %v1452_v44 = vmul.f32 %v9942_v34, %v1436_v40  ;;  %v8449_v40 = vld [vmem:[%s14457_s4 + $0x2] sm:$0x3] }
  0xdc   : > { %v10005_v29 = vrot.slane %v8450_v2, %v9914_v12  ;;  %v10008_v30 = vrot.slane %v8450_v2, %v9912_v11  ;;  %v10025_v45 = vrot.slane %v8449_v40, %v9914_v12 }
  0xdd   : > { %v1398_v46 = vpop.permute.xlu1 %1397  ;;  %v1396_v47 = vpop.permute.xlu0 %1395  ;;  %v1528_v48 = vpack.c.bf16 %v1454_v42, %v1452_v44  ;;  %v1527_v49 = vpack.c.bf16 %v1453_v41, %v1451_v43 }
  0xde   : > { %14470 = vst [vmem:[#allocation41_spill] sm:$0xff] %v10005_v29  ;;  %14471 = vst [vmem:[#allocation42_spill] sm:$0xff] %v10008_v30 }
  0xdf   : > { %1546 = vmatprep.subr.bf16.mxu0 %v1528_v48  ;;  %14472 = vst [vmem:[#allocation43_spill] sm:$0xff] %v10025_v45 }
  0xe0   : > { %1547 = vmatpush1.bf16.msra.mxu0 %v1527_v49 }
  0xe1   : > { %v1402_v52 = vpop.permute.xlu1 %1401  ;;  %v1400_v53 = vpop.permute.xlu0 %1399 }
  0xe2   : > { %v1405_v54 = vsel %vm1403_vm3, %v1398_v46, %v1402_v52  ;;  %v1407_v55 = vsel %vm1403_vm3, %v1402_v52, %v1398_v46  ;;  %v1404_v56 = vsel %vm1403_vm3, %v1396_v47, %v1400_v53  ;;  %v1406_v57 = vsel %vm1403_vm3, %v1400_v53, %v1396_v47 }
  0xe3   : > { %v1423_v58 = vmul.f32 %v9959_v50, %v1405_v54  ;;  %v1424_v59 = vmul.f32 %v9962_v51, %v1407_v55  ;;  %v1421_v60 = vmul.f32 %v9959_v50, %v1404_v56  ;;  %v1422_v61 = vmul.f32 %v9962_v51, %v1406_v57 }
  0xe4   : > { %v10028_v46 = vrot.slane %v8449_v40, %v9912_v11 }
  0xe5   : > { %v1368_v63 = vpop.permute.xlu1 %1367  ;;  %v1366_v7 = vpop.permute.xlu0 %1365  ;;  %v1526_v8 = vpack.c.bf16 %v1424_v59, %v1422_v61  ;;  %v1525_v9 = vpack.c.bf16 %v1423_v58, %v1421_v60  ;;  %v1289_v59 = vld [vmem:[%s14457_s4] sm:$0x3] }
  0xe6   : > { %14473 = vst [vmem:[#allocation44_spill] sm:$0xff] %v10028_v46 }
  0xe7   : > { %1548 = vmatprep.subr.bf16.mxu0 %v1526_v8  ;;  %v10048_v8 = vrot.slane %v1289_v59, %v9912_v11 }
  0xe8   : > { %1549 = vmatpush1.bf16.msra.mxu0 %v1525_v9 }
  0xe9   : > { %v1372_v15 = vpop.permute.xlu1 %1371  ;;  %v1370_v18 = vpop.permute.xlu0 %1369  ;;  %1550 = vmatprep.subr.bf16.mxu0 %v1524_v4  ;;  %14475 = vst [vmem:[#allocation46_spill] sm:$0xff] %v10048_v8 }
  0xea   : > { %v1375_v19 = vsel %vm1373_vm4, %v1368_v63, %v1372_v15  ;;  %v1377_v20 = vsel %vm1373_vm4, %v1372_v15, %v1368_v63  ;;  %v1374_v21 = vsel %vm1373_vm4, %v1366_v7, %v1370_v18  ;;  %v1376_v22 = vsel %vm1373_vm4, %v1370_v18, %v1366_v7 }
  0xeb   : > { %v1393_v23 = vmul.f32 %v9979_v13, %v1377_v20  ;;  %v1394_v24 = vmul.f32 %v9982_v14, %v1375_v19  ;;  %v1391_v25 = vmul.f32 %v9979_v13, %v1376_v22  ;;  %v1392_v0 = vmul.f32 %v9982_v14, %v1374_v21 }
  0xec   : > { %1551 = vmatpush1.bf16.msra.mxu0 %v1523_v5  ;;  %v10045_v7 = vrot.slane %v1289_v59, %v9914_v12 }
  0xed   : > { %v1338_v4 = vpop.permute.xlu1 %1337  ;;  %v1336_v26 = vpop.permute.xlu0 %1335  ;;  %v1522_v27 = vpack.c.bf16 %v1394_v24, %v1392_v0  ;;  %v1521_v28 = vpack.c.bf16 %v1393_v23, %v1391_v25  ;;  %v8455_v0 = vld [vmem:[%s14457_s4 + $0x10] sm:$0x3]  ;;  %s14608_s4 = sld [smem:[#allocation16_spill]] }
  0xee   : > { %14474 = vst [vmem:[#allocation45_spill] sm:$0xff] %v10045_v7 }
  0xef   : > { %1552 = vmatprep.subr.bf16.mxu0 %v1522_v27 }
  0xf0   : > { %1553 = vmatpush1.bf16.msra.mxu0 %v1521_v28  ;;  %v10065_v28 = vrot.slane %v8455_v0, %v9914_v12 }
  0xf1   : > { %v1342_v31 = vpop.permute.xlu1 %1341  ;;  %v1340_v32 = vpop.permute.xlu0 %1339 }
  0xf2   : > { %v1345_v1 = vsel %vm1343_vm5, %v1338_v4, %v1342_v31  ;;  %v1347_v3 = vsel %vm1343_vm5, %v1342_v31, %v1338_v4  ;;  %v1344_v5 = vsel %vm1343_vm5, %v1336_v26, %v1340_v32  ;;  %v1346_v35 = vsel %vm1343_vm5, %v1340_v32, %v1336_v26  ;;  %14476 = vst [vmem:[#allocation47_spill] sm:$0xff] %v10065_v28 }
  0xf3   : > { %v1363_v36 = vmul.f32 %v10005_v29, %v1347_v3  ;;  %v1364_v37 = vmul.f32 %v10008_v30, %v1345_v1  ;;  %v1361_v38 = vmul.f32 %v10005_v29, %v1346_v35  ;;  %v1362_v39 = vmul.f32 %v10008_v30, %v1344_v5 }
  0xf4   : > { %v10068_v31 = vrot.slane %v8455_v0, %v9912_v11 }
  0xf5   : > { %v1308_v41 = vpop.permute.xlu1 %1307  ;;  %v1306_v42 = vpop.permute.xlu0 %1305  ;;  %v1520_v43 = vpack.c.bf16 %v1364_v37, %v1362_v39  ;;  %v1519_v44 = vpack.c.bf16 %v1363_v36, %v1361_v38 }
  0xf6   : > { %14477 = vst [vmem:[#allocation48_spill] sm:$0xff] %v10068_v31 }
  0xf7   : > { %1554 = vmatprep.subr.bf16.mxu0 %v1520_v43  ;;  %v8456_v43 = vcombine.low %v9897_v6, %v9897_v6 }
  0xf8   : > { %1555 = vmatpush1.bf16.msra.mxu0 %v1519_v44  ;;  %v10084_v44 = vstv %s1269_s7  ;;  %s14486_s7 = sld [smem:[#allocation10_spill]] }
  0xf9   : > { %v1312_v47 = vpop.permute.xlu1 %1311  ;;  %v1310_v48 = vpop.permute.xlu0 %1309  ;;  %14478 = vst [vmem:[#allocation49_spill] sm:$0xff] %v10084_v44 }
  0xfa   : > { %v1315_v49 = vsel %vm1313_vm6, %v1308_v41, %v1312_v47  ;;  %v1317_v52 = vsel %vm1313_vm6, %v1312_v47, %v1308_v41  ;;  %v1314_v53 = vsel %vm1313_vm6, %v1306_v42, %v1310_v48  ;;  %v1316_v54 = vsel %vm1313_vm6, %v1310_v48, %v1306_v42 }
  0xfb   : > { %v1333_v55 = vmul.f32 %v10025_v45, %v1317_v52  ;;  %v1334_v56 = vmul.f32 %v10028_v46, %v1315_v49  ;;  %v1331_v57 = vmul.f32 %v10025_v45, %v1316_v54  ;;  %v1332_v58 = vmul.f32 %v10028_v46, %v1314_v53 }
  0xfd   : > { %v1277_v60 = vpop.permute.xlu1 %1276  ;;  %v1275_v61 = vpop.permute.xlu0 %1274  ;;  %v1518_v62 = vpack.c.bf16 %v1334_v56, %v1332_v58  ;;  %v1517_v63 = vpack.c.bf16 %v1333_v55, %v1331_v57  ;;  %v14185_v56 = vmov 0  }
  0xfe   : > { %1710 = vmatprep.mubr.bf16.mxu1 %v14185_v56  ;;  %9389 = vset.pattern.permute.xlu1 %v14185_v56 }
  0xff   : > { %1556 = vmatprep.subr.bf16.mxu0 %v1518_v62  ;;  %9388 = vset.pattern.permute.xlu0 %v14185_v56 }
 0x100   : > { %1557 = vmatpush1.bf16.msra.mxu0 %v1517_v63 }
 0x101   : > { %v1281_v9 = vpop.permute.xlu1 %1280  ;;  %v1279_v15 = vpop.permute.xlu0 %1278 }
 0x102   : > { %v1286_v18 = vsel %vm1284_vm7, %v1277_v60, %v1281_v9  ;;  %v1288_v19 = vsel %vm1284_vm7, %v1281_v9, %v1277_v60  ;;  %v1285_v20 = vsel %vm1284_vm7, %v1275_v61, %v1279_v15  ;;  %v1287_v21 = vsel %vm1284_vm7, %v1279_v15, %v1275_v61 }
 0x103   : > { %v1303_v22 = vmul.f32 %v10045_v7, %v1288_v19  ;;  %v1304_v23 = vmul.f32 %v10048_v8, %v1286_v18  ;;  %v1301_v24 = vmul.f32 %v10045_v7, %v1287_v21  ;;  %v1302_v25 = vmul.f32 %v10048_v8, %v1285_v20 }
 0x105   : > { %v1488_v2 = vpop.permute.xlu1 %1487  ;;  %v1486_v4 = vpop.permute.xlu0 %1485  ;;  %v1516_v26 = vpack.c.bf16 %v1304_v23, %v1302_v25  ;;  %v1515_v27 = vpack.c.bf16 %v1303_v22, %v1301_v24 }
 0x107   : > { %1558 = vmatprep.subr.bf16.mxu0 %v1516_v26 }
 0x108   : > { %1559 = vmatpush1.bf16.msra.mxu0 %v1515_v27 }
 0x109   : > { %v1492_v32 = vpop.permute.xlu1 %1491  ;;  %v1490_v1 = vpop.permute.xlu0 %1489 }
 0x10a   : > { %v1495_v3 = vsel %vm1493_vm8, %v1488_v2, %v1492_v32  ;;  %v1497_v5 = vsel %vm1493_vm8, %v1492_v32, %v1488_v2  ;;  %v1494_v35 = vsel %vm1493_vm8, %v1486_v4, %v1490_v1  ;;  %v1496_v36 = vsel %vm1493_vm8, %v1490_v1, %v1486_v4 }
 0x10b   : > { %v1513_v37 = vmul.f32 %v10065_v28, %v1495_v3  ;;  %v1514_v38 = vmul.f32 %v10068_v31, %v1497_v5  ;;  %v1511_v39 = vmul.f32 %v10065_v28, %v1494_v35  ;;  %v1512_v40 = vmul.f32 %v10068_v31, %v1496_v36 }
 0x10d   : > { %v1532_v41 = vpack.c.bf16 %v1514_v38, %v1512_v40  ;;  %v1531_v42 = vpack.c.bf16 %v1513_v37, %v1511_v39 }
 0x10f   : > { %1574 = vmatprep.subr.bf16.mxu0 %v1532_v41 }
 0x110   : > { %1575 = vmatpush2.bf16.msra.mxu0 %v1531_v42 }
 0x113   : > { %1577 = vmatmul.mubr.bf16.vlgmr.msra.gmra.mxu0 %v8456_v43 }
 0x1d3   : > { %v1578_v47 = vpop.f32.mrf.mxu0 }
 0x1d4   : > { %vm1585_vm9 = vcmp.ge.f32.partialorder %v1578_v47, 0.0  ;;  %v1588_v48 = vmul.f32 %v10084_v44, %v1578_v47 }
 0x1d5   : > { %v1580_v49 = vpop.f32.mrf.mxu0 }
 0x1d6   : > { %v10087_v52 = vsel %vm1585_vm9, %v1578_v47, %v1588_v48  ;;  %vm1586_vm10 = vcmp.ge.f32.partialorder %v1580_v49, 0.0  ;;  %v1589_v53 = vmul.f32 %v10084_v44, %v1580_v49  ;;  %vm1903_vm9 = vcmask 64512  }
 0x1d7   : > { %14479 = vst [vmem:[#allocation50_spill] sm:$0xff] %v10087_v52  ;;  %1648 = vrot.lane.b32.xlu0 %v10087_v52, %s14224_s12  ;;  %v1582_v54 = vpop.f32.mrf.mxu0 }
 0x1d8   : > { %v10092_v6 = vsel %vm1586_vm10, %v1580_v49, %v1589_v53  ;;  %vm1984_vm10 = vcmask 523264  }
 0x1d9   : > { %14480 = vst [vmem:[#allocation51_spill] sm:$0xff] %v10092_v6  ;;  %1650 = vrot.lane.b32.xlu1 %v10092_v6, %s14224_s12  ;;  %v1583_v55 = vpop.f32.mrf.mxu0 }
 0x1db   : > { %1632 = vrot.lane.b32.xlu0 %v10087_v52, %s14226_s30 }
 0x1dd   : > { %1634 = vrot.lane.b32.xlu1 %v10092_v6, %s14226_s30 }
 0x1df   : > { %1640 = vrot.lane.b32.xlu0 %v10087_v52, %s14220_s18 }
 0x1e1   : > { %1642 = vrot.lane.b32.xlu1 %v10092_v6, %s14220_s18 }
 0x1e3   : > { %1624 = vrot.lane.b32.xlu0 %v10087_v52, %s14228_s22 }
 0x1e5   : > { %1626 = vrot.lane.b32.xlu1 %v10092_v6, %s14228_s22 }
 0x1e7   : > { %1608 = vrot.lane.b32.xlu0 %v10087_v52, %s14267_s20 }
 0x1e9   : > { %1610 = vrot.lane.b32.xlu1 %v10092_v6, %s14267_s20 }
 0x1eb   : > { %1616 = vrot.lane.b32.xlu0 %v10087_v52, %s14230_s26 }
 0x1ed   : > { %1618 = vrot.lane.b32.xlu1 %v10092_v6, %s14230_s26 }
 0x1ef   : > { %1592 = vrot.lane.b32.xlu0 %v10087_v52, %s14232_s2 }
 0x1f1   : > { %1594 = vrot.lane.b32.xlu1 %v10092_v6, %s14232_s2 }
 0x1f3   : > { %1600 = vrot.lane.b32.xlu0 %v10087_v52, %s14222_s28 }
 0x1f5   : > { %1602 = vrot.lane.b32.xlu1 %v10092_v6, %s14222_s28 }
 0x249   : > { %v1649_v57 = vpop.permute.xlu0 %1648 }
 0x24b   : > { %v1651_v58 = vpop.permute.xlu1 %1650 }
 0x24c   : > { %v1652_v59 = vsel %vm1493_vm8, %v1649_v57, %v1651_v58  ;;  %v1653_v60 = vsel %vm1493_vm8, %v1651_v58, %v1649_v57 }
 0x24d   : > { %v1633_v61 = vpop.permute.xlu0 %1632  ;;  %v1655_v62 = vmul.f32 %v1653_v60, %v10068_v31  ;;  %v1654_v63 = vmul.f32 %v1652_v59, %v10065_v28 }
 0x24f   : > { %v1635_v9 = vpop.permute.xlu1 %1634  ;;  %v1665_v15 = vpack.c.bf16 %v1655_v62, %v1655_v62  ;;  %v1664_v18 = vpack.c.bf16 %v1654_v63, %v1654_v63 }
 0x250   : > { %v1636_v21 = vsel %vm1433_vm2, %v1633_v61, %v1635_v9  ;;  %v1637_v22 = vsel %vm1433_vm2, %v1635_v9, %v1633_v61 }
 0x251   : > { %v1641_v19 = vpop.permute.xlu0 %1640  ;;  %8459 = vmatprep.subr.msk.bf16.mxu1 %vm1671_vm11, %v1665_v15  ;;  %v1673_v20 = vsel %vm1671_vm11, %v1664_v18, 0  ;;  %v1638_v0 = vmul.f32 %v1636_v21, %v9939_v33  ;;  %v1639_v2 = vmul.f32 %v1637_v22, %v9942_v34 }
 0x252   : > { %1685 = vmatpush1.bf16.msra.mxu1 %v1673_v20 }
 0x253   : > { %v1643_v23 = vpop.permute.xlu1 %1642 }
 0x254   : > { %v1644_v24 = vsel %vm1463_vm1, %v1641_v19, %v1643_v23  ;;  %v1645_v25 = vsel %vm1463_vm1, %v1643_v23, %v1641_v19 }
 0x255   : > { %v1646_v4 = vmul.f32 %v1644_v24, %v9922_v17  ;;  %v1647_v26 = vmul.f32 %v1645_v25, %v9919_v16  ;;  %v1625_v27 = vpop.permute.xlu0 %1624 }
 0x257   : > { %v1627_v32 = vpop.permute.xlu1 %1626  ;;  %v1663_v1 = vpack.c.bf16 %v1647_v26, %v1639_v2  ;;  %v1662_v3 = vpack.c.bf16 %v1646_v4, %v1638_v0  ;;  %v9392_v2 = vld [vmem:[%s9793_s16 + $0x78] sm:$0xff]   ;;  %v1666_v4 = vld [vmem:[%s9618_s17] sm:$0xf] }
 0x258   : > { %v1628_v5 = vsel %vm1403_vm3, %v1625_v27, %v1627_v32  ;;  %v1629_v35 = vsel %vm1403_vm3, %v1627_v32, %v1625_v27  ;;  %v9393_v26 = vld [vmem:[%s9793_s16 + $0x38] sm:$0xff]   ;;  %v9394_v27 = vld [vmem:[%s9793_s16 + $0x70] sm:$0xff]  }
 0x259   : > { %v1630_v36 = vmul.f32 %v1628_v5, %v9959_v50  ;;  %v1631_v37 = vmul.f32 %v1629_v35, %v9962_v51  ;;  %v1609_v38 = vpop.permute.xlu0 %1608  ;;  %1686 = vmatprep.subr.bf16.mxu1 %v1663_v1  ;;  %v9395_v32 = vld [vmem:[%s9793_s16 + $0x30] sm:$0xff]   ;;  %v9396_v1 = vld [vmem:[%s9793_s16 + $0x68] sm:$0xff]   ;;  %v9398_v5 = vld [vmem:[%s9793_s16 + $0x60] sm:$0xff]  }
 0x25a   : > { %1687 = vmatpush1.bf16.msra.mxu1 %v1662_v3  ;;  %v9397_v3 = vld [vmem:[%s9793_s16 + $0x28] sm:$0xff]   ;;  %v9399_v35 = vld [vmem:[%s9793_s16 + $0x20] sm:$0xff]  }
 0x25b   : > { %v1611_v39 = vpop.permute.xlu1 %1610  ;;  %v1661_v40 = vpack.c.bf16 %v1631_v37, %v10092_v6  ;;  %v1660_v41 = vpack.c.bf16 %v1630_v36, %v10087_v52  ;;  %v9400_v36 = vld [vmem:[%s9793_s16 + $0x58] sm:$0xff]  }
 0x25c   : > { %v1612_v43 = vsel %vm1343_vm5, %v1609_v38, %v1611_v39  ;;  %v1613_v47 = vsel %vm1343_vm5, %v1611_v39, %v1609_v38  ;;  %v9401_v37 = vld [vmem:[%s9793_s16 + $0x18] sm:$0xff]   ;;  %v9402_v38 = vld [vmem:[%s9793_s16 + $0x50] sm:$0xff]  }
 0x25d   : > { %v1617_v42 = vpop.permute.xlu0 %1616  ;;  %1688 = vmatprep.subr.bf16.mxu1 %v1661_v40  ;;  %v1614_v54 = vmul.f32 %v1613_v47, %v10005_v29  ;;  %v1615_v55 = vmul.f32 %v1612_v43, %v10008_v30  ;;  %v9403_v39 = vld [vmem:[%s9793_s16 + $0x10] sm:$0xff]   ;;  %v9404_v40 = vld [vmem:[%s9793_s16 + $0x48] sm:$0xff]   ;;  %v9407_v43 = vld [vmem:[%s9793_s16] sm:$0xff]  }
 0x25e   : > { %1689 = vmatpush1.bf16.msra.mxu1 %v1660_v41  ;;  %v9405_v41 = vld [vmem:[%s9793_s16 + $0x8] sm:$0xff]  }
 0x25f   : > { %v1619_v48 = vpop.permute.xlu1 %1618 }
 0x260   : > { %v1620_v49 = vsel %vm1373_vm4, %v1617_v42, %v1619_v48  ;;  %v1621_v53 = vsel %vm1373_vm4, %v1619_v48, %v1617_v42  ;;  %v9406_v42 = vld [vmem:[%s9793_s16 + $0x40] sm:$0xff]  }
 0x261   : > { %v1622_v57 = vmul.f32 %v1621_v53, %v9979_v13  ;;  %v1623_v58 = vmul.f32 %v1620_v49, %v9982_v14  ;;  %v1593_v59 = vpop.permute.xlu0 %1592 }
 0x263   : > { %v1595_v60 = vpop.permute.xlu1 %1594  ;;  %v1659_v61 = vpack.c.bf16 %v1623_v58, %v1615_v55  ;;  %v1658_v62 = vpack.c.bf16 %v1622_v57, %v1614_v54 }
 0x264   : > { %v1596_v63 = vsel %vm1284_vm7, %v1593_v59, %v1595_v60  ;;  %v1597_v9 = vsel %vm1284_vm7, %v1595_v60, %v1593_v59 }
 0x265   : > { %1690 = vmatprep.subr.bf16.mxu1 %v1659_v61  ;;  %v1601_v15 = vpop.permute.xlu0 %1600  ;;  %v1598_v21 = vmul.f32 %v1597_v9, %v10045_v7  ;;  %v1599_v22 = vmul.f32 %v1596_v63, %v10048_v8  ;;  %v14183_v61 = vmov 0.0   ;;  %v9412_v63 = vld [vmem:[%s14459_s1 + $0x30] sm:$0xff]   ;;  %v9414_v9 = vld [vmem:[%s14459_s1 + $0x28] sm:$0xff]  }
 0x266   : > { %1691 = vmatpush1.bf16.msra.mxu1 %v1658_v62  ;;  %8988 = vmatprep.subr.bf16.mxu0 %v14183_v61  ;;  %v9410_v62 = vld [vmem:[%s14459_s1 + $0x38] sm:$0xff]  }
 0x267   : > { %v1603_v18 = vpop.permute.xlu1 %1602  ;;  %8990 = vmatprep.mubr.msk.bf16.mxu0 %vm9581_vm15, %v14183_v61 }
 0x268   : > { %v1604_v19 = vsel %vm1313_vm6, %v1601_v15, %v1603_v18  ;;  %v1605_v20 = vsel %vm1313_vm6, %v1603_v18, %v1601_v15 }
 0x269   : > { %v1606_v23 = vmul.f32 %v1605_v20, %v10025_v45  ;;  %v1607_v24 = vmul.f32 %v1604_v19, %v10028_v46 }
 0x26b   : > { %v1657_v25 = vpack.c.bf16 %v1607_v24, %v1599_v22  ;;  %v1656_v0 = vpack.c.bf16 %v1606_v23, %v1598_v21  ;;  %v9408_v24 = vld [vmem:[%s9623_s21] sm:$0xff]  }
 0x26d   : > { %1692 = vmatprep.subr.bf16.mxu1 %v1657_v25  ;;  %v9409_v25 = vld [vmem:[%s14459_s1 + $0x18] sm:$0xff]  }
 0x26e   : > { %1693 = vmatpush1.bf16.msra.mxu1 %v1656_v0  ;;  %v9411_v0 = vld [vmem:[%s14459_s1 + $0x10] sm:$0xff]  }
 0x26f   : > { %8822 = vmatprep.subr.bf16.mxu1 %v9392_v2  ;;  %v9413_v2 = vld [vmem:[%s14459_s1 + $0x8] sm:$0xff]  }
 0x271   : > { %8460 = vmatmul.mubr.msk.bf16.vlgmr.msra.gmra.mxu1 %vm14219_vm12, %v1666_v4  ;;  %v9415_v4 = vld [vmem:[%s14459_s1] sm:$0xff]  }
 0x272   : > { %8823 = vmatpush3.bf16.msra.mxu1 %v9393_v26  ;;  %v9416_v26 = vld [vmem:[%s14459_s1 + $0x20] sm:$0xff]  }
 0x273   : > { %8824 = vmatprep.subr.bf16.mxu1 %v9394_v27 }
 0x276   : > { %8825 = vmatpush3.bf16.msra.mxu1 %v9395_v32 }
 0x277   : > { %8826 = vmatprep.subr.bf16.mxu1 %v9396_v1 }
 0x27a   : > { %8827 = vmatpush3.bf16.msra.mxu1 %v9397_v3  ;;  %v10235_v3 = vld [vmem:[%s14459_s1 + $0x58] sm:$0xff]  }
 0x27b   : > { %8828 = vmatprep.subr.bf16.mxu1 %v9398_v5  ;;  %v9418_v5 = vld [vmem:[%s14459_s1 + $0x78] sm:$0xff]  }
 0x27e   : > { %8829 = vmatpush3.bf16.msra.mxu1 %v9399_v35 }
 0x27f   : > { %8830 = vmatprep.subr.bf16.mxu1 %v9400_v36 }
 0x282   : > { %8831 = vmatpush3.bf16.msra.mxu1 %v9401_v37  ;;  %v10246_v37 = vld [vmem:[%s14459_s1 + $0x50] sm:$0xff]  }
 0x283   : > { %8832 = vmatprep.subr.bf16.mxu1 %v9402_v38  ;;  %v9420_v38 = vld [vmem:[%s14459_s1 + $0x70] sm:$0xff]  }
 0x286   : > { %8833 = vmatpush3.bf16.msra.mxu1 %v9403_v39  ;;  %v10257_v39 = vld [vmem:[%s14459_s1 + $0x48] sm:$0xff]  }
 0x287   : > { %8834 = vmatprep.subr.bf16.mxu1 %v9404_v40  ;;  %v9422_v40 = vld [vmem:[%s14459_s1 + $0x68] sm:$0xff]  }
 0x28a   : > { %8835 = vmatpush3.bf16.msra.mxu1 %v9405_v41  ;;  %v10264_v41 = vld [vmem:[%s14459_s1 + $0x40] sm:$0xff]  }
 0x28b   : > { %8836 = vmatprep.subr.bf16.mxu1 %v9406_v42  ;;  %v9424_v42 = vld [vmem:[%s14459_s1 + $0x60] sm:$0xff]  }
 0x28e   : > { %8837 = vmatpush3.bf16.msra.mxu1 %v9407_v43  ;;  %v10271_v43 = vld [vmem:[%s14459_s1 + $0xb8] sm:$0xff]  }
 0x28f   : > { %9006 = vmatprep.subr.bf16.mxu1 %v14183_v61 }
 0x331   : > { %v1712_v47 = vpop.f32.mrf.mxu1 }
 0x332   : > { %vm1719_vm13 = vcmp.ge.f32.partialorder %v1712_v47, 0.0  ;;  %v1721_v48 = vmul.f32 %v1712_v47, %v10084_v44 }
 0x333   : > { %v1714_v49 = vpop.f32.mrf.mxu1 }
 0x334   : > { %vm1720_vm14 = vcmp.ge.f32.partialorder %v1714_v49, 0.0  ;;  %v1722_v53 = vmul.f32 %v1714_v49, %v10084_v44  ;;  %v10199_v54 = vsel %vm1719_vm13, %v1712_v47, %v1721_v48  ;;  %v9426_v47 = vld [vmem:[%s14459_s1 + $0xd8] sm:$0xff]   ;;  %v10282_v48 = vld [vmem:[%s14459_s1 + $0xb0] sm:$0xff]  }
 0x335   : > { %v1716_v55 = vpop.f32.mrf.mxu1  ;;  %v1725_v60 = vpack.c.bf16 %v10199_v54, %v10199_v54 }
 0x336   : > { %v10201_v57 = vsel %vm1720_vm14, %v1714_v49, %v1722_v53  ;;  %v9428_v49 = vld [vmem:[%s14459_s1 + $0xd0] sm:$0xff]   ;;  %v10293_v53 = vld [vmem:[%s14459_s1 + $0xa8] sm:$0xff]  }
 0x337   : > { %v1717_v58 = vpop.f32.mrf.mxu1  ;;  %v1726_v59 = vpack.c.bf16 %v10201_v57, %v10201_v57  ;;  %v9430_v55 = vld [vmem:[%s14459_s1 + $0xc8] sm:$0xff]  }
 0x338   : > { %v10300_v58 = vld [vmem:[%s14459_s1 + $0xa0] sm:$0xff]  }
 0x339   : > { %1887 = vmatprep.mubr.bf16.mxu1 %v1726_v59  ;;  %v9432_v59 = vld [vmem:[%s14459_s1 + $0xc0] sm:$0xff]  }
 0x33a   : > { %1888 = vmatmul.mubr.bf16.vlgmr.msra.gmra.mxu1 %v1725_v60  ;;  %v10307_v60 = vld [vmem:[%s14459_s1 + $0xf8] sm:$0xff]  }
 0x33b   : > { %9014 = vmatprep.mubr.msk.bf16.mxu1 %vm9581_vm15, %v14183_v61  ;;  %9007 = vmatpush3.bf16.msra.mxu1 %v9410_v62  ;;  %v10310_v62 = vld [vmem:[%s14459_s1 + $0x118] sm:$0xff]  }
 0x33c   : > { %9008 = vmatprep.subr.bf16.mxu1 %v14183_v61 }
 0x33f   : > { %9009 = vmatpush3.bf16.msra.mxu1 %v9412_v63  ;;  %v10321_v63 = vld [vmem:[%s14459_s1 + $0xf0] sm:$0xff]  }
 0x340   : > { %9010 = vmatprep.subr.bf16.mxu1 %v14183_v61 }
 0x343   : > { %9011 = vmatpush3.bf16.msra.mxu1 %v9414_v9  ;;  %v10324_v9 = vld [vmem:[%s14459_s1 + $0x110] sm:$0xff]  }
 0x344   : > { %9012 = vmatprep.subr.bf16.mxu1 %v14183_v61 }
 0x347   : > { %9013 = vmatpush3.bf16.msra.mxu1 %v9416_v26 }
 0x348   : > { %9030 = vmatprep.subr.bf16.mxu1 %v14183_v61 }
 0x3fa   : > { %v8838_v15 = vpop.f32.mrf.mxu1 }
 0x3fc   : > { %v8839_v18 = vpop.f32.mrf.mxu1 }
 0x3fd   : > { %v8840_v19 = vadd.f32 %v8839_v18, %v8838_v15  ;;  %v10335_v15 = vld [vmem:[%s14459_s1 + $0xe8] sm:$0xff]  }
 0x3fe   : > { %v8841_v20 = vpop.f32.mrf.mxu1  ;;  %v10338_v18 = vld [vmem:[%s14459_s1 + $0x108] sm:$0xff]  }
 0x3ff   : > { %v1897_v21 = vpack.c.bf16 %v8840_v19, %v8840_v19  ;;  %v10345_v19 = vld [vmem:[%s14459_s1 + $0xe0] sm:$0xff]  }
 0x400   : > { %v8842_v22 = vpop.f32.mrf.mxu1  ;;  %v10348_v20 = vld [vmem:[%s14459_s1 + $0x100] sm:$0xff]  }
 0x401   : > { %v1908_v23 = vsel %vm1671_vm11, %v1897_v21, 0  ;;  %v9441_v21 = vld [vmem:[%s9628_s25 + $0x4] ss:$8 sps:$4 sm:$0xff]   ;;  %v9444_v22 = vld [vmem:[%s9798_s27 + $0x18] sm:$0xff]  }
 0x402   : > { %8989 = vmatpush3.bf16.msra.mxu0 %v1908_v23  ;;  %v9445_v23 = vld [vmem:[%s9798_s27 + $0x10] sm:$0xff]  }
 0x403   : > { %8994 = vmatprep.subr.bf16.mxu0 %v14183_v61 }
 0x405   : > { %8991 = vmatmul.mubr.msk.bf16.vlgmr.msra.gmra.mxu0 %vm1903_vm9, %v9408_v24  ;;  %vm3253_vm9 = vcmask 719872  }
 0x406   : > { %8995 = vmatpush3.bf16.msra.mxu0 %v9409_v25  ;;  %9002 = vmatprep.mubr.msk.bf16.mxu0 %vm9581_vm15, %v14183_v61 }
 0x407   : > { %8996 = vmatprep.subr.bf16.mxu0 %v14183_v61 }
 0x40a   : > { %8997 = vmatpush3.bf16.msra.mxu0 %v9411_v0 }
 0x40b   : > { %8998 = vmatprep.subr.bf16.mxu0 %v14183_v61 }
 0x40e   : > { %8999 = vmatpush3.bf16.msra.mxu0 %v9413_v2 }
 0x40f   : > { %9000 = vmatprep.subr.bf16.mxu0 %v14183_v61 }
 0x412   : > { %9001 = vmatpush3.bf16.msra.mxu0 %v9415_v4 }
 0x413   : > { %9018 = vmatprep.subr.bf16.mxu0 %v14183_v61 }
 0x4c5   : > { %v1944_v27 = vpop.f32.mrf.mxu0 }
 0x4c7   : > { %v8992_v32 = vpop.f32.mrf.mxu0 }
 0x4c9   : > { %v1947_v1 = vpop.f32.mrf.mxu0 }
 0x4ca   : > { %v10238_v35 = vpack.c.bf16 %v1947_v1, %v1944_v27 }
 0x4cb   : > { %v8993_v36 = vpop.f32.mrf.mxu0 }
 0x4cc   : > { %9003 = vmatmul.mubr.msk.bf16.vlgmr.msra.gmra.mxu0 %vm1984_vm10, %v10238_v35  ;;  %9015 = vmatmul.mubr.msk.bf16.vlgmr.msra.gmra.mxu1 %vm1984_vm10, %v10238_v35 }
 0x4cd   : > { %9019 = vmatpush3.bf16.msra.mxu0 %v10235_v3  ;;  %9031 = vmatpush3.bf16.msra.mxu1 %v9418_v5 }
 0x4ce   : > { %9020 = vmatprep.subr.bf16.mxu0 %v14183_v61  ;;  %9032 = vmatprep.subr.bf16.mxu1 %v14183_v61 }
 0x4cf   : > { %9026 = vmatprep.mubr.msk.bf16.mxu0 %vm9581_vm15, %v14183_v61  ;;  %9038 = vmatprep.mubr.msk.bf16.mxu1 %vm9581_vm15, %v14183_v61 }
 0x4d1   : > { %9021 = vmatpush3.bf16.msra.mxu0 %v10246_v37  ;;  %9033 = vmatpush3.bf16.msra.mxu1 %v9420_v38 }
 0x4d2   : > { %9022 = vmatprep.subr.bf16.mxu0 %v14183_v61  ;;  %9034 = vmatprep.subr.bf16.mxu1 %v14183_v61 }
 0x4d5   : > { %9023 = vmatpush3.bf16.msra.mxu0 %v10257_v39  ;;  %9035 = vmatpush3.bf16.msra.mxu1 %v9422_v40 }
 0x4d6   : > { %9024 = vmatprep.subr.bf16.mxu0 %v14183_v61  ;;  %9036 = vmatprep.subr.bf16.mxu1 %v14183_v61 }
 0x4d9   : > { %9025 = vmatpush3.bf16.msra.mxu0 %v10264_v41  ;;  %9037 = vmatpush3.bf16.msra.mxu1 %v9424_v42 }
 0x4da   : > { %9042 = vmatprep.subr.bf16.mxu0 %v14183_v61  ;;  %9054 = vmatprep.subr.bf16.mxu1 %v14183_v61 }
 0x4dc   : > { %9027 = vmatmul.mubr.msk.bf16.vlgmr.msra.gmra.mxu0 %vm1984_vm10, %v10238_v35  ;;  %9039 = vmatmul.mubr.msk.bf16.vlgmr.msra.gmra.mxu1 %vm1984_vm10, %v10238_v35 }
 0x4dd   : > { %9043 = vmatpush3.bf16.msra.mxu0 %v10271_v43  ;;  %9055 = vmatpush3.bf16.msra.mxu1 %v9426_v47 }
 0x4de   : > { %9044 = vmatprep.subr.bf16.mxu0 %v14183_v61  ;;  %9056 = vmatprep.subr.bf16.mxu1 %v14183_v61 }
 0x4df   : > { %9050 = vmatprep.mubr.msk.bf16.mxu0 %vm9581_vm15, %v14183_v61  ;;  %9062 = vmatprep.mubr.msk.bf16.mxu1 %vm9581_vm15, %v14183_v61 }
 0x4e1   : > { %9045 = vmatpush3.bf16.msra.mxu0 %v10282_v48  ;;  %9057 = vmatpush3.bf16.msra.mxu1 %v9428_v49 }
 0x4e2   : > { %9046 = vmatprep.subr.bf16.mxu0 %v14183_v61  ;;  %9058 = vmatprep.subr.bf16.mxu1 %v14183_v61 }
 0x4e5   : > { %9047 = vmatpush3.bf16.msra.mxu0 %v10293_v53  ;;  %9059 = vmatpush3.bf16.msra.mxu1 %v9430_v55 }
 0x4e6   : > { %9048 = vmatprep.subr.bf16.mxu0 %v14183_v61  ;;  %9060 = vmatprep.subr.bf16.mxu1 %v14183_v61 }
 0x4e9   : > { %9049 = vmatpush3.bf16.msra.mxu0 %v10300_v58  ;;  %9061 = vmatpush3.bf16.msra.mxu1 %v9432_v59 }
 0x4ea   : > { %9066 = vmatprep.subr.bf16.mxu0 %v14183_v61  ;;  %9078 = vmatprep.subr.bf16.mxu1 %v14183_v61 }
 0x4ec   : > { %9051 = vmatmul.mubr.msk.bf16.vlgmr.msra.gmra.mxu0 %vm1984_vm10, %v10238_v35  ;;  %9063 = vmatmul.mubr.msk.bf16.vlgmr.msra.gmra.mxu1 %vm1984_vm10, %v10238_v35 }
 0x4ed   : > { %9067 = vmatpush3.bf16.msra.mxu0 %v10307_v60  ;;  %9079 = vmatpush3.bf16.msra.mxu1 %v10310_v62 }
 0x4ee   : > { %9068 = vmatprep.subr.bf16.mxu0 %v14183_v61  ;;  %9080 = vmatprep.subr.bf16.mxu1 %v14183_v61 }
 0x4ef   : > { %9074 = vmatprep.mubr.msk.bf16.mxu0 %vm9581_vm15, %v14183_v61  ;;  %9086 = vmatprep.mubr.msk.bf16.mxu1 %vm9581_vm15, %v14183_v61 }
 0x4f1   : > { %9069 = vmatpush3.bf16.msra.mxu0 %v10321_v63  ;;  %9081 = vmatpush3.bf16.msra.mxu1 %v10324_v9 }
 0x4f2   : > { %9070 = vmatprep.subr.bf16.mxu0 %v14183_v61  ;;  %9082 = vmatprep.subr.bf16.mxu1 %v14183_v61 }
 0x4f5   : > { %9071 = vmatpush3.bf16.msra.mxu0 %v10335_v15  ;;  %9083 = vmatpush3.bf16.msra.mxu1 %v10338_v18 }
 0x4f6   : > { %9072 = vmatprep.subr.bf16.mxu0 %v14183_v61  ;;  %9084 = vmatprep.subr.bf16.mxu1 %v14183_v61 }
 0x4f9   : > { %9073 = vmatpush3.bf16.msra.mxu0 %v10345_v19  ;;  %9085 = vmatpush3.bf16.msra.mxu1 %v10348_v20 }
 0x4fa   : > { %2569 = vmatprep.subr.bf16.mxu0 %v14185_v56  ;;  %9090 = vmatprep.subr.bf16.mxu1 %v14183_v61 }
 0x4fc   : > { %9075 = vmatmul.mubr.msk.bf16.vlgmr.msra.gmra.mxu0 %vm1984_vm10, %v10238_v35  ;;  %9087 = vmatmul.mubr.msk.bf16.vlgmr.msra.gmra.mxu1 %vm1984_vm10, %v10238_v35 }
 0x4fd   : > { %9098 = vmatprep.mubr.msk.bf16.mxu1 %vm9581_vm15, %v14183_v61  ;;  %8577 = vmatprep.mubr.msk.bf16.mxu0 %vm1540_vm0, %v9441_v21 }
 0x4fe   : > { %9091 = vmatpush3.bf16.msra.mxu1 %v9444_v22 }
 0x4ff   : > { %9092 = vmatprep.subr.bf16.mxu1 %v14183_v61 }
 0x502   : > { %9093 = vmatpush3.bf16.msra.mxu1 %v9445_v23 }
 0x503   : > { %9094 = vmatprep.subr.bf16.mxu1 %v14183_v61 }
 0x58c   : > { %v2022_v24 = vpop.f32.mrf.mxu0  ;;  %v2096_v25 = vpop.f32.mrf.mxu1 }
 0x58e   : > { %v9004_v0 = vpop.f32.mrf.mxu0  ;;  %v9016_v2 = vpop.f32.mrf.mxu1 }
 0x590   : > { %v2025_v4 = vpop.f32.mrf.mxu0  ;;  %v2099_v26 = vpop.f32.mrf.mxu1 }
 0x591   : > { %v2547_v27 = vpack.c.bf16 %v2025_v4, %v2022_v24  ;;  %v2548_v32 = vpack.c.bf16 %v2099_v26, %v2096_v25 }
 0x592   : > { %v9005_v1 = vpop.f32.mrf.mxu0  ;;  %v9017_v5 = vpop.f32.mrf.mxu1 }
 0x59c   : > { %v2170_v36 = vpop.f32.mrf.mxu0  ;;  %v2244_v38 = vpop.f32.mrf.mxu1 }
 0x59e   : > { %v9028_v40 = vpop.f32.mrf.mxu0  ;;  %v9040_v42 = vpop.f32.mrf.mxu1 }
 0x5a0   : > { %v2173_v47 = vpop.f32.mrf.mxu0  ;;  %v2247_v49 = vpop.f32.mrf.mxu1 }
 0x5a2   : > { %v9029_v55 = vpop.f32.mrf.mxu0  ;;  %v9041_v59 = vpop.f32.mrf.mxu1 }
 0x5a3   : > { %v14481_v55 = vmov 0  }
 0x5ac   : > { %v2318_v21 = vpop.f32.mrf.mxu0  ;;  %v2392_v22 = vpop.f32.mrf.mxu1 }
 0x5ae   : > { %v9052_v23 = vpop.f32.mrf.mxu0  ;;  %v9064_v61 = vpop.f32.mrf.mxu1 }
 0x5b0   : > { %v2321_v0 = vpop.f32.mrf.mxu0  ;;  %v2395_v2 = vpop.f32.mrf.mxu1 }
 0x5b1   : > { %v2552_v59 = vpack.c.bf16 %v2395_v2, %v2392_v22  ;;  %v2551_v61 = vpack.c.bf16 %v2321_v0, %v2318_v21  ;;  %v9446_v21 = vld [vmem:[%s9798_s27 + $0x8] sm:$0xff]  }
 0x5b2   : > { %v9053_v56 = vpop.f32.mrf.mxu0  ;;  %v9065_v6 = vpop.f32.mrf.mxu1  ;;  %9095 = vmatpush3.bf16.msra.mxu1 %v9446_v21 }
 0x5b3   : > { %v2550_v6 = vpack.c.bf16 %v2247_v49, %v2244_v38  ;;  %v14482_v38 = vmov 0.0   ;;  %v9447_v49 = vld [vmem:[%s9798_s27] sm:$0xff]  }
 0x5b4   : > { %9096 = vmatprep.subr.bf16.mxu1 %v14482_v38 }
 0x5b6   : > { %9097 = vmatpush3.bf16.msra.mxu1 %v9447_v49 }
 0x5bc   : > { %v2466_v24 = vpop.f32.mrf.mxu0  ;;  %v2540_v25 = vpop.f32.mrf.mxu1 }
 0x5be   : > { %v9076_v4 = vpop.f32.mrf.mxu0  ;;  %v9088_v26 = vpop.f32.mrf.mxu1 }
 0x5c0   : > { %v2469_v1 = vpop.f32.mrf.mxu0  ;;  %v2543_v5 = vpop.f32.mrf.mxu1 }
 0x5c1   : > { %v2553_v40 = vpack.c.bf16 %v2469_v1, %v2466_v24  ;;  %v2554_v56 = vpack.c.bf16 %v2543_v5, %v2540_v25  ;;  %v9448_v25 = vld [vmem:[%s9633_s29] sm:$0xff]  }
 0x5c2   : > { %v9077_v42 = vpop.f32.mrf.mxu0  ;;  %v9089_v52 = vpop.f32.mrf.mxu1 }
 0x5c3   : > { %2570 = vmatpush1.bf16.msra.mxu0 %v2553_v40  ;;  %v2549_v52 = vpack.c.bf16 %v2173_v47, %v2170_v36  ;;  %v9449_v42 = vld [vmem:[%s9633_s29 + $0x8] ss:$0 sps:$4 sm:$0xff]  }
 0x5c4   : > { %2571 = vmatprep.subr.bf16.mxu0 %v14481_v55 }
 0x5c7   : > { %2572 = vmatpush1.bf16.msra.mxu0 %v2552_v59  ;;  %v9450_v59 = vld [vmem:[%s9788_s10] sm:$0xff]  }
 0x5c8   : > { %2573 = vmatprep.subr.bf16.mxu0 %v14481_v55 }
 0x5cb   : > { %2574 = vmatpush1.bf16.msra.mxu0 %v2551_v61  ;;  %v10396_v61 = vld [vmem:[%s9788_s10 + $0x8] sm:$0xff]  }
 0x5cc   : > { %2575 = vmatprep.subr.bf16.mxu0 %v14481_v55 }
 0x5cf   : > { %2576 = vmatpush1.bf16.msra.mxu0 %v10238_v35  ;;  %v9443_v35 = vld [vmem:[%s9628_s25] ss:$8 sps:$4 sm:$0xff]  }
 0x5d0   : > { %2577 = vmatprep.subr.bf16.mxu0 %v14481_v55 }
 0x5d3   : > { %2578 = vmatpush1.bf16.msra.mxu0 %v2550_v6  ;;  %v10401_v6 = vld [vmem:[%s9788_s10 + $0x10] sm:$0xff]  }
 0x5d4   : > { %2579 = vmatprep.subr.bf16.mxu0 %v14481_v55 }
 0x5d7   : > { %2580 = vmatpush1.bf16.msra.mxu0 %v2549_v52  ;;  %v10404_v52 = vld [vmem:[%s9788_s10 + $0x18] sm:$0xff]  }
 0x5d8   : > { %2581 = vmatprep.subr.bf16.mxu0 %v14481_v55 }
 0x5db   : > { %2582 = vmatpush1.bf16.msra.mxu0 %v2548_v32 }
 0x5dc   : > { %2583 = vmatprep.subr.bf16.mxu0 %v14481_v55 }
 0x5df   : > { %2584 = vmatpush1.bf16.msra.mxu0 %v2547_v27 }
 0x5e0   : > { %2599 = vmatprep.subr.bf16.mxu0 %v14481_v55 }
 0x5e3   : > { %2600 = vmatpush2.bf16.msra.mxu0 %v2554_v56 }
 0x5e4   : > { %9114 = vmatprep.subr.bf16.mxu0 %v10396_v61 }
 0x5e6   : > { %2602 = vmatmul.mubr.bf16.vlgmr.msra.gmra.mxu0 %v9443_v35 }
 0x5e7   : > { %9115 = vmatpush3.bf16.msra.mxu0 %v10396_v61 }
 0x5e8   : > { %9126 = vmatprep.subr.bf16.mxu0 %v10404_v52 }
 0x6a6   : > { %v2603_v36 = vpop.f32.mrf.mxu0 }
 0x6a7   : > { %v2612_v32 = vmul.f32 %v2603_v36, %v10084_v44  ;;  %vm2610_vm13 = vcmp.ge.f32.partialorder %v2603_v36, 0.0 }
 0x6a8   : > { %v2605_v47 = vpop.f32.mrf.mxu0 }
 0x6a9   : > { %v10383_v0 = vsel %vm2610_vm13, %v2603_v36, %v2612_v32  ;;  %v10419_v32 = vld [vmem:[%s9788_s10 + $0x28] sm:$0xff]  }
 0x6aa   : > { %v2606_v22 = vpop.f32.mrf.mxu0 }
 0x6ab   : > { %vm2611_vm14 = vcmp.ge.f32.partialorder %v2606_v22, 0.0  ;;  %v2613_v27 = vmul.f32 %v2606_v22, %v10084_v44 }
 0x6ac   : > { %v2608_v23 = vpop.f32.mrf.mxu0 }
 0x6ad   : > { %v10385_v2 = vsel %vm2611_vm14, %v2606_v22, %v2613_v27  ;;  %v10422_v22 = vld [vmem:[%s9788_s10 + $0x30] sm:$0xff]   ;;  %v10435_v27 = vld [vmem:[%s9788_s10 + $0x38] sm:$0xff]   ;;  %v10438_v23 = vld [vmem:[%s9788_s10 + $0x40] sm:$0xff]  }
 0x6ae   : > { %v2616_v24 = vpack.c.bf16 %v10385_v2, %v10383_v0 }
 0x6b0   : > { %9099 = vmatmul.mubr.msk.bf16.vlgmr.msra.gmra.mxu1 %vm1984_vm10, %v2616_v24  ;;  %v9458_v24 = vld [vmem:[%s14458_s3 + $0x4] ss:$8 sps:$4 sm:$0xff]  }
 0x6b1   : > { %9104 = vmatprep.mubr.msk.bf16.mxu1 %vm1540_vm0, %v9448_v25 }
 0x770   : > { %v2686_v4 = vpop.f32.mrf.mxu1 }
 0x772   : > { %v9100_v26 = vpop.f32.mrf.mxu1 }
 0x774   : > { %v2689_v1 = vpop.f32.mrf.mxu1 }
 0x775   : > { %v2696_v5 = vpack.c.bf16 %v2689_v1, %v2686_v4 }
 0x776   : > { %v9101_v40 = vpop.f32.mrf.mxu1 }
 0x777   : > { %9102 = vmatprep.subr.bf16.mxu1 %v2696_v5 }
 0x778   : > { %9103 = vmatpush3.bf16.msra.mxu1 %v2696_v5 }
 0x779   : > { %9108 = vmatprep.subr.bf16.mxu1 %v9450_v59 }
 0x77b   : > { %9105 = vmatmul.mubr.msk.bf16.vlgmr.msra.gmra.mxu1 %vm1540_vm0, %v9449_v42 }
 0x77c   : > { %9109 = vmatpush3.bf16.msra.mxu1 %v9450_v59 }
 0x77d   : > { %9120 = vmatprep.subr.bf16.mxu1 %v10401_v6 }
 0x83b   : > { %v10408_v56 = vpop.f32.mrf.mxu1 }
 0x83c   : > { %v2760_v47 = vpack.c.bf16 %v10408_v56, %v10408_v56 }
 0x83d   : > { %v2745_v35 = vpop.f32.mrf.mxu1 }
 0x83f   : > { %v9107_v21 = vpop.f32.mrf.mxu1 }
 0x841   : > { %v2748_v49 = vpop.f32.mrf.mxu1 }
 0x842   : > { %v10410_v36 = vpack.c.bf16 %v2748_v49, %v2745_v35 }
 0x844   : > { %9110 = vmatprep.mubr.msk.bf16.mxu1 %vm1540_vm0, %v10410_v36  ;;  %9116 = vmatprep.mubr.msk.bf16.mxu0 %vm1540_vm0, %v10410_v36 }
 0x845   : > { %9111 = vmatmul.mubr.msk.bf16.vlgmr.msra.gmra.mxu1 %vm1540_vm0, %v2760_v47  ;;  %9117 = vmatmul.mubr.msk.bf16.vlgmr.msra.gmra.mxu0 %vm1540_vm0, %v2760_v47 }
 0x846   : > { %9122 = vmatprep.mubr.msk.bf16.mxu1 %vm1540_vm0, %v10410_v36  ;;  %9128 = vmatprep.mubr.msk.bf16.mxu0 %vm1540_vm0, %v10410_v36 }
 0x847   : > { %9121 = vmatpush3.bf16.msra.mxu1 %v10401_v6  ;;  %9127 = vmatpush3.bf16.msra.mxu0 %v10404_v52 }
 0x848   : > { %9132 = vmatprep.subr.bf16.mxu1 %v10419_v32  ;;  %9138 = vmatprep.subr.bf16.mxu0 %v10422_v22 }
 0x84d   : > { %9123 = vmatmul.mubr.msk.bf16.vlgmr.msra.gmra.mxu1 %vm1540_vm0, %v2760_v47  ;;  %9129 = vmatmul.mubr.msk.bf16.vlgmr.msra.gmra.mxu0 %vm1540_vm0, %v2760_v47 }
 0x84e   : > { %9134 = vmatprep.mubr.msk.bf16.mxu1 %vm1540_vm0, %v10410_v36  ;;  %9140 = vmatprep.mubr.msk.bf16.mxu0 %vm1540_vm0, %v10410_v36 }
 0x84f   : > { %9133 = vmatpush3.bf16.msra.mxu1 %v10419_v32  ;;  %9139 = vmatpush3.bf16.msra.mxu0 %v10422_v22 }
 0x850   : > { %9144 = vmatprep.subr.bf16.mxu1 %v10435_v27  ;;  %9150 = vmatprep.subr.bf16.mxu0 %v10438_v23 }
 0x855   : > { %9135 = vmatmul.mubr.msk.bf16.vlgmr.msra.gmra.mxu1 %vm1540_vm0, %v2760_v47  ;;  %9141 = vmatmul.mubr.msk.bf16.vlgmr.msra.gmra.mxu0 %vm1540_vm0, %v2760_v47 }
 0x856   : > { %9146 = vmatprep.mubr.msk.bf16.mxu1 %vm1540_vm0, %v10410_v36  ;;  %9152 = vmatprep.mubr.msk.bf16.mxu0 %vm1540_vm0, %v10410_v36 }
 0x857   : > { %9145 = vmatpush3.bf16.msra.mxu1 %v10435_v27  ;;  %9151 = vmatpush3.bf16.msra.mxu0 %v10438_v23 }
 0x858   : > { %3263 = vmatprep.subr.bf16.mxu1 %v14481_v55  ;;  %9156 = vmatprep.subr.bf16.mxu0 %v9450_v59 }
 0x85d   : > { %9147 = vmatmul.mubr.msk.bf16.vlgmr.msra.gmra.mxu1 %vm1540_vm0, %v2760_v47  ;;  %9153 = vmatmul.mubr.msk.bf16.vlgmr.msra.gmra.mxu0 %vm1540_vm0, %v2760_v47 }
 0x85e   : > { %9157 = vmatpush3.bf16.msra.mxu0 %v9450_v59  ;;  %8629 = vmatprep.mubr.msk.bf16.mxu1 %vm3253_vm9, %v9458_v24 }
 0x85f   : > { %9162 = vmatprep.subr.bf16.mxu0 %v10396_v61 }
 0x905   : > { %v9112_v25 = vpop.f32.mrf.mxu1  ;;  %v9118_v4 = vpop.f32.mrf.mxu0 }
 0x907   : > { %v2809_v26 = vpop.f32.mrf.mxu1  ;;  %v2866_v1 = vpop.f32.mrf.mxu0 }
 0x909   : > { %v9113_v5 = vpop.f32.mrf.mxu1  ;;  %v9119_v40 = vpop.f32.mrf.mxu0 }
 0x90b   : > { %v2812_v42 = vpop.f32.mrf.mxu1  ;;  %v2869_v35 = vpop.f32.mrf.mxu0 }
 0x90d   : > { %v9124_v21 = vpop.f32.mrf.mxu1  ;;  %v9130_v49 = vpop.f32.mrf.mxu0 }
 0x90f   : > { %v2923_v11 = vpop.f32.mrf.mxu1  ;;  %v2980_v12 = vpop.f32.mrf.mxu0 }
 0x911   : > { %v9125_v47 = vpop.f32.mrf.mxu1  ;;  %v9131_v59 = vpop.f32.mrf.mxu0 }
 0x913   : > { %v2926_v46 = vpop.f32.mrf.mxu1  ;;  %v2983_v45 = vpop.f32.mrf.mxu0 }
 0x914   : > { %v3227_v16 = vpack.c.bf16 %v9130_v49, %v2983_v45 }
 0x915   : > { %v9136_v8 = vpop.f32.mrf.mxu1  ;;  %v9142_v7 = vpop.f32.mrf.mxu0 }
 0x917   : > { %v3037_v14 = vpop.f32.mrf.mxu1  ;;  %v3094_v24 = vpop.f32.mrf.mxu0 }
 0x918   : > { %v3228_v13 = vpack.c.bf16 %v3037_v14, %v10408_v56  ;;  %v3226_v14 = vpack.c.bf16 %v2980_v12, %v9124_v21 }
 0x919   : > { %v9137_v30 = vpop.f32.mrf.mxu1  ;;  %v9143_v29 = vpop.f32.mrf.mxu0 }
 0x91a   : > { %3264 = vmatpush1.bf16.msra.mxu1 %v3228_v13  ;;  %v3225_v13 = vpack.c.bf16 %v2926_v46, %v2923_v11  ;;  %v3224_v29 = vpack.c.bf16 %v9118_v4, %v2869_v35  ;;  %v3223_v30 = vpack.c.bf16 %v2866_v1, %v9112_v25  ;;  %v9460_v4 = vld [vmem:[%s14458_s3] ss:$8 sps:$4 sm:$0xff]  }
 0x91b   : > { %v3040_v5 = vpop.f32.mrf.mxu1  ;;  %v3097_v40 = vpop.f32.mrf.mxu0  ;;  %3265 = vmatprep.subr.bf16.mxu1 %v14481_v55 }
 0x91c   : > { %v3230_v56 = vpack.c.bf16 %v3097_v40, %v3094_v24  ;;  %v3229_v25 = vpack.c.bf16 %v9136_v8, %v3040_v5 }
 0x91d   : > { %v9148_v51 = vpop.f32.mrf.mxu1  ;;  %v9154_v50 = vpop.f32.mrf.mxu0 }
 0x91e   : > { %3266 = vmatpush1.bf16.msra.mxu1 %v10410_v36  ;;  %v3237_v36 = vld [vmem:[%s14458_s3 + $0x10] sm:$0xff]  ;;  %s14554_s3 = smov 111  }
 0x91f   : > { %v3151_v47 = vpop.f32.mrf.mxu1  ;;  %v3208_v59 = vpop.f32.mrf.mxu0  ;;  %3267 = vmatprep.subr.bf16.mxu1 %v14481_v55 }
 0x921   : > { %v9149_v17 = vpop.f32.mrf.mxu1  ;;  %v9155_v34 = vpop.f32.mrf.mxu0 }
 0x922   : > { %3268 = vmatpush1.bf16.msra.mxu1 %v3227_v16  ;;  %v3222_v17 = vpack.c.bf16 %v2812_v42, %v2809_v26  ;;  %v3234_v16 = vpack.c.bf16 %v9154_v50, %v9154_v50  ;;  %v3231_v50 = vpack.c.bf16 %v3151_v47, %v9142_v7  ;;  %v8628_v26 = vcombine.high %v3237_v36, %v3237_v36 }
 0x923   : > { %3269 = vmatprep.subr.bf16.mxu1 %v14481_v55  ;;  %v3211_v34 = vpop.f32.mrf.mxu0  ;;  %v3154_v45 = vpop.f32.mrf.mxu1 }
 0x924   : > { %v3261_v12 = vsel %vm1671_vm11, %v3234_v16, 0  ;;  %v3233_v11 = vpack.c.bf16 %v3211_v34, %v3208_v59  ;;  %v3232_v46 = vpack.c.bf16 %v9148_v51, %v3154_v45  ;;  %v8627_v51 = vcombine.low %v3237_v36, %v3237_v36 }
 0x926   : > { %3270 = vmatpush1.bf16.msra.mxu1 %v3226_v14 }
 0x927   : > { %3271 = vmatprep.subr.bf16.mxu1 %v14481_v55 }
 0x92a   : > { %3272 = vmatpush1.bf16.msra.mxu1 %v3225_v13 }
 0x92b   : > { %3273 = vmatprep.subr.bf16.mxu1 %v14481_v55 }
 0x92e   : > { %3274 = vmatpush1.bf16.msra.mxu1 %v3224_v29 }
 0x92f   : > { %3275 = vmatprep.subr.bf16.mxu1 %v14481_v55 }
 0x932   : > { %3276 = vmatpush1.bf16.msra.mxu1 %v3223_v30 }
 0x933   : > { %3277 = vmatprep.subr.bf16.mxu1 %v14481_v55 }
 0x936   : > { %3278 = vmatpush1.bf16.msra.mxu1 %v3222_v17 }
 0x937   : > { %3283 = vmatprep.subr.bf16.mxu1 %v14481_v55 }
 0x93a   : > { %3284 = vmatpush2.bf16.msra.mxu1 %v3261_v12 }
 0x93b   : > { %3285 = vmatprep.subr.bf16.mxu1 %v14481_v55 }
 0x93e   : > { %3286 = vmatpush2.bf16.msra.mxu1 %v3233_v11 }
 0x93f   : > { %3287 = vmatprep.subr.bf16.mxu1 %v14481_v55 }
 0x942   : > { %3288 = vmatpush2.bf16.msra.mxu1 %v3232_v46 }
 0x943   : > { %3289 = vmatprep.subr.bf16.mxu1 %v14481_v55 }
 0x946   : > { %3290 = vmatpush2.bf16.msra.mxu1 %v3231_v50 }
 0x947   : > { %3291 = vmatprep.subr.bf16.mxu1 %v14481_v55 }
 0x94a   : > { %3292 = vmatpush2.bf16.msra.mxu1 %v3230_v56 }
 0x94b   : > { %3293 = vmatprep.subr.bf16.mxu1 %v14481_v55 }
 0x94e   : > { %3294 = vmatpush2.bf16.msra.mxu1 %v3229_v25 }
 0x94f   : > { %3752 = vmatprep.subr.bf16.mxu1 %v14481_v55 }
 0x951   : > { %3296 = vmatmul.mubr.bf16.vlgmr.msra.gmra.mxu1 %v9460_v4 }
 0x952   : > { %8630 = vmatprep.mubr.msk.bf16.mxu1 %vm3253_vm9, %v8628_v26 }
 0x959   : > { %3304 = vmatmul.mubr.bf16.gmra.mxu1 %v8627_v51 }
 0xa11   : > { %v3297_v7 = vpop.f32.mrf.mxu1 }
 0xa12   : > { %v3314_v42 = vmul.f32 %v3297_v7, %v10084_v44  ;;  %vm3311_vm13 = vcmp.ge.f32.partialorder %v3297_v7, 0.0 }
 0xa13   : > { %v3299_v1 = vpop.f32.mrf.mxu1 }
 0xa14   : > { %v3317_v49 = vsel %vm3311_vm13, %v3297_v7, %v3314_v42 }
 0xa15   : > { %v3300_v35 = vpop.f32.mrf.mxu1 }
 0xa16   : > { %vm3312_vm14 = vcmp.ge.f32.partialorder %v3300_v35, 0.0  ;;  %v3315_v21 = vmul.f32 %v3300_v35, %v10084_v44 }
 0xa17   : > { %v3302_v8 = vpop.f32.mrf.mxu1 }
 0xa18   : > { %v3318_v24 = vsel %vm3312_vm14, %v3300_v35, %v3315_v21 }
 0xa19   : > { %v10486_v5 = vpack.c.bf16 %v3318_v24, %v3317_v49  ;;  %v3305_v40 = vpop.f32.mrf.mxu1 }
 0xa1a   : > { %vm3313_vm12 = vcmp.ge.f32.partialorder %v3305_v40, 0.0  ;;  %v3316_v47 = vmul.f32 %v3305_v40, %v10084_v44 }
 0xa1b   : > { %v3307_v59 = vpop.f32.mrf.mxu1  ;;  %9158 = vmatprep.mubr.msk.bf16.mxu0 %vm1540_vm0, %v10486_v5 }
 0xa1c   : > { %v3319_v14 = vsel %vm3313_vm12, %v3305_v40, %v3316_v47 }
 0xa1d   : > { %v3321_v13 = vpack.c.bf16 %v3319_v14, %v3319_v14  ;;  %v3308_v29 = vpop.f32.mrf.mxu1 }
 0xa1f   : > { %v3309_v30 = vpop.f32.mrf.mxu1  ;;  %9159 = vmatmul.mubr.msk.bf16.vlgmr.msra.gmra.mxu0 %vm1540_vm0, %v3321_v13 }
 0xa20   : > { %9164 = vmatprep.mubr.msk.bf16.mxu0 %vm1540_vm0, %v10486_v5  ;;  %9163 = vmatpush3.bf16.msra.mxu0 %v10396_v61  ;;  %v9465_v61 = vld [vmem:[%s9643_s8 + $0x4] ss:$8 sps:$4 sm:$0xff]  }
 0xa21   : > { %9168 = vmatprep.subr.bf16.mxu0 %v10401_v6  ;;  %8651 = vmatprep.mubr.msk.bf16.mxu1 %vm3253_vm9, %v9465_v61 }
 0xa27   : > { %9165 = vmatmul.mubr.msk.bf16.vlgmr.msra.gmra.mxu0 %vm1540_vm0, %v3321_v13 }
 0xa28   : > { %9170 = vmatprep.mubr.msk.bf16.mxu0 %vm1540_vm0, %v10486_v5  ;;  %9169 = vmatpush3.bf16.msra.mxu0 %v10401_v6 }
 0xa29   : > { %9174 = vmatprep.subr.bf16.mxu0 %v10404_v52 }
 0xa2f   : > { %9171 = vmatmul.mubr.msk.bf16.vlgmr.msra.gmra.mxu0 %vm1540_vm0, %v3321_v13 }
 0xa30   : > { %9176 = vmatprep.mubr.msk.bf16.mxu0 %vm1540_vm0, %v10486_v5  ;;  %9175 = vmatpush3.bf16.msra.mxu0 %v10404_v52 }
 0xa31   : > { %9180 = vmatprep.subr.bf16.mxu0 %v10419_v32 }
 0xa37   : > { %9177 = vmatmul.mubr.msk.bf16.vlgmr.msra.gmra.mxu0 %vm1540_vm0, %v3321_v13 }
 0xa38   : > { %9182 = vmatprep.mubr.msk.bf16.mxu0 %vm1540_vm0, %v10486_v5  ;;  %9181 = vmatpush3.bf16.msra.mxu0 %v10419_v32 }
 0xa39   : > { %9186 = vmatprep.subr.bf16.mxu0 %v10422_v22 }
 0xa3f   : > { %9183 = vmatmul.mubr.msk.bf16.vlgmr.msra.gmra.mxu0 %vm1540_vm0, %v3321_v13 }
 0xa40   : > { %9188 = vmatprep.mubr.msk.bf16.mxu0 %vm1540_vm0, %v10486_v5  ;;  %9187 = vmatpush3.bf16.msra.mxu0 %v10422_v22 }
 0xa41   : > { %9192 = vmatprep.subr.bf16.mxu0 %v10435_v27 }
 0xa47   : > { %9189 = vmatmul.mubr.msk.bf16.vlgmr.msra.gmra.mxu0 %vm1540_vm0, %v3321_v13 }
 0xa48   : > { %9194 = vmatprep.mubr.msk.bf16.mxu0 %vm1540_vm0, %v10486_v5  ;;  %9193 = vmatpush3.bf16.msra.mxu0 %v10435_v27 }
 0xa49   : > { %9198 = vmatprep.subr.bf16.mxu0 %v10438_v23 }
 0xa4f   : > { %9195 = vmatmul.mubr.msk.bf16.vlgmr.msra.gmra.mxu0 %vm1540_vm0, %v3321_v13 }
 0xa50   : > { %9200 = vmatprep.mubr.msk.bf16.mxu0 %vm1540_vm0, %v10486_v5  ;;  %9199 = vmatpush3.bf16.msra.mxu0 %v10438_v23 }
 0xa57   : > { %9201 = vmatmul.mubr.msk.bf16.vlgmr.msra.gmra.mxu0 %vm1540_vm0, %v3321_v13 }
 0xadf   : > { %v9160_v6 = vpop.f32.mrf.mxu0 }
 0xae1   : > { %v3362_v52 = vpop.f32.mrf.mxu0 }
 0xae3   : > { %v9161_v32 = vpop.f32.mrf.mxu0 }
 0xae5   : > { %v3365_v22 = vpop.f32.mrf.mxu0 }
 0xae6   : > { %v3712_v32 = vpack.c.bf16 %v3365_v22, %v3362_v52 }
 0xae7   : > { %v9166_v17 = vpop.f32.mrf.mxu0 }
 0xae9   : > { %v3410_v27 = vpop.f32.mrf.mxu0 }
 0xaea   : > { %v3713_v30 = vpack.c.bf16 %v3410_v27, %v9160_v6  ;;  %v3727_v27 = vld [vmem:[%s9643_s8 + $0x10] sm:$0xff] }
 0xaeb   : > { %v9167_v16 = vpop.f32.mrf.mxu0 }
 0xaed   : > { %v3413_v12 = vpop.f32.mrf.mxu0 }
 0xaef   : > { %v9172_v34 = vpop.f32.mrf.mxu0 }
 0xaf1   : > { %v3458_v11 = vpop.f32.mrf.mxu0 }
 0xaf3   : > { %v9173_v45 = vpop.f32.mrf.mxu0 }
 0xaf4   : > { %v9463_v45 = vld [vmem:[%s9643_s8] ss:$8 sps:$4 sm:$0xff]  }
 0xaf5   : > { %v3461_v46 = vpop.f32.mrf.mxu0 }
 0xaf6   : > { %v3715_v47 = vpack.c.bf16 %v3461_v46, %v3458_v11  ;;  %v8650_v46 = vcombine.high %v3727_v27, %v3727_v27 }
 0xaf7   : > { %v9178_v50 = vpop.f32.mrf.mxu0 }
 0xaf9   : > { %v3506_v56 = vpop.f32.mrf.mxu0 }
 0xafa   : > { %v3716_v49 = vpack.c.bf16 %v3506_v56, %v9172_v34 }
 0xafb   : > { %v9179_v23 = vpop.f32.mrf.mxu0 }
 0xafd   : > { %v3509_v36 = vpop.f32.mrf.mxu0 }
 0xafe   : > { %v3717_v35 = vpack.c.bf16 %v9178_v50, %v3509_v36  ;;  %v8649_v50 = vcombine.low %v3727_v27, %v3727_v27  ;;  %v9509_v27 = vld [vmem:[%s14459_s1 + $0x38] sm:$0xff]  }
 0xaff   : > { %v9184_v25 = vpop.f32.mrf.mxu0 }
 0xb01   : > { %v3554_v4 = vpop.f32.mrf.mxu0 }
 0xb02   : > { %v3718_v26 = vpack.c.bf16 %v3554_v4, %v3319_v14 }
 0xb03   : > { %v9185_v51 = vpop.f32.mrf.mxu0 }
 0xb04   : > { %3753 = vmatpush1.bf16.msra.mxu1 %v3718_v26 }
 0xb05   : > { %v3557_v7 = vpop.f32.mrf.mxu0  ;;  %3754 = vmatprep.subr.bf16.mxu1 %v14481_v55 }
 0xb07   : > { %v9190_v1 = vpop.f32.mrf.mxu0 }
 0xb08   : > { %3755 = vmatpush1.bf16.msra.mxu1 %v10486_v5  ;;  %v3714_v5 = vpack.c.bf16 %v9166_v17, %v3413_v12  ;;  %v3719_v12 = vpack.c.bf16 %v9184_v25, %v3557_v7 }
 0xb09   : > { %v3602_v42 = vpop.f32.mrf.mxu0  ;;  %3756 = vmatprep.subr.bf16.mxu1 %v14481_v55 }
 0xb0b   : > { %v9191_v21 = vpop.f32.mrf.mxu0 }
 0xb0c   : > { %3757 = vmatpush1.bf16.msra.mxu1 %v3717_v35 }
 0xb0d   : > { %v3605_v8 = vpop.f32.mrf.mxu0  ;;  %3758 = vmatprep.subr.bf16.mxu1 %v14481_v55 }
 0xb0e   : > { %v3720_v22 = vpack.c.bf16 %v3605_v8, %v3602_v42 }
 0xb0f   : > { %v9196_v24 = vpop.f32.mrf.mxu0 }
 0xb10   : > { %3759 = vmatpush1.bf16.msra.mxu1 %v3716_v49 }
 0xb11   : > { %v3650_v40 = vpop.f32.mrf.mxu0  ;;  %3760 = vmatprep.subr.bf16.mxu1 %v14481_v55 }
 0xb12   : > { %v3721_v52 = vpack.c.bf16 %v3650_v40, %v9190_v1 }
 0xb13   : > { %v9197_v59 = vpop.f32.mrf.mxu0 }
 0xb14   : > { %3761 = vmatpush1.bf16.msra.mxu1 %v3715_v47 }
 0xb15   : > { %v3653_v14 = vpop.f32.mrf.mxu0  ;;  %3762 = vmatprep.subr.bf16.mxu1 %v14481_v55 }
 0xb16   : > { %v3722_v6 = vpack.c.bf16 %v9196_v24, %v3653_v14 }
 0xb17   : > { %v9202_v13 = vpop.f32.mrf.mxu0 }
 0xb18   : > { %3763 = vmatpush1.bf16.msra.mxu1 %v3714_v5  ;;  %v3724_v16 = vpack.c.bf16 %v9202_v13, %v9202_v13  ;;  %v9469_v13 = vld [vmem:[%s9648_s14] sm:$0xff]  }
 0xb19   : > { %v3698_v29 = vpop.f32.mrf.mxu0  ;;  %3764 = vmatprep.subr.bf16.mxu1 %v14481_v55 }
 0xb1a   : > { %v3750_v34 = vsel %vm1671_vm11, %v3724_v16, 0 }
 0xb1b   : > { %v9203_v61 = vpop.f32.mrf.mxu0 }
 0xb1c   : > { %3765 = vmatpush1.bf16.msra.mxu1 %v3713_v30  ;;  %v9506_v30 = vld [vmem:[%s14459_s1 + $0x10] sm:$0xff]   ;;  %v9507_v61 = vld [vmem:[%s14459_s1 + $0x8] sm:$0xff]  }
 0xb1d   : > { %3766 = vmatprep.subr.bf16.mxu1 %v14481_v55  ;;  %v3701_v11 = vpop.f32.mrf.mxu0 }
 0xb1e   : > { %v3723_v17 = vpack.c.bf16 %v3701_v11, %v3698_v29  ;;  %v9505_v29 = vld [vmem:[%s14459_s1 + $0x18] sm:$0xff]  }
 0xb20   : > { %3767 = vmatpush1.bf16.msra.mxu1 %v3712_v32  ;;  %v9508_v32 = vld [vmem:[%s14459_s1] sm:$0xff]  }
 0xb21   : > { %3772 = vmatprep.subr.bf16.mxu1 %v14481_v55 }
 0xb24   : > { %3773 = vmatpush2.bf16.msra.mxu1 %v3750_v34 }
 0xb25   : > { %3774 = vmatprep.subr.bf16.mxu1 %v14481_v55 }
 0xb28   : > { %3775 = vmatpush2.bf16.msra.mxu1 %v3723_v17 }
 0xb29   : > { %3776 = vmatprep.subr.bf16.mxu1 %v14481_v55 }
 0xb2c   : > { %3777 = vmatpush2.bf16.msra.mxu1 %v3722_v6 }
 0xb2d   : > { %3778 = vmatprep.subr.bf16.mxu1 %v14481_v55 }
 0xb30   : > { %3779 = vmatpush2.bf16.msra.mxu1 %v3721_v52 }
 0xb31   : > { %3780 = vmatprep.subr.bf16.mxu1 %v14481_v55 }
 0xb34   : > { %3781 = vmatpush2.bf16.msra.mxu1 %v3720_v22 }
 0xb35   : > { %3782 = vmatprep.subr.bf16.mxu1 %v14481_v55 }
 0xb38   : > { %3783 = vmatpush2.bf16.msra.mxu1 %v3719_v12  ;;  %v9520_v12 = vld [vmem:[%s14459_s1 + $0xc0] sm:$0xff]  }
 0xb39   : > { %9242 = vmatprep.subr.bf16.mxu1 %v14482_v38 }
 0xb3b   : > { %3785 = vmatmul.mubr.bf16.vlgmr.msra.gmra.mxu1 %v9463_v45  ;;  %v9473_v45 = vld [vmem:[%s9808_s24 + $0x30] ss:$8 sps:$4 sm:$0xff]  }
 0xb3c   : > { %8652 = vmatprep.mubr.msk.bf16.mxu1 %vm3253_vm9, %v8650_v46  ;;  %9243 = vmatpush3.bf16.msra.mxu1 %v10235_v3  ;;  %v9468_v3 = vld [vmem:[%s9803_s6] sm:$0xff]   ;;  %v9475_v46 = vld [vmem:[%s9808_s24 + $0x34] ss:$8 sps:$4 sm:$0xff]  }
 0xb3d   : > { %9244 = vmatprep.subr.bf16.mxu1 %v14482_v38  ;;  %9204 = vmatprep.subr.bf16.mxu0 %v9468_v3 }
 0xb3e   : > { %9205 = vmatpush3.bf16.msra.mxu0 %v9468_v3 }
 0xb3f   : > { %9210 = vmatprep.subr.bf16.mxu0 %v14482_v38 }
 0xb40   : > { %9245 = vmatpush3.bf16.msra.mxu1 %v10246_v37 }
 0xb41   : > { %9246 = vmatprep.subr.bf16.mxu1 %v14482_v38 }
 0xb43   : > { %3793 = vmatmul.mubr.bf16.gmra.mxu1 %v8649_v50  ;;  %v9478_v50 = vld [vmem:[%s9808_s24 + $0x24] ss:$8 sps:$4 sm:$0xff]  }
 0xb44   : > { %9247 = vmatpush3.bf16.msra.mxu1 %v10257_v39  ;;  %9250 = vmatprep.mubr.msk.bf16.mxu1 %vm9581_vm15, %v14482_v38 }
 0xb45   : > { %9248 = vmatprep.subr.bf16.mxu1 %v14482_v38 }
 0xb48   : > { %9249 = vmatpush3.bf16.msra.mxu1 %v10264_v41 }
 0xb49   : > { %9266 = vmatprep.subr.bf16.mxu1 %v14482_v38 }
 0xbfb   : > { %v3786_v37 = vpop.f32.mrf.mxu1 }
 0xbfc   : > { %v3803_v23 = vmul.f32 %v3786_v37, %v10084_v44  ;;  %vm3800_vm12 = vcmp.ge.f32.partialorder %v3786_v37, 0.0 }
 0xbfd   : > { %v3788_v56 = vpop.f32.mrf.mxu1 }
 0xbfe   : > { %v3806_v4 = vsel %vm3800_vm12, %v3786_v37, %v3803_v23  ;;  %vm3882_vm12 = vcmask 195584  }
 0xbff   : > { %v3789_v39 = vpop.f32.mrf.mxu1 }
 0xc00   : > { %vm3801_vm13 = vcmp.ge.f32.partialorder %v3789_v39, 0.0  ;;  %v3804_v36 = vmul.f32 %v3789_v39, %v10084_v44 }
 0xc01   : > { %v3791_v25 = vpop.f32.mrf.mxu1 }
 0xc02   : > { %v3807_v26 = vsel %vm3801_vm13, %v3789_v39, %v3804_v36 }
 0xc03   : > { %v3809_v41 = vpack.c.bf16 %v3807_v26, %v3806_v4  ;;  %v3794_v51 = vpop.f32.mrf.mxu1 }
 0xc04   : > { %vm3802_vm14 = vcmp.ge.f32.partialorder %v3794_v51, 0.0  ;;  %v3805_v7 = vmul.f32 %v3794_v51, %v10084_v44 }
 0xc05   : > { %v3796_v1 = vpop.f32.mrf.mxu1  ;;  %9206 = vmatprep.mubr.msk.bf16.mxu0 %vm1540_vm0, %v3809_v41 }
 0xc06   : > { %v3808_v42 = vsel %vm3802_vm14, %v3794_v51, %v3805_v7 }
 0xc07   : > { %v3810_v35 = vpack.c.bf16 %v3808_v42, %v3808_v42  ;;  %v3797_v21 = vpop.f32.mrf.mxu1 }
 0xc09   : > { %v3798_v8 = vpop.f32.mrf.mxu1  ;;  %9207 = vmatmul.mubr.msk.bf16.vlgmr.msra.gmra.mxu0 %vm1540_vm0, %v3810_v35 }
 0xc0a   : > { %9214 = vmatprep.mubr.msk.bf16.mxu0 %vm9581_vm15, %v14482_v38 }
 0xcc9   : > { %v9208_v49 = vpop.f32.mrf.mxu0 }
 0xcca   : > { %v3876_v24 = vpack.c.bf16 %v9208_v49, %v9208_v49 }
 0xccb   : > { %v3859_v40 = vpop.f32.mrf.mxu0 }
 0xccc   : > { %v3887_v47 = vsel %vm1671_vm11, %v3876_v24, 0 }
 0xccd   : > { %v9209_v59 = vpop.f32.mrf.mxu0  ;;  %9211 = vmatpush3.bf16.msra.mxu0 %v3887_v47 }
 0xcce   : > { %9212 = vmatprep.subr.bf16.mxu0 %v14482_v38 }
 0xccf   : > { %v3862_v14 = vpop.f32.mrf.mxu0 }
 0xcd0   : > { %v3875_v5 = vpack.c.bf16 %v3862_v14, %v3859_v40 }
 0xcd2   : > { %9213 = vmatpush3.bf16.msra.mxu0 %v3875_v5 }
 0xcd3   : > { %9218 = vmatprep.subr.bf16.mxu0 %v14482_v38 }
 0xcd5   : > { %9215 = vmatmul.mubr.msk.bf16.vlgmr.msra.gmra.mxu0 %vm3882_vm12, %v9469_v13 }
 0xcd6   : > { %9219 = vmatpush3.bf16.msra.mxu0 %v9505_v29  ;;  %9226 = vmatprep.mubr.msk.bf16.mxu0 %vm9581_vm15, %v14482_v38 }
 0xcd7   : > { %9220 = vmatprep.subr.bf16.mxu0 %v14482_v38 }
 0xcda   : > { %9221 = vmatpush3.bf16.msra.mxu0 %v9506_v30 }
 0xcdb   : > { %9222 = vmatprep.subr.bf16.mxu0 %v14482_v38 }
 0xcde   : > { %9223 = vmatpush3.bf16.msra.mxu0 %v9507_v61 }
 0xcdf   : > { %9224 = vmatprep.subr.bf16.mxu0 %v14482_v38 }
 0xce2   : > { %9225 = vmatpush3.bf16.msra.mxu0 %v9508_v32 }
 0xce3   : > { %9230 = vmatprep.subr.bf16.mxu0 %v14482_v38 }
 0xd95   : > { %v3923_v16 = vpop.f32.mrf.mxu0 }
 0xd96   : > { %v3924_v17 = vadd.f32 %v3923_v16, %v10383_v0  ;;  %v9510_v0 = vld [vmem:[%s14459_s1 + $0x30] sm:$0xff]  }
 0xd97   : > { %v9216_v34 = vpop.f32.mrf.mxu0 }
 0xd99   : > { %v3926_v11 = vpop.f32.mrf.mxu0 }
 0xd9a   : > { %v3927_v6 = vadd.f32 %v3926_v11, %v10385_v2  ;;  %v9512_v2 = vld [vmem:[%s14459_s1 + $0x20] sm:$0xff]  }
 0xd9b   : > { %v9217_v52 = vpop.f32.mrf.mxu0 }
 0xd9c   : > { %v10582_v22 = vpack.c.bf16 %v3927_v6, %v3924_v17 }
 0xd9e   : > { %9227 = vmatmul.mubr.msk.bf16.vlgmr.msra.gmra.mxu0 %vm1984_vm10, %v10582_v22  ;;  %9251 = vmatmul.mubr.msk.bf16.vlgmr.msra.gmra.mxu1 %vm1984_vm10, %v10582_v22 }
 0xd9f   : > { %9231 = vmatpush3.bf16.msra.mxu0 %v9509_v27  ;;  %9267 = vmatpush3.bf16.msra.mxu1 %v10271_v43  ;;  %v9511_v43 = vld [vmem:[%s14459_s1 + $0x28] sm:$0xff]  }
 0xda0   : > { %9232 = vmatprep.subr.bf16.mxu0 %v14482_v38  ;;  %9268 = vmatprep.subr.bf16.mxu1 %v14482_v38 }
 0xda1   : > { %9238 = vmatprep.mubr.msk.bf16.mxu0 %vm9581_vm15, %v14482_v38  ;;  %9274 = vmatprep.mubr.msk.bf16.mxu1 %vm9581_vm15, %v14482_v38 }
 0xda3   : > { %9233 = vmatpush3.bf16.msra.mxu0 %v9510_v0  ;;  %9269 = vmatpush3.bf16.msra.mxu1 %v10282_v48  ;;  %v9513_v48 = vld [vmem:[%s14459_s1 + $0x78] sm:$0xff]   ;;  %v9472_v0 = vld [vmem:[%s14483_s11] ss:$8 sps:$4 sm:$0xff]  }
 0xda4   : > { %9234 = vmatprep.subr.bf16.mxu0 %v14482_v38  ;;  %9270 = vmatprep.subr.bf16.mxu1 %v14482_v38 }
 0xda7   : > { %9235 = vmatpush3.bf16.msra.mxu0 %v9511_v43  ;;  %9271 = vmatpush3.bf16.msra.mxu1 %v10293_v53  ;;  %v9514_v53 = vld [vmem:[%s14459_s1 + $0x70] sm:$0xff]  }
 0xda8   : > { %9236 = vmatprep.subr.bf16.mxu0 %v14482_v38  ;;  %9272 = vmatprep.subr.bf16.mxu1 %v14482_v38  ;;  %v9481_v43 = vld [vmem:[%s9808_s24 + $0x14] ss:$8 sps:$4 sm:$0xff]  }
 0xdab   : > { %9237 = vmatpush3.bf16.msra.mxu0 %v9512_v2  ;;  %9273 = vmatpush3.bf16.msra.mxu1 %v10300_v58  ;;  %v9515_v58 = vld [vmem:[%s14459_s1 + $0x68] sm:$0xff]   ;;  %v9479_v2 = vld [vmem:[%s9808_s24 + $0x10] ss:$8 sps:$4 sm:$0xff]  }
 0xdac   : > { %9254 = vmatprep.subr.bf16.mxu0 %v14482_v38  ;;  %9290 = vmatprep.subr.bf16.mxu1 %v14482_v38 }
 0xdae   : > { %9239 = vmatmul.mubr.msk.bf16.vlgmr.msra.gmra.mxu0 %vm1984_vm10, %v10582_v22  ;;  %9275 = vmatmul.mubr.msk.bf16.vlgmr.msra.gmra.mxu1 %vm1984_vm10, %v10582_v22 }
 0xdaf   : > { %9255 = vmatpush3.bf16.msra.mxu0 %v9513_v48  ;;  %9291 = vmatpush3.bf16.msra.mxu1 %v10307_v60  ;;  %v9516_v60 = vld [vmem:[%s14459_s1 + $0x60] sm:$0xff]  }
 0xdb0   : > { %9256 = vmatprep.subr.bf16.mxu0 %v14482_v38  ;;  %9292 = vmatprep.subr.bf16.mxu1 %v14482_v38  ;;  %v9484_v48 = vld [vmem:[%s9808_s24 + $0x4] ss:$8 sps:$4 sm:$0xff]  }
 0xdb1   : > { %9262 = vmatprep.mubr.msk.bf16.mxu0 %vm9581_vm15, %v14482_v38  ;;  %9298 = vmatprep.mubr.msk.bf16.mxu1 %vm9581_vm15, %v14482_v38 }
 0xdb3   : > { %9257 = vmatpush3.bf16.msra.mxu0 %v9514_v53  ;;  %9293 = vmatpush3.bf16.msra.mxu1 %v10321_v63  ;;  %v9517_v63 = vld [vmem:[%s14459_s1 + $0xd8] sm:$0xff]   ;;  %v9482_v53 = vld [vmem:[%s9808_s24] ss:$8 sps:$4 sm:$0xff]  }
 0xdb4   : > { %9258 = vmatprep.subr.bf16.mxu0 %v14482_v38  ;;  %9294 = vmatprep.subr.bf16.mxu1 %v14482_v38 }
 0xdb7   : > { %9259 = vmatpush3.bf16.msra.mxu0 %v9515_v58  ;;  %9295 = vmatpush3.bf16.msra.mxu1 %v10335_v15  ;;  %v9518_v15 = vld [vmem:[%s14459_s1 + $0xd0] sm:$0xff]  }
 0xdb8   : > { %9260 = vmatprep.subr.bf16.mxu0 %v14482_v38  ;;  %9296 = vmatprep.subr.bf16.mxu1 %v14482_v38 }
 0xdbb   : > { %9261 = vmatpush3.bf16.msra.mxu0 %v9516_v60  ;;  %9297 = vmatpush3.bf16.msra.mxu1 %v10345_v19  ;;  %v9519_v19 = vld [vmem:[%s14459_s1 + $0xc8] sm:$0xff]   ;;  %s14547_s1 = smov 127  }
 0xdbc   : > { %9278 = vmatprep.subr.bf16.mxu0 %v14482_v38  ;;  %4284 = vmatprep.subr.bf16.mxu1 %v14481_v55 }
 0xdbe   : > { %9263 = vmatmul.mubr.msk.bf16.vlgmr.msra.gmra.mxu0 %vm1984_vm10, %v10582_v22  ;;  %9299 = vmatmul.mubr.msk.bf16.vlgmr.msra.gmra.mxu1 %vm1984_vm10, %v10582_v22 }
 0xdbf   : > { %9279 = vmatpush3.bf16.msra.mxu0 %v9517_v63  ;;  %9286 = vmatprep.mubr.msk.bf16.mxu0 %vm9581_vm15, %v14482_v38 }
 0xdc0   : > { %9280 = vmatprep.subr.bf16.mxu0 %v14482_v38 }
 0xdc3   : > { %9281 = vmatpush3.bf16.msra.mxu0 %v9518_v15 }
 0xdc4   : > { %9282 = vmatprep.subr.bf16.mxu0 %v14482_v38 }
 0xdc7   : > { %9283 = vmatpush3.bf16.msra.mxu0 %v9519_v19 }
 0xdc8   : > { %9284 = vmatprep.subr.bf16.mxu0 %v14482_v38 }
 0xdcb   : > { %9285 = vmatpush3.bf16.msra.mxu0 %v9520_v12 }
 0xdcc   : > { %9302 = vmatprep.subr.bf16.mxu0 %v14482_v38 }
 0xdce   : > { %9287 = vmatmul.mubr.msk.bf16.vlgmr.msra.gmra.mxu0 %vm1984_vm10, %v10582_v22 }
 0xdcf   : > { %9303 = vmatpush3.bf16.msra.mxu0 %v10310_v62  ;;  %9310 = vmatprep.mubr.msk.bf16.mxu0 %vm9581_vm15, %v14482_v38  ;;  %v9470_v62 = vld [vmem:[%s14483_s11 + $0x4] ss:$8 sps:$4 sm:$0xff]  }
 0xdd0   : > { %9304 = vmatprep.subr.bf16.mxu0 %v14482_v38  ;;  %8668 = vmatprep.mubr.msk.bf16.mxu1 %vm1540_vm0, %v9470_v62 }
 0xdd3   : > { %9305 = vmatpush3.bf16.msra.mxu0 %v10324_v9  ;;  %v9476_v9 = vld [vmem:[%s9808_s24 + $0x20] ss:$8 sps:$4 sm:$0xff]  }
 0xdd4   : > { %9306 = vmatprep.subr.bf16.mxu0 %v14482_v38 }
 0xdd7   : > { %9307 = vmatpush3.bf16.msra.mxu0 %v10338_v18 }
 0xdd8   : > { %9308 = vmatprep.subr.bf16.mxu0 %v14482_v38 }
 0xddb   : > { %9309 = vmatpush3.bf16.msra.mxu0 %v10348_v20 }
 0xddc   : > { %4391 = vmatprep.subr.bf16.mxu0 %v9475_v46 }
 0xdde   : > { %9311 = vmatmul.mubr.msk.bf16.vlgmr.msra.gmra.mxu0 %vm1984_vm10, %v10582_v22 }
 0xddf   : > { %4415 = vmatprep.mubr.bf16.mxu0 %v14481_v55  ;;  %4392 = vmatpush1.bf16.msra.mxu0 %v9473_v45 }
 0xde0   : > { %4393 = vmatprep.subr.bf16.mxu0 %v9478_v50 }
 0xde3   : > { %4394 = vmatpush1.bf16.msra.mxu0 %v9476_v9 }
 0xde4   : > { %4395 = vmatprep.subr.bf16.mxu0 %v9481_v43 }
 0xde7   : > { %4396 = vmatpush1.bf16.msra.mxu0 %v9479_v2 }
 0xde8   : > { %4397 = vmatprep.subr.bf16.mxu0 %v9484_v48 }
 0xdeb   : > { %4398 = vmatpush1.bf16.msra.mxu0 %v9482_v53 }
 0xe5e   : > { %v3968_v18 = vpop.f32.mrf.mxu0  ;;  %v4050_v38 = vpop.f32.mrf.mxu1 }
 0xe60   : > { %v9228_v3 = vpop.f32.mrf.mxu0  ;;  %v9252_v20 = vpop.f32.mrf.mxu1 }
 0xe62   : > { %v3971_v37 = vpop.f32.mrf.mxu0  ;;  %v4053_v56 = vpop.f32.mrf.mxu1 }
 0xe63   : > { %v4262_v23 = vpack.c.bf16 %v3971_v37, %v3968_v18  ;;  %v4264_v39 = vpack.c.bf16 %v4053_v56, %v4050_v38  ;;  %v4426_v37 = vld [vmem:[%s14484_s0] sm:$0xf]  ;;  %s14487_s0 = sld [smem:[#allocation8_spill]] }
 0xe64   : > { %v9229_v36 = vpop.f32.mrf.mxu0  ;;  %v9253_v25 = vpop.f32.mrf.mxu1 }
 0xe6e   : > { %v4009_v4 = vpop.f32.mrf.mxu0  ;;  %v4132_v26 = vpop.f32.mrf.mxu1 }
 0xe70   : > { %v9240_v41 = vpop.f32.mrf.mxu0  ;;  %v9276_v51 = vpop.f32.mrf.mxu1 }
 0xe71   : > { %v5195_v41 = vld [vmem:[%s14485_s5] sm:$0xff] }
 0xe72   : > { %v4012_v7 = vpop.f32.mrf.mxu0  ;;  %v4135_v1 = vpop.f32.mrf.mxu1  ;;  %v4680_v51 = vld [vmem:[%s14487_s0] sm:$0xff] }
 0xe73   : > { %v4266_v16 = vpack.c.bf16 %v4135_v1, %v4132_v26  ;;  %v4263_v27 = vpack.c.bf16 %v4012_v7, %v4009_v4  ;;  %v4681_v26 = vld [vmem:[%s14487_s0 + $0x8] sm:$0xff]  ;;  %v4948_v7 = vld [vmem:[%s14486_s7] sm:$0xff]  ;;  %s14546_s0 = smov 15  }
 0xe74   : > { %v9241_v42 = vpop.f32.mrf.mxu0  ;;  %v9277_v35 = vpop.f32.mrf.mxu1 }
 0xe7e   : > { %v4091_v21 = vpop.f32.mrf.mxu0  ;;  %v4214_v8 = vpop.f32.mrf.mxu1 }
 0xe80   : > { %v9264_v49 = vpop.f32.mrf.mxu0  ;;  %v9300_v24 = vpop.f32.mrf.mxu1 }
 0xe82   : > { %v4094_v40 = vpop.f32.mrf.mxu0  ;;  %v4217_v47 = vpop.f32.mrf.mxu1 }
 0xe83   : > { %v4268_v59 = vpack.c.bf16 %v4217_v47, %v4214_v8  ;;  %v4265_v11 = vpack.c.bf16 %v4094_v40, %v4091_v21 }
 0xe84   : > { %v9265_v14 = vpop.f32.mrf.mxu0  ;;  %v9301_v5 = vpop.f32.mrf.mxu1 }
 0xe85   : > { %4285 = vmatpush1.bf16.msra.mxu1 %v4268_v59 }
 0xe86   : > { %4286 = vmatprep.subr.bf16.mxu1 %v14481_v55 }
 0xe8e   : > { %v4173_v13 = vpop.f32.mrf.mxu0 }
 0xe90   : > { %v9288_v29 = vpop.f32.mrf.mxu0 }
 0xe92   : > { %v4176_v30 = vpop.f32.mrf.mxu0 }
 0xe93   : > { %v4267_v61 = vpack.c.bf16 %v4176_v30, %v4173_v13 }
 0xe94   : > { %v9289_v32 = vpop.f32.mrf.mxu0 }
 0xe95   : > { %4287 = vmatpush1.bf16.msra.mxu1 %v4267_v61 }
 0xe96   : > { %4288 = vmatprep.subr.bf16.mxu1 %v14481_v55 }
 0xe99   : > { %4289 = vmatpush1.bf16.msra.mxu1 %v4266_v16 }
 0xe9a   : > { %4290 = vmatprep.subr.bf16.mxu1 %v14481_v55 }
 0xe9d   : > { %4291 = vmatpush1.bf16.msra.mxu1 %v10582_v22 }
 0xe9e   : > { %v4255_v34 = vpop.f32.mrf.mxu0  ;;  %4292 = vmatprep.subr.bf16.mxu1 %v14481_v55 }
 0xea0   : > { %v9312_v17 = vpop.f32.mrf.mxu0 }
 0xea1   : > { %4293 = vmatpush1.bf16.msra.mxu1 %v4265_v11 }
 0xea2   : > { %v4258_v6 = vpop.f32.mrf.mxu0  ;;  %4294 = vmatprep.subr.bf16.mxu1 %v14481_v55 }
 0xea3   : > { %v4269_v22 = vpack.c.bf16 %v4258_v6, %v4255_v34 }
 0xea4   : > { %v9313_v52 = vpop.f32.mrf.mxu0 }
 0xea5   : > { %4295 = vmatpush1.bf16.msra.mxu1 %v4264_v39 }
 0xea6   : > { %4296 = vmatprep.subr.bf16.mxu1 %v14481_v55 }
 0xea9   : > { %4297 = vmatpush1.bf16.msra.mxu1 %v4263_v27 }
 0xeaa   : > { %4298 = vmatprep.subr.bf16.mxu1 %v14481_v55 }
 0xead   : > { %4299 = vmatpush1.bf16.msra.mxu1 %v4262_v23 }
 0xeae   : > { %4314 = vmatprep.subr.bf16.mxu1 %v14481_v55 }
 0xeb1   : > { %4315 = vmatpush2.bf16.msra.mxu1 %v4269_v22 }
 0xeb4   : > { %4317 = vmatmul.mubr.bf16.vlgmr.msra.gmra.mxu1 %v9472_v0 }
 0xeb5   : > { %4738 = vmatprep.mubr.bf16.mxu1 %v14481_v55 }
 0xf74   : > { %v4318_v58 = vpop.f32.mrf.mxu1 }
 0xf75   : > { %v4327_v63 = vmul.f32 %v4318_v58, %v10084_v44  ;;  %vm4325_vm15 = vcmp.ge.f32.partialorder %v4318_v58, 0.0 }
 0xf76   : > { %v4320_v60 = vpop.f32.mrf.mxu1 }
 0xf77   : > { %v4329_v62 = vsel %vm4325_vm15, %v4318_v58, %v4327_v63  ;;  %vm5076_vm15 = vcmp.lt.s32.totalorder %v9910_v10, 60 }
 0xf78   : > { %v4321_v15 = vpop.f32.mrf.mxu1 }
 0xf79   : > { %vm4326_vm13 = vcmp.ge.f32.partialorder %v4321_v15, 0.0  ;;  %v4328_v19 = vmul.f32 %v4321_v15, %v10084_v44 }
 0xf7a   : > { %v4323_v12 = vpop.f32.mrf.mxu1 }
 0xf7b   : > { %v4330_v45 = vsel %vm4326_vm13, %v4321_v15, %v4328_v19  ;;  %vm4918_vm13 = vcmp.lt.s32.totalorder %v9910_v10, 94 }
 0xf7c   : > { %v4331_v46 = vpack.c.bf16 %v4330_v45, %v4329_v62  ;;  %v14489_v62 = vld [vmem:[#allocation36_spill] sm:$0xff] }
 0xf7e   : > { %8677 = vmatmul.mubr.msk.bf16.vlgmr.msra.gmra.mxu0 %vm1984_vm10, %v4331_v46  ;;  %v14490_v46 = vld [vmem:[#allocation34_spill] sm:$0xff]  ;;  %vm14503_vm10 = vcmask 588800  }
 0xf7f   : > { %4464 = vmatprep.mubr.bf16.mxu0 %v14481_v55 }
0x103e   : > { %v4417_v50 = vpop.f32.mrf.mxu0 }
0x1040   : > { %v4419_v9 = vpop.f32.mrf.mxu0 }
0x1042   : > { %v4421_v18 = vpop.f32.mrf.mxu0 }
0x1043   : > { %v4427_v20 = vpack.c.bf16 %v4421_v18, %v4417_v50 }
0x1044   : > { %v4423_v38 = vpop.f32.mrf.mxu0 }
0x1045   : > { %v4428_v3 = vpack.c.bf16 %v4423_v38, %v4419_v9  ;;  %v14491_v9 = vld [vmem:[#allocation33_spill] sm:$0xff] }
0x1047   : > { %4446 = vmatprep.subr.bf16.mxu0 %v4428_v3 }
0x1048   : > { %4447 = vmatpush1.bf16.msra.mxu0 %v4427_v20 }
0x104b   : > { %8678 = vmatmul.mubr.msk.bf16.vlgmr.msra.gmra.mxu0 %vm1540_vm0, %v4426_v37 }
0x104c   : > { %4589 = vmatprep.mubr.bf16.mxu0 %v14481_v55 }
0x110b   : > { %v4466_v56 = vpop.f32.mrf.mxu0 }
0x110c   : > { %v10689_v23 = vadd.f32 %v4466_v56, %v10199_v54  ;;  %v5196_v54 = vld [vmem:[%s14485_s5 + $0x8] sm:$0xff]  ;;  %s14615_s5 = sld [smem:[#allocation17_spill]] }
0x110d   : > { %v4468_v39 = vpop.f32.mrf.mxu0 }
0x110e   : > { %v10692_v36 = vadd.f32 %v4468_v39, %v10201_v57  ;;  %4529 = vrot.lane.b32.xlu0 %v10689_v23, %s14224_s12  ;;  %v4949_v57 = vld [vmem:[%s14486_s7 + $0x8] sm:$0xff] }
0x110f   : > { %v4470_v25 = vpop.f32.mrf.mxu0 }
0x1110   : > { %4531 = vrot.lane.b32.xlu1 %v10692_v36, %s14224_s12  ;;  %v14492_v25 = vld [vmem:[#allocation37_spill] sm:$0xff] }
0x1111   : > { %v4471_v4 = vpop.f32.mrf.mxu0 }
0x1112   : > { %4513 = vrot.lane.b32.xlu0 %v10689_v23, %s14226_s30 }
0x1114   : > { %4515 = vrot.lane.b32.xlu1 %v10692_v36, %s14226_s30 }
0x1116   : > { %4521 = vrot.lane.b32.xlu0 %v10689_v23, %s14220_s18 }
0x1118   : > { %4523 = vrot.lane.b32.xlu1 %v10692_v36, %s14220_s18  ;;  %s14488_s18 = sld [smem:[#allocation13_spill]] }
0x111a   : > { %4505 = vrot.lane.b32.xlu0 %v10689_v23, %s14228_s22 }
0x111c   : > { %4507 = vrot.lane.b32.xlu1 %v10692_v36, %s14228_s22 }
0x111e   : > { %4489 = vrot.lane.b32.xlu0 %v10689_v23, %s14267_s20  ;;  %v8710_v1 = vld [vmem:[%s14488_s18 + $0x68] sm:$0xff]  ;;  %v5330_v42 = vld [vmem:[%s14488_s18 + $0x30] sm:$0xff]  ;;  %v5328_v35 = vld [vmem:[%s14488_s18 + $0x20] sm:$0xff] }
0x111f   : > { %v8717_v21 = vld [vmem:[%s14488_s18 + $0xa0] sm:$0xff]  ;;  %v8708_v8 = vld [vmem:[%s14488_s18 + $0x58] sm:$0xff]  ;;  %v5329_v49 = vld [vmem:[%s14488_s18 + $0x28] sm:$0xff] }
0x1120   : > { %4491 = vrot.lane.b32.xlu1 %v10692_v36, %s14267_s20  ;;  %v8724_v24 = vld [vmem:[%s14488_s18 + $0xd8] sm:$0xff]  ;;  %v8709_v40 = vld [vmem:[%s14488_s18 + $0x60] sm:$0xff]  ;;  %v8715_v59 = vld [vmem:[%s14488_s18 + $0x90] sm:$0xff] }
0x1121   : > { %v8716_v47 = vld [vmem:[%s14488_s18 + $0x98] sm:$0xff]  ;;  %v5326_v14 = vld [vmem:[%s14488_s18 + $0x10] sm:$0xff]  ;;  %v8706_v13 = vld [vmem:[%s14488_s18 + $0x48] sm:$0xff] }
0x1122   : > { %4497 = vrot.lane.b32.xlu0 %v10689_v23, %s14230_s26  ;;  %v8731_v5 = vld [vmem:[%s14488_s18 + $0x110] sm:$0xff]  ;;  %v5327_v29 = vld [vmem:[%s14488_s18 + $0x18] sm:$0xff]  ;;  %v8722_v30 = vld [vmem:[%s14488_s18 + $0xc8] sm:$0xff] }
0x1123   : > { %v8707_v61 = vld [vmem:[%s14488_s18 + $0x50] sm:$0xff]  ;;  %v8738_v32 = vld [vmem:[%s14488_s18 + $0x148] sm:$0xff] }
0x1124   : > { %4499 = vrot.lane.b32.xlu1 %v10692_v36, %s14230_s26  ;;  %v8723_v16 = vld [vmem:[%s14488_s18 + $0xd0] sm:$0xff] }
0x1126   : > { %4473 = vrot.lane.b32.xlu0 %v10689_v23, %s14232_s2 }
0x1128   : > { %4475 = vrot.lane.b32.xlu1 %v10692_v36, %s14232_s2 }
0x112a   : > { %4481 = vrot.lane.b32.xlu0 %v10689_v23, %s14222_s28 }
0x112c   : > { %4483 = vrot.lane.b32.xlu1 %v10692_v36, %s14222_s28  ;;  %s14498_s28 = sld [smem:[#allocation6_spill]] }
0x112e   : > { %5204 = vperm.xlu0 %9388, %v5196_v54   ;;  %v14493_v54 = vld [vmem:[#allocation38_spill] sm:$0xff] }
0x1130   : > { %4957 = vperm.xlu1 %9389, %v4949_v57  }
0x1132   : > { %4689 = vperm.xlu0 %9388, %v4681_v26  }
0x1134   : > { %5199 = vperm.xlu1 %9389, %v5195_v41  }
0x1136   : > { %4684 = vperm.xlu0 %9388, %v4680_v51  }
0x1138   : > { %4952 = vperm.xlu1 %9389, %v4948_v7  }
0x113a   : > { %5468 = vperm.xlu0 %9388, %v8710_v1  }
0x113c   : > { %5363 = vperm.xlu1 %9389, %v5330_v42  }
0x113e   : > { %5353 = vperm.xlu0 %9388, %v5328_v35  }
0x1140   : > { %5587 = vperm.xlu1 %9389, %v8717_v21  }
0x1142   : > { %5458 = vperm.xlu0 %9388, %v8708_v8  }
0x1144   : > { %5358 = vperm.xlu1 %9389, %v5329_v49  }
0x1146   : > { %5706 = vperm.xlu0 %9388, %v8724_v24  }
0x1148   : > { %5463 = vperm.xlu1 %9389, %v8709_v40   ;;  %v14495_v40 = vld [vmem:[#allocation42_spill] sm:$0xff] }
0x114a   : > { %5582 = vperm.xlu0 %9388, %v8716_v47   ;;  %v14496_v47 = vld [vmem:[#allocation39_spill] sm:$0xff] }
0x114c   : > { %5577 = vperm.xlu1 %9389, %v8715_v59  }
0x114e   : > { %5343 = vperm.xlu0 %9388, %v5326_v14   ;;  %v14497_v14 = vld [vmem:[#allocation40_spill] sm:$0xff] }
0x1150   : > { %5777 = vperm.xlu1 %9389, %v8731_v5  }
0x1152   : > { %5448 = vperm.xlu0 %9388, %v8706_v13  }
0x1154   : > { %5348 = vperm.xlu1 %9389, %v5327_v29  }
0x1156   : > { %5696 = vperm.xlu0 %9388, %v8722_v30  }
0x1158   : > { %5453 = vperm.xlu1 %9389, %v8707_v61  }
0x115a   : > { %5896 = vperm.xlu0 %9388, %v8738_v32  }
0x115c   : > { %5701 = vperm.xlu1 %9389, %v8723_v16  }
0x1180   : > { %v4530_v34 = vpop.permute.xlu0 %4529 }
0x1182   : > { %v4532_v11 = vpop.permute.xlu1 %4531 }
0x1183   : > { %v4533_v17 = vsel %vm1493_vm8, %v4530_v34, %v4532_v11  ;;  %v4534_v6 = vsel %vm1493_vm8, %v4532_v11, %v4530_v34 }
0x1184   : > { %v4535_v52 = vmul.f32 %v4533_v17, %v10065_v28  ;;  %v4536_v27 = vmul.f32 %v4534_v6, %v10068_v31  ;;  %v4514_v22 = vpop.permute.xlu0 %4513 }
0x1186   : > { %v4545_v0 = vpack.c.bf16 %v4535_v52, %v4535_v52  ;;  %v4546_v43 = vpack.c.bf16 %v4536_v27, %v4536_v27  ;;  %v4516_v2 = vpop.permute.xlu1 %4515  ;;  %v14499_v52 = vld [vmem:[#allocation45_spill] sm:$0xff] }
0x1187   : > { %v4517_v58 = vsel %vm1433_vm2, %v4514_v22, %v4516_v2  ;;  %v4518_v60 = vsel %vm1433_vm2, %v4516_v2, %v4514_v22  ;;  %v14500_v22 = vld [vmem:[#allocation46_spill] sm:$0xff] }
0x1188   : > { %8679 = vmatprep.subr.msk.bf16.mxu0 %vm1671_vm11, %v4546_v43  ;;  %v4522_v48 = vpop.permute.xlu0 %4521  ;;  %v4552_v53 = vsel %vm1671_vm11, %v4545_v0, 0  ;;  %v4519_v12 = vmul.f32 %v4517_v58, %v9939_v33  ;;  %v4520_v45 = vmul.f32 %v4518_v60, %v14489_v62  ;;  %v14501_v43 = vld [vmem:[#allocation43_spill] sm:$0xff] }
0x1189   : > { %4564 = vmatpush1.bf16.msra.mxu0 %v4552_v53 }
0x118a   : > { %v4524_v63 = vpop.permute.xlu1 %4523 }
0x118b   : > { %v4525_v15 = vsel %vm1463_vm1, %v4522_v48, %v4524_v63  ;;  %v4526_v19 = vsel %vm1463_vm1, %v4524_v63, %v4522_v48  ;;  %v14502_v48 = vld [vmem:[#allocation44_spill] sm:$0xff]  ;;  %v4547_v63 = vld [vmem:[%s14498_s28] sm:$0xf]  ;;  %s14504_s28 = smov 112  }
0x118c   : > { %v4527_v50 = vmul.f32 %v4525_v15, %v14490_v46  ;;  %v4528_v18 = vmul.f32 %v4526_v19, %v14491_v9  ;;  %v4506_v38 = vpop.permute.xlu0 %4505 }
0x118e   : > { %v4543_v3 = vpack.c.bf16 %v4527_v50, %v4519_v12  ;;  %v4508_v20 = vpop.permute.xlu1 %4507  ;;  %v4544_v37 = vpack.c.bf16 %v4528_v18, %v4520_v45 }
0x118f   : > { %v4509_v56 = vsel %vm1403_vm3, %v4506_v38, %v4508_v20  ;;  %v4510_v39 = vsel %vm1403_vm3, %v4508_v20, %v4506_v38 }
0x1190   : > { %v4511_v4 = vmul.f32 %v4509_v56, %v14492_v25  ;;  %v4512_v57 = vmul.f32 %v4510_v39, %v14493_v54  ;;  %4565 = vmatprep.subr.bf16.mxu0 %v4544_v37  ;;  %v4490_v26 = vpop.permute.xlu0 %4489 }
0x1191   : > { %4566 = vmatpush1.bf16.msra.mxu0 %v4543_v3 }
0x1192   : > { %v4541_v41 = vpack.c.bf16 %v4511_v4, %v10689_v23  ;;  %v4492_v51 = vpop.permute.xlu1 %4491  ;;  %v4542_v7 = vpack.c.bf16 %v4512_v57, %v10692_v36  ;;  %v14494_v23 = vld [vmem:[#allocation41_spill] sm:$0xff] }
0x1193   : > { %v4493_v42 = vsel %vm1343_vm5, %v4490_v26, %v4492_v51  ;;  %v4494_v35 = vsel %vm1343_vm5, %v4492_v51, %v4490_v26 }
0x1194   : > { %4567 = vmatprep.subr.bf16.mxu0 %v4542_v7  ;;  %v4498_v1 = vpop.permute.xlu0 %4497  ;;  %v4495_v24 = vmul.f32 %v4494_v35, %v14494_v23  ;;  %v4496_v36 = vmul.f32 %v4493_v42, %v14495_v40 }
0x1195   : > { %4568 = vmatpush1.bf16.msra.mxu0 %v4541_v41 }
0x1196   : > { %v4500_v21 = vpop.permute.xlu1 %4499 }
0x1197   : > { %v4501_v8 = vsel %vm1373_vm4, %v4498_v1, %v4500_v21  ;;  %v4502_v49 = vsel %vm1373_vm4, %v4500_v21, %v4498_v1  ;;  %v8714_v21 = vld [vmem:[%s14488_s18 + $0x88] sm:$0xff] }
0x1198   : > { %v4503_v59 = vmul.f32 %v4502_v49, %v14496_v47  ;;  %v4504_v5 = vmul.f32 %v4501_v8, %v14497_v14  ;;  %v4474_v13 = vpop.permute.xlu0 %4473  ;;  %v8713_v49 = vld [vmem:[%s14488_s18 + $0x80] sm:$0xff] }
0x119a   : > { %v4539_v29 = vpack.c.bf16 %v4503_v59, %v4495_v24  ;;  %v4476_v30 = vpop.permute.xlu1 %4475  ;;  %v4540_v61 = vpack.c.bf16 %v4504_v5, %v4496_v36  ;;  %v8730_v24 = vld [vmem:[%s14488_s18 + $0x108] sm:$0xff]  ;;  %v8729_v59 = vld [vmem:[%s14488_s18 + $0x100] sm:$0xff] }
0x119b   : > { %v4477_v32 = vsel %vm1284_vm7, %v4474_v13, %v4476_v30  ;;  %v4478_v16 = vsel %vm1284_vm7, %v4476_v30, %v4474_v13  ;;  %v5324_v13 = vld [vmem:[%s14488_s18] sm:$0xff] }
0x119c   : > { %4569 = vmatprep.subr.bf16.mxu0 %v4540_v61  ;;  %v4482_v34 = vpop.permute.xlu0 %4481  ;;  %v4479_v27 = vmul.f32 %v4478_v16, %v14499_v52  ;;  %v4480_v0 = vmul.f32 %v4477_v32, %v14500_v22  ;;  %v8704_v61 = vld [vmem:[%s14488_s18 + $0x38] sm:$0xff]  ;;  %v5325_v16 = vld [vmem:[%s14488_s18 + $0x8] sm:$0xff] }
0x119d   : > { %4570 = vmatpush1.bf16.msra.mxu0 %v4539_v29  ;;  %v8745_v29 = vld [vmem:[%s14488_s18 + $0x180] sm:$0xff] }
0x119e   : > { %v4484_v11 = vpop.permute.xlu1 %4483 }
0x119f   : > { %v4485_v17 = vsel %vm1313_vm6, %v4482_v34, %v4484_v11  ;;  %v4486_v6 = vsel %vm1313_vm6, %v4484_v11, %v4482_v34  ;;  %v8720_v34 = vld [vmem:[%s14488_s18 + $0xb8] sm:$0xff] }
0x11a0   : > { %v4487_v2 = vmul.f32 %v4486_v6, %v14501_v43  ;;  %v4488_v53 = vmul.f32 %v4485_v17, %v14502_v48  ;;  %v8705_v17 = vld [vmem:[%s14488_s18 + $0x40] sm:$0xff] }
0x11a2   : > { %v4537_v58 = vpack.c.bf16 %v4487_v2, %v4479_v27  ;;  %v4538_v60 = vpack.c.bf16 %v4488_v53, %v4480_v0  ;;  %v8736_v27 = vld [vmem:[%s14488_s18 + $0x138] sm:$0xff]  ;;  %v8721_v0 = vld [vmem:[%s14488_s18 + $0xc0] sm:$0xff] }
0x11a3   : > { %v8752_v53 = vld [vmem:[%s14488_s18 + $0x1b8] sm:$0xff] }
0x11a4   : > { %4571 = vmatprep.subr.bf16.mxu0 %v4538_v60  ;;  %v8737_v60 = vld [vmem:[%s14488_s18 + $0x140] sm:$0xff] }
0x11a5   : > { %4572 = vmatpush1.bf16.msra.mxu0 %v4537_v58 }
0x11a8   : > { %8680 = vmatmul.mubr.msk.bf16.vlgmr.msra.gmra.mxu0 %vm14503_vm10, %v4547_v63  ;;  %v8712_v63 = vld [vmem:[%s14488_s18 + $0x78] sm:$0xff] }
0x11a9   : > { %5006 = vmatprep.mubr.bf16.mxu0 %v14481_v55  ;;  %v10849_v20 = vpop.permute.xlu0 %5204 }
0x11ab   : > { %v10852_v37 = vpop.permute.xlu1 %4957 }
0x11ad   : > { %v10856_v56 = vpop.permute.xlu0 %4689 }
0x11af   : > { %v10859_v39 = vpop.permute.xlu1 %5199 }
0x11b1   : > { %v10863_v4 = vpop.permute.xlu0 %4684 }
0x11b3   : > { %v10866_v57 = vpop.permute.xlu1 %4952 }
0x11b5   : > { %v10870_v26 = vpop.permute.xlu0 %5468 }
0x11b6   : > { %14506 = vst [vmem:[#allocation52_spill] sm:$0xff] %v10870_v26 }
0x11b7   : > { %v10873_v41 = vpop.permute.xlu1 %5363 }
0x11b8   : > { %14507 = vst [vmem:[#allocation53_spill] sm:$0xff] %v10873_v41  ;;  %v14530_v41 = vld [vmem:[#allocation31_spill] sm:$0xff] }
0x11b9   : > { %v10877_v51 = vpop.permute.xlu0 %5353 }
0x11ba   : > { %14508 = vst [vmem:[#allocation54_spill] sm:$0xff] %v10877_v51 }
0x11bb   : > { %v10880_v7 = vpop.permute.xlu1 %5587 }
0x11bc   : > { %14509 = vst [vmem:[#allocation55_spill] sm:$0xff] %v10880_v7 }
0x11bd   : > { %v10884_v1 = vpop.permute.xlu0 %5458 }
0x11be   : > { %14510 = vst [vmem:[#allocation56_spill] sm:$0xff] %v10884_v1 }
0x11bf   : > { %v10887_v42 = vpop.permute.xlu1 %5358 }
0x11c0   : > { %14511 = vst [vmem:[#allocation57_spill] sm:$0xff] %v10887_v42 }
0x11c1   : > { %v10891_v35 = vpop.permute.xlu0 %5706 }
0x11c2   : > { %14512 = vst [vmem:[#allocation58_spill] sm:$0xff] %v10891_v35  ;;  %v14529_v35 = vld [vmem:[#allocation32_spill] sm:$0xff] }
0x11c3   : > { %v10895_v8 = vpop.permute.xlu1 %5463 }
0x11c4   : > { %14513 = vst [vmem:[#allocation59_spill] sm:$0xff] %v10895_v8 }
0x11c5   : > { %v10900_v36 = vpop.permute.xlu0 %5582 }
0x11c6   : > { %14514 = vst [vmem:[#allocation60_spill] sm:$0xff] %v10900_v36 }
0x11c7   : > { %v10903_v5 = vpop.permute.xlu1 %5577 }
0x11c8   : > { %14515 = vst [vmem:[#allocation61_spill] sm:$0xff] %v10903_v5  ;;  %v8732_v5 = vld [vmem:[%s14488_s18 + $0x118] sm:$0xff] }
0x11c9   : > { %v10907_v30 = vpop.permute.xlu0 %5343 }
0x11ca   : > { %14516 = vst [vmem:[#allocation62_spill] sm:$0xff] %v10907_v30 }
0x11cb   : > { %v10910_v32 = vpop.permute.xlu1 %5777 }
0x11cc   : > { %14517 = vst [vmem:[#allocation63_spill] sm:$0xff] %v10910_v32 }
0x11cd   : > { %v10914_v11 = vpop.permute.xlu0 %5448 }
0x11ce   : > { %14518 = vst [vmem:[#allocation64_spill] sm:$0xff] %v10914_v11 }
0x11cf   : > { %v10917_v6 = vpop.permute.xlu1 %5348 }
0x11d1   : > { %v10921_v2 = vpop.permute.xlu0 %5696 }
0x11d2   : > { %14519 = vst [vmem:[#allocation65_spill] sm:$0xff] %v10921_v2 }
0x11d3   : > { %v10924_v58 = vpop.permute.xlu1 %5453 }
0x1268   : > { %v4591_v15 = vpop.f32.mrf.mxu0 }
0x1269   : > { %vm4598_vm14 = vcmp.ge.f32.partialorder %v4591_v15, 0.0  ;;  %v4600_v19 = vmul.f32 %v4591_v15, %v10084_v44 }
0x126a   : > { %v4593_v12 = vpop.f32.mrf.mxu0 }
0x126b   : > { %v10806_v45 = vsel %vm4598_vm14, %v4591_v15, %v4600_v19  ;;  %vm4599_vm12 = vcmp.ge.f32.partialorder %v4593_v12, 0.0  ;;  %v4601_v50 = vmul.f32 %v4593_v12, %v10084_v44  ;;  %v10928_v15 = vpop.permute.xlu0 %5896  ;;  %v8711_v19 = vld [vmem:[%s14488_s18 + $0x70] sm:$0xff]  ;;  %vm5033_vm14 = vcmp.lt.s32.totalorder %v9910_v10, 68 }
0x126c   : > { %4660 = vrot.lane.b32.xlu0 %v10806_v45, %s14224_s12  ;;  %v4595_v18 = vpop.f32.mrf.mxu0  ;;  %14520 = vst [vmem:[#allocation66_spill] sm:$0xff] %v10928_v15  ;;  %v8742_v15 = vld [vmem:[%s14488_s18 + $0x168] sm:$0xff] }
0x126d   : > { %v10811_v38 = vsel %vm4599_vm12, %v4593_v12, %v4601_v50  ;;  %v10931_v12 = vpop.permute.xlu1 %5701  ;;  %v8728_v50 = vld [vmem:[%s14488_s18 + $0xf8] sm:$0xff]  ;;  %vm5054_vm12 = vcmp.lt.s32.totalorder %v9910_v10, 64 }
0x126e   : > { %4662 = vrot.lane.b32.xlu1 %v10811_v38, %s14224_s12  ;;  %v4596_v3 = vpop.f32.mrf.mxu0  ;;  %s14505_s12 = smov 16   ;;  %14521 = vst [vmem:[#allocation67_spill] sm:$0xff] %v10931_v12 }
0x126f   : > { %v8727_v3 = vld [vmem:[%s14488_s18 + $0xf0] sm:$0xff] }
0x1270   : > { %4644 = vrot.lane.b32.xlu0 %v10806_v45, %s14226_s30 }
0x1272   : > { %4646 = vrot.lane.b32.xlu1 %v10811_v38, %s14226_s30  ;;  %s9582_s30 = smov 60  }
0x1274   : > { %4652 = vrot.lane.b32.xlu0 %v10806_v45, %s14504_s28 }
0x1276   : > { %4654 = vrot.lane.b32.xlu1 %v10811_v38, %s14504_s28 }
0x1278   : > { %4636 = vrot.lane.b32.xlu0 %v10806_v45, %s14228_s22 }
0x127a   : > { %4638 = vrot.lane.b32.xlu1 %v10811_v38, %s14228_s22  ;;  %s9583_s22 = smov 94  }
0x127c   : > { %4620 = vrot.lane.b32.xlu0 %v10806_v45, %s14267_s20 }
0x127e   : > { %4622 = vrot.lane.b32.xlu1 %v10811_v38, %s14267_s20 }
0x1280   : > { %4628 = vrot.lane.b32.xlu0 %v10806_v45, %s14230_s26 }
0x1282   : > { %4630 = vrot.lane.b32.xlu1 %v10811_v38, %s14230_s26  ;;  %s9584_s26 = smov 68  }
0x1284   : > { %4604 = vrot.lane.b32.xlu0 %v10806_v45, %s14232_s2 }
0x1286   : > { %4606 = vrot.lane.b32.xlu1 %v10811_v38, %s14232_s2  ;;  %s9585_s2 = smov 64  }
0x1288   : > { %4612 = vrot.lane.b32.xlu0 %v10806_v45, %s14505_s12 }
0x128a   : > { %4614 = vrot.lane.b32.xlu1 %v10811_v38, %s14505_s12 }
0x128c   : > { %5072 = vrot.lane.b32.xlu0 %v10806_v45, %s9582_s30 }
0x128e   : > { %5074 = vrot.lane.b32.xlu1 %v10811_v38, %s9582_s30  ;;  %s9586_s30 = smov 98  }
0x1290   : > { %4914 = vrot.lane.b32.xlu0 %v10806_v45, %s9583_s22 }
0x1292   : > { %4916 = vrot.lane.b32.xlu1 %v10811_v38, %s9583_s22  ;;  %s9587_s22 = smov 96  }
0x1294   : > { %5029 = vrot.lane.b32.xlu0 %v10806_v45, %s9584_s26 }
0x1296   : > { %5031 = vrot.lane.b32.xlu1 %v10811_v38, %s9584_s26  ;;  %s9588_s26 = smov 124  }
0x1298   : > { %5050 = vrot.lane.b32.xlu0 %v10806_v45, %s9585_s2 }
0x129a   : > { %5052 = vrot.lane.b32.xlu1 %v10811_v38, %s9585_s2  ;;  %s9589_s2 = smov 126  }
0x129c   : > { %4870 = vrot.lane.b32.xlu0 %v10806_v45, %s9586_s30 }
0x129e   : > { %4872 = vrot.lane.b32.xlu1 %v10811_v38, %s9586_s30  ;;  %s9590_s30 = smov 4  }
0x12a0   : > { %4892 = vrot.lane.b32.xlu0 %v10806_v45, %s9587_s22 }
0x12a2   : > { %4894 = vrot.lane.b32.xlu1 %v10811_v38, %s9587_s22  ;;  %s9591_s22 = smov 30  }
0x12a4   : > { %5116 = vrot.lane.b32.xlu0 %v10806_v45, %s9588_s26 }
0x12a6   : > { %5118 = vrot.lane.b32.xlu1 %v10811_v38, %s9588_s26  ;;  %s9592_s26 = smov 2  }
0x12a8   : > { %4848 = vrot.lane.b32.xlu0 %v10806_v45, %s9589_s2 }
0x12aa   : > { %4850 = vrot.lane.b32.xlu1 %v10811_v38, %s9589_s2  ;;  %s9593_s2 = smov 34  }
0x12ac   : > { %5094 = vrot.lane.b32.xlu0 %v10806_v45, %s9590_s30 }
0x12ae   : > { %5096 = vrot.lane.b32.xlu1 %v10811_v38, %s9590_s30  ;;  %s9594_s30 = smov 32  }
0x12b0   : > { %4804 = vrot.lane.b32.xlu0 %v10806_v45, %s9591_s22 }
0x12b2   : > { %4806 = vrot.lane.b32.xlu1 %v10811_v38, %s9591_s22  ;;  %s14526_s22 = sld [smem:[#allocation29_spill]] }
0x12b4   : > { %4826 = vrot.lane.b32.xlu0 %v10806_v45, %s9592_s26 }
0x12b6   : > { %4828 = vrot.lane.b32.xlu1 %v10811_v38, %s9592_s26  ;;  %s14527_s26 = sld [smem:[#allocation14_spill]] }
0x12b8   : > { %4761 = vrot.lane.b32.xlu0 %v10806_v45, %s9593_s2 }
0x12ba   : > { %4763 = vrot.lane.b32.xlu1 %v10811_v38, %s9593_s2  ;;  %s14528_s2 = sld [smem:[#allocation28_spill]] }
0x12bc   : > { %4782 = vrot.lane.b32.xlu0 %v10806_v45, %s9594_s30  ;;  %v6290_v12 = vld [vmem:[%s14527_s26 + $0x30] sm:$0xff] }
0x12be   : > { %4784 = vrot.lane.b32.xlu1 %v10811_v38, %s9594_s30  ;;  %s14531_s30 = sld [smem:[#allocation7_spill]] }
0x12c0   : > { %5572 = vperm.xlu0 %9388, %v8714_v21   ;;  %v8690_v36 = vld [vmem:[%s14528_s2 + $0x10] sm:$0x3] }
0x12c1   : > { %v4927_v2 = vrot.slane %v8690_v36, %v14529_v35  ;;  %v4931_v30 = vrot.slane %v8690_v36, %v14530_v41 }
0x12c2   : > { %5567 = vperm.xlu1 %9389, %v8713_v49  }
0x12c4   : > { %5772 = vperm.xlu0 %9388, %v8730_v24   ;;  %v9485_v11 = vld [vmem:[%s14531_s30] sm:$0xff]   ;;  %s14532_s30 = sld [smem:[#allocation11_spill]] }
0x12c6   : > { %5767 = vperm.xlu1 %9389, %v8729_v59   ;;  %v8744_v59 = vld [vmem:[%s14488_s18 + $0x178] sm:$0xff] }
0x12c8   : > { %5333 = vperm.xlu0 %9388, %v5324_v13  }
0x12ca   : > { %6015 = vperm.xlu1 %9389, %v8745_v29  }
0x12cc   : > { %5438 = vperm.xlu0 %9388, %v8704_v61  }
0x12ce   : > { %5338 = vperm.xlu1 %9389, %v5325_v16   ;;  %v8743_v16 = vld [vmem:[%s14488_s18 + $0x170] sm:$0xff] }
0x12d0   : > { %5686 = vperm.xlu0 %9388, %v8720_v34  }
0x12d2   : > { %5443 = vperm.xlu1 %9389, %v8705_v17  }
0x12d4   : > { %5886 = vperm.xlu0 %9388, %v8736_v27  }
0x12d6   : > { %5691 = vperm.xlu1 %9389, %v8721_v0   ;;  %v8718_v0 = vld [vmem:[%s14488_s18 + $0xa8] sm:$0xff] }
0x12d8   : > { %6134 = vperm.xlu0 %9388, %v8752_v53  }
0x12da   : > { %5891 = vperm.xlu1 %9389, %v8737_v60  }
0x12dc   : > { %5562 = vperm.xlu0 %9388, %v8712_v63  }
0x12de   : > { %5557 = vperm.xlu1 %9389, %v8711_v19   ;;  %v4661_v18 = vpop.permute.xlu0 %4660 }
0x12e0   : > { %5762 = vperm.xlu0 %9388, %v8728_v50   ;;  %v4663_v21 = vpop.permute.xlu1 %4662  ;;  %v8759_v50 = vld [vmem:[%s14488_s18 + $0x1f0] sm:$0xff] }
0x12e1   : > { %v4664_v49 = vsel %vm1493_vm8, %v4661_v18, %v4663_v21  ;;  %v4665_v24 = vsel %vm1493_vm8, %v4663_v21, %v4661_v18 }
0x12e2   : > { %v10941_v13 = vmul.f32 %v4664_v49, %v10065_v28  ;;  %v10944_v29 = vmul.f32 %v4665_v24, %v10068_v31  ;;  %5757 = vperm.xlu1 %9389, %v8727_v3   ;;  %v4645_v61 = vpop.permute.xlu0 %4644  ;;  %v8734_v49 = vld [vmem:[%s14488_s18 + $0x128] sm:$0xff] }
0x12e4   : > { %14522 = vst [vmem:[#allocation68_spill] sm:$0xff] %v10941_v13  ;;  %14523 = vst [vmem:[#allocation69_spill] sm:$0xff] %v10944_v29  ;;  %v4677_v34 = vpack.c.bf16 %v10944_v29, %v10944_v29  ;;  %6010 = vperm.xlu0 %9388, %v8744_v59   ;;  %v4647_v17 = vpop.permute.xlu1 %4646  ;;  %v4676_v27 = vpack.c.bf16 %v10941_v13, %v10941_v13 }
0x12e5   : > { %v4648_v63 = vsel %vm1433_vm2, %v4645_v61, %v4647_v17  ;;  %v4649_v19 = vsel %vm1433_vm2, %v4647_v17, %v4645_v61  ;;  %v8719_v17 = vld [vmem:[%s14488_s18 + $0xb0] sm:$0xff] }
0x12e6   : > { %6005 = vperm.xlu1 %9389, %v8743_v16   ;;  %8682 = vmatprep.subr.msk.bf16.mxu1 %vm1671_vm11, %v4677_v34  ;;  %v4653_v53 = vpop.permute.xlu0 %4652  ;;  %v4701_v60 = vsel %vm1671_vm11, %v4676_v27, 0  ;;  %v10965_v24 = vmul.f32 %v4648_v63, %v9939_v33  ;;  %v10968_v59 = vmul.f32 %v4649_v19, %v14489_v62  ;;  %v8750_v19 = vld [vmem:[%s14488_s18 + $0x1a8] sm:$0xff]  ;;  %v8747_v33 = vld [vmem:[%s14488_s18 + $0x190] sm:$0xff] }
0x12e7   : > { %4713 = vmatpush1.bf16.msra.mxu1 %v4701_v60 }
0x12e8   : > { %5676 = vperm.xlu0 %9388, %v8718_v0   ;;  %v4655_v18 = vpop.permute.xlu1 %4654 }
0x12e9   : > { %v4656_v3 = vsel %vm1463_vm1, %v4653_v53, %v4655_v18  ;;  %v4657_v21 = vsel %vm1463_vm1, %v4655_v18, %v4653_v53 }
0x12ea   : > { %v10971_v61 = vmul.f32 %v4656_v3, %v14490_v46  ;;  %v10974_v16 = vmul.f32 %v4657_v21, %v14491_v9  ;;  %6253 = vperm.xlu1 %9389, %v8759_v50   ;;  %v4637_v34 = vpop.permute.xlu0 %4636  ;;  %v8735_v21 = vld [vmem:[%s14488_s18 + $0x130] sm:$0xff] }
0x12ec   : > { %14524 = vst [vmem:[#allocation70_spill] sm:$0xff] %v10971_v61  ;;  %14525 = vst [vmem:[#allocation71_spill] sm:$0xff] %v10974_v16  ;;  %v4674_v27 = vpack.c.bf16 %v10971_v61, %v10965_v24  ;;  %5876 = vperm.xlu0 %9388, %v8734_v49   ;;  %v4639_v0 = vpop.permute.xlu1 %4638  ;;  %v4675_v53 = vpack.c.bf16 %v10974_v16, %v10968_v59  ;;  %v8700_v61 = vld [vmem:[%s14526_s22 + $0x10] sm:$0x3] }
0x12ed   : > { %v4640_v60 = vsel %vm1403_vm3, %v4637_v34, %v4639_v0  ;;  %v4641_v63 = vsel %vm1403_vm3, %v4639_v0, %v4637_v34  ;;  %v8725_v0 = vld [vmem:[%s14488_s18 + $0xe0] sm:$0xff]  ;;  %v5174_v7 = vrot.slane %v8700_v61, %v14529_v35  ;;  %v5178_v26 = vrot.slane %v8700_v61, %v14530_v41 }
0x12ee   : > { %v10987_v50 = vmul.f32 %v4640_v60, %v14492_v25  ;;  %v10990_v18 = vmul.f32 %v4641_v63, %v14493_v54  ;;  %5681 = vperm.xlu1 %9389, %v8719_v17   ;;  %4714 = vmatprep.subr.bf16.mxu1 %v4675_v53  ;;  %v4621_v3 = vpop.permute.xlu0 %4620  ;;  %v8751_v53 = vld [vmem:[%s14488_s18 + $0x1b0] sm:$0xff]  ;;  %v8687_v54 = vld [vmem:[%s14528_s2 + $0xa] sm:$0x3] }
0x12ef   : > { %4715 = vmatpush1.bf16.msra.mxu1 %v4674_v27  ;;  %v8746_v25 = vld [vmem:[%s14488_s18 + $0x188] sm:$0xff] }
0x12f0   : > { %v4672_v49 = vpack.c.bf16 %v10987_v50, %v10806_v45  ;;  %6124 = vperm.xlu0 %9388, %v8750_v19   ;;  %v4623_v29 = vpop.permute.xlu1 %4622  ;;  %v4673_v34 = vpack.c.bf16 %v10990_v18, %v10811_v38 }
0x12f1   : > { %v4624_v17 = vsel %vm1343_vm5, %v4621_v3, %v4623_v29  ;;  %v4625_v27 = vsel %vm1343_vm5, %v4623_v29, %v4621_v3 }
0x12f2   : > { %5881 = vperm.xlu1 %9389, %v8735_v21   ;;  %4716 = vmatprep.subr.bf16.mxu1 %v4673_v34  ;;  %v4629_v60 = vpop.permute.xlu0 %4628  ;;  %v8741_v34 = vld [vmem:[%s14488_s18 + $0x160] sm:$0xff]  ;;  %v11009_v13 = vmul.f32 %v4625_v27, %v14494_v23  ;;  %v11012_v16 = vmul.f32 %v4624_v17, %v14495_v40 }
0x12f3   : > { %4717 = vmatpush1.bf16.msra.mxu1 %v4672_v49  ;;  %v8757_v17 = vld [vmem:[%s14488_s18 + $0x1e0] sm:$0xff] }
0x12f4   : > { %5747 = vperm.xlu0 %9388, %v8725_v0   ;;  %v4631_v63 = vpop.permute.xlu1 %4630  ;;  %v8726_v0 = vld [vmem:[%s14488_s18 + $0xe8] sm:$0xff] }
0x12f5   : > { %v4632_v19 = vsel %vm1373_vm4, %v4629_v60, %v4631_v63  ;;  %v4633_v21 = vsel %vm1373_vm4, %v4631_v63, %v4629_v60 }
0x12f6   : > { %v11015_v29 = vmul.f32 %v4633_v21, %v14496_v47  ;;  %v11018_v3 = vmul.f32 %v4632_v19, %v14497_v14  ;;  %6129 = vperm.xlu1 %9389, %v8751_v53   ;;  %v4605_v49 = vpop.permute.xlu0 %4604 }
0x12f8   : > { %v4670_v60 = vpack.c.bf16 %v11015_v29, %v11009_v13  ;;  %5995 = vperm.xlu0 %9388, %v8741_v34   ;;  %v4607_v63 = vpop.permute.xlu1 %4606  ;;  %v4671_v27 = vpack.c.bf16 %v11018_v3, %v11012_v16 }
0x12f9   : > { %v4608_v19 = vsel %vm1284_vm7, %v4605_v49, %v4607_v63  ;;  %v4609_v53 = vsel %vm1284_vm7, %v4607_v63, %v4605_v49 }
0x12fa   : > { %5752 = vperm.xlu1 %9389, %v8726_v0   ;;  %4718 = vmatprep.subr.bf16.mxu1 %v4671_v27  ;;  %v4613_v21 = vpop.permute.xlu0 %4612  ;;  %v11041_v49 = vmul.f32 %v4609_v53, %v14499_v52 }
0x12fb   : > { %4719 = vmatpush1.bf16.msra.mxu1 %v4670_v60  ;;  %v11044_v60 = vmul.f32 %v4608_v19, %v14500_v22 }
0x12fc   : > { %6243 = vperm.xlu0 %9388, %v8757_v17   ;;  %v4615_v34 = vpop.permute.xlu1 %4614 }
0x12fd   : > { %v4616_v0 = vsel %vm1313_vm6, %v4613_v21, %v4615_v34  ;;  %v4617_v27 = vsel %vm1313_vm6, %v4615_v34, %v4613_v21  ;;  %v8758_v34 = vld [vmem:[%s14488_s18 + $0x1e8] sm:$0xff] }
0x12fe   : > { %v11047_v63 = vmul.f32 %v4617_v27, %v14501_v43  ;;  %v11050_v17 = vmul.f32 %v4616_v0, %v14502_v48  ;;  %6000 = vperm.xlu1 %9389, %v8742_v15   ;;  %v5073_v21 = vpop.permute.xlu0 %5072  ;;  %v8733_v0 = vld [vmem:[%s14488_s18 + $0x120] sm:$0xff] }
0x1300   : > { %v4668_v61 = vpack.c.bf16 %v11047_v63, %v11041_v49  ;;  %v5075_v53 = vpop.permute.xlu1 %5074  ;;  %6323 = vperm.xlu0 %9388, %v6290_v12   ;;  %v4669_v19 = vpack.c.bf16 %v11050_v17, %v11044_v60 }
0x1301   : > { %v11060_v27 = vsel %vm5076_vm15, %v5073_v21, %v5075_v53  ;;  %v11064_v15 = vsel %vm5076_vm15, %v5075_v53, %v5073_v21  ;;  %vm4874_vm15 = vcmp.lt.s32.totalorder %v9910_v10, 98 }
0x1302   : > { %v5181_v42 = vmul.f32 %v5174_v7, %v11060_v27  ;;  %v5182_v8 = vmul.f32 %v5178_v26, %v11064_v15  ;;  %6248 = vperm.xlu1 %9389, %v8758_v34   ;;  %v4915_v12 = vpop.permute.xlu0 %4914  ;;  %4720 = vmatprep.subr.bf16.mxu1 %v4669_v19  ;;  %v8749_v34 = vld [vmem:[%s14488_s18 + $0x1a0] sm:$0xff]  ;;  %v8698_v19 = vld [vmem:[%s14526_s22 + $0xc] sm:$0x3] }
0x1303   : > { %4721 = vmatpush1.bf16.msra.mxu1 %v4668_v61  ;;  %v8748_v61 = vld [vmem:[%s14488_s18 + $0x198] sm:$0xff] }
0x1304   : > { %v5191_v21 = vpack.c.bf16 %v5181_v42, %v5181_v42  ;;  %v5192_v53 = vpack.c.bf16 %v5182_v8, %v5182_v8  ;;  %v4917_v1 = vpop.permute.xlu1 %4916  ;;  %5871 = vperm.xlu0 %9388, %v8733_v0   ;;  %v8699_v0 = vld [vmem:[%s14526_s22 + $0xe] sm:$0x3] }
0x1305   : > { %v4919_v26 = vsel %vm4918_vm13, %v4915_v12, %v4917_v1  ;;  %v4920_v7 = vsel %vm4918_vm13, %v4917_v1, %v4915_v12  ;;  %v5163_v12 = vrot.slane %v8699_v0, %v14530_v41  ;;  %vm4896_vm13 = vcmp.lt.s32.totalorder %v9910_v10, 96 }
0x1306   : > { %v4934_v51 = vmul.f32 %v4927_v2, %v4919_v26  ;;  %v4935_v36 = vmul.f32 %v4931_v30, %v4920_v7  ;;  %5866 = vperm.xlu1 %9389, %v8732_v5   ;;  %8702 = vmatprep.subr.msk.bf16.mxu1 %vm1671_vm11, %v5192_v53  ;;  %v5030_v42 = vpop.permute.xlu0 %5029  ;;  %v5216_v8 = vsel %vm1671_vm11, %v5191_v21, 0  ;;  %v5144_v5 = vrot.slane %v8698_v19, %v14529_v35  ;;  %v8740_v30 = vld [vmem:[%s14488_s18 + $0x158] sm:$0xff]  ;;  %v8739_v7 = vld [vmem:[%s14488_s18 + $0x150] sm:$0xff] }
0x1307   : > { %8683 = vmatmul.mubr.msk.bf16.vlgmr.msra.gmra.mxu1 %vm14503_vm10, %v9485_v11  ;;  %v5148_v2 = vrot.slane %v8698_v19, %v14530_v41  ;;  %v8756_v19 = vld [vmem:[%s14488_s18 + $0x1d8] sm:$0xff]  ;;  %vm5120_vm10 = vcmp.lt.s32.totalorder %v9910_v10, 124 }
0x1308   : > { %v4944_v31 = vpack.c.bf16 %v4934_v51, %v4934_v51  ;;  %v4945_v28 = vpack.c.bf16 %v4935_v36, %v4935_v36  ;;  %5228 = vmatpush1.bf16.msra.mxu1 %v5216_v8  ;;  %v5032_v1 = vpop.permute.xlu1 %5031  ;;  %6119 = vperm.xlu0 %9388, %v8749_v34   ;;  %v5159_v51 = vrot.slane %v8699_v0, %v14529_v35 }
0x1309   : > { %5253 = vmatprep.mubr.bf16.mxu1 %v14481_v55  ;;  %v11093_v21 = vsel %vm5033_vm14, %v5030_v42, %v5032_v1  ;;  %v11095_v53 = vsel %vm5033_vm14, %v5032_v1, %v5030_v42  ;;  %v8688_v1 = vld [vmem:[%s14528_s2 + $0xc] sm:$0x3]  ;;  %vm4852_vm14 = vcmp.lt.s32.totalorder %v9910_v10, 126 }
0x130a   : > { %6114 = vperm.xlu1 %9389, %v8748_v61   ;;  %v5051_v11 = vpop.permute.xlu0 %5050  ;;  %8692 = vmatprep.subr.msk.bf16.mxu0 %vm1671_vm11, %v4945_v28  ;;  %v4969_v26 = vsel %vm1671_vm11, %v4944_v31, 0  ;;  %v5151_v42 = vmul.f32 %v5144_v5, %v11093_v21  ;;  %v5152_v61 = vmul.f32 %v5148_v2, %v11095_v53  ;;  %v4883_v5 = vrot.slane %v8688_v1, %v14529_v35  ;;  %v6289_v2 = vld [vmem:[%s14527_s26 + $0x28] sm:$0xff] }
0x130b   : > { %4981 = vmatpush1.bf16.msra.mxu0 %v4969_v26  ;;  %v8755_v26 = vld [vmem:[%s14488_s18 + $0x1d0] sm:$0xff] }
0x130c   : > { %v5053_v34 = vpop.permute.xlu1 %5052  ;;  %5990 = vperm.xlu0 %9388, %v8740_v30   ;;  %v8689_v30 = vld [vmem:[%s14528_s2 + $0xe] sm:$0x3] }
0x130d   : > { %v11100_v36 = vsel %vm5054_vm12, %v5051_v11, %v5053_v34  ;;  %v11102_v8 = vsel %vm5054_vm12, %v5053_v34, %v5051_v11  ;;  %vm5098_vm12 = vcmp.lt.s32.totalorder %v9910_v10, 4 }
0x130e   : > { %v5166_v28 = vmul.f32 %v5159_v51, %v11100_v36  ;;  %v5167_v0 = vmul.f32 %v5163_v12, %v11102_v8  ;;  %5985 = vperm.xlu1 %9389, %v8739_v7   ;;  %v4871_v31 = vpop.permute.xlu0 %4870  ;;  %v4887_v51 = vrot.slane %v8688_v1, %v14530_v41  ;;  %v4905_v7 = vrot.slane %v8689_v30, %v14529_v35 }
0x1310   : > { %v5189_v9 = vpack.c.bf16 %v5166_v28, %v5151_v42  ;;  %v4873_v11 = vpop.permute.xlu1 %4872  ;;  %6238 = vperm.xlu0 %9388, %v8756_v19   ;;  %v5190_v34 = vpack.c.bf16 %v5167_v0, %v5152_v61  ;;  %v4909_v42 = vrot.slane %v8689_v30, %v14530_v41  ;;  %v8697_v28 = vld [vmem:[%s14526_s22 + $0xa] sm:$0x3]  ;;  %v6288_v19 = vld [vmem:[%s14527_s26 + $0x20] sm:$0xff] }
0x1311   : > { %v4875_v46 = vsel %vm4874_vm15, %v4871_v31, %v4873_v11  ;;  %v4876_v62 = vsel %vm4874_vm15, %v4873_v11, %v4871_v31  ;;  %vm4808_vm15 = vcmp.lt.s32.totalorder %v9910_v10, 30 }
0x1312   : > { %6233 = vperm.xlu1 %9389, %v8755_v26   ;;  %5229 = vmatprep.subr.bf16.mxu1 %v5190_v34  ;;  %v4893_v12 = vpop.permute.xlu0 %4892  ;;  %v5129_v26 = vrot.slane %v8697_v28, %v14529_v35  ;;  %v5133_v34 = vrot.slane %v8697_v28, %v14530_v41  ;;  %v4890_v30 = vmul.f32 %v4883_v5, %v4875_v46  ;;  %v8694_v5 = vld [vmem:[%s14526_s22 + $0x2] sm:$0x3] }
0x1313   : > { %5230 = vmatpush1.bf16.msra.mxu1 %v5189_v9  ;;  %v4891_v32 = vmul.f32 %v4887_v51, %v4876_v62  ;;  %v4861_v62 = vrot.slane %v8687_v54, %v14529_v35 }
0x1314   : > { %v4895_v61 = vpop.permute.xlu1 %4894  ;;  %6318 = vperm.xlu0 %9388, %v6289_v2  }
0x1315   : > { %v4897_v0 = vsel %vm4896_vm13, %v4893_v12, %v4895_v61  ;;  %v4898_v1 = vsel %vm4896_vm13, %v4895_v61, %v4893_v12  ;;  %v8695_v61 = vld [vmem:[%s14526_s22 + $0x4] sm:$0x3]  ;;  %vm4830_vm13 = vcmp.lt.s32.totalorder %v9910_v10, 2 }
0x1316   : > { %v4912_v31 = vmul.f32 %v4905_v7, %v4897_v0  ;;  %v4913_v9 = vmul.f32 %v4909_v42, %v4898_v1  ;;  %6313 = vperm.xlu1 %9389, %v6288_v19   ;;  %v5117_v11 = vpop.permute.xlu0 %5116  ;;  %v5085_v28 = vrot.slane %v8695_v61, %v14529_v35  ;;  %v5089_v19 = vrot.slane %v8695_v61, %v14530_v41 }
0x1318   : > { %v4942_v2 = vpack.c.bf16 %v4912_v31, %v4890_v30  ;;  %v5119_v14 = vpop.permute.xlu1 %5118  ;;  %6109 = vperm.xlu0 %9388, %v8747_v33   ;;  %v4943_v12 = vpack.c.bf16 %v4913_v9, %v4891_v32  ;;  %v4865_v33 = vrot.slane %v8687_v54, %v14530_v41  ;;  %v8696_v32 = vld [vmem:[%s14526_s22 + $0x6] sm:$0x3] }
0x1319   : > { %v5121_v47 = vsel %vm5120_vm10, %v5117_v11, %v5119_v14  ;;  %v5122_v46 = vsel %vm5120_vm10, %v5119_v14, %v5117_v11  ;;  %v5107_v9 = vrot.slane %v8696_v32, %v14529_v35  ;;  %v5111_v11 = vrot.slane %v8696_v32, %v14530_v41 }
0x131a   : > { %v5136_v51 = vmul.f32 %v5129_v26, %v5121_v47  ;;  %v5137_v7 = vmul.f32 %v5133_v34, %v5122_v46  ;;  %6104 = vperm.xlu1 %9389, %v8746_v25   ;;  %4982 = vmatprep.subr.bf16.mxu0 %v4943_v12  ;;  %v4849_v42 = vpop.permute.xlu0 %4848  ;;  %v5036_v47 = vld [vmem:[%s14526_s22] sm:$0x3]  ;;  %v5067_v25 = vrot.slane %v8694_v5, %v14530_v41  ;;  %vm4765_vm10 = vcmp.lt.s32.totalorder %v9910_v10, 34 }
0x131b   : > { %4983 = vmatpush1.bf16.msra.mxu0 %v4942_v2  ;;  %v5045_v2 = vrot.slane %v5036_v47, %v14530_v41 }
0x131c   : > { %v5187_v14 = vpack.c.bf16 %v5136_v51, %v10806_v45  ;;  %v4851_v0 = vpop.permute.xlu1 %4850  ;;  %v5188_v1 = vpack.c.bf16 %v5137_v7, %v10811_v38  ;;  %v5092_v51 = vmul.f32 %v5085_v28, %v11064_v15  ;;  %v5071_v32 = vmul.f32 %v5067_v25, %v11100_v36 }
0x131d   : > { %v4853_v26 = vsel %vm4852_vm14, %v4849_v42, %v4851_v0  ;;  %v4854_v34 = vsel %vm4852_vm14, %v4851_v0, %v4849_v42  ;;  %vm14533_vm14 = vcmask 588800  }
0x131e   : > { %v4868_v30 = vmul.f32 %v4861_v62, %v4853_v26  ;;  %v4869_v54 = vmul.f32 %v4865_v33, %v4854_v34  ;;  %5231 = vmatprep.subr.bf16.mxu1 %v5188_v1  ;;  %v5095_v31 = vpop.permute.xlu0 %5094  ;;  %v5063_v62 = vrot.slane %v8694_v5, %v14529_v35  ;;  %v5093_v33 = vmul.f32 %v5089_v19, %v11060_v27  ;;  %v8685_v26 = vld [vmem:[%s14528_s2 + $0x4] sm:$0x3] }
0x131f   : > { %5232 = vmatpush1.bf16.msra.mxu1 %v5187_v14  ;;  %v5041_v34 = vrot.slane %v5036_v47, %v14529_v35  ;;  %v4817_v36 = vrot.slane %v8685_v26, %v14529_v35  ;;  %v4821_v19 = vrot.slane %v8685_v26, %v14530_v41 }
0x1320   : > { %v4940_v12 = vpack.c.bf16 %v4868_v30, %v10806_v45  ;;  %v5097_v61 = vpop.permute.xlu1 %5096  ;;  %v4941_v46 = vpack.c.bf16 %v4869_v54, %v10811_v38  ;;  %v8686_v30 = vld [vmem:[%s14528_s2 + $0x6] sm:$0x3]  ;;  %v5049_v54 = vmul.f32 %v5045_v2, %v11093_v21  ;;  %v5070_v27 = vmul.f32 %v5063_v62, %v11102_v8 }
0x1321   : > { %v5099_v7 = vsel %vm5098_vm12, %v5095_v31, %v5097_v61  ;;  %v5100_v42 = vsel %vm5098_vm12, %v5097_v61, %v5095_v31  ;;  %v4839_v47 = vrot.slane %v8686_v30, %v14529_v35  ;;  %v4843_v31 = vrot.slane %v8686_v30, %v14530_v41 }
0x1322   : > { %v5114_v0 = vmul.f32 %v5107_v9, %v5100_v42  ;;  %v5115_v14 = vmul.f32 %v5111_v11, %v5099_v7  ;;  %4984 = vmatprep.subr.bf16.mxu0 %v4941_v46  ;;  %v4805_v1 = vpop.permute.xlu0 %4804  ;;  %v5184_v21 = vpack.c.bf16 %v5071_v32, %v5049_v54  ;;  %v5048_v9 = vmul.f32 %v5041_v34, %v11095_v53  ;;  %v8684_v32 = vld [vmem:[%s14528_s2 + $0x2] sm:$0x3] }
0x1323   : > { %4985 = vmatpush1.bf16.msra.mxu0 %v4940_v12  ;;  %vm4786_vm12 = vcmp.lt.s32.totalorder %v9910_v10, 32  ;;  %v4795_v54 = vrot.slane %v8684_v32, %v14529_v35 }
0x1324   : > { %v5185_v15 = vpack.c.bf16 %v5114_v0, %v5092_v51  ;;  %v4807_v5 = vpop.permute.xlu1 %4806  ;;  %v5186_v28 = vpack.c.bf16 %v5115_v14, %v5093_v33  ;;  %v5183_v12 = vpack.c.bf16 %v5070_v27, %v5048_v9  ;;  %v4768_v0 = vld [vmem:[%s14528_s2] sm:$0x3]  ;;  %s14551_s2 = smov 113  }
0x1325   : > { %v4809_v11 = vsel %vm4808_vm15, %v4805_v1, %v4807_v5  ;;  %v4810_v8 = vsel %vm4808_vm15, %v4807_v5, %v4805_v1  ;;  %v9486_v14 = vld [vmem:[%s14532_s30] sm:$0xff]   ;;  %v4773_v34 = vrot.slane %v4768_v0, %v14529_v35  ;;  %v4777_v30 = vrot.slane %v4768_v0, %v14530_v41  ;;  %s14534_s30 = sld [smem:[#allocation9_spill]]  ;;  %vm14535_vm15 = vmmov %vm14533_vm14 }
0x1326   : > { %5233 = vmatprep.subr.bf16.mxu1 %v5186_v28  ;;  %v4827_v25 = vpop.permute.xlu0 %4826  ;;  %v4824_v51 = vmul.f32 %v4817_v36, %v4810_v8  ;;  %v4825_v62 = vmul.f32 %v4821_v19, %v4809_v11 }
0x1327   : > { %5234 = vmatpush1.bf16.msra.mxu1 %v5185_v15  ;;  %v4799_v15 = vrot.slane %v8684_v32, %v14530_v41 }
0x1328   : > { %v4829_v2 = vpop.permute.xlu1 %4828  ;;  %5235 = vmatprep.subr.bf16.mxu1 %v5184_v21 }
0x1329   : > { %v4831_v61 = vsel %vm4830_vm13, %v4827_v25, %v4829_v2  ;;  %v4832_v46 = vsel %vm4830_vm13, %v4829_v2, %v4827_v25 }
0x132a   : > { %v4846_v7 = vmul.f32 %v4839_v47, %v4832_v46  ;;  %v4847_v42 = vmul.f32 %v4843_v31, %v4831_v61  ;;  %v4762_v33 = vpop.permute.xlu0 %4761 }
0x132b   : > { %5236 = vmatpush1.bf16.msra.mxu1 %v5183_v12  ;;  %v9487_v35 = vld [vmem:[%s14534_s30] sm:$0xff]   ;;  %s14542_s30 = smov 17  }
0x132c   : > { %v4938_v26 = vpack.c.bf16 %v4846_v7, %v4824_v51  ;;  %v4764_v53 = vpop.permute.xlu1 %4763  ;;  %v4939_v1 = vpack.c.bf16 %v4847_v42, %v4825_v62 }
0x132d   : > { %v4766_v5 = vsel %vm4765_vm10, %v4762_v33, %v4764_v53  ;;  %v4767_v28 = vsel %vm4765_vm10, %v4764_v53, %v4762_v33 }
0x132e   : > { %4986 = vmatprep.subr.bf16.mxu0 %v4939_v1  ;;  %8703 = vmatmul.mubr.msk.bf16.vlgmr.msra.gmra.mxu1 %vm14533_vm14, %v9486_v14  ;;  %v4783_v27 = vpop.permute.xlu0 %4782  ;;  %v4780_v47 = vmul.f32 %v4773_v34, %v4767_v28  ;;  %v4781_v31 = vmul.f32 %v4777_v30, %v4766_v5 }
0x132f   : > { %4987 = vmatpush1.bf16.msra.mxu0 %v4938_v26  ;;  %7171 = vmatprep.mubr.bf16.mxu1 %v14481_v55 }
0x1330   : > { %v4785_v36 = vpop.permute.xlu1 %4784 }
0x1331   : > { %v4787_v19 = vsel %vm4786_vm12, %v4783_v27, %v4785_v36  ;;  %v4788_v25 = vsel %vm4786_vm12, %v4785_v36, %v4783_v27 }
0x1332   : > { %v4802_v21 = vmul.f32 %v4795_v54, %v4788_v25  ;;  %v4803_v9 = vmul.f32 %v4799_v15, %v4787_v19 }
0x1334   : > { %v4936_v11 = vpack.c.bf16 %v4802_v21, %v4780_v47  ;;  %v4937_v8 = vpack.c.bf16 %v4803_v9, %v4781_v31 }
0x1336   : > { %4988 = vmatprep.subr.bf16.mxu0 %v4937_v8 }
0x1337   : > { %4989 = vmatpush1.bf16.msra.mxu0 %v4936_v11 }
0x133a   : > { %8693 = vmatmul.mubr.msk.bf16.vlgmr.msra.gmra.mxu0 %vm14535_vm15, %v9487_v35 }
0x133b   : > { %6431 = vmatprep.mubr.bf16.mxu0 %v14481_v55  ;;  %v11179_v41 = vpop.permute.xlu0 %5572 }
0x133d   : > { %v11181_v2 = vpop.permute.xlu1 %5567 }
0x133e   : > { %14536 = vst [vmem:[#allocation32_spill] sm:$0xff] %v11181_v2 }
0x133f   : > { %v11183_v12 = vpop.permute.xlu0 %5772 }
0x1340   : > { %14537 = vst [vmem:[#allocation31_spill] sm:$0xff] %v11183_v12 }
0x1341   : > { %v11185_v61 = vpop.permute.xlu1 %5767 }
0x1342   : > { %14538 = vst [vmem:[#allocation72_spill] sm:$0xff] %v11185_v61 }
0x1343   : > { %v11187_v46 = vpop.permute.xlu0 %5333 }
0x1345   : > { %v11189_v51 = vpop.permute.xlu1 %6015 }
0x1346   : > { %14539 = vst [vmem:[#allocation73_spill] sm:$0xff] %v11189_v51 }
0x1347   : > { %v11191_v42 = vpop.permute.xlu0 %5438 }
0x1349   : > { %v11195_v14 = vpop.permute.xlu1 %5338 }
0x134a   : > { %14540 = vst [vmem:[#allocation74_spill] sm:$0xff] %v11195_v14 }
0x134b   : > { %v11205_v1 = vpop.permute.xlu0 %5686 }
0x134c   : > { %14543 = vst [vmem:[#allocation76_spill] sm:$0xff] %v11205_v1 }
0x134d   : > { %v11207_v34 = vpop.permute.xlu1 %5443 }
0x134f   : > { %v11215_v54 = vpop.permute.xlu0 %5886 }
0x1350   : > { %14544 = vst [vmem:[#allocation77_spill] sm:$0xff] %v11215_v54 }
0x1351   : > { %v11217_v15 = vpop.permute.xlu1 %5691 }
0x1353   : > { %v11227_v28 = vpop.permute.xlu0 %6134 }
0x1354   : > { %14548 = vst [vmem:[#allocation78_spill] sm:$0xff] %v11227_v28 }
0x1355   : > { %v11229_v27 = vpop.permute.xlu1 %5891 }
0x1356   : > { %14549 = vst [vmem:[#allocation79_spill] sm:$0xff] %v11229_v27 }
0x1357   : > { %v11236_v25 = vpop.permute.xlu0 %5562 }
0x1358   : > { %14550 = vst [vmem:[#allocation80_spill] sm:$0xff] %v11236_v25 }
0x1359   : > { %v11240_v21 = vpop.permute.xlu1 %5557 }
0x135d   : > { %v11255_v11 = vpop.permute.xlu1 %5757 }
0x13c7   : > { %v4740_v62 = vpop.f32.mrf.mxu1 }
0x13c8   : > { %v4741_v33 = vadd.f32 %v4740_v62, %v10863_v4 }
0x13c9   : > { %v4742_v19 = vpop.f32.mrf.mxu1 }
0x13ca   : > { %v4753_v26 = vmul.f32 %v4741_v33, %v10084_v44  ;;  %vm4749_vm10 = vcmp.ge.f32.partialorder %v4741_v33, 0.0  ;;  %v4743_v47 = vadd.f32 %v4742_v19, %v10863_v4  ;;  %v11253_v4 = vpop.permute.xlu0 %5762 }
0x13cb   : > { %14553 = vst [vmem:[#allocation82_spill] sm:$0xff] %v11253_v4 }
0x13cc   : > { %v11209_v30 = vsel %vm4749_vm10, %v4741_v33, %v4753_v26  ;;  %vm4750_vm12 = vcmp.ge.f32.partialorder %v4743_v47, 0.0  ;;  %v11266_v33 = vpop.permute.xlu1 %6005 }
0x13cd   : > { %14556 = vst [vmem:[#allocation84_spill] sm:$0xff] %v11266_v33 }
0x13ce   : > { %v11263_v62 = vpop.permute.xlu0 %6010 }
0x13cf   : > { %14555 = vst [vmem:[#allocation83_spill] sm:$0xff] %v11263_v62 }
0x13d2   : > { %v11277_v26 = vpop.permute.xlu0 %5676 }
0x13fa   : > { %v5008_v7 = vpop.f32.mrf.mxu0 }
0x13fb   : > { %v5009_v0 = vadd.f32 %v5008_v7, %v10866_v57 }
0x13fc   : > { %v5010_v5 = vpop.f32.mrf.mxu0 }
0x13fd   : > { %vm5017_vm13 = vcmp.ge.f32.partialorder %v5009_v0, 0.0  ;;  %v5021_v32 = vmul.f32 %v5009_v0, %v10084_v44  ;;  %v5011_v36 = vadd.f32 %v5010_v5, %v10866_v57  ;;  %v4754_v57 = vmul.f32 %v4743_v47, %v10084_v44  ;;  %v11279_v5 = vpop.permute.xlu1 %6253 }
0x13fe   : > { %v5012_v35 = vpop.f32.mrf.mxu0  ;;  %14557 = vst [vmem:[#allocation85_spill] sm:$0xff] %v11279_v5 }
0x13ff   : > { %v11199_v53 = vsel %vm5017_vm13, %v5009_v0, %v5021_v32  ;;  %v5022_v31 = vmul.f32 %v5011_v36, %v10084_v44  ;;  %vm5018_vm14 = vcmp.ge.f32.partialorder %v5011_v36, 0.0  ;;  %v11257_v8 = vsel %vm4750_vm12, %v4743_v47, %v4754_v57  ;;  %v4744_v32 = vpop.f32.mrf.mxu1  ;;  %v11288_v47 = vpop.permute.xlu0 %5876 }
0x1400   : > { %14541 = vst [vmem:[#allocation75_spill] sm:$0xff] %v11199_v53  ;;  %5503 = vrot.lane.b32.xlu1 %v11199_v53, %s14267_s20  ;;  %5280 = vrot.lane.b32.xlu0 %v11199_v53, %s14542_s30  ;;  %s14545_s20 = smov 1   ;;  %v5013_v7 = vadd.f32 %v5012_v35, %v10852_v37  ;;  %14559 = vst [vmem:[#allocation87_spill] sm:$0xff] %v11288_v47  ;;  %v5014_v51 = vpop.f32.mrf.mxu0 }
0x1401   : > { %v11247_v9 = vsel %vm5018_vm14, %v5011_v36, %v5022_v31  ;;  %v4745_v36 = vadd.f32 %v4744_v32, %v10856_v56  ;;  %v11291_v57 = vpop.permute.xlu1 %5681  ;;  %v5015_v27 = vadd.f32 %v5014_v51, %v10852_v37 }
0x1402   : > { %14552 = vst [vmem:[#allocation81_spill] sm:$0xff] %v11247_v9  ;;  %v5023_v0 = vmul.f32 %v5013_v7, %v10084_v44  ;;  %vm5019_vm15 = vcmp.ge.f32.partialorder %v5013_v7, 0.0  ;;  %14560 = vst [vmem:[#allocation88_spill] sm:$0xff] %v11291_v57 }
0x1403   : > { %v4755_v31 = vmul.f32 %v4745_v36, %v10084_v44  ;;  %vm4751_vm13 = vcmp.ge.f32.partialorder %v4745_v36, 0.0  ;;  %vm5020_vm10 = vcmp.ge.f32.partialorder %v5015_v27, 0.0 }
0x1404   : > { %5384 = vrot.lane.b32.xlu0 %v11199_v53, %s14505_s12  ;;  %5276 = vrot.lane.b32.xlu1 %v11209_v30, %s14542_s30  ;;  %v11282_v19 = vsel %vm5019_vm15, %v5013_v7, %v5023_v0  ;;  %v11303_v7 = vpop.permute.xlu0 %6124 }
0x1405   : > { %14558 = vst [vmem:[#allocation86_spill] sm:$0xff] %v11282_v19  ;;  %v11297_v35 = vsel %vm4751_vm13, %v4745_v36, %v4755_v31  ;;  %14561 = vst [vmem:[#allocation89_spill] sm:$0xff] %v11303_v7  ;;  %v11305_v0 = vpop.permute.xlu1 %5881  ;;  %v4746_v7 = vpop.f32.mrf.mxu1 }
0x1406   : > { %14562 = vst [vmem:[#allocation90_spill] sm:$0xff] %v11305_v0  ;;  %v4747_v37 = vadd.f32 %v4746_v7, %v10856_v56 }
0x1408   : > { %5622 = vrot.lane.b32.xlu0 %v11199_v53, %s14545_s20  ;;  %5380 = vrot.lane.b32.xlu1 %v11209_v30, %s14505_s12  ;;  %v11311_v32 = vpop.permute.xlu0 %5747  ;;  %vm4752_vm14 = vcmp.ge.f32.partialorder %v4747_v37, 0.0 }
0x1409   : > { %v11313_v36 = vpop.permute.xlu1 %6129 }
0x140a   : > { %14563 = vst [vmem:[#allocation91_spill] sm:$0xff] %v11313_v36 }
0x140c   : > { %5499 = vrot.lane.b32.xlu0 %v11209_v30, %s14546_s0  ;;  %5812 = vrot.lane.b32.xlu1 %v11199_v53, %s14547_s1  ;;  %v11323_v31 = vpop.permute.xlu0 %5995 }
0x140d   : > { %14564 = vst [vmem:[#allocation92_spill] sm:$0xff] %v11323_v31  ;;  %v11325_v55 = vpop.permute.xlu1 %5752  ;;  %v5024_v31 = vmul.f32 %v5015_v27, %v10084_v44 }
0x140f   : > { %v11362_v51 = vsel %vm5020_vm10, %v5015_v27, %v5024_v31 }
0x1410   : > { %5618 = vrot.lane.b32.xlu0 %v11209_v30, %s14545_s20  ;;  %5808 = vrot.lane.b32.xlu1 %v11209_v30, %s14547_s1  ;;  %v11331_v5 = vpop.permute.xlu0 %6243  ;;  %14570 = vst [vmem:[#allocation98_spill] sm:$0xff] %v11362_v51 }
0x1411   : > { %14565 = vst [vmem:[#allocation93_spill] sm:$0xff] %v11331_v5  ;;  %v11333_v28 = vpop.permute.xlu1 %6000 }
0x1412   : > { %14566 = vst [vmem:[#allocation94_spill] sm:$0xff] %v11333_v28 }
0x1414   : > { %5931 = vrot.lane.b32.xlu0 %v11199_v53, %s14551_s2  ;;  %5927 = vrot.lane.b32.xlu1 %v11209_v30, %s14551_s2  ;;  %v11343_v36 = vpop.permute.xlu0 %6323 }
0x1415   : > { %14567 = vst [vmem:[#allocation95_spill] sm:$0xff] %v11343_v36  ;;  %v11345_v62 = vpop.permute.xlu1 %6248 }
0x1416   : > { %14568 = vst [vmem:[#allocation96_spill] sm:$0xff] %v11345_v62  ;;  %v4756_v62 = vmul.f32 %v4747_v37, %v10084_v44 }
0x1418   : > { %6050 = vrot.lane.b32.xlu0 %v11199_v53, %s14504_s28  ;;  %5515 = vrot.lane.b32.xlu1 %v11247_v9, %s14546_s0  ;;  %v11352_v5 = vpop.permute.xlu0 %5871  ;;  %v11377_v56 = vsel %vm4752_vm14, %v4747_v37, %v4756_v62  ;;  %v5255_v37 = vpop.f32.mrf.mxu1  ;;  %vm6386_vm14 = vcmask 457728  }
0x1419   : > { %14569 = vst [vmem:[#allocation97_spill] sm:$0xff] %v11352_v5  ;;  %v11355_v54 = vpop.permute.xlu1 %5866 }
0x141c   : > { %6169 = vrot.lane.b32.xlu0 %v11199_v53, %s14554_s3  ;;  %5511 = vrot.lane.b32.xlu1 %v11257_v8, %s14546_s0  ;;  %v11368_v5 = vpop.permute.xlu0 %6119 }
0x141d   : > { %14571 = vst [vmem:[#allocation99_spill] sm:$0xff] %v11368_v5  ;;  %v11370_v36 = vpop.permute.xlu1 %6114 }
0x141e   : > { %14572 = vst [vmem:[#allocation100_spill] sm:$0xff] %v11370_v36 }
0x1420   : > { %5292 = vrot.lane.b32.xlu0 %v11247_v9, %s14542_s30  ;;  %5630 = vrot.lane.b32.xlu1 %v11257_v8, %s14545_s20  ;;  %v11379_v27 = vpop.permute.xlu0 %5990 }
0x1421   : > { %14573 = vst [vmem:[#allocation101_spill] sm:$0xff] %v11379_v27  ;;  %v11381_v7 = vpop.permute.xlu1 %5985  ;;  %v5256_v27 = vadd.f32 %v5255_v37, %v10859_v39 }
0x1423   : > { %vm5264_vm12 = vcmp.ge.f32.partialorder %v5256_v27, 0.0 }
0x1424   : > { %5396 = vrot.lane.b32.xlu0 %v11247_v9, %s14505_s12  ;;  %5824 = vrot.lane.b32.xlu1 %v11247_v9, %s14547_s1  ;;  %v11391_v31 = vpop.permute.xlu0 %6238 }
0x1425   : > { %14574 = vst [vmem:[#allocation102_spill] sm:$0xff] %v11391_v31  ;;  %v11393_v62 = vpop.permute.xlu1 %6233 }
0x1426   : > { %14575 = vst [vmem:[#allocation103_spill] sm:$0xff] %v11393_v62  ;;  %v5268_v62 = vmul.f32 %v5256_v27, %v10084_v44 }
0x1428   : > { %5288 = vrot.lane.b32.xlu0 %v11257_v8, %s14542_s30  ;;  %5282 = vrot.lane.b32.xlu1 %v11282_v19, %s14542_s30  ;;  %v11400_v36 = vpop.permute.xlu0 %6318 }
0x1429   : > { %14576 = vst [vmem:[#allocation104_spill] sm:$0xff] %v11400_v36  ;;  %v11402_v1 = vpop.permute.xlu1 %6313 }
0x142a   : > { %14577 = vst [vmem:[#allocation105_spill] sm:$0xff] %v11402_v1  ;;  %v11417_v1 = vsel %vm5264_vm12, %v5256_v27, %v5268_v62  ;;  %v5257_v62 = vpop.f32.mrf.mxu1 }
0x142b   : > { %14580 = vst [vmem:[#allocation108_spill] sm:$0xff] %v11417_v1  ;;  %v5258_v31 = vadd.f32 %v5257_v62, %v10859_v39 }
0x142c   : > { %5392 = vrot.lane.b32.xlu0 %v11257_v8, %s14505_s12  ;;  %5386 = vrot.lane.b32.xlu1 %v11282_v19, %s14505_s12  ;;  %v11413_v37 = vpop.permute.xlu0 %6109 }
0x142d   : > { %14578 = vst [vmem:[#allocation106_spill] sm:$0xff] %v11413_v37  ;;  %v11415_v36 = vpop.permute.xlu1 %6104  ;;  %vm5265_vm15 = vcmp.ge.f32.partialorder %v5258_v31, 0.0 }
0x142e   : > { %14579 = vst [vmem:[#allocation107_spill] sm:$0xff] %v11415_v36 }
0x1430   : > { %5634 = vrot.lane.b32.xlu0 %v11247_v9, %s14545_s20  ;;  %5278 = vrot.lane.b32.xlu1 %v11297_v35, %s14542_s30 }
0x1434   : > { %5943 = vrot.lane.b32.xlu0 %v11247_v9, %s14551_s2  ;;  %5382 = vrot.lane.b32.xlu1 %v11297_v35, %s14505_s12 }
0x1438   : > { %5820 = vrot.lane.b32.xlu0 %v11257_v8, %s14547_s1  ;;  %5624 = vrot.lane.b32.xlu1 %v11282_v19, %s14545_s20 }
0x143c   : > { %6062 = vrot.lane.b32.xlu0 %v11247_v9, %s14504_s28  ;;  %5620 = vrot.lane.b32.xlu1 %v11297_v35, %s14545_s20 }
0x1440   : > { %5939 = vrot.lane.b32.xlu0 %v11257_v8, %s14551_s2  ;;  %5814 = vrot.lane.b32.xlu1 %v11282_v19, %s14547_s1 }
0x1444   : > { %6181 = vrot.lane.b32.xlu0 %v11247_v9, %s14554_s3  ;;  %5929 = vrot.lane.b32.xlu1 %v11297_v35, %s14551_s2 }
0x1448   : > { %5505 = vrot.lane.b32.xlu0 %v11282_v19, %s14546_s0  ;;  %6171 = vrot.lane.b32.xlu1 %v11282_v19, %s14554_s3 }
0x144c   : > { %5501 = vrot.lane.b32.xlu0 %v11297_v35, %s14546_s0  ;;  %6048 = vrot.lane.b32.xlu1 %v11297_v35, %s14504_s28 }
0x1450   : > { %5933 = vrot.lane.b32.xlu0 %v11282_v19, %s14551_s2  ;;  %6167 = vrot.lane.b32.xlu1 %v11297_v35, %s14554_s3 }
0x1454   : > { %5810 = vrot.lane.b32.xlu0 %v11297_v35, %s14547_s1  ;;  %5294 = vrot.lane.b32.xlu1 %v11362_v51, %s14542_s30 }
0x1458   : > { %6052 = vrot.lane.b32.xlu0 %v11282_v19, %s14504_s28  ;;  %5398 = vrot.lane.b32.xlu1 %v11362_v51, %s14505_s12 }
0x145c   : > { %5517 = vrot.lane.b32.xlu0 %v11362_v51, %s14546_s0  ;;  %5290 = vrot.lane.b32.xlu1 %v11377_v56, %s14542_s30 }
0x1460   : > { %5513 = vrot.lane.b32.xlu0 %v11377_v56, %s14546_s0  ;;  %5394 = vrot.lane.b32.xlu1 %v11377_v56, %s14505_s12 }
0x1464   : > { %5945 = vrot.lane.b32.xlu0 %v11362_v51, %s14551_s2  ;;  %5636 = vrot.lane.b32.xlu1 %v11362_v51, %s14545_s20 }
0x1468   : > { %5822 = vrot.lane.b32.xlu0 %v11377_v56, %s14547_s1  ;;  %5632 = vrot.lane.b32.xlu1 %v11377_v56, %s14545_s20 }
0x146c   : > { %6064 = vrot.lane.b32.xlu0 %v11362_v51, %s14504_s28  ;;  %5826 = vrot.lane.b32.xlu1 %v11362_v51, %s14547_s1 }
0x1470   : > { %5284 = vrot.lane.b32.xlu0 %v11417_v1, %s14542_s30  ;;  %5941 = vrot.lane.b32.xlu1 %v11377_v56, %s14551_s2 }
0x1472   : > { %v11423_v47 = vpop.permute.xlu1 %5503  ;;  %v11425_v33 = vpop.permute.xlu0 %5280 }
0x1474   : > { %5388 = vrot.lane.b32.xlu0 %v11417_v1, %s14505_s12  ;;  %6183 = vrot.lane.b32.xlu1 %v11362_v51, %s14554_s3  ;;  %v5269_v51 = vmul.f32 %v5258_v31, %v10084_v44 }
0x1476   : > { %v11431_v37 = vpop.permute.xlu0 %5384  ;;  %v11433_v27 = vpop.permute.xlu1 %5276  ;;  %v11461_v61 = vsel %vm5265_vm15, %v5258_v31, %v5269_v51 }
0x1477   : > { %14584 = vst [vmem:[#allocation112_spill] sm:$0xff] %v11461_v61  ;;  %v5259_v31 = vpop.f32.mrf.mxu1 }
0x1478   : > { %5626 = vrot.lane.b32.xlu0 %v11417_v1, %s14545_s20  ;;  %6060 = vrot.lane.b32.xlu1 %v11377_v56, %s14504_s28 }
0x1479   : > { %v5261_v25 = vpop.f32.mrf.mxu1 }
0x147a   : > { %v11439_v36 = vpop.permute.xlu0 %5622  ;;  %v11441_v2 = vpop.permute.xlu1 %5380 }
0x147c   : > { %5816 = vrot.lane.b32.xlu0 %v11417_v1, %s14547_s1  ;;  %6179 = vrot.lane.b32.xlu1 %v11377_v56, %s14554_s3 }
0x147e   : > { %v11448_v5 = vpop.permute.xlu0 %5499  ;;  %v11450_v28 = vpop.permute.xlu1 %5812 }
0x147f   : > { %14581 = vst [vmem:[#allocation109_spill] sm:$0xff] %v11450_v28  ;;  %v5262_v28 = vadd.f32 %v5261_v25, %v10849_v20 }
0x1480   : > { %6173 = vrot.lane.b32.xlu0 %v11417_v1, %s14554_s3  ;;  %5507 = vrot.lane.b32.xlu1 %v11417_v1, %s14546_s0 }
0x1481   : > { %vm5267_vm10 = vcmp.ge.f32.partialorder %v5262_v28, 0.0 }
0x1482   : > { %v11457_v39 = vpop.permute.xlu0 %5618  ;;  %v11459_v62 = vpop.permute.xlu1 %5808 }
0x1483   : > { %14582 = vst [vmem:[#allocation110_spill] sm:$0xff] %v11457_v39  ;;  %14583 = vst [vmem:[#allocation111_spill] sm:$0xff] %v11459_v62 }
0x1484   : > { %5296 = vrot.lane.b32.xlu0 %v11461_v61, %s14542_s30  ;;  %5935 = vrot.lane.b32.xlu1 %v11417_v1, %s14551_s2 }
0x1486   : > { %v11467_v19 = vpop.permute.xlu0 %5931  ;;  %v11469_v0 = vpop.permute.xlu1 %5927 }
0x1487   : > { %14585 = vst [vmem:[#allocation113_spill] sm:$0xff] %v11467_v19  ;;  %14586 = vst [vmem:[#allocation114_spill] sm:$0xff] %v11469_v0  ;;  %v5260_v19 = vadd.f32 %v5259_v31, %v10849_v20 }
0x1488   : > { %5400 = vrot.lane.b32.xlu0 %v11461_v61, %s14505_s12  ;;  %6054 = vrot.lane.b32.xlu1 %v11417_v1, %s14504_s28 }
0x1489   : > { %v5270_v4 = vmul.f32 %v5260_v19, %v10084_v44  ;;  %vm5266_vm13 = vcmp.ge.f32.partialorder %v5260_v19, 0.0 }
0x148a   : > { %v11475_v57 = vpop.permute.xlu0 %6050  ;;  %v11477_v51 = vpop.permute.xlu1 %5515 }
0x148b   : > { %14587 = vst [vmem:[#allocation115_spill] sm:$0xff] %v11475_v57  ;;  %v11505_v53 = vsel %vm5266_vm13, %v5260_v19, %v5270_v4 }
0x148c   : > { %5638 = vrot.lane.b32.xlu0 %v11461_v61, %s14545_s20  ;;  %5519 = vrot.lane.b32.xlu1 %v11461_v61, %s14546_s0  ;;  %14591 = vst [vmem:[#allocation119_spill] sm:$0xff] %v11505_v53 }
0x148e   : > { %v11483_v62 = vpop.permute.xlu0 %6169  ;;  %v11485_v0 = vpop.permute.xlu1 %5511 }
0x148f   : > { %14588 = vst [vmem:[#allocation116_spill] sm:$0xff] %v11483_v62 }
0x1490   : > { %5828 = vrot.lane.b32.xlu0 %v11461_v61, %s14547_s1  ;;  %5947 = vrot.lane.b32.xlu1 %v11461_v61, %s14551_s2 }
0x1492   : > { %v11492_v57 = vpop.permute.xlu0 %5292  ;;  %v11494_v9 = vpop.permute.xlu1 %5630 }
0x1493   : > { %14589 = vst [vmem:[#allocation117_spill] sm:$0xff] %v11494_v9  ;;  %v6286_v9 = vld [vmem:[%s14527_s26 + $0x10] sm:$0xff] }
0x1494   : > { %6185 = vrot.lane.b32.xlu0 %v11461_v61, %s14554_s3  ;;  %6066 = vrot.lane.b32.xlu1 %v11461_v61, %s14504_s28  ;;  %v5271_v61 = vmul.f32 %v5262_v28, %v10084_v44 }
0x1496   : > { %v11501_v31 = vpop.permute.xlu0 %5396  ;;  %v11503_v62 = vpop.permute.xlu1 %5824 }
0x1497   : > { %14590 = vst [vmem:[#allocation118_spill] sm:$0xff] %v11503_v62 }
0x1498   : > { %5509 = vrot.lane.b32.xlu0 %v11505_v53, %s14546_s0  ;;  %5286 = vrot.lane.b32.xlu1 %v11505_v53, %s14542_s30 }
0x149a   : > { %v11511_v12 = vpop.permute.xlu0 %5288  ;;  %v11513_v1 = vpop.permute.xlu1 %5282 }
0x149b   : > { %14592 = vst [vmem:[#allocation120_spill] sm:$0xff] %v11513_v1  ;;  %v11533_v1 = vsel %vm5267_vm10, %v5262_v28, %v5271_v61 }
0x149c   : > { %5937 = vrot.lane.b32.xlu0 %v11505_v53, %s14551_s2  ;;  %5390 = vrot.lane.b32.xlu1 %v11505_v53, %s14505_s12  ;;  %14595 = vst [vmem:[#allocation123_spill] sm:$0xff] %v11533_v1 }
0x149e   : > { %v11520_v4 = vpop.permute.xlu0 %5392  ;;  %v11522_v19 = vpop.permute.xlu1 %5386 }
0x149f   : > { %14593 = vst [vmem:[#allocation121_spill] sm:$0xff] %v11522_v19 }
0x14a0   : > { %6175 = vrot.lane.b32.xlu0 %v11505_v53, %s14554_s3  ;;  %5628 = vrot.lane.b32.xlu1 %v11505_v53, %s14545_s20 }
0x14a2   : > { %v11529_v20 = vpop.permute.xlu0 %5634  ;;  %v11531_v25 = vpop.permute.xlu1 %5278 }
0x14a3   : > { %14594 = vst [vmem:[#allocation122_spill] sm:$0xff] %v11531_v25 }
0x14a4   : > { %5298 = vrot.lane.b32.xlu0 %v11533_v1, %s14542_s30  ;;  %5818 = vrot.lane.b32.xlu1 %v11505_v53, %s14547_s1 }
0x14a6   : > { %v11539_v44 = vpop.permute.xlu0 %5943  ;;  %v11541_v19 = vpop.permute.xlu1 %5382 }
0x14a7   : > { %14596 = vst [vmem:[#allocation124_spill] sm:$0xff] %v11539_v44  ;;  %14597 = vst [vmem:[#allocation125_spill] sm:$0xff] %v11541_v19  ;;  %v6287_v44 = vld [vmem:[%s14527_s26 + $0x18] sm:$0xff] }
0x14a8   : > { %5402 = vrot.lane.b32.xlu0 %v11533_v1, %s14505_s12  ;;  %6056 = vrot.lane.b32.xlu1 %v11505_v53, %s14504_s28  ;;  %v8753_v53 = vld [vmem:[%s14488_s18 + $0x1c0] sm:$0xff] }
0x14aa   : > { %v11547_v62 = vpop.permute.xlu0 %5820  ;;  %v11549_v61 = vpop.permute.xlu1 %5624 }
0x14ab   : > { %14598 = vst [vmem:[#allocation126_spill] sm:$0xff] %v11547_v62  ;;  %14599 = vst [vmem:[#allocation127_spill] sm:$0xff] %v11549_v61 }
0x14ac   : > { %6058 = vrot.lane.b32.xlu0 %v11257_v8, %s14504_s28  ;;  %5521 = vrot.lane.b32.xlu1 %v11533_v1, %s14546_s0 }
0x14ae   : > { %v11555_v28 = vpop.permute.xlu0 %6062  ;;  %v11557_v25 = vpop.permute.xlu1 %5620 }
0x14af   : > { %14600 = vst [vmem:[#allocation128_spill] sm:$0xff] %v11555_v28  ;;  %14601 = vst [vmem:[#allocation129_spill] sm:$0xff] %v11557_v25 }
0x14b0   : > { %5640 = vrot.lane.b32.xlu0 %v11533_v1, %s14545_s20  ;;  %6046 = vrot.lane.b32.xlu1 %v11209_v30, %s14504_s28 }
0x14b2   : > { %v11563_v19 = vpop.permute.xlu0 %5939  ;;  %v11565_v61 = vpop.permute.xlu1 %5814 }
0x14b3   : > { %14602 = vst [vmem:[#allocation130_spill] sm:$0xff] %v11563_v19  ;;  %14603 = vst [vmem:[#allocation131_spill] sm:$0xff] %v11565_v61  ;;  %v8754_v19 = vld [vmem:[%s14488_s18 + $0x1c8] sm:$0xff] }
0x14b4   : > { %5830 = vrot.lane.b32.xlu0 %v11533_v1, %s14547_s1  ;;  %5949 = vrot.lane.b32.xlu1 %v11533_v1, %s14551_s2 }
0x14b6   : > { %v11571_v62 = vpop.permute.xlu0 %6181  ;;  %v11573_v25 = vpop.permute.xlu1 %5929 }
0x14b7   : > { %14604 = vst [vmem:[#allocation132_spill] sm:$0xff] %v11571_v62  ;;  %14605 = vst [vmem:[#allocation133_spill] sm:$0xff] %v11573_v25 }
0x14b8   : > { %6068 = vrot.lane.b32.xlu0 %v11533_v1, %s14504_s28  ;;  %6187 = vrot.lane.b32.xlu1 %v11533_v1, %s14554_s3 }
0x14ba   : > { %v11580_v61 = vpop.permute.xlu0 %5505  ;;  %v11582_v28 = vpop.permute.xlu1 %6171 }
0x14bb   : > { %14606 = vst [vmem:[#allocation134_spill] sm:$0xff] %v11580_v61  ;;  %14607 = vst [vmem:[#allocation135_spill] sm:$0xff] %v11582_v28  ;;  %v6284_v28 = vld [vmem:[%s14527_s26] sm:$0xff] }
0x14bc   : > { %6228 = vperm.xlu0 %9388, %v8754_v19   ;;  %6223 = vperm.xlu1 %9389, %v8753_v53   ;;  %v6285_v53 = vld [vmem:[%s14527_s26 + $0x8] sm:$0xff] }
0x14be   : > { %v11586_v62 = vpop.permute.xlu0 %5501  ;;  %v11588_v25 = vpop.permute.xlu1 %6048 }
0x14bf   : > { %14609 = vst [vmem:[#allocation136_spill] sm:$0xff] %v11586_v62  ;;  %14610 = vst [vmem:[#allocation137_spill] sm:$0xff] %v11588_v25  ;;  %v6353_v62 = vld [vmem:[%s14608_s4 + $0x8] sm:$0xff] }
0x14c0   : > { %6308 = vperm.xlu0 %9388, %v6287_v44   ;;  %6303 = vperm.xlu1 %9389, %v6286_v9   ;;  %v6355_v44 = vld [vmem:[%s14608_s4 + $0x18] sm:$0xff] }
0x14c2   : > { %v11591_v1 = vpop.permute.xlu0 %5933  ;;  %v11593_v61 = vpop.permute.xlu1 %6167 }
0x14c3   : > { %14611 = vst [vmem:[#allocation138_spill] sm:$0xff] %v11591_v1  ;;  %14612 = vst [vmem:[#allocation139_spill] sm:$0xff] %v11593_v61  ;;  %v6354_v1 = vld [vmem:[%s14608_s4 + $0x10] sm:$0xff] }
0x14c4   : > { %6177 = vrot.lane.b32.xlu0 %v11257_v8, %s14554_s3  ;;  %6165 = vrot.lane.b32.xlu1 %v11209_v30, %s14554_s3 }
0x14c6   : > { %v11600_v19 = vpop.permute.xlu0 %5810  ;;  %v11602_v25 = vpop.permute.xlu1 %5294 }
0x14c7   : > { %14613 = vst [vmem:[#allocation140_spill] sm:$0xff] %v11600_v19  ;;  %14614 = vst [vmem:[#allocation141_spill] sm:$0xff] %v11602_v25  ;;  %v6352_v19 = vld [vmem:[%s14608_s4] sm:$0xff]  ;;  %s14736_s4 = sld [smem:[#allocation18_spill]] }
0x14c8   : > { %6298 = vperm.xlu0 %9388, %v6285_v53   ;;  %6293 = vperm.xlu1 %9389, %v6284_v28   ;;  %v5471_v53 = vmul.f32 %v11191_v42, %v11047_v63  ;;  %v5472_v28 = vmul.f32 %v11191_v42, %v11050_v17  ;;  %v5367_v63 = vmul.f32 %v11187_v46, %v11044_v60  ;;  %v8767_v60 = vld [vmem:[%s14615_s5 + $0x30] sm:$0xff] }
0x14c9   : > { %v5591_v17 = vmul.f32 %v11240_v21, %v11012_v16 }
0x14ca   : > { %v11606_v9 = vpop.permute.xlu0 %6052  ;;  %v11608_v61 = vpop.permute.xlu1 %5398 }
0x14cb   : > { %14616 = vst [vmem:[#allocation142_spill] sm:$0xff] %v11606_v9  ;;  %14617 = vst [vmem:[#allocation143_spill] sm:$0xff] %v11608_v61  ;;  %v6511_v9 = vld [vmem:[%s14615_s5 + $0x18] sm:$0xff]  ;;  %v6510_v61 = vld [vmem:[%s14615_s5 + $0x10] sm:$0xff] }
0x14cc   : > { %6373 = vperm.xlu0 %9388, %v6355_v44   ;;  %6368 = vperm.xlu1 %9389, %v6354_v1   ;;  %v5366_v44 = vmul.f32 %v11187_v46, %v11041_v49  ;;  %v5590_v1 = vmul.f32 %v11240_v21, %v11009_v13  ;;  %v5709_v49 = vmul.f32 %v11277_v26, %v11015_v29 }
0x14cd   : > { %v5710_v13 = vmul.f32 %v11277_v26, %v11018_v3  ;;  %v5780_v46 = vmul.f32 %v11311_v32, %v10806_v45  ;;  %v5781_v29 = vmul.f32 %v11311_v32, %v10811_v38  ;;  %v5412_v3 = vsel %vm1313_vm6, %v11501_v31, %v11431_v37  ;;  %v8772_v38 = vld [vmem:[%s14615_s5 + $0x58] sm:$0xff] }
0x14ce   : > { %v11612_v39 = vpop.permute.xlu0 %5517  ;;  %v11614_v14 = vpop.permute.xlu1 %5290  ;;  %v5485_v42 = vadd.f32 %v5471_v53, %v5366_v44  ;;  %v5406_v21 = vsel %vm1313_vm6, %v11431_v37, %v11501_v31  ;;  %v5308_v45 = vsel %vm1284_vm7, %v11492_v57, %v11425_v33  ;;  %v5302_v32 = vsel %vm1284_vm7, %v11425_v33, %v11492_v57 }
0x14cf   : > { %14618 = vst [vmem:[#allocation144_spill] sm:$0xff] %v11612_v39  ;;  %14619 = vst [vmem:[#allocation145_spill] sm:$0xff] %v11614_v14  ;;  %v11678_v44 = vmul.f32 %v11355_v54, %v10987_v50  ;;  %v11683_v33 = vmul.f32 %v11355_v54, %v10990_v18  ;;  %v11687_v57 = vmul.f32 %v11381_v7, %v10965_v24 }
0x14d0   : > { %6363 = vperm.xlu0 %9388, %v6353_v62   ;;  %6358 = vperm.xlu1 %9389, %v6352_v19   ;;  %v5486_v62 = vadd.f32 %v5472_v28, %v5367_v63  ;;  %v8768_v19 = vld [vmem:[%s14615_s5 + $0x38] sm:$0xff]  ;;  %v5316_v63 = vmul.f32 %v5308_v45, %v14499_v52  ;;  %v5525_v50 = vsel %vm1343_vm5, %v11423_v47, %v11477_v51 }
0x14d1   : > { %14624 = vst [vmem:[#allocation150_spill] sm:$0xff] %v11678_v44  ;;  %14625 = vst [vmem:[#allocation151_spill] sm:$0xff] %v11683_v33  ;;  %v5531_v24 = vsel %vm1343_vm5, %v11477_v51, %v11423_v47  ;;  %v5317_v18 = vmul.f32 %v5302_v32, %v14500_v22  ;;  %v5650_v54 = vsel %vm1373_vm4, %v11529_v20, %v11439_v36  ;;  %v14664_v33 = vld [vmem:[#allocation111_spill] sm:$0xff]  ;;  %v14670_v44 = vld [vmem:[#allocation94_spill] sm:$0xff] }
0x14d2   : > { %v11626_v39 = vpop.permute.xlu0 %5513  ;;  %v11628_v14 = vpop.permute.xlu1 %5394  ;;  %v5605_v16 = vadd.f32 %v5591_v17, %v5486_v62  ;;  %14626 = vst [vmem:[#allocation152_spill] sm:$0xff] %v11687_v57  ;;  %v5410_v17 = vsel %vm1313_vm6, %v11520_v4, %v11441_v2  ;;  %v11710_v62 = vmul.f32 %v11381_v7, %v10968_v59  ;;  %v5306_v47 = vsel %vm1284_vm7, %v11511_v12, %v11433_v27  ;;  %v14655_v57 = vld [vmem:[#allocation128_spill] sm:$0xff] }
0x14d3   : > { %14620 = vst [vmem:[#allocation146_spill] sm:$0xff] %v11626_v39  ;;  %14621 = vst [vmem:[#allocation147_spill] sm:$0xff] %v11628_v14  ;;  %v5604_v39 = vadd.f32 %v5590_v1, %v5485_v42  ;;  %v5421_v1 = vmul.f32 %v5406_v21, %v14502_v48  ;;  %v6509_v42 = vld [vmem:[%s14615_s5 + $0x8] sm:$0xff]  ;;  %v5644_v51 = vsel %vm1373_vm4, %v11439_v36, %v11529_v20 }
0x14d4   : > { %6529 = vperm.xlu0 %9388, %v6511_v9   ;;  %6524 = vperm.xlu1 %9389, %v6510_v61   ;;  %v5724_v61 = vadd.f32 %v5710_v13, %v5605_v16  ;;  %v5420_v9 = vmul.f32 %v5412_v3, %v14501_v43  ;;  %14627 = vst [vmem:[#allocation153_spill] sm:$0xff] %v11710_v62  ;;  %v14628_v3 = vld [vmem:[#allocation39_spill] sm:$0xff] }
0x14d5   : > { %v5723_v26 = vadd.f32 %v5709_v49, %v5604_v39  ;;  %v8771_v39 = vld [vmem:[%s14615_s5 + $0x50] sm:$0xff]  ;;  %v5478_v59 = vmul.f32 %v10924_v58, %v5421_v1  ;;  %v5404_v7 = vsel %vm1313_vm6, %v11441_v2, %v11520_v4  ;;  %v5416_v16 = vmul.f32 %v5410_v17, %v14501_v43  ;;  %v14629_v4 = vld [vmem:[#allocation40_spill] sm:$0xff] }
0x14d6   : > { %v11640_v14 = vpop.permute.xlu0 %5945  ;;  %v11642_v25 = vpop.permute.xlu1 %5636  ;;  %v11674_v28 = vadd.f32 %v5781_v29, %v5724_v61  ;;  %v5477_v49 = vmul.f32 %v10924_v58, %v5420_v9  ;;  %v5539_v36 = vmul.f32 %v5531_v24, %v14494_v23  ;;  %v5540_v20 = vmul.f32 %v5525_v50, %v14495_v40  ;;  %v8766_v61 = vld [vmem:[%s14615_s5 + $0x28] sm:$0xff] }
0x14d7   : > { %v11672_v31 = vadd.f32 %v5780_v46, %v5723_v26  ;;  %v11734_v46 = vmul.f32 %v11325_v55, %v11209_v30  ;;  %v5372_v29 = vmul.f32 %v10917_v6, %v5316_v63  ;;  %v5658_v58 = vmul.f32 %v5650_v54, %v14628_v3  ;;  %v14631_v54 = vld [vmem:[#allocation74_spill] sm:$0xff] }
0x14d8   : > { %6594 = vperm.xlu0 %9388, %v8768_v19   ;;  %6589 = vperm.xlu1 %9389, %v8767_v60   ;;  %14623 = vst [vmem:[#allocation149_spill] sm:$0xff] %v11674_v28  ;;  %v6508_v60 = vld [vmem:[%s14615_s5] sm:$0xff]  ;;  %v5373_v21 = vmul.f32 %v10917_v6, %v5317_v18  ;;  %v5300_v2 = vsel %vm1284_vm7, %v11433_v27, %v11511_v12  ;;  %v8774_v28 = vld [vmem:[%s14615_s5 + $0x68] sm:$0xff] }
0x14d9   : > { %14622 = vst [vmem:[#allocation148_spill] sm:$0xff] %v11672_v31  ;;  %v5312_v30 = vmul.f32 %v5306_v47, %v14499_v52  ;;  %v5659_v26 = vmul.f32 %v5644_v51, %v14629_v4  ;;  %v5529_v45 = vsel %vm1343_vm5, %v11485_v0, %v11448_v5  ;;  %v5417_v32 = vmul.f32 %v5404_v7, %v14502_v48  ;;  %v8765_v27 = vld [vmem:[%s14615_s5 + $0x20] sm:$0xff]  ;;  %v14634_v51 = vld [vmem:[#allocation118_spill] sm:$0xff] }
0x14da   : > { %v11667_v53 = vpop.permute.xlu0 %5822  ;;  %v11669_v37 = vpop.permute.xlu1 %5632  ;;  %v11755_v6 = vmul.f32 %v11325_v55, %v11257_v8  ;;  %v5473_v1 = vmul.f32 %v11207_v34, %v5416_v16  ;;  %v11765_v63 = vmul.f32 %v11255_v11, %v11297_v35  ;;  %v11769_v17 = vmul.f32 %v11255_v11, %v11377_v56 }
0x14db   : > { %v5596_v55 = vmul.f32 %v11179_v41, %v5539_v36  ;;  %v5597_v8 = vmul.f32 %v11179_v41, %v5540_v20  ;;  %v5313_v50 = vmul.f32 %v5300_v2, %v14500_v22  ;;  %v5715_v24 = vmul.f32 %v11217_v15, %v5658_v58  ;;  %v14632_v41 = vld [vmem:[#allocation110_spill] sm:$0xff]  ;;  %v14636_v58 = vld [vmem:[#allocation108_spill] sm:$0xff] }
0x14dc   : > { %6667 = vperm.xlu0 %9388, %v8772_v38   ;;  %6662 = vperm.xlu1 %9389, %v8771_v39   ;;  %v5491_v38 = vadd.f32 %v5477_v49, %v5372_v29  ;;  %14630 = vst [vmem:[#allocation39_spill] sm:$0xff] %v11755_v6  ;;  %v5492_v39 = vadd.f32 %v5478_v59, %v5373_v21  ;;  %v14633_v49 = vld [vmem:[#allocation117_spill] sm:$0xff]  ;;  %v14637_v21 = vld [vmem:[#allocation31_spill] sm:$0xff] }
0x14dd   : > { %v5523_v35 = vsel %vm1343_vm5, %v11448_v5, %v11485_v0  ;;  %v5535_v18 = vmul.f32 %v5529_v45, %v14494_v23  ;;  %v5368_v11 = vmul.f32 %v14631_v54, %v5312_v30  ;;  %v5716_v56 = vmul.f32 %v11217_v15, %v5659_v26  ;;  %v8775_v15 = vld [vmem:[%s14615_s5 + $0x70] sm:$0xff]  ;;  %v14639_v45 = vld [vmem:[#allocation80_spill] sm:$0xff] }
0x14de   : > { %v11721_v13 = vpop.permute.xlu0 %6064  ;;  %v11723_v19 = vpop.permute.xlu1 %5826  ;;  %v5648_v47 = vsel %vm1373_vm4, %v14633_v49, %v14632_v41  ;;  %v5474_v5 = vmul.f32 %v11207_v34, %v5417_v32  ;;  %v5610_v0 = vadd.f32 %v5596_v55, %v5491_v38  ;;  %v5642_v36 = vsel %vm1373_vm4, %v14632_v41, %v14633_v49  ;;  %v8770_v55 = vld [vmem:[%s14615_s5 + $0x48] sm:$0xff]  ;;  %v14642_v41 = vld [vmem:[#allocation82_spill] sm:$0xff] }
0x14df   : > { %v5487_v20 = vadd.f32 %v5473_v1, %v5368_v11  ;;  %v5611_v29 = vadd.f32 %v5597_v8, %v5492_v39  ;;  %v11803_v2 = vmul.f32 %v14637_v21, %v14636_v58  ;;  %v5536_v34 = vmul.f32 %v5523_v35, %v14495_v40  ;;  %v14641_v11 = vld [vmem:[#allocation75_spill] sm:$0xff] }
0x14e0   : > { %6519 = vperm.xlu0 %9388, %v6509_v42   ;;  %6514 = vperm.xlu1 %9389, %v6508_v60   ;;  %v8776_v42 = vld [vmem:[%s14615_s5 + $0x78] sm:$0xff]  ;;  %v14635_v60 = vld [vmem:[#allocation109_spill] sm:$0xff]  ;;  %v5369_v26 = vmul.f32 %v14631_v54, %v5313_v50  ;;  %v5592_v38 = vmul.f32 %v14639_v45, %v5535_v18  ;;  %v5654_v32 = vmul.f32 %v5648_v47, %v14628_v3  ;;  %v8769_v18 = vld [vmem:[%s14615_s5 + $0x40] sm:$0xff] }
0x14e1   : > { %v5834_v59 = vsel %vm1403_vm3, %v14635_v60, %v14634_v51  ;;  %14638 = vst [vmem:[#allocation40_spill] sm:$0xff] %v11803_v2  ;;  %v5840_v30 = vsel %vm1403_vm3, %v14634_v51, %v14635_v60  ;;  %v5730_v1 = vadd.f32 %v5716_v56, %v5611_v29  ;;  %v5655_v8 = vmul.f32 %v5642_v36, %v14629_v4  ;;  %v14643_v51 = vld [vmem:[#allocation81_spill] sm:$0xff]  ;;  %v14646_v60 = vld [vmem:[#allocation124_spill] sm:$0xff]  ;;  %v14703_v2 = vld [vmem:[#allocation54_spill] sm:$0xff] }
0x14e2   : > { %v11757_v9 = vpop.permute.xlu0 %5284  ;;  %v11759_v12 = vpop.permute.xlu1 %5941  ;;  %v5488_v35 = vadd.f32 %v5474_v5, %v5369_v26  ;;  %v5786_v49 = vmul.f32 %v14642_v41, %v14641_v11  ;;  %v5787_v50 = vmul.f32 %v14642_v41, %v14643_v51  ;;  %v5606_v56 = vadd.f32 %v5592_v38, %v5487_v20  ;;  %v14648_v29 = vld [vmem:[#allocation112_spill] sm:$0xff]  ;;  %v14650_v20 = vld [vmem:[#allocation119_spill] sm:$0xff]  ;;  %v14654_v41 = vld [vmem:[#allocation90_spill] sm:$0xff] }
0x14e3   : > { %v11837_v58 = vmul.f32 %v14637_v21, %v14648_v29  ;;  %v14653_v38 = vld [vmem:[#allocation88_spill] sm:$0xff] }
0x14e4   : > { %6584 = vperm.xlu0 %9388, %v8766_v61   ;;  %6579 = vperm.xlu1 %9389, %v8765_v27   ;;  %v5729_v61 = vadd.f32 %v5715_v24, %v5610_v0  ;;  %v14640_v27 = vld [vmem:[#allocation37_spill] sm:$0xff]  ;;  %v5711_v11 = vmul.f32 %v14653_v38, %v5654_v32  ;;  %v5801_v62 = vadd.f32 %v5787_v50, %v5730_v1 }
0x14e5   : > { %v5848_v39 = vmul.f32 %v5834_v59, %v14640_v27  ;;  %v14647_v59 = vld [vmem:[#allocation113_spill] sm:$0xff]  ;;  %14649 = vst [vmem:[#allocation110_spill] sm:$0xff] %v11837_v58  ;;  %v5712_v50 = vmul.f32 %v14653_v38, %v5655_v8  ;;  %v14665_v8 = vld [vmem:[#allocation34_spill] sm:$0xff] }
0x14e6   : > { %v11792_v7 = vpop.permute.xlu0 %5388  ;;  %v11794_v16 = vpop.permute.xlu1 %6183  ;;  %v5953_v5 = vsel %vm1433_vm2, %v14647_v59, %v14646_v60  ;;  %v5959_v0 = vsel %vm1433_vm2, %v14646_v60, %v14647_v59  ;;  %v5800_v36 = vadd.f32 %v5786_v49, %v5729_v61  ;;  %v14656_v60 = vld [vmem:[#allocation115_spill] sm:$0xff]  ;;  %v8780_v61 = vld [vmem:[%s14615_s5 + $0x98] sm:$0xff]  ;;  %v14658_v49 = vld [vmem:[#allocation36_spill] sm:$0xff] }
0x14e7   : > { %v5905_v51 = vmul.f32 %v14654_v41, %v5848_v39  ;;  %v5968_v59 = vmul.f32 %v5959_v0, %v14658_v49  ;;  %v6078_v32 = vsel %vm1463_vm1, %v14655_v57, %v14656_v60  ;;  %v8779_v1 = vld [vmem:[%s14615_s5 + $0x90] sm:$0xff]  ;;  %v14711_v58 = vld [vmem:[#allocation62_spill] sm:$0xff] }
0x14e8   : > { %6740 = vperm.xlu0 %9388, %v8776_v42   ;;  %6735 = vperm.xlu1 %9389, %v8775_v15   ;;  %v14645_v42 = vld [vmem:[#allocation38_spill] sm:$0xff]  ;;  %v5593_v15 = vmul.f32 %v14639_v45, %v5536_v34  ;;  %v6072_v34 = vsel %vm1463_vm1, %v14656_v60, %v14655_v57 }
0x14e9   : > { %v5849_v47 = vmul.f32 %v5840_v30, %v14645_v42  ;;  %v14651_v30 = vld [vmem:[#allocation63_spill] sm:$0xff]  ;;  %v5919_v0 = vadd.f32 %v5905_v51, %v5800_v36  ;;  %v6086_v38 = vmul.f32 %v6072_v34, %v14665_v8  ;;  %v14669_v51 = vld [vmem:[#allocation98_spill] sm:$0xff] }
0x14ea   : > { %v11820_v24 = vpop.permute.xlu0 %5626  ;;  %v11822_v54 = vpop.permute.xlu1 %6060  ;;  %v11841_v26 = vmul.f32 %v14651_v30, %v14650_v20  ;;  %v5607_v45 = vadd.f32 %v5593_v15, %v5488_v35  ;;  %v5725_v35 = vadd.f32 %v5711_v11, %v5606_v56  ;;  %v14661_v15 = vld [vmem:[#allocation123_spill] sm:$0xff]  ;;  %v14663_v20 = vld [vmem:[#allocation126_spill] sm:$0xff]  ;;  %v14666_v56 = vld [vmem:[#allocation33_spill] sm:$0xff] }
0x14eb   : > { %14644 = vst [vmem:[#allocation74_spill] sm:$0xff] %v11822_v54  ;;  %v5832_v57 = vsel %vm1403_vm3, %v14664_v33, %v14663_v20  ;;  %v5838_v60 = vsel %vm1403_vm3, %v14663_v20, %v14664_v33  ;;  %v6087_v11 = vmul.f32 %v6078_v32, %v14666_v56  ;;  %v6025_v33 = vmul.f32 %v14670_v44, %v5968_v59  ;;  %v14672_v34 = vld [vmem:[#allocation130_spill] sm:$0xff]  ;;  %v14679_v59 = vld [vmem:[#allocation116_spill] sm:$0xff] }
0x14ec   : > { %6657 = vperm.xlu0 %9388, %v8770_v55   ;;  %14652 = vst [vmem:[#allocation117_spill] sm:$0xff] %v11841_v26  ;;  %6652 = vperm.xlu1 %9389, %v8769_v18   ;;  %v14657_v55 = vld [vmem:[#allocation35_spill] sm:$0xff]  ;;  %v5906_v18 = vmul.f32 %v14654_v41, %v5849_v47  ;;  %v14668_v41 = vld [vmem:[#allocation72_spill] sm:$0xff]  ;;  %v11888_v20 = vadd.f32 %v5712_v50, %v5607_v45 }
0x14ed   : > { %v5967_v21 = vmul.f32 %v5953_v5, %v14657_v55  ;;  %v11865_v5 = vmul.f32 %v14651_v30, %v14661_v15  ;;  %v14667_v30 = vld [vmem:[#allocation86_spill] sm:$0xff]  ;;  %v11883_v15 = vmul.f32 %v14668_v41, %v14669_v51  ;;  %v14678_v45 = vld [vmem:[#allocation132_spill] sm:$0xff]  ;;  %v14680_v51 = vld [vmem:[#allocation99_spill] sm:$0xff] }
0x14ee   : > { %v11856_v29 = vpop.permute.xlu0 %5816  ;;  %v11858_v39 = vpop.permute.xlu1 %6179  ;;  %v5920_v47 = vadd.f32 %v5906_v18, %v5801_v62  ;;  %v11879_v36 = vmul.f32 %v14668_v41, %v14667_v30  ;;  %14671 = vst [vmem:[#allocation31_spill] sm:$0xff] %v11888_v20  ;;  %v14673_v62 = vld [vmem:[#allocation114_spill] sm:$0xff]  ;;  %v8773_v30 = vld [vmem:[%s14615_s5 + $0x60] sm:$0xff]  ;;  %v6191_v50 = vsel %vm1493_vm8, %v14679_v59, %v14678_v45  ;;  %v6143_v6 = vmul.f32 %v14680_v51, %v6086_v38  ;;  %v14681_v20 = vld [vmem:[#allocation141_spill] sm:$0xff] }
0x14ef   : > { %14659 = vst [vmem:[#allocation118_spill] sm:$0xff] %v11856_v29  ;;  %14660 = vst [vmem:[#allocation109_spill] sm:$0xff] %v11858_v39  ;;  %v6024_v31 = vmul.f32 %v14670_v44, %v5967_v21  ;;  %v11903_v21 = vmul.f32 %v5832_v57, %v14640_v27  ;;  %v11906_v44 = vmul.f32 %v5838_v60, %v14645_v42  ;;  %v14682_v39 = vld [vmem:[#allocation120_spill] sm:$0xff]  ;;  %v8784_v38 = vld [vmem:[%s14615_s5 + $0xb8] sm:$0xff] }
0x14f0   : > { %14662 = vst [vmem:[#allocation108_spill] sm:$0xff] %v11865_v5  ;;  %6781 = vperm.xlu0 %9388, %v8780_v61   ;;  %6776 = vperm.xlu1 %9389, %v8779_v1   ;;  %v5951_v61 = vsel %vm1433_vm2, %v14673_v62, %v14672_v34  ;;  %v11900_v1 = vadd.f32 %v11734_v46, %v5725_v35  ;;  %v8778_v5 = vld [vmem:[%s14615_s5 + $0x88] sm:$0xff]  ;;  %v8777_v26 = vld [vmem:[%s14615_s5 + $0x80] sm:$0xff] }
0x14f1   : > { %14676 = vst [vmem:[#allocation75_spill] sm:$0xff] %v11903_v21  ;;  %14677 = vst [vmem:[#allocation82_spill] sm:$0xff] %v11906_v44  ;;  %v6038_v41 = vadd.f32 %v6024_v31, %v5919_v0  ;;  %v5303_v46 = vsel %vm1284_vm7, %v14682_v39, %v14681_v20  ;;  %v5309_v35 = vsel %vm1284_vm7, %v14681_v20, %v14682_v39  ;;  %v14686_v39 = vld [vmem:[#allocation47_spill] sm:$0xff]  ;;  %v14694_v44 = vld [vmem:[#allocation134_spill] sm:$0xff] }
0x14f2   : > { %v11894_v32 = vpop.permute.xlu0 %6173  ;;  %v11896_v18 = vpop.permute.xlu1 %5507  ;;  %14675 = vst [vmem:[#allocation37_spill] sm:$0xff] %v11900_v1  ;;  %v11921_v57 = vadd.f32 %v6025_v33, %v5920_v47  ;;  %v11924_v60 = vmul.f32 %v14680_v51, %v6087_v11  ;;  %v5957_v31 = vsel %vm1433_vm2, %v14672_v34, %v14673_v62  ;;  %v11931_v0 = vmul.f32 %v5951_v61, %v14657_v55  ;;  %v14687_v33 = vld [vmem:[#allocation143_spill] sm:$0xff]  ;;  %v14688_v11 = vld [vmem:[#allocation121_spill] sm:$0xff] }
0x14f3   : > { %14674 = vst [vmem:[#allocation80_spill] sm:$0xff] %v11894_v32  ;;  %v6205_v47 = vmul.f32 %v6191_v50, %v14686_v39  ;;  %v5407_v20 = vsel %vm1313_vm6, %v14688_v11, %v14687_v33  ;;  %v5413_v34 = vsel %vm1313_vm6, %v14687_v33, %v14688_v11  ;;  %v14690_v50 = vld [vmem:[#allocation147_spill] sm:$0xff]  ;;  %v14691_v51 = vld [vmem:[#allocation125_spill] sm:$0xff]  ;;  %v11963_v11 = vmul.f32 %v5957_v31, %v14658_v49 }
0x14f4   : > { %6730 = vperm.xlu0 %9388, %v8774_v28   ;;  %14683 = vst [vmem:[#allocation81_spill] sm:$0xff] %v11921_v57  ;;  %14684 = vst [vmem:[#allocation38_spill] sm:$0xff] %v11924_v60  ;;  %6725 = vperm.xlu1 %9389, %v8773_v30   ;;  %v6197_v28 = vsel %vm1493_vm8, %v14678_v45, %v14679_v59  ;;  %v8783_v30 = vld [vmem:[%s14615_s5 + $0xb0] sm:$0xff]  ;;  %v5318_v45 = vmul.f32 %v5309_v35, %v14499_v52 }
0x14f5   : > { %14685 = vst [vmem:[#allocation124_spill] sm:$0xff] %v11931_v0  ;;  %v5319_v59 = vmul.f32 %v5303_v46, %v14500_v22  ;;  %v5405_v1 = vsel %vm1313_vm6, %v14691_v51, %v14690_v50  ;;  %v5411_v33 = vsel %vm1313_vm6, %v14690_v50, %v14691_v51  ;;  %14692 = vst [vmem:[#allocation112_spill] sm:$0xff] %v11963_v11  ;;  %v14693_v0 = vld [vmem:[#allocation144_spill] sm:$0xff]  ;;  %v14696_v31 = vld [vmem:[#allocation145_spill] sm:$0xff] }
0x14f6   : > { %v11947_v62 = vpop.permute.xlu0 %5296  ;;  %v11949_v61 = vpop.permute.xlu1 %5935  ;;  %v5526_v35 = vsel %vm1343_vm5, %v14694_v44, %v14693_v0  ;;  %v5532_v46 = vsel %vm1343_vm5, %v14693_v0, %v14694_v44  ;;  %v11973_v21 = vadd.f32 %v6143_v6, %v6038_v41  ;;  %v5422_v60 = vmul.f32 %v5413_v34, %v14501_v43  ;;  %v14697_v51 = vld [vmem:[#allocation122_spill] sm:$0xff]  ;;  %v14698_v44 = vld [vmem:[#allocation48_spill] sm:$0xff] }
0x14f7   : > { %14689 = vst [vmem:[#allocation113_spill] sm:$0xff] %v11949_v61  ;;  %v5423_v50 = vmul.f32 %v5407_v20, %v14502_v48  ;;  %v5301_v11 = vsel %vm1284_vm7, %v14697_v51, %v14696_v31  ;;  %v5307_v57 = vsel %vm1284_vm7, %v14696_v31, %v14697_v51  ;;  %v11987_v0 = vmul.f32 %v6197_v28, %v14698_v44  ;;  %v14700_v6 = vld [vmem:[#allocation102_spill] sm:$0xff] }
0x14f8   : > { %6854 = vperm.xlu0 %9388, %v8784_v38   ;;  %14695 = vst [vmem:[#allocation119_spill] sm:$0xff] %v11973_v21  ;;  %6849 = vperm.xlu1 %9389, %v8783_v30   ;;  %v11990_v41 = vmul.f32 %v14700_v6, %v6205_v47  ;;  %v5418_v38 = vmul.f32 %v5411_v33, %v14501_v43 }
0x14f9   : > { %14699 = vst [vmem:[#allocation63_spill] sm:$0xff] %v11987_v0  ;;  %v5419_v20 = vmul.f32 %v5405_v1, %v14502_v48  ;;  %v5374_v31 = vmul.f32 %v14703_v2, %v5318_v45  ;;  %v5375_v30 = vmul.f32 %v14703_v2, %v5319_v59  ;;  %v5541_v28 = vmul.f32 %v5532_v46, %v14494_v23  ;;  %v14704_v1 = vld [vmem:[#allocation127_spill] sm:$0xff]  ;;  %v14705_v2 = vld [vmem:[#allocation56_spill] sm:$0xff]  ;;  %v14706_v46 = vld [vmem:[#allocation146_spill] sm:$0xff] }
0x14fa   : > { %14701 = vst [vmem:[#allocation88_spill] sm:$0xff] %v11990_v41  ;;  %v11994_v34 = vpop.permute.xlu0 %5400  ;;  %v11996_v21 = vpop.permute.xlu1 %6054  ;;  %v5542_v51 = vmul.f32 %v5526_v35, %v14495_v40  ;;  %v5314_v47 = vmul.f32 %v5307_v57, %v14499_v52  ;;  %v5315_v33 = vmul.f32 %v5301_v11, %v14500_v22  ;;  %v5645_v41 = vsel %vm1373_vm4, %v14704_v1, %v11642_v25  ;;  %v14707_v57 = vld [vmem:[#allocation136_spill] sm:$0xff]  ;;  %v8788_v0 = vld [vmem:[%s14615_s5 + $0xd8] sm:$0xff] }
0x14fb   : > { %14702 = vst [vmem:[#allocation90_spill] sm:$0xff] %v11996_v21  ;;  %v5651_v45 = vsel %vm1373_vm4, %v11642_v25, %v14704_v1  ;;  %v5479_v59 = vmul.f32 %v14705_v2, %v5422_v60  ;;  %v5480_v35 = vmul.f32 %v14705_v2, %v5423_v50  ;;  %v5524_v11 = vsel %vm1343_vm5, %v14707_v57, %v14706_v46  ;;  %v14708_v21 = vld [vmem:[#allocation64_spill] sm:$0xff] }
0x14fc   : > { %6771 = vperm.xlu0 %9388, %v8778_v5   ;;  %v5530_v6 = vsel %vm1343_vm5, %v14706_v46, %v14707_v57  ;;  %6766 = vperm.xlu1 %9389, %v8777_v26   ;;  %v5475_v32 = vmul.f32 %v14708_v21, %v5418_v38  ;;  %v5476_v25 = vmul.f32 %v14708_v21, %v5419_v20  ;;  %v14709_v5 = vld [vmem:[#allocation138_spill] sm:$0xff]  ;;  %v8787_v26 = vld [vmem:[%s14615_s5 + $0xd0] sm:$0xff] }
0x14fd   : > { %v5954_v60 = vsel %vm1433_vm2, %v14709_v5, %v11640_v14  ;;  %v5960_v50 = vsel %vm1433_vm2, %v11640_v14, %v14709_v5  ;;  %v14710_v46 = vld [vmem:[#allocation61_spill] sm:$0xff]  ;;  %v5660_v20 = vmul.f32 %v5651_v45, %v14628_v3  ;;  %v5661_v57 = vmul.f32 %v5645_v41, %v14629_v4 }
0x14fe   : > { %v12034_v1 = vpop.permute.xlu0 %5638  ;;  %v12036_v2 = vpop.permute.xlu1 %5519  ;;  %v5598_v38 = vmul.f32 %v14710_v46, %v5541_v28  ;;  %v5599_v21 = vmul.f32 %v14710_v46, %v5542_v51  ;;  %v5370_v54 = vmul.f32 %v14711_v58, %v5314_v47  ;;  %v5371_v61 = vmul.f32 %v14711_v58, %v5315_v33  ;;  %v14712_v51 = vld [vmem:[#allocation140_spill] sm:$0xff]  ;;  %v14713_v41 = vld [vmem:[#allocation129_spill] sm:$0xff]  ;;  %v8781_v46 = vld [vmem:[%s14615_s5 + $0xa0] sm:$0xff] }
0x14ff   : > { %v5537_v14 = vmul.f32 %v5530_v6, %v14494_v23  ;;  %v5538_v5 = vmul.f32 %v5524_v11, %v14495_v40  ;;  %v5969_v29 = vmul.f32 %v5954_v60, %v14657_v55  ;;  %v5970_v28 = vmul.f32 %v5960_v50, %v14658_v49  ;;  %v8782_v47 = vld [vmem:[%s14615_s5 + $0xa8] sm:$0xff] }
0x1500   : > { %6927 = vperm.xlu0 %9388, %v8788_v0   ;;  %v5833_v45 = vsel %vm1403_vm3, %v14712_v51, %v11667_v53  ;;  %v5649_v58 = vsel %vm1373_vm4, %v11669_v37, %v14713_v41  ;;  %6922 = vperm.xlu1 %9389, %v8787_v26   ;;  %v5489_v6 = vadd.f32 %v5475_v32, %v5370_v54  ;;  %v14716_v54 = vld [vmem:[#allocation65_spill] sm:$0xff] }
0x1501   : > { %v5490_v33 = vadd.f32 %v5476_v25, %v5371_v61  ;;  %v5839_v0 = vsel %vm1403_vm3, %v11667_v53, %v14712_v51  ;;  %v5643_v11 = vsel %vm1373_vm4, %v14713_v41, %v11669_v37  ;;  %v5493_v26 = vadd.f32 %v5479_v59, %v5374_v31  ;;  %v14717_v25 = vld [vmem:[#allocation32_spill] sm:$0xff] }
0x1502   : > { %v12066_v60 = vpop.permute.xlu0 %5828  ;;  %v12068_v50 = vpop.permute.xlu1 %5947  ;;  %v5494_v44 = vadd.f32 %v5480_v35, %v5375_v30  ;;  %v5717_v32 = vmul.f32 %v14716_v54, %v5660_v20  ;;  %v5718_v61 = vmul.f32 %v14716_v54, %v5661_v57  ;;  %v5594_v49 = vmul.f32 %v14717_v25, %v5537_v14  ;;  %v8792_v30 = vld [vmem:[%s14615_s5 + $0xf8] sm:$0xff]  ;;  %v14718_v59 = vld [vmem:[#allocation84_spill] sm:$0xff] }
0x1503   : > { %14714 = vst [vmem:[#allocation128_spill] sm:$0xff] %v12066_v60  ;;  %14715 = vst [vmem:[#allocation115_spill] sm:$0xff] %v12068_v50  ;;  %v5595_v53 = vmul.f32 %v14717_v25, %v5538_v5  ;;  %v5846_v51 = vmul.f32 %v5833_v45, %v14640_v27  ;;  %v5656_v37 = vmul.f32 %v5649_v58, %v14628_v3  ;;  %v8791_v45 = vld [vmem:[%s14615_s5 + $0xf0] sm:$0xff] }
0x1504   : > { %6844 = vperm.xlu0 %9388, %v8782_v47   ;;  %v5612_v41 = vadd.f32 %v5598_v38, %v5493_v26  ;;  %v5613_v50 = vadd.f32 %v5599_v21, %v5494_v44  ;;  %v5847_v60 = vmul.f32 %v5839_v0, %v14645_v42  ;;  %v5657_v31 = vmul.f32 %v5643_v11, %v14629_v4  ;;  %v14719_v21 = vld [vmem:[#allocation142_spill] sm:$0xff]  ;;  %v14722_v0 = vld [vmem:[#allocation131_spill] sm:$0xff] }
0x1505   : > { %6839 = vperm.xlu1 %9389, %v8781_v46   ;;  %v12081_v35 = vmul.f32 %v14718_v59, %v5969_v29  ;;  %v12084_v20 = vmul.f32 %v14718_v59, %v5970_v28  ;;  %v5608_v57 = vadd.f32 %v5594_v49, %v5489_v6  ;;  %v5609_v14 = vadd.f32 %v5595_v53, %v5490_v33  ;;  %v14720_v49 = vld [vmem:[#allocation87_spill] sm:$0xff]  ;;  %v14721_v6 = vld [vmem:[#allocation76_spill] sm:$0xff] }
0x1506   : > { %v12086_v5 = vpop.permute.xlu0 %6185  ;;  %v5731_v38 = vadd.f32 %v5717_v32, %v5612_v41  ;;  %v5732_v44 = vadd.f32 %v5718_v61, %v5613_v50  ;;  %v6073_v58 = vsel %vm1463_vm1, %v14719_v21, %v11721_v13  ;;  %v6079_v29 = vsel %vm1463_vm1, %v11721_v13, %v14719_v21  ;;  %v12097_v28 = vpop.permute.xlu1 %6066  ;;  %v8786_v32 = vld [vmem:[%s14615_s5 + $0xc8] sm:$0xff] }
0x1507   : > { %v12100_v47 = vmul.f32 %v14720_v49, %v5846_v51  ;;  %v5713_v33 = vmul.f32 %v14721_v6, %v5656_v37  ;;  %v5835_v11 = vsel %vm1403_vm3, %v14722_v0, %v11723_v19  ;;  %v5408_v50 = vsel %vm1313_vm6, %v11792_v7, %v11994_v34  ;;  %v8785_v51 = vld [vmem:[%s14615_s5 + $0xc0] sm:$0xff] }
0x1508   : > { %7000 = vperm.xlu0 %9388, %v8792_v30   ;;  %v12112_v13 = vmul.f32 %v14720_v49, %v5847_v60  ;;  %v5714_v46 = vmul.f32 %v14721_v6, %v5657_v31  ;;  %v5841_v26 = vsel %vm1403_vm3, %v11723_v19, %v14722_v0  ;;  %v5414_v54 = vsel %vm1313_vm6, %v11994_v34, %v11792_v7 }
0x1509   : > { %6995 = vperm.xlu1 %9389, %v8791_v45   ;;  %v6088_v61 = vmul.f32 %v6073_v58, %v14665_v8  ;;  %v6089_v25 = vmul.f32 %v6079_v29, %v14666_v56  ;;  %v5304_v60 = vsel %vm1284_vm7, %v11757_v9, %v11947_v62  ;;  %v5527_v19 = vsel %vm1343_vm5, %v11896_v18, %v12036_v2 }
0x150a   : > { %v12134_v53 = vpop.permute.xlu0 %5509  ;;  %v5850_v7 = vmul.f32 %v5835_v11, %v14640_v27  ;;  %v5310_v34 = vsel %vm1284_vm7, %v11947_v62, %v11757_v9  ;;  %v5425_v37 = vmul.f32 %v5408_v50, %v14502_v48  ;;  %v5533_v41 = vsel %vm1343_vm5, %v12036_v2, %v11896_v18  ;;  %v12147_v31 = vpop.permute.xlu1 %5286  ;;  %v8796_v18 = vld [vmem:[%s14615_s5 + $0x118] sm:$0xff]  ;;  %v14723_v2 = vld [vmem:[#allocation89_spill] sm:$0xff]  ;;  %v14726_v50 = vld [vmem:[#allocation59_spill] sm:$0xff] }
0x150b   : > { %v5727_v30 = vadd.f32 %v5713_v33, %v5608_v57  ;;  %v5802_v59 = vadd.f32 %v11879_v36, %v5731_v38  ;;  %v5851_v45 = vmul.f32 %v5841_v26, %v14645_v42  ;;  %v5424_v21 = vmul.f32 %v5414_v54, %v14501_v43  ;;  %v14725_v33 = vld [vmem:[#allocation133_spill] sm:$0xff] }
0x150c   : > { %6917 = vperm.xlu0 %9388, %v8786_v32   ;;  %v5728_v58 = vadd.f32 %v5714_v46, %v5609_v14  ;;  %v5803_v9 = vadd.f32 %v11883_v15, %v5732_v44  ;;  %v5321_v62 = vmul.f32 %v5304_v60, %v14500_v22  ;;  %v5544_v29 = vmul.f32 %v5527_v19, %v14495_v40  ;;  %v8795_v14 = vld [vmem:[%s14615_s5 + $0x110] sm:$0xff]  ;;  %v14727_v60 = vld [vmem:[#allocation135_spill] sm:$0xff] }
0x150d   : > { %6912 = vperm.xlu1 %9389, %v8785_v51   ;;  %v12157_v49 = vmul.f32 %v14723_v2, %v6088_v61  ;;  %v12160_v57 = vmul.f32 %v14723_v2, %v6089_v25  ;;  %v5320_v36 = vmul.f32 %v5310_v34, %v14499_v52  ;;  %v5543_v38 = vmul.f32 %v5533_v41, %v14494_v23  ;;  %v14724_v15 = vld [vmem:[#allocation77_spill] sm:$0xff] }
0x150e   : > { %v12164_v6 = vpop.permute.xlu0 %5937  ;;  %v5907_v44 = vmul.f32 %v14724_v15, %v5850_v7  ;;  %v5952_v0 = vsel %vm1433_vm2, %v14725_v33, %v11759_v12  ;;  %v5958_v11 = vsel %vm1433_vm2, %v11759_v12, %v14725_v33  ;;  %v5482_v46 = vmul.f32 %v14726_v50, %v5425_v37  ;;  %v12177_v26 = vpop.permute.xlu1 %5390  ;;  %v14728_v19 = vld [vmem:[#allocation57_spill] sm:$0xff]  ;;  %v14729_v7 = vld [vmem:[#allocation60_spill] sm:$0xff] }
0x150f   : > { %v5798_v54 = vadd.f32 %v11765_v63, %v5727_v30  ;;  %v5908_v32 = vmul.f32 %v14724_v15, %v5851_v45  ;;  %v5481_v61 = vmul.f32 %v14726_v50, %v5424_v21  ;;  %v5646_v25 = vsel %vm1373_vm4, %v11820_v24, %v12034_v1  ;;  %v8790_v37 = vld [vmem:[%s14615_s5 + $0xe8] sm:$0xff] }
0x1510   : > { %7073 = vperm.xlu0 %9388, %v8796_v18   ;;  %v6192_v12 = vsel %vm1493_vm8, %v14727_v60, %v11794_v16  ;;  %v5377_v51 = vmul.f32 %v14728_v19, %v5321_v62  ;;  %v5652_v63 = vsel %vm1373_vm4, %v12034_v1, %v11820_v24  ;;  %v5601_v34 = vmul.f32 %v14729_v7, %v5544_v29  ;;  %v8789_v18 = vld [vmem:[%s14615_s5 + $0xe0] sm:$0xff]  ;;  %v14730_v15 = vld [vmem:[#allocation36_spill] sm:$0xff] }
0x1511   : > { %7068 = vperm.xlu1 %9389, %v8795_v14   ;;  %v12198_v41 = vadd.f32 %v11769_v17, %v5728_v58  ;;  %v6198_v30 = vsel %vm1493_vm8, %v11794_v16, %v14727_v60  ;;  %v5376_v45 = vmul.f32 %v14728_v19, %v5320_v36  ;;  %v5600_v21 = vmul.f32 %v14729_v7, %v5543_v38  ;;  %v8794_v50 = vld [vmem:[%s14615_s5 + $0x108] sm:$0xff]  ;;  %v14738_v7 = vld [vmem:[#allocation67_spill] sm:$0xff] }
0x1512   : > { %v12206_v62 = vpop.permute.xlu0 %6175  ;;  %v5921_v24 = vadd.f32 %v5907_v44, %v5802_v59  ;;  %v5965_v1 = vmul.f32 %v5952_v0, %v14657_v55  ;;  %v5496_v29 = vadd.f32 %v5482_v46, %v5377_v51  ;;  %v5663_v17 = vmul.f32 %v5646_v25, %v14629_v4  ;;  %v12211_v58 = vpop.permute.xlu1 %5628  ;;  %v14731_v44 = vld [vmem:[#allocation48_spill] sm:$0xff]  ;;  %v14735_v25 = vld [vmem:[#allocation113_spill] sm:$0xff] }
0x1513   : > { %v5922_v2 = vadd.f32 %v5908_v32, %v5803_v9  ;;  %v6207_v16 = vmul.f32 %v6192_v12, %v14686_v39  ;;  %v5495_v14 = vadd.f32 %v5481_v61, %v5376_v45  ;;  %v5662_v36 = vmul.f32 %v5652_v63, %v14628_v3  ;;  %v14732_v9 = vld [vmem:[#allocation128_spill] sm:$0xff]  ;;  %v14733_v32 = vld [vmem:[#allocation118_spill] sm:$0xff]  ;;  %v8793_v12 = vld [vmem:[%s14615_s5 + $0x100] sm:$0xff]  ;;  %s14794_s5 = sld [smem:[#allocation15_spill]] }
0x1514   : > { %6990 = vperm.xlu0 %9388, %v8790_v37   ;;  %v12216_v38 = vadd.f32 %v12100_v47, %v5798_v54  ;;  %v12219_v59 = vmul.f32 %v5958_v11, %v14730_v15  ;;  %v6208_v33 = vmul.f32 %v6198_v30, %v14731_v44  ;;  %v5615_v0 = vadd.f32 %v5601_v34, %v5496_v29  ;;  %v14734_v54 = vld [vmem:[#allocation115_spill] sm:$0xff]  ;;  %v14737_v51 = vld [vmem:[#allocation92_spill] sm:$0xff] }
0x1515   : > { %6985 = vperm.xlu1 %9389, %v8789_v18   ;;  %v5614_v46 = vadd.f32 %v5600_v21, %v5495_v14  ;;  %v5836_v61 = vsel %vm1403_vm3, %v14733_v32, %v14732_v9  ;;  %v5842_v47 = vsel %vm1403_vm3, %v14732_v9, %v14733_v32  ;;  %v5955_v11 = vsel %vm1433_vm2, %v14735_v25, %v14734_v54  ;;  %v14739_v21 = vld [vmem:[#allocation93_spill] sm:$0xff] }
0x1516   : > { %v5299_v60 = vpop.permute.xlu0 %5298  ;;  %v12237_v19 = vadd.f32 %v12081_v35, %v5921_v24  ;;  %v12240_v63 = vmul.f32 %v14737_v51, %v5965_v1  ;;  %v5720_v34 = vmul.f32 %v14738_v7, %v5663_v17  ;;  %v5961_v37 = vsel %vm1433_vm2, %v14734_v54, %v14735_v25  ;;  %v12247_v30 = vpop.permute.xlu1 %5818  ;;  %v14740_v35 = vld [vmem:[#allocation74_spill] sm:$0xff]  ;;  %v14741_v24 = vld [vmem:[#allocation137_spill] sm:$0xff] }
0x1517   : > { %v6041_v45 = vadd.f32 %v12084_v20, %v5922_v2  ;;  %v12251_v18 = vmul.f32 %v14739_v21, %v6207_v16  ;;  %v6071_v1 = vsel %vm1463_vm1, %v14741_v24, %v14740_v35  ;;  %v5719_v29 = vmul.f32 %v14738_v7, %v5662_v36  ;;  %v7095_v20 = vld [vmem:[%s14736_s4 + $0x18] sm:$0xff] }
0x1518   : > { %7063 = vperm.xlu0 %9388, %v8794_v50   ;;  %v5734_v17 = vadd.f32 %v5720_v34, %v5615_v0  ;;  %v5852_v14 = vmul.f32 %v5836_v61, %v14640_v27  ;;  %v5853_v9 = vmul.f32 %v5842_v47, %v14645_v42  ;;  %v5971_v32 = vmul.f32 %v5955_v11, %v14657_v55  ;;  %v7094_v61 = vld [vmem:[%s14736_s4 + $0x10] sm:$0xff] }
0x1519   : > { %7058 = vperm.xlu1 %9389, %v8793_v12   ;;  %v12263_v2 = vmul.f32 %v14739_v21, %v6208_v33  ;;  %v12269_v16 = vsel %vm1463_vm1, %v14740_v35, %v14741_v24  ;;  %v5733_v36 = vadd.f32 %v5719_v29, %v5614_v46  ;;  %v5972_v0 = vmul.f32 %v5961_v37, %v14730_v15  ;;  %v14743_v37 = vld [vmem:[#allocation79_spill] sm:$0xff]  ;;  %v14745_v29 = vld [vmem:[#allocation80_spill] sm:$0xff] }
0x151a   : > { %v5403_v50 = vpop.permute.xlu0 %5402  ;;  %v5305_v47 = vsel %vm1284_vm7, %v12147_v31, %v5299_v60  ;;  %v5311_v33 = vsel %vm1284_vm7, %v5299_v60, %v12147_v31  ;;  %v12285_v25 = vpop.permute.xlu1 %6056  ;;  %v12288_v11 = vmul.f32 %v6071_v1, %v14665_v8  ;;  %v12293_v31 = vadd.f32 %v12160_v57, %v6041_v45  ;;  %v14742_v60 = vld [vmem:[#allocation110_spill] sm:$0xff] }
0x151b   : > { %v5409_v54 = vsel %vm1313_vm6, %v12177_v26, %v5403_v50  ;;  %v5415_v46 = vsel %vm1313_vm6, %v5403_v50, %v12177_v26  ;;  %v5805_v34 = vadd.f32 %v14742_v60, %v5734_v17  ;;  %v5909_v21 = vmul.f32 %v14743_v37, %v5852_v14  ;;  %v14744_v26 = vld [vmem:[#allocation83_spill] sm:$0xff]  ;;  %v14746_v17 = vld [vmem:[#allocation40_spill] sm:$0xff] }
0x151c   : > { %v5426_v12 = vmul.f32 %v5415_v46, %v14501_v43  ;;  %v5427_v7 = vmul.f32 %v5409_v54, %v14502_v48  ;;  %7113 = vperm.xlu0 %9388, %v7095_v20   ;;  %v5910_v35 = vmul.f32 %v14743_v37, %v5853_v9  ;;  %v6028_v24 = vmul.f32 %v14744_v26, %v5971_v32  ;;  %v14747_v32 = vld [vmem:[#allocation90_spill] sm:$0xff]  ;;  %v14750_v48 = vld [vmem:[#allocation55_spill] sm:$0xff] }
0x151d   : > { %7108 = vperm.xlu1 %9389, %v7094_v61   ;;  %v6029_v1 = vmul.f32 %v14744_v26, %v5972_v0  ;;  %v6199_v50 = vsel %vm1493_vm8, %v12086_v5, %v14745_v29  ;;  %v5322_v20 = vmul.f32 %v5311_v33, %v14499_v52  ;;  %v5323_v57 = vmul.f32 %v5305_v47, %v14500_v22  ;;  %v14748_v33 = vld [vmem:[#allocation52_spill] sm:$0xff]  ;;  %v14753_v22 = vld [vmem:[#allocation91_spill] sm:$0xff] }
0x151e   : > { %v12306_v45 = vpop.permute.xlu0 %6058  ;;  %v5804_v14 = vadd.f32 %v14746_v17, %v5733_v36  ;;  %v6193_v9 = vsel %vm1493_vm8, %v14745_v29, %v12086_v5  ;;  %v6074_v0 = vsel %vm1463_vm1, %v14747_v32, %v12097_v28  ;;  %v6080_v61 = vsel %vm1463_vm1, %v12097_v28, %v14747_v32  ;;  %v5522_v47 = vpop.permute.xlu1 %5521 }
0x151f   : > { %v5483_v54 = vmul.f32 %v14748_v33, %v5426_v12  ;;  %v5484_v36 = vmul.f32 %v14748_v33, %v5427_v7  ;;  %v5528_v46 = vsel %vm1343_vm5, %v12134_v53, %v5522_v47  ;;  %v5534_v5 = vsel %vm1343_vm5, %v5522_v47, %v12134_v53  ;;  %v14749_v7 = vld [vmem:[#allocation53_spill] sm:$0xff] }
0x1520   : > { %v5924_v60 = vadd.f32 %v5910_v35, %v5805_v34  ;;  %v6210_v37 = vmul.f32 %v6199_v50, %v14731_v44  ;;  %v5545_v26 = vmul.f32 %v5534_v5, %v14494_v23  ;;  %v5546_v28 = vmul.f32 %v5528_v46, %v14495_v40  ;;  %v14751_v5 = vld [vmem:[#allocation96_spill] sm:$0xff]  ;;  %v14752_v40 = vld [vmem:[#allocation58_spill] sm:$0xff] }
0x1521   : > { %v6090_v29 = vmul.f32 %v6074_v0, %v14665_v8  ;;  %v6091_v12 = vmul.f32 %v6080_v61, %v14666_v56  ;;  %v5378_v17 = vmul.f32 %v14749_v7, %v5322_v20  ;;  %v5379_v32 = vmul.f32 %v14749_v7, %v5323_v57 }
0x1522   : > { %v5641_v33 = vpop.permute.xlu0 %5640  ;;  %v5602_v43 = vmul.f32 %v14750_v48, %v5545_v26  ;;  %v5603_v53 = vmul.f32 %v14750_v48, %v5546_v28  ;;  %v12344_v50 = vpop.permute.xlu1 %6046  ;;  %v5923_v47 = vadd.f32 %v5909_v21, %v5804_v14  ;;  %v6043_v46 = vadd.f32 %v6029_v1, %v5924_v60 }
0x1523   : > { %v5647_v34 = vsel %vm1373_vm4, %v12211_v58, %v5641_v33  ;;  %v5653_v35 = vsel %vm1373_vm4, %v5641_v33, %v12211_v58  ;;  %v5497_v0 = vadd.f32 %v5483_v54, %v5378_v17  ;;  %v5498_v61 = vadd.f32 %v5484_v36, %v5379_v32 }
0x1524   : > { %v5664_v20 = vmul.f32 %v5653_v35, %v14628_v3  ;;  %v5665_v57 = vmul.f32 %v5647_v34, %v14629_v4  ;;  %v6209_v48 = vmul.f32 %v6193_v9, %v14686_v39  ;;  %v6267_v26 = vmul.f32 %v14751_v5, %v6210_v37 }
0x1525   : > { %v5616_v28 = vadd.f32 %v5602_v43, %v5497_v0  ;;  %v5617_v7 = vadd.f32 %v5603_v53, %v5498_v61  ;;  %v6147_v54 = vmul.f32 %v14753_v22, %v6090_v29  ;;  %v6148_v36 = vmul.f32 %v14753_v22, %v6091_v12  ;;  %v14754_v12 = vld [vmem:[#allocation117_spill] sm:$0xff] }
0x1526   : > { %v5721_v23 = vmul.f32 %v14752_v40, %v5664_v20  ;;  %v5722_v58 = vmul.f32 %v14752_v40, %v5665_v57  ;;  %v5831_v33 = vpop.permute.xlu0 %5830  ;;  %v5950_v14 = vpop.permute.xlu1 %5949  ;;  %v6042_v37 = vadd.f32 %v6028_v24, %v5923_v47 }
0x1527   : > { %v5837_v21 = vsel %vm1403_vm3, %v12247_v30, %v5831_v33  ;;  %v5843_v1 = vsel %vm1403_vm3, %v5831_v33, %v12247_v30  ;;  %v6162_v17 = vadd.f32 %v6148_v36, %v6043_v46  ;;  %v5956_v22 = vsel %vm1433_vm2, %v12164_v6, %v5950_v14  ;;  %v14755_v30 = vld [vmem:[#allocation108_spill] sm:$0xff] }
0x1528   : > { %v5735_v43 = vadd.f32 %v5721_v23, %v5616_v28  ;;  %v5736_v9 = vadd.f32 %v5722_v58, %v5617_v7  ;;  %v5854_v60 = vmul.f32 %v5837_v21, %v14640_v27  ;;  %v5855_v40 = vmul.f32 %v5843_v1, %v14645_v42  ;;  %v14756_v23 = vld [vmem:[#allocation66_spill] sm:$0xff]  ;;  %v14757_v58 = vld [vmem:[#allocation73_spill] sm:$0xff] }
0x1529   : > { %v5962_v29 = vsel %vm1433_vm2, %v5950_v14, %v12164_v6  ;;  %v5973_v24 = vmul.f32 %v5956_v22, %v14657_v55  ;;  %v14760_v22 = vld [vmem:[#allocation139_spill] sm:$0xff] }
0x152a   : > { %v5806_v32 = vadd.f32 %v14754_v12, %v5735_v43  ;;  %v5807_v53 = vadd.f32 %v14755_v30, %v5736_v9  ;;  %v5911_v34 = vmul.f32 %v14756_v23, %v5854_v60  ;;  %v5912_v35 = vmul.f32 %v14756_v23, %v5855_v40  ;;  %v6069_v0 = vpop.permute.xlu0 %6068  ;;  %v6188_v57 = vpop.permute.xlu1 %6187  ;;  %v14759_v40 = vld [vmem:[#allocation109_spill] sm:$0xff] }
0x152b   : > { %v5974_v61 = vmul.f32 %v5962_v29, %v14730_v15  ;;  %v6075_v20 = vsel %vm1463_vm1, %v12285_v25, %v6069_v0  ;;  %v6081_v6 = vsel %vm1463_vm1, %v6069_v0, %v12285_v25  ;;  %v6030_v33 = vmul.f32 %v14757_v58, %v5973_v24  ;;  %v14758_v25 = vld [vmem:[#allocation78_spill] sm:$0xff]  ;;  %v14761_v24 = vld [vmem:[#allocation85_spill] sm:$0xff] }
0x152c   : > { %v5925_v47 = vadd.f32 %v5911_v34, %v5806_v32  ;;  %v5926_v46 = vadd.f32 %v5912_v35, %v5807_v53  ;;  %v6092_v28 = vmul.f32 %v6075_v20, %v14665_v8  ;;  %v6093_v7 = vmul.f32 %v6081_v6, %v14666_v56 }
0x152d   : > { %v6031_v36 = vmul.f32 %v14757_v58, %v5974_v61  ;;  %v6194_v21 = vsel %vm1493_vm8, %v12206_v62, %v6188_v57  ;;  %v6200_v1 = vsel %vm1493_vm8, %v6188_v57, %v12206_v62  ;;  %v6190_v29 = vsel %vm1493_vm8, %v14760_v22, %v14759_v40  ;;  %v14766_v58 = vld [vmem:[#allocation104_spill] sm:$0xff] }
0x152e   : > { %v6149_v14 = vmul.f32 %v14758_v25, %v6092_v28  ;;  %v6150_v43 = vmul.f32 %v14758_v25, %v6093_v7  ;;  %v6211_v9 = vmul.f32 %v6194_v21, %v14686_v39  ;;  %v6212_v60 = vmul.f32 %v6200_v1, %v14731_v44  ;;  %v14765_v7 = vld [vmem:[#allocation95_spill] sm:$0xff]  ;;  %v14768_v21 = vld [vmem:[#allocation105_spill] sm:$0xff] }
0x152f   : > { %v6161_v12 = vadd.f32 %v6147_v54, %v6042_v37  ;;  %v6044_v32 = vadd.f32 %v6030_v33, %v5925_v47  ;;  %v6045_v30 = vadd.f32 %v6031_v36, %v5926_v46  ;;  %v6085_v53 = vmul.f32 %v12269_v16, %v14666_v56  ;;  %v14764_v46 = vld [vmem:[#allocation102_spill] sm:$0xff] }
0x1530   : > { %v6196_v62 = vsel %vm1493_vm8, %v14759_v40, %v14760_v22  ;;  %v6266_v23 = vmul.f32 %v14751_v5, %v6209_v48  ;;  %v6281_v34 = vadd.f32 %v6267_v26, %v6162_v17  ;;  %v6268_v61 = vmul.f32 %v14761_v24, %v6211_v9  ;;  %v14769_v40 = vld [vmem:[#allocation81_spill] sm:$0xff]  ;;  %v14770_v22 = vld [vmem:[#allocation38_spill] sm:$0xff] }
0x1531   : > { %v6163_v35 = vadd.f32 %v6149_v14, %v6044_v32  ;;  %v6164_v0 = vadd.f32 %v6150_v43, %v6045_v30  ;;  %v6269_v20 = vmul.f32 %v14761_v24, %v6212_v60  ;;  %v6023_v54 = vmul.f32 %v14737_v51, %v12219_v59  ;;  %v14762_v59 = vld [vmem:[#allocation100_spill] sm:$0xff]  ;;  %v14774_v24 = vld [vmem:[#allocation97_spill] sm:$0xff] }
0x1532   : > { %v6159_v16 = vadd.f32 %v12157_v49, %v12237_v19  ;;  %v6203_v37 = vmul.f32 %v6190_v29, %v14686_v39  ;;  %v6279_v6 = vadd.f32 %v12263_v2, %v12293_v31  ;;  %v6204_v48 = vmul.f32 %v6196_v62, %v14731_v44  ;;  %v14763_v19 = vld [vmem:[#allocation63_spill] sm:$0xff] }
0x1533   : > { %v6280_v5 = vadd.f32 %v6266_v23, %v6161_v12  ;;  %v6283_v26 = vadd.f32 %v6269_v20, %v6164_v0  ;;  %v6282_v17 = vadd.f32 %v6268_v61, %v6163_v35  ;;  %v5918_v57 = vadd.f32 %v12112_v13, %v12198_v41  ;;  %v14767_v41 = vld [vmem:[#allocation103_spill] sm:$0xff] }
0x1534   : > { %v6278_v47 = vadd.f32 %v12251_v18, %v6159_v16  ;;  %v6141_v51 = vmul.f32 %v14762_v59, %v12288_v11  ;;  %v6142_v49 = vmul.f32 %v14762_v59, %v6085_v53  ;;  %v6263_v28 = vmul.f32 %v14764_v46, %v14763_v19  ;;  %v14771_v23 = vld [vmem:[#allocation31_spill] sm:$0xff]  ;;  %v14779_v19 = vld [vmem:[#allocation101_spill] sm:$0xff] }
0x1535   : > { %v6339_v2 = vadd.f32 %v14765_v7, %v6283_v26  ;;  %v6338_v31 = vadd.f32 %v14765_v7, %v6282_v17  ;;  %v6337_v33 = vadd.f32 %v14766_v58, %v6281_v34  ;;  %v6036_v36 = vadd.f32 %v12240_v63, %v12216_v38  ;;  %v14772_v34 = vld [vmem:[#allocation39_spill] sm:$0xff]  ;;  %v14780_v7 = vld [vmem:[#allocation112_spill] sm:$0xff] }
0x1536   : > { %v6037_v13 = vadd.f32 %v6023_v54, %v5918_v57  ;;  %v6260_v18 = vmul.f32 %v14767_v41, %v6203_v37  ;;  %v6335_v1 = vadd.f32 %v14768_v21, %v6279_v6  ;;  %v6261_v11 = vmul.f32 %v14767_v41, %v6204_v48  ;;  %v14773_v0 = vld [vmem:[#allocation75_spill] sm:$0xff]  ;;  %v14776_v54 = vld [vmem:[#allocation88_spill] sm:$0xff]  ;;  %v14777_v6 = vld [vmem:[#allocation82_spill] sm:$0xff] }
0x1537   : > { %v6229_v25 = vpop.permute.xlu0 %6228  ;;  %v6351_v14 = vpack.c.bf16 %v6339_v2, %v6339_v2  ;;  %v6350_v43 = vpack.c.bf16 %v6338_v31, %v6338_v31  ;;  %v6336_v9 = vadd.f32 %v14766_v58, %v6280_v5  ;;  %v6224_v60 = vpop.permute.xlu1 %6223  ;;  %v6158_v29 = vadd.f32 %v14770_v22, %v14769_v40  ;;  %v14775_v20 = vld [vmem:[#allocation119_spill] sm:$0xff]  ;;  %v14781_v58 = vld [vmem:[#allocation148_spill] sm:$0xff] }
0x1538   : > { %v6155_v12 = vadd.f32 %v6141_v51, %v6036_v36  ;;  %v6156_v32 = vadd.f32 %v6142_v49, %v6037_v13  ;;  %v6334_v38 = vadd.f32 %v14768_v21, %v6278_v47  ;;  %v6070_v63 = vsel %vm1463_vm1, %v12344_v50, %v12306_v45  ;;  %v14778_v49 = vld [vmem:[#allocation124_spill] sm:$0xff]  ;;  %v14783_v13 = vld [vmem:[#allocation149_spill] sm:$0xff]  ;;  %v14784_v41 = vld [vmem:[#allocation151_spill] sm:$0xff] }
0x1539   : > { %v6076_v30 = vsel %vm1463_vm1, %v12306_v45, %v12344_v50  ;;  %8762 = vmatprep.subr.msk.bf16.mxu0 %vm1671_vm11, %v6351_v14  ;;  %v6394_v53 = vsel %vm1671_vm11, %v6350_v43, 0  ;;  %v6349_v62 = vpack.c.bf16 %v6337_v33, %v6335_v1  ;;  %v5797_v35 = vadd.f32 %v14772_v34, %v14771_v23  ;;  %v14782_v33 = vld [vmem:[#allocation150_spill] sm:$0xff]  ;;  %v14786_v1 = vld [vmem:[#allocation107_spill] sm:$0xff] }
0x153a   : > { %v5901_v61 = vmul.f32 %v14774_v24, %v14773_v0  ;;  %6408 = vmatpush1.bf16.msra.mxu0 %v6394_v53  ;;  %v6276_v16 = vadd.f32 %v14776_v54, %v14775_v20  ;;  %v6277_v37 = vadd.f32 %v6263_v28, %v6158_v29  ;;  %v5902_v48 = vmul.f32 %v14774_v24, %v14777_v6  ;;  %v14785_v21 = vld [vmem:[#allocation70_spill] sm:$0xff]  ;;  %v14787_v14 = vld [vmem:[#allocation71_spill] sm:$0xff] }
0x153b   : > { %6409 = vmatprep.subr.bf16.mxu0 %v6349_v62  ;;  %v6309_v45 = vpop.permute.xlu0 %6308  ;;  %v6274_v50 = vadd.f32 %v6260_v18, %v6155_v12  ;;  %v6275_v5 = vadd.f32 %v6261_v11, %v6156_v32  ;;  %v6348_v26 = vpack.c.bf16 %v6336_v9, %v6334_v38  ;;  %v6082_v17 = vmul.f32 %v6070_v63, %v14665_v8  ;;  %v6304_v51 = vpop.permute.xlu1 %6303  ;;  %v14788_v9 = vld [vmem:[#allocation37_spill] sm:$0xff]  ;;  %v14789_v38 = vld [vmem:[#allocation152_spill] sm:$0xff]  ;;  %v14791_v62 = vld [vmem:[#allocation106_spill] sm:$0xff] }
0x153c   : > { %v6083_v57 = vmul.f32 %v6076_v30, %v14666_v56  ;;  %v6332_v47 = vadd.f32 %v6309_v45, %v6276_v16  ;;  %v6333_v59 = vadd.f32 %v6309_v45, %v6277_v37  ;;  %v6020_v46 = vmul.f32 %v14779_v19, %v14778_v49  ;;  %v14790_v30 = vld [vmem:[#allocation153_spill] sm:$0xff] }
0x153d   : > { %v6021_v28 = vmul.f32 %v14779_v19, %v14780_v7  ;;  %v6330_v2 = vadd.f32 %v6304_v51, %v6274_v50  ;;  %v6331_v31 = vadd.f32 %v6304_v51, %v6275_v5  ;;  %v5913_v36 = vadd.f32 %v14782_v33, %v14781_v58  ;;  %v14793_v37 = vld [vmem:[#allocation69_spill] sm:$0xff] }
0x153e   : > { %v5914_v18 = vadd.f32 %v14784_v41, %v14783_v13  ;;  %v6137_v11 = vmul.f32 %v14786_v1, %v14785_v21  ;;  %v6138_v43 = vmul.f32 %v14786_v1, %v14787_v14  ;;  %6410 = vmatpush1.bf16.msra.mxu0 %v6348_v26  ;;  %v5915_v40 = vadd.f32 %v5901_v61, %v14788_v9  ;;  %v14792_v61 = vld [vmem:[#allocation68_spill] sm:$0xff] }
0x153f   : > { %v5916_v22 = vadd.f32 %v5902_v48, %v5797_v35  ;;  %v6346_v29 = vpack.c.bf16 %v6332_v47, %v6330_v2  ;;  %v6178_v12 = vpop.permute.xlu0 %6177  ;;  %v6347_v32 = vpack.c.bf16 %v6333_v59, %v6331_v31  ;;  %v6032_v63 = vadd.f32 %v14789_v38, %v5913_v36  ;;  %v6166_v0 = vpop.permute.xlu1 %6165  ;;  %v9488_v36 = vld [vmem:[%s14794_s5] sm:$0xff]   ;;  %v9489_v13 = vld [vmem:[%s14794_s5 + $0x8] sm:$0xff]   ;;  %s14824_s5 = sld [smem:[#allocation20_spill]] }
0x1540   : > { %v6033_v53 = vadd.f32 %v14790_v30, %v5914_v18  ;;  %v6139_v23 = vmul.f32 %v14791_v62, %v6082_v17  ;;  %v6140_v34 = vmul.f32 %v14791_v62, %v6083_v57  ;;  %v6034_v24 = vadd.f32 %v6020_v46, %v5915_v40 }
0x1541   : > { %v6035_v20 = vadd.f32 %v6021_v28, %v5916_v22  ;;  %v6189_v54 = vsel %vm1493_vm8, %v6166_v0, %v6178_v12  ;;  %v6195_v35 = vsel %vm1493_vm8, %v6178_v12, %v6166_v0  ;;  %6411 = vmatprep.subr.bf16.mxu0 %v6347_v32  ;;  %v6256_v16 = vmul.f32 %v6224_v60, %v14792_v61 }
0x1542   : > { %v6257_v6 = vmul.f32 %v6224_v60, %v14793_v37  ;;  %v6201_v48 = vmul.f32 %v6189_v54, %v14686_v39  ;;  %v6202_v45 = vmul.f32 %v6195_v35, %v14731_v44  ;;  %6412 = vmatpush1.bf16.msra.mxu0 %v6346_v29  ;;  %v6151_v50 = vadd.f32 %v6137_v11, %v6032_v63 }
0x1543   : > { %v6152_v5 = vadd.f32 %v6138_v43, %v6033_v53  ;;  %v6153_v57 = vadd.f32 %v6139_v23, %v6034_v24  ;;  %v6154_v47 = vadd.f32 %v6140_v34, %v6035_v20  ;;  %v6294_v59 = vpop.permute.xlu1 %6293  ;;  %v6299_v7 = vpop.permute.xlu0 %6298  ;;  %v14796_v43 = vld [vmem:[#allocation49_spill] sm:$0xff] }
0x1544   : > { %v6258_v26 = vmul.f32 %v6229_v25, %v6201_v48  ;;  %v6259_v17 = vmul.f32 %v6229_v25, %v6202_v45  ;;  %v6270_v19 = vadd.f32 %v6256_v16, %v6151_v50  ;;  %v14795_v25 = vmov 0  }
0x1545   : > { %v6271_v46 = vadd.f32 %v6257_v6, %v6152_v5 }
0x1546   : > { %v6272_v51 = vadd.f32 %v6258_v26, %v6153_v57  ;;  %v6273_v49 = vadd.f32 %v6259_v17, %v6154_v47  ;;  %v6326_v2 = vadd.f32 %v6294_v59, %v6270_v19 }
0x1547   : > { %v6327_v31 = vadd.f32 %v6294_v59, %v6271_v46  ;;  %v12484_v41 = vpop.permute.xlu1 %6368  ;;  %v12486_v18 = vpop.permute.xlu0 %6373 }
0x1548   : > { %v6328_v60 = vadd.f32 %v6299_v7, %v6272_v51  ;;  %v6329_v28 = vadd.f32 %v6299_v7, %v6273_v49 }
0x154a   : > { %v6344_v58 = vpack.c.bf16 %v6328_v60, %v6326_v2  ;;  %v6345_v33 = vpack.c.bf16 %v6329_v28, %v6327_v31 }
0x154b   : > { %v6359_v21 = vpop.permute.xlu1 %6358  ;;  %v6364_v40 = vpop.permute.xlu0 %6363 }
0x154c   : > { %6413 = vmatprep.subr.bf16.mxu0 %v6345_v33 }
0x154d   : > { %6414 = vmatpush1.bf16.msra.mxu0 %v6344_v58 }
0x154f   : > { %v12494_v38 = vpop.permute.xlu1 %6524  ;;  %v12502_v30 = vpop.permute.xlu0 %6529 }
0x1550   : > { %8763 = vmatmul.mubr.msk.bf16.vlgmr.msra.gmra.mxu0 %vm6386_vm14, %v9488_v36  ;;  %14797 = vst [vmem:[#allocation35_spill] sm:$0xff] %v12494_v38  ;;  %14798 = vst [vmem:[#allocation123_spill] sm:$0xff] %v12502_v30 }
0x1551   : > { %6441 = vmatprep.mubr.bf16.mxu0 %v14795_v25 }
0x1553   : > { %v12504_v53 = vpop.permute.xlu1 %6589  ;;  %v12510_v62 = vpop.permute.xlu0 %6594 }
0x1554   : > { %14799 = vst [vmem:[#allocation126_spill] sm:$0xff] %v12504_v53  ;;  %14800 = vst [vmem:[#allocation111_spill] sm:$0xff] %v12510_v62 }
0x1557   : > { %v12516_v23 = vpop.permute.xlu1 %6662  ;;  %v12522_v34 = vpop.permute.xlu0 %6667 }
0x1558   : > { %8764 = vmatmul.mubr.msk.bf16.gmra.mxu0 %vm6386_vm14, %v9489_v13  ;;  %14801 = vst [vmem:[#allocation86_spill] sm:$0xff] %v12516_v23  ;;  %14802 = vst [vmem:[#allocation72_spill] sm:$0xff] %v12522_v34 }
0x1559   : > { %7302 = vmatprep.mubr.bf16.mxu0 %v14795_v25  ;;  %v7092_v25 = vld [vmem:[%s14736_s4] sm:$0xff] }
0x155b   : > { %v12524_v0 = vpop.permute.xlu1 %6514  ;;  %v12530_v20 = vpop.permute.xlu0 %6519 }
0x155f   : > { %v12536_v35 = vpop.permute.xlu1 %6579  ;;  %v12543_v37 = vpop.permute.xlu0 %6584 }
0x1563   : > { %v12548_v45 = vpop.permute.xlu1 %6735  ;;  %v12556_v5 = vpop.permute.xlu0 %6740 }
0x1564   : > { %14803 = vst [vmem:[#allocation98_spill] sm:$0xff] %v12548_v45  ;;  %14804 = vst [vmem:[#allocation94_spill] sm:$0xff] %v12556_v5 }
0x1567   : > { %v12562_v26 = vpop.permute.xlu1 %6652  ;;  %v12568_v17 = vpop.permute.xlu0 %6657 }
0x156b   : > { %v12570_v57 = vpop.permute.xlu1 %6776  ;;  %v12576_v59 = vpop.permute.xlu0 %6781 }
0x156c   : > { %14805 = vst [vmem:[#allocation130_spill] sm:$0xff] %v12576_v59  ;;  %v14838_v59 = vld [vmem:[#allocation44_spill] sm:$0xff] }
0x156f   : > { %v12582_v49 = vpop.permute.xlu1 %6725  ;;  %v12589_v7 = vpop.permute.xlu0 %6730 }
0x1573   : > { %v12593_v2 = vpop.permute.xlu1 %6849  ;;  %v12602_v33 = vpop.permute.xlu0 %6854 }
0x1574   : > { %14806 = vst [vmem:[#allocation114_spill] sm:$0xff] %v12593_v2  ;;  %14807 = vst [vmem:[#allocation132_spill] sm:$0xff] %v12602_v33 }
0x1577   : > { %v12608_v36 = vpop.permute.xlu1 %6766 }
0x1610   : > { %v6433_v1 = vpop.f32.mrf.mxu0 }
0x1611   : > { %v6434_v11 = vadd.f32 %v6433_v1, %v6359_v21  ;;  %v12618_v1 = vpop.permute.xlu1 %6922 }
0x1612   : > { %v6435_v14 = vpop.f32.mrf.mxu0  ;;  %14809 = vst [vmem:[#allocation99_spill] sm:$0xff] %v12618_v1 }
0x1613   : > { %vm6452_vm12 = vcmp.ge.f32.partialorder %v6434_v11, 0.0  ;;  %v6460_v9 = vmul.f32 %v6434_v11, %v14796_v43  ;;  %v6436_v24 = vadd.f32 %v6435_v14, %v6359_v21  ;;  %v12616_v21 = vpop.permute.xlu0 %6771 }
0x1614   : > { %v6437_v22 = vpop.f32.mrf.mxu0 }
0x1615   : > { %v12489_v29 = vsel %vm6452_vm12, %v6434_v11, %v6460_v9  ;;  %v6438_v12 = vadd.f32 %v6437_v22, %v6364_v40  ;;  %v6461_v61 = vmul.f32 %v6436_v24, %v14796_v43  ;;  %vm6453_vm13 = vcmp.ge.f32.partialorder %v6436_v24, 0.0  ;;  %v12630_v14 = vpop.permute.xlu1 %6839 }
0x1616   : > { %6476 = vrot.lane.b32.xlu1 %v12489_v29, %s14542_s30  ;;  %v6439_v54 = vpop.f32.mrf.mxu0 }
0x1617   : > { %vm6454_vm15 = vcmp.ge.f32.partialorder %v6438_v12, 0.0  ;;  %v6462_v32 = vmul.f32 %v6438_v12, %v14796_v43  ;;  %v6440_v16 = vadd.f32 %v6439_v54, %v6364_v40  ;;  %v12545_v6 = vsel %vm6453_vm13, %v6436_v24, %v6461_v61  ;;  %v12624_v11 = vpop.permute.xlu0 %6927 }
0x1618   : > { %v6443_v47 = vpop.f32.mrf.mxu0  ;;  %14810 = vst [vmem:[#allocation141_spill] sm:$0xff] %v12624_v11 }
0x1619   : > { %v12496_v63 = vsel %vm6454_vm15, %v6438_v12, %v6462_v32  ;;  %v6463_v48 = vmul.f32 %v6440_v16, %v14796_v43  ;;  %vm6455_vm10 = vcmp.ge.f32.partialorder %v6440_v16, 0.0  ;;  %v6444_v19 = vadd.f32 %v6443_v47, %v12484_v41  ;;  %v12638_v40 = vpop.permute.xlu1 %6995 }
0x161a   : > { %6478 = vrot.lane.b32.xlu0 %v12496_v63, %s14542_s30  ;;  %6540 = vrot.lane.b32.xlu1 %v12489_v29, %s14505_s12  ;;  %v6445_v51 = vpop.f32.mrf.mxu0  ;;  %14811 = vst [vmem:[#allocation120_spill] sm:$0xff] %v12638_v40 }
0x161b   : > { %v12554_v50 = vsel %vm6455_vm10, %v6440_v16, %v6463_v48  ;;  %v6464_v60 = vmul.f32 %v6444_v19, %v14796_v43  ;;  %vm6456_vm14 = vcmp.ge.f32.partialorder %v6444_v19, 0.0  ;;  %v12636_v9 = vpop.permute.xlu0 %6844  ;;  %v6446_v22 = vadd.f32 %v6445_v51, %v12484_v41 }
0x161c   : > { %v6447_v46 = vpop.f32.mrf.mxu0  ;;  %vm7135_vm10 = vcmask 261120  }
0x161d   : > { %v6448_v28 = vadd.f32 %v6447_v46, %v12486_v18  ;;  %v12599_v31 = vsel %vm6456_vm14, %v6444_v19, %v6464_v60  ;;  %v12651_v24 = vpop.permute.xlu1 %6912  ;;  %v6465_v54 = vmul.f32 %v6446_v22, %v14796_v43  ;;  %vm6457_vm15 = vcmp.ge.f32.partialorder %v6446_v22, 0.0 }
0x161e   : > { %6542 = vrot.lane.b32.xlu0 %v12496_v63, %s14505_s12  ;;  %6613 = vrot.lane.b32.xlu1 %v12489_v29, %s14546_s0  ;;  %v6449_v32 = vpop.f32.mrf.mxu0  ;;  %14813 = vst [vmem:[#allocation121_spill] sm:$0xff] %v12651_v24  ;;  %v14836_v24 = vld [vmem:[#allocation46_spill] sm:$0xff] }
0x161f   : > { %v6466_v58 = vmul.f32 %v6448_v28, %v14796_v43  ;;  %vm6458_vm12 = vcmp.ge.f32.partialorder %v6448_v28, 0.0  ;;  %v12645_v12 = vpop.permute.xlu0 %7000  ;;  %v6450_v61 = vadd.f32 %v6449_v32, %v12486_v18  ;;  %v12661_v16 = vsel %vm6457_vm15, %v6446_v22, %v6465_v54 }
0x1620   : > { %14812 = vst [vmem:[#allocation143_spill] sm:$0xff] %v12645_v12  ;;  %vm14900_vm15 = vcmask 588800  }
0x1621   : > { %v12610_v13 = vsel %vm6458_vm12, %v6448_v28, %v6466_v58  ;;  %v6467_v48 = vmul.f32 %v6450_v61, %v14796_v43  ;;  %v12664_v47 = vpop.permute.xlu1 %7068  ;;  %vm6459_vm13 = vcmp.ge.f32.partialorder %v6450_v61, 0.0 }
0x1622   : > { %6615 = vrot.lane.b32.xlu0 %v12496_v63, %s14546_s0  ;;  %6686 = vrot.lane.b32.xlu1 %v12489_v29, %s14545_s20  ;;  %14808 = vst [vmem:[#allocation116_spill] sm:$0xff] %v12610_v13  ;;  %14815 = vst [vmem:[#allocation125_spill] sm:$0xff] %v12664_v47 }
0x1623   : > { %v12659_v41 = vpop.permute.xlu0 %6917  ;;  %v12670_v18 = vsel %vm6459_vm13, %v6450_v61, %v6467_v48 }
0x1624   : > { %14814 = vst [vmem:[#allocation147_spill] sm:$0xff] %v12659_v41  ;;  %14816 = vst [vmem:[#allocation144_spill] sm:$0xff] %v12670_v18 }
0x1625   : > { %v12678_v19 = vpop.permute.xlu1 %6985 }
0x1626   : > { %6688 = vrot.lane.b32.xlu0 %v12496_v63, %s14545_s20  ;;  %6800 = vrot.lane.b32.xlu1 %v12489_v29, %s14547_s1  ;;  %14818 = vst [vmem:[#allocation145_spill] sm:$0xff] %v12678_v19 }
0x1627   : > { %v12672_v51 = vpop.permute.xlu0 %7073 }
0x1628   : > { %14817 = vst [vmem:[#allocation134_spill] sm:$0xff] %v12672_v51 }
0x1629   : > { %v12686_v60 = vpop.permute.xlu1 %7058 }
0x162a   : > { %6802 = vrot.lane.b32.xlu0 %v12496_v63, %s14547_s1  ;;  %6873 = vrot.lane.b32.xlu1 %v12489_v29, %s14551_s2  ;;  %14820 = vst [vmem:[#allocation54_spill] sm:$0xff] %v12686_v60 }
0x162b   : > { %v12684_v46 = vpop.permute.xlu0 %6990 }
0x162c   : > { %14819 = vst [vmem:[#allocation122_spill] sm:$0xff] %v12684_v46  ;;  %v7093_v46 = vld [vmem:[%s14736_s4 + $0x8] sm:$0xff]  ;;  %s14906_s4 = sld [smem:[#allocation24_spill]] }
0x162d   : > { %v12698_v58 = vpop.permute.xlu1 %7108 }
0x162e   : > { %6875 = vrot.lane.b32.xlu0 %v12496_v63, %s14551_s2  ;;  %6946 = vrot.lane.b32.xlu1 %v12489_v29, %s14504_s28  ;;  %14822 = vst [vmem:[#allocation56_spill] sm:$0xff] %v12698_v58 }
0x162f   : > { %v12692_v28 = vpop.permute.xlu0 %7063 }
0x1630   : > { %14821 = vst [vmem:[#allocation127_spill] sm:$0xff] %v12692_v28 }
0x1632   : > { %6948 = vrot.lane.b32.xlu0 %v12496_v63, %s14504_s28  ;;  %7019 = vrot.lane.b32.xlu1 %v12489_v29, %s14554_s3 }
0x1633   : > { %v12704_v22 = vpop.permute.xlu0 %7113 }
0x1634   : > { %14823 = vst [vmem:[#allocation146_spill] sm:$0xff] %v12704_v22  ;;  %v7129_v22 = vld [vmem:[%s14824_s5] sm:$0xff]  ;;  %s14892_s5 = sld [smem:[#allocation19_spill]] }
0x1636   : > { %7021 = vrot.lane.b32.xlu0 %v12496_v63, %s14554_s3  ;;  %6484 = vrot.lane.b32.xlu1 %v12545_v6, %s14542_s30 }
0x163a   : > { %6486 = vrot.lane.b32.xlu0 %v12554_v50, %s14542_s30  ;;  %6548 = vrot.lane.b32.xlu1 %v12545_v6, %s14505_s12 }
0x163e   : > { %6550 = vrot.lane.b32.xlu0 %v12554_v50, %s14505_s12  ;;  %6621 = vrot.lane.b32.xlu1 %v12545_v6, %s14546_s0 }
0x1642   : > { %6623 = vrot.lane.b32.xlu0 %v12554_v50, %s14546_s0  ;;  %6694 = vrot.lane.b32.xlu1 %v12545_v6, %s14545_s20 }
0x1646   : > { %6696 = vrot.lane.b32.xlu0 %v12554_v50, %s14545_s20  ;;  %6808 = vrot.lane.b32.xlu1 %v12545_v6, %s14547_s1 }
0x164a   : > { %6810 = vrot.lane.b32.xlu0 %v12554_v50, %s14547_s1  ;;  %6881 = vrot.lane.b32.xlu1 %v12545_v6, %s14551_s2 }
0x164e   : > { %6883 = vrot.lane.b32.xlu0 %v12554_v50, %s14551_s2  ;;  %6954 = vrot.lane.b32.xlu1 %v12545_v6, %s14504_s28 }
0x1652   : > { %6956 = vrot.lane.b32.xlu0 %v12554_v50, %s14504_s28  ;;  %6480 = vrot.lane.b32.xlu1 %v12599_v31, %s14542_s30 }
0x1656   : > { %6482 = vrot.lane.b32.xlu0 %v12610_v13, %s14542_s30  ;;  %6544 = vrot.lane.b32.xlu1 %v12599_v31, %s14505_s12 }
0x165a   : > { %6546 = vrot.lane.b32.xlu0 %v12610_v13, %s14505_s12  ;;  %6617 = vrot.lane.b32.xlu1 %v12599_v31, %s14546_s0 }
0x165e   : > { %6619 = vrot.lane.b32.xlu0 %v12610_v13, %s14546_s0  ;;  %6690 = vrot.lane.b32.xlu1 %v12599_v31, %s14545_s20 }
0x1662   : > { %6692 = vrot.lane.b32.xlu0 %v12610_v13, %s14545_s20  ;;  %6804 = vrot.lane.b32.xlu1 %v12599_v31, %s14547_s1 }
0x1666   : > { %6806 = vrot.lane.b32.xlu0 %v12610_v13, %s14547_s1  ;;  %6877 = vrot.lane.b32.xlu1 %v12599_v31, %s14551_s2 }
0x166a   : > { %6879 = vrot.lane.b32.xlu0 %v12610_v13, %s14551_s2  ;;  %6950 = vrot.lane.b32.xlu1 %v12599_v31, %s14504_s28 }
0x166e   : > { %6952 = vrot.lane.b32.xlu0 %v12610_v13, %s14504_s28  ;;  %7023 = vrot.lane.b32.xlu1 %v12599_v31, %s14554_s3 }
0x1672   : > { %7025 = vrot.lane.b32.xlu0 %v12610_v13, %s14554_s3  ;;  %6488 = vrot.lane.b32.xlu1 %v12661_v16, %s14542_s30 }
0x1676   : > { %6490 = vrot.lane.b32.xlu0 %v12670_v18, %s14542_s30  ;;  %6552 = vrot.lane.b32.xlu1 %v12661_v16, %s14505_s12 }
0x167a   : > { %6554 = vrot.lane.b32.xlu0 %v12670_v18, %s14505_s12  ;;  %6625 = vrot.lane.b32.xlu1 %v12661_v16, %s14546_s0 }
0x167e   : > { %6627 = vrot.lane.b32.xlu0 %v12670_v18, %s14546_s0  ;;  %6698 = vrot.lane.b32.xlu1 %v12661_v16, %s14545_s20 }
0x1682   : > { %6700 = vrot.lane.b32.xlu0 %v12670_v18, %s14545_s20  ;;  %6812 = vrot.lane.b32.xlu1 %v12661_v16, %s14547_s1 }
0x1686   : > { %6814 = vrot.lane.b32.xlu0 %v12670_v18, %s14547_s1  ;;  %6885 = vrot.lane.b32.xlu1 %v12661_v16, %s14551_s2 }
0x1688   : > { %v6477_v32 = vpop.permute.xlu1 %6476 }
0x168a   : > { %6887 = vrot.lane.b32.xlu0 %v12670_v18, %s14551_s2  ;;  %6958 = vrot.lane.b32.xlu1 %v12661_v16, %s14504_s28 }
0x168c   : > { %v6479_v54 = vpop.permute.xlu0 %6478  ;;  %v6541_v61 = vpop.permute.xlu1 %6540 }
0x168e   : > { %6960 = vrot.lane.b32.xlu0 %v12670_v18, %s14504_s28  ;;  %7031 = vrot.lane.b32.xlu1 %v12661_v16, %s14554_s3 }
0x1690   : > { %v6543_v48 = vpop.permute.xlu0 %6542  ;;  %v6614_v43 = vpop.permute.xlu1 %6613 }
0x1692   : > { %7033 = vrot.lane.b32.xlu0 %v12670_v18, %s14554_s3  ;;  %7027 = vrot.lane.b32.xlu1 %v12545_v6, %s14554_s3 }
0x1694   : > { %v6616_v28 = vpop.permute.xlu0 %6615  ;;  %v6687_v60 = vpop.permute.xlu1 %6686 }
0x1696   : > { %7029 = vrot.lane.b32.xlu0 %v12554_v50, %s14554_s3  ;;  %7098 = vperm.xlu1 %9389, %v7092_v25  }
0x1698   : > { %v6689_v58 = vpop.permute.xlu0 %6688  ;;  %v12723_v19 = vpop.permute.xlu1 %6800 }
0x169a   : > { %7103 = vperm.xlu0 %9388, %v7093_v46   ;;  %7132 = vperm.xlu1 %9389, %v7129_v22  }
0x169c   : > { %v12725_v51 = vpop.permute.xlu0 %6802  ;;  %v12727_v47 = vpop.permute.xlu1 %6873 }
0x16a0   : > { %v12729_v12 = vpop.permute.xlu0 %6875  ;;  %v12731_v44 = vpop.permute.xlu1 %6946 }
0x16a1   : > { %14825 = vst [vmem:[#allocation136_spill] sm:$0xff] %v12731_v44 }
0x16a4   : > { %v12733_v39 = vpop.permute.xlu0 %6948  ;;  %v12735_v40 = vpop.permute.xlu1 %7019 }
0x16a5   : > { %14826 = vst [vmem:[#allocation64_spill] sm:$0xff] %v12733_v39  ;;  %14827 = vst [vmem:[#allocation138_spill] sm:$0xff] %v12735_v40 }
0x16a8   : > { %v12737_v25 = vpop.permute.xlu0 %7021  ;;  %v6485_v11 = vpop.permute.xlu1 %6484 }
0x16a9   : > { %14828 = vst [vmem:[#allocation61_spill] sm:$0xff] %v12737_v25  ;;  %v6492_v56 = vsel %vm1284_vm7, %v6477_v32, %v6485_v11  ;;  %v6496_v8 = vsel %vm1284_vm7, %v6485_v11, %v6477_v32 }
0x16aa   : > { %v6501_v11 = vmul.f32 %v6492_v56, %v14836_v24 }
0x16ac   : > { %v6487_v1 = vpop.permute.xlu0 %6486  ;;  %v6549_v33 = vpop.permute.xlu1 %6548 }
0x16ad   : > { %v6493_v32 = vsel %vm1284_vm7, %v6479_v54, %v6487_v1 }
0x16b0   : > { %v6551_v2 = vpop.permute.xlu0 %6550  ;;  %v6622_v46 = vpop.permute.xlu1 %6621 }
0x16b4   : > { %v6624_v22 = vpop.permute.xlu0 %6623  ;;  %v6695_v5 = vpop.permute.xlu1 %6694 }
0x16b8   : > { %v6697_v45 = vpop.permute.xlu0 %6696  ;;  %v12739_v34 = vpop.permute.xlu1 %6808 }
0x16bc   : > { %v12741_v23 = vpop.permute.xlu0 %6810  ;;  %v12743_v62 = vpop.permute.xlu1 %6881 }
0x16c0   : > { %v12745_v30 = vpop.permute.xlu0 %6883  ;;  %v12747_v38 = vpop.permute.xlu1 %6954 }
0x16c1   : > { %14829 = vst [vmem:[#allocation62_spill] sm:$0xff] %v12747_v38  ;;  %v6556_v38 = vsel %vm1313_vm6, %v6541_v61, %v6549_v33 }
0x16c4   : > { %v12749_v40 = vpop.permute.xlu0 %6956  ;;  %v12751_v25 = vpop.permute.xlu1 %6480 }
0x16c5   : > { %14830 = vst [vmem:[#allocation140_spill] sm:$0xff] %v12749_v40  ;;  %14831 = vst [vmem:[#allocation129_spill] sm:$0xff] %v12751_v25  ;;  %v6560_v40 = vsel %vm1313_vm6, %v6549_v33, %v6541_v61  ;;  %v6500_v25 = vmul.f32 %v6496_v8, %v14499_v52  ;;  %v6565_v33 = vmul.f32 %v6556_v38, %v14838_v59 }
0x16c6   : > { %v6629_v61 = vsel %vm1343_vm5, %v6614_v43, %v6622_v46  ;;  %v6634_v38 = vsel %vm1343_vm5, %v6624_v22, %v6616_v28 }
0x16c8   : > { %v12753_v39 = vpop.permute.xlu0 %6482  ;;  %v12755_v53 = vpop.permute.xlu1 %6544 }
0x16c9   : > { %14832 = vst [vmem:[#allocation65_spill] sm:$0xff] %v12753_v39  ;;  %14833 = vst [vmem:[#allocation32_spill] sm:$0xff] %v12755_v53  ;;  %v6557_v39 = vsel %vm1313_vm6, %v6543_v48, %v6551_v2  ;;  %v6561_v53 = vsel %vm1313_vm6, %v6551_v2, %v6543_v48  ;;  %v6633_v2 = vsel %vm1343_vm5, %v6622_v46, %v6614_v43 }
0x16ca   : > { %v6567_v13 = vmul.f32 %v6557_v39, %v14838_v59  ;;  %v6702_v43 = vsel %vm1373_vm4, %v6687_v60, %v6695_v5  ;;  %v6706_v46 = vsel %vm1373_vm4, %v6695_v5, %v6687_v60  ;;  %v6703_v59 = vsel %vm1373_vm4, %v6689_v58, %v6697_v45 }
0x16cc   : > { %v12761_v41 = vpop.permute.xlu0 %6546  ;;  %v12763_v44 = vpop.permute.xlu1 %6617 }
0x16cd   : > { %14834 = vst [vmem:[#allocation84_spill] sm:$0xff] %v12761_v41  ;;  %14835 = vst [vmem:[#allocation142_spill] sm:$0xff] %v12763_v44  ;;  %v6497_v44 = vsel %vm1284_vm7, %v6487_v1, %v6479_v54  ;;  %v14837_v41 = vld [vmem:[#allocation43_spill] sm:$0xff]  ;;  %v6630_v1 = vsel %vm1343_vm5, %v6616_v28, %v6624_v22  ;;  %v6503_v54 = vmul.f32 %v6493_v32, %v14836_v24 }
0x16ce   : > { %v6564_v18 = vmul.f32 %v6560_v40, %v14837_v41  ;;  %v6566_v56 = vmul.f32 %v6561_v53, %v14837_v41  ;;  %v6502_v40 = vmul.f32 %v6497_v44, %v14499_v52  ;;  %v6707_v28 = vsel %vm1373_vm4, %v6697_v45, %v6689_v58 }
0x16cf   : > { %v6598_v22 = vmul.f32 %v12536_v35, %v6565_v33  ;;  %v6711_v45 = vmul.f32 %v6702_v43, %v14629_v4  ;;  %v6712_v58 = vmul.f32 %v6707_v28, %v14628_v3  ;;  %v6713_v33 = vmul.f32 %v6703_v59, %v14629_v4 }
0x16d0   : > { %v12785_v48 = vpop.permute.xlu0 %6619  ;;  %v12787_v8 = vpop.permute.xlu1 %6690  ;;  %v6597_v44 = vmul.f32 %v12536_v35, %v6564_v18  ;;  %v6599_v60 = vmul.f32 %v12543_v37, %v6566_v56  ;;  %v6532_v18 = vmul.f32 %v12524_v0, %v6500_v25  ;;  %v6533_v35 = vmul.f32 %v12524_v0, %v6501_v11 }
0x16d1   : > { %14839 = vst [vmem:[#allocation87_spill] sm:$0xff] %v12785_v48  ;;  %14840 = vst [vmem:[#allocation76_spill] sm:$0xff] %v12787_v8  ;;  %v14841_v8 = vld [vmem:[#allocation41_spill] sm:$0xff]  ;;  %v14842_v48 = vld [vmem:[#allocation42_spill] sm:$0xff] }
0x16d2   : > { %v6637_v53 = vmul.f32 %v6633_v2, %v14841_v8  ;;  %v6638_v39 = vmul.f32 %v6629_v61, %v14842_v48  ;;  %v6639_v32 = vmul.f32 %v6634_v38, %v14841_v8  ;;  %v6640_v24 = vmul.f32 %v6630_v1, %v14842_v48 }
0x16d3   : > { %v6600_v61 = vmul.f32 %v12543_v37, %v6567_v13  ;;  %v6710_v2 = vmul.f32 %v6706_v46, %v14628_v3  ;;  %v6534_v1 = vmul.f32 %v12530_v20, %v6502_v40  ;;  %v6535_v38 = vmul.f32 %v12530_v20, %v6503_v54 }
0x16d4   : > { %v12811_v52 = vpop.permute.xlu0 %6692  ;;  %v12813_v5 = vpop.permute.xlu1 %6804  ;;  %v6670_v56 = vmul.f32 %v12562_v26, %v6637_v53  ;;  %v6671_v37 = vmul.f32 %v12562_v26, %v6638_v39  ;;  %v6605_v13 = vadd.f32 %v6597_v44, %v6532_v18  ;;  %v6606_v46 = vadd.f32 %v6598_v22, %v6533_v35 }
0x16d5   : > { %14843 = vst [vmem:[#allocation131_spill] sm:$0xff] %v12813_v5  ;;  %v6672_v43 = vmul.f32 %v12568_v17, %v6639_v32  ;;  %v6673_v25 = vmul.f32 %v12568_v17, %v6640_v24  ;;  %v6607_v11 = vadd.f32 %v6599_v60, %v6534_v1  ;;  %v6608_v59 = vadd.f32 %v6600_v61, %v6535_v38 }
0x16d6   : > { %v6743_v40 = vmul.f32 %v12582_v49, %v6710_v2  ;;  %v6744_v20 = vmul.f32 %v12582_v49, %v6711_v45  ;;  %v6745_v54 = vmul.f32 %v12589_v7, %v6712_v58  ;;  %v6746_v26 = vmul.f32 %v12589_v7, %v6713_v33 }
0x16d7   : > { %v6816_v53 = vsel %vm1403_vm3, %v12723_v19, %v12739_v34  ;;  %v6820_v17 = vsel %vm1403_vm3, %v12739_v34, %v12723_v19  ;;  %v6678_v24 = vadd.f32 %v6670_v56, %v6605_v13  ;;  %v6679_v39 = vadd.f32 %v6671_v37, %v6606_v46 }
0x16d8   : > { %v12829_v5 = vpop.permute.xlu0 %6806  ;;  %v12831_v0 = vpop.permute.xlu1 %6877  ;;  %v6817_v49 = vsel %vm1403_vm3, %v12725_v51, %v12741_v23  ;;  %v6821_v7 = vsel %vm1403_vm3, %v12741_v23, %v12725_v51  ;;  %v6680_v28 = vadd.f32 %v6672_v43, %v6607_v11  ;;  %v6681_v44 = vadd.f32 %v6673_v25, %v6608_v59 }
0x16d9   : > { %v6751_v60 = vadd.f32 %v6743_v40, %v6678_v24  ;;  %v6752_v34 = vadd.f32 %v6744_v20, %v6679_v39  ;;  %v6824_v19 = vmul.f32 %v6816_v53, %v14640_v27  ;;  %v6825_v61 = vmul.f32 %v6820_v17, %v14645_v42  ;;  %v14844_v40 = vld [vmem:[#allocation116_spill] sm:$0xff]  ;;  %v14845_v20 = vld [vmem:[#allocation130_spill] sm:$0xff] }
0x16da   : > { %v6753_v2 = vadd.f32 %v6745_v54, %v6680_v28  ;;  %v6754_v45 = vadd.f32 %v6746_v26, %v6681_v44  ;;  %v6826_v18 = vmul.f32 %v6817_v49, %v14640_v27  ;;  %v6827_v35 = vmul.f32 %v6821_v7, %v14645_v42  ;;  %v14846_v26 = vld [vmem:[#allocation144_spill] sm:$0xff]  ;;  %v14848_v7 = vld [vmem:[#allocation62_spill] sm:$0xff] }
0x16db   : > { %v6785_v23 = vmul.f32 %v12608_v36, %v12545_v6  ;;  %v6784_v51 = vmul.f32 %v12608_v36, %v12489_v29  ;;  %v6787_v58 = vmul.f32 %v12616_v21, %v12554_v50  ;;  %v6786_v33 = vmul.f32 %v12616_v21, %v12496_v63  ;;  %v14849_v28 = vld [vmem:[#allocation136_spill] sm:$0xff] }
0x16dc   : > { %v12853_v22 = vpop.permute.xlu0 %6879  ;;  %v12855_v32 = vpop.permute.xlu1 %6950  ;;  %v6889_v1 = vsel %vm1433_vm2, %v12727_v47, %v12743_v62  ;;  %v6893_v38 = vsel %vm1433_vm2, %v12743_v62, %v12727_v47  ;;  %v6857_v50 = vmul.f32 %v12630_v14, %v6824_v19  ;;  %v6858_v63 = vmul.f32 %v12630_v14, %v6825_v61 }
0x16dd   : > { %v6793_v29 = vadd.f32 %v6785_v23, %v6752_v34  ;;  %v6792_v36 = vadd.f32 %v6784_v51, %v6751_v60  ;;  %v6795_v21 = vadd.f32 %v6787_v58, %v6754_v45  ;;  %v6794_v37 = vadd.f32 %v6786_v33, %v6753_v2  ;;  %v14850_v34 = vld [vmem:[#allocation129_spill] sm:$0xff]  ;;  %v14852_v51 = vld [vmem:[#allocation32_spill] sm:$0xff] }
0x16de   : > { %v6859_v13 = vmul.f32 %v12636_v9, %v6826_v18  ;;  %v6860_v46 = vmul.f32 %v12636_v9, %v6827_v35  ;;  %v6897_v43 = vmul.f32 %v6889_v1, %v14657_v55  ;;  %v6898_v62 = vmul.f32 %v6893_v38, %v14730_v15  ;;  %v14851_v18 = vld [vmem:[#allocation65_spill] sm:$0xff]  ;;  %v14853_v1 = vld [vmem:[#allocation147_spill] sm:$0xff] }
0x16df   : > { %v6890_v47 = vsel %vm1433_vm2, %v12729_v12, %v12745_v30  ;;  %v6894_v14 = vsel %vm1433_vm2, %v12745_v30, %v12729_v12  ;;  %v12899_v9 = vmul.f32 %v12570_v57, %v12599_v31  ;;  %v12903_v59 = vmul.f32 %v12570_v57, %v12661_v16  ;;  %v14847_v16 = vld [vmem:[#allocation121_spill] sm:$0xff] }
0x16e0   : > { %v12877_v6 = vpop.permute.xlu0 %6952  ;;  %v12879_v56 = vpop.permute.xlu1 %7023  ;;  %v12907_v54 = vmul.f32 %v14845_v20, %v14844_v40  ;;  %v12911_v53 = vmul.f32 %v14845_v20, %v14846_v26  ;;  %v12913_v30 = vadd.f32 %v6857_v50, %v6792_v36  ;;  %v12915_v12 = vadd.f32 %v6858_v63, %v6793_v29  ;;  %v14854_v50 = vld [vmem:[#allocation44_spill] sm:$0xff]  ;;  %v14859_v20 = vld [vmem:[#allocation126_spill] sm:$0xff] }
0x16e1   : > { %v6899_v17 = vmul.f32 %v6890_v47, %v14657_v55  ;;  %v6900_v31 = vmul.f32 %v6894_v14, %v14730_v15  ;;  %v12919_v24 = vadd.f32 %v6859_v13, %v6794_v37  ;;  %v12921_v57 = vadd.f32 %v6860_v46, %v6795_v21  ;;  %v14855_v21 = vld [vmem:[#allocation34_spill] sm:$0xff]  ;;  %v14856_v13 = vld [vmem:[#allocation33_spill] sm:$0xff] }
0x16e2   : > { %v12924_v39 = vmul.f32 %v14847_v16, %v6897_v43  ;;  %v12927_v49 = vmul.f32 %v14847_v16, %v6898_v62  ;;  %v6962_v44 = vsel %vm1463_vm1, %v14849_v28, %v14848_v7  ;;  %v6966_v60 = vsel %vm1463_vm1, %v14848_v7, %v14849_v28  ;;  %v14857_v43 = vld [vmem:[#allocation45_spill] sm:$0xff]  ;;  %v14858_v47 = vld [vmem:[#allocation46_spill] sm:$0xff]  ;;  %v14860_v7 = vld [vmem:[#allocation84_spill] sm:$0xff] }
0x16e3   : > { %v12956_v38 = vmul.f32 %v14853_v1, %v6899_v17  ;;  %v12959_v29 = vmul.f32 %v14853_v1, %v6900_v31  ;;  %v12964_v37 = vmul.f32 %v6962_v44, %v14855_v21  ;;  %v12967_v46 = vmul.f32 %v6966_v60, %v14856_v13  ;;  %v14861_v60 = vld [vmem:[#allocation142_spill] sm:$0xff] }
0x16e4   : > { %v12895_v25 = vpop.permute.xlu0 %7025  ;;  %v6489_v11 = vpop.permute.xlu1 %6488 }
0x16e5   : > { %v6494_v19 = vsel %vm1284_vm7, %v14850_v34, %v6489_v11  ;;  %v6498_v61 = vsel %vm1284_vm7, %v6489_v11, %v14850_v34 }
0x16e6   : > { %v6504_v62 = vmul.f32 %v6498_v61, %v14857_v43  ;;  %v6505_v14 = vmul.f32 %v6494_v19, %v14858_v47  ;;  %v14862_v61 = vld [vmem:[#allocation140_spill] sm:$0xff] }
0x16e8   : > { %v6491_v2 = vpop.permute.xlu0 %6490  ;;  %v6553_v45 = vpop.permute.xlu1 %6552 }
0x16e9   : > { %v6495_v35 = vsel %vm1284_vm7, %v14851_v18, %v6491_v2  ;;  %v6499_v23 = vsel %vm1284_vm7, %v6491_v2, %v14851_v18  ;;  %v6558_v58 = vsel %vm1313_vm6, %v14852_v51, %v6553_v45  ;;  %v6562_v33 = vsel %vm1313_vm6, %v6553_v45, %v14852_v51  ;;  %v14863_v2 = vld [vmem:[#allocation64_spill] sm:$0xff]  ;;  %v14864_v51 = vld [vmem:[#allocation35_spill] sm:$0xff] }
0x16ea   : > { %v6568_v36 = vmul.f32 %v6562_v33, %v14837_v41  ;;  %v6569_v63 = vmul.f32 %v6558_v58, %v14854_v50  ;;  %v6506_v11 = vmul.f32 %v6499_v23, %v14857_v43  ;;  %v6507_v40 = vmul.f32 %v6495_v35, %v14858_v47 }
0x16eb   : > { %v6963_v45 = vsel %vm1463_vm1, %v14863_v2, %v14862_v61  ;;  %v6967_v18 = vsel %vm1463_vm1, %v14862_v61, %v14863_v2  ;;  %v6536_v58 = vmul.f32 %v14864_v51, %v6504_v62  ;;  %v6537_v33 = vmul.f32 %v14864_v51, %v6505_v14 }
0x16ec   : > { %v6601_v26 = vmul.f32 %v14859_v20, %v6568_v36  ;;  %v6602_v17 = vmul.f32 %v14859_v20, %v6569_v63  ;;  %v6555_v31 = vpop.permute.xlu0 %6554  ;;  %v6626_v16 = vpop.permute.xlu1 %6625  ;;  %v14865_v63 = vld [vmem:[#allocation123_spill] sm:$0xff] }
0x16ed   : > { %v6559_v28 = vsel %vm1313_vm6, %v14860_v7, %v6555_v31  ;;  %v6563_v44 = vsel %vm1313_vm6, %v6555_v31, %v14860_v7  ;;  %v6631_v34 = vsel %vm1343_vm5, %v14861_v60, %v6626_v16  ;;  %v6635_v19 = vsel %vm1343_vm5, %v6626_v16, %v14861_v60  ;;  %v14866_v16 = vld [vmem:[#allocation111_spill] sm:$0xff] }
0x16ee   : > { %v6570_v35 = vmul.f32 %v6563_v44, %v14837_v41  ;;  %v6571_v23 = vmul.f32 %v6559_v28, %v14854_v50  ;;  %v6641_v1 = vmul.f32 %v6635_v19, %v14841_v8  ;;  %v6642_v36 = vmul.f32 %v6631_v34, %v14842_v48  ;;  %v14867_v50 = vld [vmem:[#allocation87_spill] sm:$0xff]  ;;  %v14868_v34 = vld [vmem:[#allocation86_spill] sm:$0xff] }
0x16ef   : > { %v6538_v20 = vmul.f32 %v14865_v63, %v6506_v11  ;;  %v6539_v31 = vmul.f32 %v14865_v63, %v6507_v40  ;;  %v6609_v2 = vadd.f32 %v6601_v26, %v6536_v58  ;;  %v6610_v28 = vadd.f32 %v6602_v17, %v6537_v33  ;;  %v14869_v26 = vld [vmem:[#allocation76_spill] sm:$0xff] }
0x16f0   : > { %v6603_v7 = vmul.f32 %v14866_v16, %v6570_v35  ;;  %v6604_v60 = vmul.f32 %v14866_v16, %v6571_v23  ;;  %v6628_v61 = vpop.permute.xlu0 %6627  ;;  %v6699_v44 = vpop.permute.xlu1 %6698  ;;  %v6674_v11 = vmul.f32 %v14868_v34, %v6641_v1  ;;  %v6675_v40 = vmul.f32 %v14868_v34, %v6642_v36  ;;  %v14870_v33 = vld [vmem:[#allocation72_spill] sm:$0xff]  ;;  %v14872_v34 = vld [vmem:[#allocation98_spill] sm:$0xff] }
0x16f1   : > { %v6632_v62 = vsel %vm1343_vm5, %v14867_v50, %v6628_v61  ;;  %v6636_v14 = vsel %vm1343_vm5, %v6628_v61, %v14867_v50  ;;  %v6704_v17 = vsel %vm1373_vm4, %v14869_v26, %v6699_v44  ;;  %v6708_v58 = vsel %vm1373_vm4, %v6699_v44, %v14869_v26 }
0x16f2   : > { %v6643_v19 = vmul.f32 %v6636_v14, %v14841_v8  ;;  %v6644_v35 = vmul.f32 %v6632_v62, %v14842_v48  ;;  %v6611_v23 = vadd.f32 %v6603_v7, %v6538_v20  ;;  %v6612_v51 = vadd.f32 %v6604_v60, %v6539_v31  ;;  %v14871_v7 = vld [vmem:[#allocation131_spill] sm:$0xff] }
0x16f3   : > { %v6714_v36 = vmul.f32 %v6708_v58, %v14628_v3  ;;  %v6715_v63 = vmul.f32 %v6704_v17, %v14629_v4  ;;  %v6682_v62 = vadd.f32 %v6674_v11, %v6609_v2  ;;  %v6683_v14 = vadd.f32 %v6675_v40, %v6610_v28  ;;  %v14873_v2 = vld [vmem:[#allocation94_spill] sm:$0xff] }
0x16f4   : > { %v6676_v50 = vmul.f32 %v14870_v33, %v6643_v19  ;;  %v6677_v1 = vmul.f32 %v14870_v33, %v6644_v35  ;;  %v6701_v16 = vpop.permute.xlu0 %6700  ;;  %v6813_v61 = vpop.permute.xlu1 %6812  ;;  %v14874_v40 = vld [vmem:[#allocation114_spill] sm:$0xff] }
0x16f5   : > { %v6705_v20 = vsel %vm1373_vm4, %v12811_v52, %v6701_v16  ;;  %v6709_v31 = vsel %vm1373_vm4, %v6701_v16, %v12811_v52  ;;  %v6818_v60 = vsel %vm1403_vm3, %v14871_v7, %v6813_v61  ;;  %v6822_v44 = vsel %vm1403_vm3, %v6813_v61, %v14871_v7 }
0x16f6   : > { %v6747_v19 = vmul.f32 %v14872_v34, %v6714_v36  ;;  %v6748_v35 = vmul.f32 %v14872_v34, %v6715_v63  ;;  %v6716_v26 = vmul.f32 %v6709_v31, %v14628_v3  ;;  %v6717_v17 = vmul.f32 %v6705_v20, %v14629_v4 }
0x16f7   : > { %v6828_v52 = vmul.f32 %v6818_v60, %v14640_v27  ;;  %v6829_v58 = vmul.f32 %v6822_v44, %v14645_v42  ;;  %v6684_v33 = vadd.f32 %v6676_v50, %v6611_v23  ;;  %v6685_v16 = vadd.f32 %v6677_v1, %v6612_v51 }
0x16f8   : > { %v6755_v41 = vadd.f32 %v6747_v19, %v6682_v62  ;;  %v6756_v47 = vadd.f32 %v6748_v35, %v6683_v14  ;;  %v6815_v43 = vpop.permute.xlu0 %6814  ;;  %v6886_v61 = vpop.permute.xlu1 %6885  ;;  %v6749_v28 = vmul.f32 %v14873_v2, %v6716_v26  ;;  %v6750_v11 = vmul.f32 %v14873_v2, %v6717_v17  ;;  %v14875_v14 = vld [vmem:[#allocation132_spill] sm:$0xff] }
0x16f9   : > { %v6861_v36 = vmul.f32 %v14874_v40, %v6828_v52  ;;  %v6862_v63 = vmul.f32 %v14874_v40, %v6829_v58  ;;  %v6819_v23 = vsel %vm1403_vm3, %v12829_v5, %v6815_v43  ;;  %v6823_v51 = vsel %vm1403_vm3, %v6815_v43, %v12829_v5  ;;  %v14876_v52 = vld [vmem:[#allocation99_spill] sm:$0xff] }
0x16fa   : > { %v6796_v20 = vadd.f32 %v12899_v9, %v6755_v41  ;;  %v6797_v31 = vadd.f32 %v12903_v59, %v6756_v47  ;;  %v6757_v50 = vadd.f32 %v6749_v28, %v6684_v33  ;;  %v6758_v1 = vadd.f32 %v6750_v11, %v6685_v16  ;;  %v14877_v11 = vld [vmem:[#allocation141_spill] sm:$0xff] }
0x16fb   : > { %v6830_v7 = vmul.f32 %v6819_v23, %v14640_v27  ;;  %v6831_v60 = vmul.f32 %v6823_v51, %v14645_v42  ;;  %v13058_v44 = vmul.f32 %v6963_v45, %v14855_v21  ;;  %v13061_v41 = vmul.f32 %v6967_v18, %v14856_v13 }
0x16fc   : > { %v6891_v9 = vsel %vm1433_vm2, %v12831_v0, %v6886_v61  ;;  %v6895_v5 = vsel %vm1433_vm2, %v6886_v61, %v12831_v0  ;;  %v6888_v59 = vpop.permute.xlu0 %6887  ;;  %v6959_v43 = vpop.permute.xlu1 %6958  ;;  %v6798_v47 = vadd.f32 %v12907_v54, %v6757_v50  ;;  %v6799_v62 = vadd.f32 %v12911_v53, %v6758_v1  ;;  %v14878_v1 = vld [vmem:[#allocation120_spill] sm:$0xff] }
0x16fd   : > { %v6863_v45 = vmul.f32 %v14875_v14, %v6830_v7  ;;  %v6864_v34 = vmul.f32 %v14875_v14, %v6831_v60  ;;  %v6901_v18 = vmul.f32 %v6891_v9, %v14657_v55  ;;  %v6902_v19 = vmul.f32 %v6895_v5, %v14730_v15  ;;  %v14879_v14 = vld [vmem:[#allocation47_spill] sm:$0xff] }
0x16fe   : > { %v6892_v35 = vsel %vm1433_vm2, %v12853_v22, %v6888_v59  ;;  %v6896_v0 = vsel %vm1433_vm2, %v6888_v59, %v12853_v22  ;;  %v6869_v26 = vadd.f32 %v6861_v36, %v6796_v20  ;;  %v6870_v54 = vadd.f32 %v6862_v63, %v6797_v31 }
0x16ff   : > { %v6903_v53 = vmul.f32 %v6892_v35, %v14657_v55  ;;  %v6904_v17 = vmul.f32 %v6896_v0, %v14730_v15  ;;  %v6934_v58 = vmul.f32 %v14876_v52, %v6901_v18  ;;  %v6935_v33 = vmul.f32 %v14876_v52, %v6902_v19  ;;  %v14881_v35 = vld [vmem:[#allocation143_spill] sm:$0xff] }
0x1700   : > { %v6964_v16 = vsel %vm1463_vm1, %v12855_v32, %v6959_v43  ;;  %v6968_v61 = vsel %vm1463_vm1, %v6959_v43, %v12855_v32  ;;  %v6961_v2 = vpop.permute.xlu0 %6960  ;;  %v7032_v22 = vpop.permute.xlu1 %7031  ;;  %v6871_v28 = vadd.f32 %v6863_v45, %v6798_v47  ;;  %v6872_v20 = vadd.f32 %v6864_v34, %v6799_v62  ;;  %v14880_v34 = vld [vmem:[#allocation48_spill] sm:$0xff] }
0x1701   : > { %v6936_v40 = vmul.f32 %v14877_v11, %v6903_v53  ;;  %v6974_v36 = vmul.f32 %v6964_v16, %v14855_v21  ;;  %v6975_v63 = vmul.f32 %v6968_v61, %v14856_v13  ;;  %v6937_v31 = vmul.f32 %v14877_v11, %v6904_v17  ;;  %v14882_v53 = vld [vmem:[#allocation125_spill] sm:$0xff] }
0x1702   : > { %v6965_v23 = vsel %vm1463_vm1, %v12877_v6, %v6961_v2  ;;  %v6969_v32 = vsel %vm1463_vm1, %v6961_v2, %v12877_v6  ;;  %v6942_v51 = vadd.f32 %v6934_v58, %v6869_v26  ;;  %v6943_v50 = vadd.f32 %v6935_v33, %v6870_v54 }
0x1703   : > { %v7007_v7 = vmul.f32 %v14878_v1, %v6974_v36  ;;  %v7008_v60 = vmul.f32 %v14878_v1, %v6975_v63  ;;  %v6976_v9 = vmul.f32 %v6965_v23, %v14855_v21  ;;  %v6977_v5 = vmul.f32 %v6969_v32, %v14856_v13  ;;  %v14884_v36 = vld [vmem:[#allocation134_spill] sm:$0xff] }
0x1704   : > { %v7037_v59 = vsel %vm1493_vm8, %v12879_v56, %v7032_v22  ;;  %v7041_v43 = vsel %vm1493_vm8, %v7032_v22, %v12879_v56  ;;  %v7034_v47 = vpop.permute.xlu0 %7033  ;;  %v6944_v6 = vadd.f32 %v6936_v40, %v6871_v28  ;;  %v7028_v19 = vpop.permute.xlu1 %7027  ;;  %v6945_v16 = vadd.f32 %v6937_v31, %v6872_v20  ;;  %v14883_v22 = vld [vmem:[#allocation138_spill] sm:$0xff] }
0x1705   : > { %v7015_v62 = vadd.f32 %v7007_v7, %v6942_v51  ;;  %v7047_v45 = vmul.f32 %v7037_v59, %v14879_v14  ;;  %v7048_v18 = vmul.f32 %v7041_v43, %v14880_v34  ;;  %v7009_v0 = vmul.f32 %v14881_v35, %v6976_v9  ;;  %v14885_v51 = vld [vmem:[#allocation61_spill] sm:$0xff] }
0x1706   : > { %v7010_v26 = vmul.f32 %v14881_v35, %v6977_v5  ;;  %v7038_v54 = vsel %vm1493_vm8, %v12895_v25, %v7034_v47  ;;  %v7042_v56 = vsel %vm1493_vm8, %v7034_v47, %v12895_v25  ;;  %v7016_v61 = vadd.f32 %v7008_v60, %v6943_v50 }
0x1707   : > { %v7080_v17 = vmul.f32 %v14882_v53, %v7047_v45  ;;  %v7081_v52 = vmul.f32 %v14882_v53, %v7048_v18  ;;  %v7049_v58 = vmul.f32 %v7038_v54, %v14879_v14  ;;  %v7050_v33 = vmul.f32 %v7042_v56, %v14880_v34  ;;  %v14888_v18 = vld [vmem:[#allocation146_spill] sm:$0xff] }
0x1708   : > { %v7017_v2 = vadd.f32 %v7009_v0, %v6944_v6  ;;  %v7035_v28 = vsel %vm1493_vm8, %v14883_v22, %v7028_v19  ;;  %v7030_v11 = vpop.permute.xlu0 %7029  ;;  %v7039_v23 = vsel %vm1493_vm8, %v7028_v19, %v14883_v22  ;;  %v7018_v32 = vadd.f32 %v7010_v26, %v6945_v16  ;;  %v14886_v6 = vld [vmem:[#allocation145_spill] sm:$0xff]  ;;  %v14890_v54 = vld [vmem:[#allocation54_spill] sm:$0xff] }
0x1709   : > { %v7088_v40 = vadd.f32 %v7080_v17, %v7015_v62  ;;  %v7082_v63 = vmul.f32 %v14884_v36, %v7049_v58  ;;  %v7083_v25 = vmul.f32 %v14884_v36, %v7050_v33  ;;  %v7036_v20 = vsel %vm1493_vm8, %v14885_v51, %v7030_v11 }
0x170a   : > { %v7040_v31 = vsel %vm1493_vm8, %v7030_v11, %v14885_v51  ;;  %v7089_v50 = vadd.f32 %v7081_v52, %v7016_v61  ;;  %v6938_v1 = vadd.f32 %v12924_v39, %v12913_v30  ;;  %v6939_v7 = vadd.f32 %v12927_v49, %v12915_v12  ;;  %v14887_v30 = vld [vmem:[#allocation56_spill] sm:$0xff]  ;;  %v14889_v49 = vld [vmem:[#allocation122_spill] sm:$0xff]  ;;  %v14891_v52 = vld [vmem:[#allocation127_spill] sm:$0xff] }
0x170b   : > { %v7090_v60 = vadd.f32 %v7082_v63, %v7017_v2  ;;  %v7043_v9 = vmul.f32 %v7035_v28, %v14879_v14  ;;  %v7044_v5 = vmul.f32 %v7039_v23, %v14880_v34  ;;  %v7045_v59 = vmul.f32 %v7036_v20, %v14879_v14 }
0x170c   : > { %v7046_v43 = vmul.f32 %v7040_v31, %v14880_v34  ;;  %v7091_v47 = vadd.f32 %v7083_v25, %v7018_v32  ;;  %v7003_v62 = vmul.f32 %v14886_v6, %v12964_v37  ;;  %v7004_v45 = vmul.f32 %v14886_v6, %v12967_v46  ;;  %v7124_v32 = vld [vmem:[%s14892_s5] sm:$0xf]  ;;  %s14895_s5 = sld [smem:[#allocation21_spill]] }
0x170d   : > { %v7120_v39 = vadd.f32 %v14887_v30, %v7088_v40  ;;  %v7122_v12 = vadd.f32 %v14888_v18, %v7090_v60  ;;  %v7005_v19 = vmul.f32 %v14889_v49, %v13058_v44  ;;  %v7006_v35 = vmul.f32 %v14889_v49, %v13061_v41 }
0x170e   : > { %v7121_v0 = vadd.f32 %v14887_v30, %v7089_v50  ;;  %v7123_v26 = vadd.f32 %v14888_v18, %v7091_v47  ;;  %v6940_v37 = vadd.f32 %v12956_v38, %v12919_v24  ;;  %v6941_v46 = vadd.f32 %v12959_v29, %v12921_v57 }
0x170f   : > { %v7076_v56 = vmul.f32 %v14890_v54, %v7043_v9  ;;  %v7127_v53 = vpack.c.bf16 %v7122_v12, %v7120_v39  ;;  %v7077_v17 = vmul.f32 %v14890_v54, %v7044_v5  ;;  %v7078_v44 = vmul.f32 %v14891_v52, %v7045_v59 }
0x1710   : > { %v7079_v58 = vmul.f32 %v14891_v52, %v7046_v43  ;;  %v7128_v41 = vpack.c.bf16 %v7123_v26, %v7121_v0  ;;  %v7012_v33 = vadd.f32 %v7004_v45, %v6939_v7  ;;  %v7011_v16 = vadd.f32 %v7003_v62, %v6938_v1  ;;  %v14894_v7 = vld [vmem:[#allocation49_spill] sm:$0xff] }
0x1711   : > { %v7014_v61 = vadd.f32 %v7006_v35, %v6941_v46  ;;  %v7013_v2 = vadd.f32 %v7005_v19, %v6940_v37  ;;  %v7099_v24 = vpop.permute.xlu1 %7098  ;;  %v14893_v51 = vmov 0  }
0x1712   : > { %7151 = vmatprep.subr.bf16.mxu1 %v7128_v41  ;;  %v7085_v38 = vadd.f32 %v7077_v17, %v7012_v33  ;;  %v7084_v57 = vadd.f32 %v7076_v56, %v7011_v16 }
0x1713   : > { %7152 = vmatpush1.bf16.msra.mxu1 %v7127_v53  ;;  %v7087_v29 = vadd.f32 %v7079_v58, %v7014_v61  ;;  %v7086_v22 = vadd.f32 %v7078_v44, %v7013_v2 }
0x1714   : > { %v7116_v11 = vadd.f32 %v7099_v24, %v7084_v57  ;;  %v7117_v40 = vadd.f32 %v7099_v24, %v7085_v38 }
0x1715   : > { %v7104_v28 = vpop.permute.xlu0 %7103  ;;  %v7133_v20 = vpop.permute.xlu1 %7132 }
0x1716   : > { %v7118_v36 = vadd.f32 %v7104_v28, %v7086_v22  ;;  %v7119_v63 = vadd.f32 %v7104_v28, %v7087_v29 }
0x1718   : > { %v7125_v25 = vpack.c.bf16 %v7118_v36, %v7116_v11  ;;  %v7126_v23 = vpack.c.bf16 %v7119_v63, %v7117_v40 }
0x171a   : > { %7153 = vmatprep.subr.bf16.mxu1 %v7126_v23 }
0x171b   : > { %7154 = vmatpush1.bf16.msra.mxu1 %v7125_v25 }
0x171e   : > { %8797 = vmatmul.mubr.msk.bf16.vlgmr.msra.gmra.mxu1 %vm7135_vm10, %v7124_v32 }
0x171f   : > { %7441 = vmatprep.mubr.bf16.mxu1 %v14893_v51 }
0x17de   : > { %v7173_v31 = vpop.f32.mrf.mxu1 }
0x17df   : > { %v7174_v50 = vadd.f32 %v7173_v31, %v7133_v20 }
0x17e0   : > { %v7175_v1 = vpop.f32.mrf.mxu1 }
0x17e1   : > { %vm7180_vm14 = vcmp.ge.f32.partialorder %v7174_v50, 0.0  ;;  %v7182_v60 = vmul.f32 %v7174_v50, %v14894_v7  ;;  %v7176_v9 = vadd.f32 %v7175_v1, %v7133_v20 }
0x17e2   : > { %v7177_v5 = vpop.f32.mrf.mxu1 }
0x17e3   : > { %v13170_v59 = vsel %vm7180_vm14, %v7174_v50, %v7182_v60  ;;  %vm7181_vm12 = vcmp.ge.f32.partialorder %v7176_v9, 0.0  ;;  %v7183_v43 = vmul.f32 %v7176_v9, %v14894_v7  ;;  %vm14904_vm14 = vmmov %vm14900_vm15 }
0x17e4   : > { %v7178_v47 = vpop.f32.mrf.mxu1  ;;  %7242 = vrot.lane.b32.xlu0 %v13170_v59, %s14554_s3 }
0x17e5   : > { %v7185_v6 = vsel %vm7181_vm12, %v7176_v9, %v7183_v43 }
0x17e6   : > { %7244 = vrot.lane.b32.xlu1 %v7185_v6, %s14554_s3 }
0x17e8   : > { %7226 = vrot.lane.b32.xlu0 %v13170_v59, %s14551_s2 }
0x17ea   : > { %7228 = vrot.lane.b32.xlu1 %v7185_v6, %s14551_s2 }
0x17ec   : > { %7234 = vrot.lane.b32.xlu0 %v13170_v59, %s14504_s28 }
0x17ee   : > { %7236 = vrot.lane.b32.xlu1 %v7185_v6, %s14504_s28 }
0x17f0   : > { %7218 = vrot.lane.b32.xlu0 %v13170_v59, %s14547_s1 }
0x17f2   : > { %7220 = vrot.lane.b32.xlu1 %v7185_v6, %s14547_s1 }
0x17f4   : > { %7202 = vrot.lane.b32.xlu0 %v13170_v59, %s14546_s0 }
0x17f6   : > { %7204 = vrot.lane.b32.xlu1 %v7185_v6, %s14546_s0 }
0x17f8   : > { %7210 = vrot.lane.b32.xlu0 %v13170_v59, %s14545_s20 }
0x17fa   : > { %7212 = vrot.lane.b32.xlu1 %v7185_v6, %s14545_s20 }
0x17fc   : > { %7186 = vrot.lane.b32.xlu0 %v13170_v59, %s14542_s30 }
0x17fe   : > { %7188 = vrot.lane.b32.xlu1 %v7185_v6, %s14542_s30 }
0x1800   : > { %7194 = vrot.lane.b32.xlu0 %v13170_v59, %s14505_s12 }
0x1802   : > { %7196 = vrot.lane.b32.xlu1 %v7185_v6, %s14505_s12 }
0x1856   : > { %v7243_v62 = vpop.permute.xlu0 %7242 }
0x1858   : > { %v7245_v45 = vpop.permute.xlu1 %7244 }
0x1859   : > { %v7246_v30 = vsel %vm1493_vm8, %v7243_v62, %v7245_v45  ;;  %v7247_v39 = vsel %vm1493_vm8, %v7245_v45, %v7243_v62 }
0x185a   : > { %v7248_v18 = vmul.f32 %v7246_v30, %v14879_v14  ;;  %v7249_v12 = vmul.f32 %v7247_v39, %v14880_v34  ;;  %v7227_v49 = vpop.permute.xlu0 %7226 }
0x185c   : > { %v7258_v19 = vpack.c.bf16 %v7248_v18, %v7248_v18  ;;  %v7259_v35 = vpack.c.bf16 %v7249_v12, %v7249_v12  ;;  %v7229_v0 = vpop.permute.xlu1 %7228  ;;  %v14896_v18 = vld [vmem:[#allocation45_spill] sm:$0xff] }
0x185d   : > { %v7230_v46 = vsel %vm1433_vm2, %v7227_v49, %v7229_v0  ;;  %v7231_v54 = vsel %vm1433_vm2, %v7229_v0, %v7227_v49  ;;  %v14897_v49 = vld [vmem:[#allocation46_spill] sm:$0xff] }
0x185e   : > { %8798 = vmatprep.subr.msk.bf16.mxu0 %vm1671_vm11, %v7259_v35  ;;  %v7235_v26 = vpop.permute.xlu0 %7234  ;;  %v7265_v37 = vsel %vm1671_vm11, %v7258_v19, 0  ;;  %v7232_v52 = vmul.f32 %v7230_v46, %v14657_v55  ;;  %v7233_v44 = vmul.f32 %v7231_v54, %v14730_v15  ;;  %v14898_v35 = vld [vmem:[#allocation43_spill] sm:$0xff] }
0x185f   : > { %7277 = vmatpush1.bf16.msra.mxu0 %v7265_v37 }
0x1860   : > { %v7237_v56 = vpop.permute.xlu1 %7236 }
0x1861   : > { %v7238_v53 = vsel %vm1463_vm1, %v7235_v26, %v7237_v56  ;;  %v7239_v17 = vsel %vm1463_vm1, %v7237_v56, %v7235_v26  ;;  %v14899_v26 = vld [vmem:[#allocation44_spill] sm:$0xff]  ;;  %v7260_v56 = vld [vmem:[%s14895_s5] sm:$0xf]  ;;  %s14903_s5 = sld [smem:[#allocation22_spill]] }
0x1862   : > { %v7240_v58 = vmul.f32 %v7238_v53, %v14855_v21  ;;  %v7241_v41 = vmul.f32 %v7239_v17, %v14856_v13  ;;  %v7219_v33 = vpop.permute.xlu0 %7218 }
0x1864   : > { %v7256_v16 = vpack.c.bf16 %v7240_v58, %v7232_v52  ;;  %v7221_v61 = vpop.permute.xlu1 %7220  ;;  %v7257_v2 = vpack.c.bf16 %v7241_v41, %v7233_v44  ;;  %v14901_v41 = vld [vmem:[#allocation50_spill] sm:$0xff] }
0x1865   : > { %v7222_v24 = vsel %vm1403_vm3, %v7219_v33, %v7221_v61  ;;  %v7223_v38 = vsel %vm1403_vm3, %v7221_v61, %v7219_v33 }
0x1866   : > { %v7224_v57 = vmul.f32 %v7222_v24, %v14640_v27  ;;  %v7225_v29 = vmul.f32 %v7223_v38, %v14645_v42  ;;  %7278 = vmatprep.subr.bf16.mxu0 %v7257_v2  ;;  %v7203_v22 = vpop.permute.xlu0 %7202  ;;  %v14902_v2 = vld [vmem:[#allocation51_spill] sm:$0xff] }
0x1867   : > { %7279 = vmatpush1.bf16.msra.mxu0 %v7256_v16 }
0x1868   : > { %v7254_v28 = vpack.c.bf16 %v7224_v57, %v13170_v59  ;;  %v7205_v11 = vpop.permute.xlu1 %7204  ;;  %v7255_v40 = vpack.c.bf16 %v7225_v29, %v7185_v6 }
0x1869   : > { %v7206_v63 = vsel %vm1343_vm5, %v7203_v22, %v7205_v11  ;;  %v7207_v25 = vsel %vm1343_vm5, %v7205_v11, %v7203_v22 }
0x186a   : > { %7280 = vmatprep.subr.bf16.mxu0 %v7255_v40  ;;  %v7211_v36 = vpop.permute.xlu0 %7210  ;;  %v7208_v31 = vmul.f32 %v7207_v25, %v14841_v8  ;;  %v7209_v50 = vmul.f32 %v7206_v63, %v14842_v48 }
0x186b   : > { %7281 = vmatpush1.bf16.msra.mxu0 %v7254_v28 }
0x186c   : > { %v7213_v23 = vpop.permute.xlu1 %7212 }
0x186d   : > { %v7214_v32 = vsel %vm1373_vm4, %v7211_v36, %v7213_v23  ;;  %v7215_v20 = vsel %vm1373_vm4, %v7213_v23, %v7211_v36 }
0x186e   : > { %v7216_v1 = vmul.f32 %v7215_v20, %v14628_v3  ;;  %v7217_v60 = vmul.f32 %v7214_v32, %v14629_v4  ;;  %v7187_v9 = vpop.permute.xlu0 %7186 }
0x1870   : > { %v7252_v5 = vpack.c.bf16 %v7216_v1, %v7208_v31  ;;  %v7189_v59 = vpop.permute.xlu1 %7188  ;;  %v7253_v43 = vpack.c.bf16 %v7217_v60, %v7209_v50 }
0x1871   : > { %v7190_v47 = vsel %vm1284_vm7, %v7187_v9, %v7189_v59  ;;  %v7191_v6 = vsel %vm1284_vm7, %v7189_v59, %v7187_v9 }
0x1872   : > { %7282 = vmatprep.subr.bf16.mxu0 %v7253_v43  ;;  %v7195_v62 = vpop.permute.xlu0 %7194  ;;  %v7192_v12 = vmul.f32 %v7191_v6, %v14896_v18  ;;  %v7193_v19 = vmul.f32 %v7190_v47, %v14897_v49 }
0x1873   : > { %7283 = vmatpush1.bf16.msra.mxu0 %v7252_v5 }
0x1874   : > { %v7197_v45 = vpop.permute.xlu1 %7196 }
0x1875   : > { %v7198_v30 = vsel %vm1313_vm6, %v7195_v62, %v7197_v45  ;;  %v7199_v39 = vsel %vm1313_vm6, %v7197_v45, %v7195_v62 }
0x1876   : > { %v7200_v0 = vmul.f32 %v7199_v39, %v14898_v35  ;;  %v7201_v37 = vmul.f32 %v7198_v30, %v14899_v26 }
0x1878   : > { %v7250_v46 = vpack.c.bf16 %v7200_v0, %v7192_v12  ;;  %v7251_v54 = vpack.c.bf16 %v7201_v37, %v7193_v19 }
0x187a   : > { %7284 = vmatprep.subr.bf16.mxu0 %v7251_v54 }
0x187b   : > { %7285 = vmatpush1.bf16.msra.mxu0 %v7250_v46 }
0x187e   : > { %8799 = vmatmul.mubr.msk.bf16.vlgmr.msra.gmra.mxu0 %vm14900_vm15, %v7260_v56 }
0x193e   : > { %v7304_v53 = vpop.f32.mrf.mxu0 }
0x193f   : > { %vm7311_vm13 = vcmp.ge.f32.partialorder %v7304_v53, 0.0  ;;  %v7313_v17 = vmul.f32 %v7304_v53, %v14894_v7 }
0x1940   : > { %v7306_v52 = vpop.f32.mrf.mxu0 }
0x1941   : > { %v7315_v44 = vsel %vm7311_vm13, %v7304_v53, %v7313_v17  ;;  %vm7312_vm10 = vcmp.ge.f32.partialorder %v7306_v52, 0.0  ;;  %v7314_v58 = vmul.f32 %v7306_v52, %v14894_v7 }
0x1942   : > { %v13253_v33 = vadd.f32 %v7315_v44, %v14901_v41  ;;  %v7308_v16 = vpop.f32.mrf.mxu0 }
0x1943   : > { %v7316_v61 = vsel %vm7312_vm10, %v7306_v52, %v7314_v58 }
0x1944   : > { %v13256_v24 = vadd.f32 %v7316_v61, %v14902_v2  ;;  %7375 = vrot.lane.b32.xlu0 %v13253_v33, %s14554_s3  ;;  %v7309_v38 = vpop.f32.mrf.mxu0 }
0x1946   : > { %7377 = vrot.lane.b32.xlu1 %v13256_v24, %s14554_s3 }
0x1948   : > { %7359 = vrot.lane.b32.xlu0 %v13253_v33, %s14551_s2 }
0x194a   : > { %7361 = vrot.lane.b32.xlu1 %v13256_v24, %s14551_s2 }
0x194c   : > { %7367 = vrot.lane.b32.xlu0 %v13253_v33, %s14504_s28 }
0x194e   : > { %7369 = vrot.lane.b32.xlu1 %v13256_v24, %s14504_s28 }
0x1950   : > { %7351 = vrot.lane.b32.xlu0 %v13253_v33, %s14547_s1 }
0x1952   : > { %7353 = vrot.lane.b32.xlu1 %v13256_v24, %s14547_s1 }
0x1954   : > { %7335 = vrot.lane.b32.xlu0 %v13253_v33, %s14546_s0 }
0x1956   : > { %7337 = vrot.lane.b32.xlu1 %v13256_v24, %s14546_s0 }
0x1958   : > { %7343 = vrot.lane.b32.xlu0 %v13253_v33, %s14545_s20 }
0x195a   : > { %7345 = vrot.lane.b32.xlu1 %v13256_v24, %s14545_s20 }
0x195c   : > { %7319 = vrot.lane.b32.xlu0 %v13253_v33, %s14542_s30 }
0x195e   : > { %7321 = vrot.lane.b32.xlu1 %v13256_v24, %s14542_s30 }
0x1960   : > { %7327 = vrot.lane.b32.xlu0 %v13253_v33, %s14505_s12 }
0x1962   : > { %7329 = vrot.lane.b32.xlu1 %v13256_v24, %s14505_s12 }
0x19b6   : > { %v7376_v57 = vpop.permute.xlu0 %7375 }
0x19b8   : > { %v7378_v29 = vpop.permute.xlu1 %7377 }
0x19b9   : > { %v7379_v22 = vsel %vm1493_vm8, %v7376_v57, %v7378_v29  ;;  %v7380_v28 = vsel %vm1493_vm8, %v7378_v29, %v7376_v57 }
0x19ba   : > { %v7381_v11 = vmul.f32 %v7379_v22, %v14879_v14  ;;  %v7382_v40 = vmul.f32 %v7380_v28, %v14880_v34  ;;  %v7360_v36 = vpop.permute.xlu0 %7359 }
0x19bc   : > { %v7391_v63 = vpack.c.bf16 %v7381_v11, %v7381_v11  ;;  %v7392_v25 = vpack.c.bf16 %v7382_v40, %v7382_v40  ;;  %v7362_v23 = vpop.permute.xlu1 %7361 }
0x19bd   : > { %v7363_v31 = vsel %vm1433_vm2, %v7360_v36, %v7362_v23  ;;  %v7364_v50 = vsel %vm1433_vm2, %v7362_v23, %v7360_v36 }
0x19be   : > { %v7368_v32 = vpop.permute.xlu0 %7367  ;;  %8801 = vmatprep.subr.msk.bf16.mxu1 %vm1671_vm11, %v7392_v25  ;;  %v7404_v20 = vsel %vm1671_vm11, %v7391_v63, 0  ;;  %v7365_v5 = vmul.f32 %v7363_v31, %v14657_v55  ;;  %v7366_v59 = vmul.f32 %v7364_v50, %v14730_v15 }
0x19bf   : > { %7416 = vmatpush1.bf16.msra.mxu1 %v7404_v20 }
0x19c0   : > { %v7370_v1 = vpop.permute.xlu1 %7369 }
0x19c1   : > { %v7371_v60 = vsel %vm1463_vm1, %v7368_v32, %v7370_v1  ;;  %v7372_v9 = vsel %vm1463_vm1, %v7370_v1, %v7368_v32 }
0x19c2   : > { %v7373_v43 = vmul.f32 %v7371_v60, %v14855_v21  ;;  %v7374_v47 = vmul.f32 %v7372_v9, %v14856_v13  ;;  %v7352_v6 = vpop.permute.xlu0 %7351  ;;  %v9490_v9 = vld [vmem:[%s14903_s5] sm:$0xff]   ;;  %s14905_s5 = sld [smem:[#allocation23_spill]] }
0x19c4   : > { %v7389_v62 = vpack.c.bf16 %v7373_v43, %v7365_v5  ;;  %v7354_v45 = vpop.permute.xlu1 %7353  ;;  %v7390_v30 = vpack.c.bf16 %v7374_v47, %v7366_v59 }
0x19c5   : > { %v7355_v39 = vsel %vm1403_vm3, %v7352_v6, %v7354_v45  ;;  %v7356_v12 = vsel %vm1403_vm3, %v7354_v45, %v7352_v6 }
0x19c6   : > { %v7357_v19 = vmul.f32 %v7355_v39, %v14640_v27  ;;  %v7358_v0 = vmul.f32 %v7356_v12, %v14645_v42  ;;  %v7336_v37 = vpop.permute.xlu0 %7335  ;;  %7417 = vmatprep.subr.bf16.mxu1 %v7390_v30 }
0x19c7   : > { %7418 = vmatpush1.bf16.msra.mxu1 %v7389_v62 }
0x19c8   : > { %v7387_v46 = vpack.c.bf16 %v7357_v19, %v13253_v33  ;;  %v7338_v54 = vpop.permute.xlu1 %7337  ;;  %v7388_v56 = vpack.c.bf16 %v7358_v0, %v13256_v24 }
0x19c9   : > { %v7339_v17 = vsel %vm1343_vm5, %v7336_v37, %v7338_v54  ;;  %v7340_v52 = vsel %vm1343_vm5, %v7338_v54, %v7336_v37  ;;  %v9493_v37 = vld [vmem:[%s14905_s5 + $0x4] ss:$8 sps:$4 sm:$0xff]  }
0x19ca   : > { %v7344_v53 = vpop.permute.xlu0 %7343  ;;  %7419 = vmatprep.subr.bf16.mxu1 %v7388_v56  ;;  %v7341_v16 = vmul.f32 %v7340_v52, %v14841_v8  ;;  %v7342_v61 = vmul.f32 %v7339_v17, %v14842_v48  ;;  %8807 = vmatprep.mubr.msk.bf16.mxu0 %vm1540_vm0, %v9493_v37 }
0x19cb   : > { %7420 = vmatpush1.bf16.msra.mxu1 %v7387_v46 }
0x19cc   : > { %v7346_v44 = vpop.permute.xlu1 %7345 }
0x19cd   : > { %v7347_v58 = vsel %vm1373_vm4, %v7344_v53, %v7346_v44  ;;  %v7348_v41 = vsel %vm1373_vm4, %v7346_v44, %v7344_v53 }
0x19ce   : > { %v7349_v2 = vmul.f32 %v7348_v41, %v14628_v3  ;;  %v7350_v38 = vmul.f32 %v7347_v58, %v14629_v4  ;;  %v7320_v57 = vpop.permute.xlu0 %7319 }
0x19d0   : > { %v7385_v29 = vpack.c.bf16 %v7349_v2, %v7341_v16  ;;  %v7322_v22 = vpop.permute.xlu1 %7321  ;;  %v7386_v28 = vpack.c.bf16 %v7350_v38, %v7342_v61 }
0x19d1   : > { %v7323_v11 = vsel %vm1284_vm7, %v7320_v57, %v7322_v22  ;;  %v7324_v40 = vsel %vm1284_vm7, %v7322_v22, %v7320_v57 }
0x19d2   : > { %7421 = vmatprep.subr.bf16.mxu1 %v7386_v28  ;;  %v7328_v36 = vpop.permute.xlu0 %7327  ;;  %v7325_v32 = vmul.f32 %v7324_v40, %v14896_v18  ;;  %v7326_v20 = vmul.f32 %v7323_v11, %v14897_v49 }
0x19d3   : > { %7422 = vmatpush1.bf16.msra.mxu1 %v7385_v29 }
0x19d4   : > { %v7330_v63 = vpop.permute.xlu1 %7329 }
0x19d5   : > { %v7331_v25 = vsel %vm1313_vm6, %v7328_v36, %v7330_v63  ;;  %v7332_v23 = vsel %vm1313_vm6, %v7330_v63, %v7328_v36 }
0x19d6   : > { %v7333_v31 = vmul.f32 %v7332_v23, %v14898_v35  ;;  %v7334_v50 = vmul.f32 %v7331_v25, %v14899_v26 }
0x19d8   : > { %v7383_v1 = vpack.c.bf16 %v7333_v31, %v7325_v32  ;;  %v7384_v60 = vpack.c.bf16 %v7334_v50, %v7326_v20 }
0x19da   : > { %7423 = vmatprep.subr.bf16.mxu1 %v7384_v60 }
0x19db   : > { %7424 = vmatpush1.bf16.msra.mxu1 %v7383_v1 }
0x19de   : > { %8802 = vmatmul.mubr.msk.bf16.vlgmr.msra.gmra.mxu1 %vm14904_vm14, %v9490_v9 }
0x1a9e   : > { %v7443_v5 = vpop.f32.mrf.mxu1 }
0x1a9f   : > { %vm7452_vm12 = vcmp.ge.f32.partialorder %v7443_v5, 0.0  ;;  %v7456_v59 = vmul.f32 %v7443_v5, %v14894_v7 }
0x1aa0   : > { %v7445_v43 = vpop.f32.mrf.mxu1 }
0x1aa1   : > { %v13345_v47 = vsel %vm7452_vm12, %v7443_v5, %v7456_v59  ;;  %v7457_v30 = vmul.f32 %v7445_v43, %v14894_v7  ;;  %vm7453_vm13 = vcmp.ge.f32.partialorder %v7445_v43, 0.0 }
0x1aa2   : > { %7560 = vrot.lane.b32.xlu0 %v13345_v47, %s14504_s28  ;;  %v7447_v6 = vpop.f32.mrf.mxu1 }
0x1aa3   : > { %vm7454_vm15 = vcmp.ge.f32.partialorder %v7447_v6, 0.0  ;;  %v7458_v62 = vmul.f32 %v7447_v6, %v14894_v7  ;;  %v13377_v12 = vsel %vm7453_vm13, %v7445_v43, %v7457_v30 }
0x1aa4   : > { %v7449_v39 = vpop.f32.mrf.mxu1 }
0x1aa5   : > { %v13350_v45 = vsel %vm7454_vm15, %v7447_v6, %v7458_v62  ;;  %v7459_v19 = vmul.f32 %v7449_v39, %v14894_v7  ;;  %vm7455_vm10 = vcmp.ge.f32.partialorder %v7449_v39, 0.0 }
0x1aa6   : > { %7544 = vrot.lane.b32.xlu0 %v13345_v47, %s14551_s2  ;;  %7562 = vrot.lane.b32.xlu1 %v13350_v45, %s14504_s28 }
0x1aa7   : > { %v13384_v0 = vsel %vm7455_vm10, %v7449_v39, %v7459_v19 }
0x1aaa   : > { %7528 = vrot.lane.b32.xlu0 %v13345_v47, %s14547_s1  ;;  %7546 = vrot.lane.b32.xlu1 %v13350_v45, %s14551_s2 }
0x1aae   : > { %7512 = vrot.lane.b32.xlu0 %v13345_v47, %s14545_s20  ;;  %7530 = vrot.lane.b32.xlu1 %v13350_v45, %s14547_s1 }
0x1ab2   : > { %7496 = vrot.lane.b32.xlu0 %v13345_v47, %s14546_s0  ;;  %7514 = vrot.lane.b32.xlu1 %v13350_v45, %s14545_s20 }
0x1ab6   : > { %7480 = vrot.lane.b32.xlu0 %v13345_v47, %s14505_s12  ;;  %7498 = vrot.lane.b32.xlu1 %v13350_v45, %s14546_s0 }
0x1aba   : > { %7464 = vrot.lane.b32.xlu0 %v13345_v47, %s14542_s30  ;;  %7482 = vrot.lane.b32.xlu1 %v13350_v45, %s14505_s12 }
0x1abe   : > { %7564 = vrot.lane.b32.xlu0 %v13377_v12, %s14504_s28  ;;  %7466 = vrot.lane.b32.xlu1 %v13350_v45, %s14542_s30 }
0x1ac2   : > { %7548 = vrot.lane.b32.xlu0 %v13377_v12, %s14551_s2  ;;  %7566 = vrot.lane.b32.xlu1 %v13384_v0, %s14504_s28 }
0x1ac6   : > { %7532 = vrot.lane.b32.xlu0 %v13377_v12, %s14547_s1  ;;  %7550 = vrot.lane.b32.xlu1 %v13384_v0, %s14551_s2 }
0x1aca   : > { %7576 = vrot.lane.b32.xlu0 %v13345_v47, %s14554_s3  ;;  %7534 = vrot.lane.b32.xlu1 %v13384_v0, %s14547_s1 }
0x1ace   : > { %7516 = vrot.lane.b32.xlu0 %v13377_v12, %s14545_s20  ;;  %7578 = vrot.lane.b32.xlu1 %v13350_v45, %s14554_s3 }
0x1ad2   : > { %7500 = vrot.lane.b32.xlu0 %v13377_v12, %s14546_s0  ;;  %7518 = vrot.lane.b32.xlu1 %v13384_v0, %s14545_s20 }
0x1ad6   : > { %7484 = vrot.lane.b32.xlu0 %v13377_v12, %s14505_s12  ;;  %7502 = vrot.lane.b32.xlu1 %v13384_v0, %s14546_s0 }
0x1ada   : > { %7468 = vrot.lane.b32.xlu0 %v13377_v12, %s14542_s30  ;;  %7486 = vrot.lane.b32.xlu1 %v13384_v0, %s14505_s12 }
0x1ade   : > { %7580 = vrot.lane.b32.xlu0 %v13377_v12, %s14554_s3  ;;  %7470 = vrot.lane.b32.xlu1 %v13384_v0, %s14542_s30 }
0x1ae2   : > { %7582 = vrot.lane.b32.xlu1 %v13384_v0, %s14554_s3 }
0x1b14   : > { %v7561_v46 = vpop.permute.xlu0 %7560 }
0x1b18   : > { %v7545_v54 = vpop.permute.xlu0 %7544  ;;  %v7563_v56 = vpop.permute.xlu1 %7562 }
0x1b1c   : > { %v7529_v53 = vpop.permute.xlu0 %7528  ;;  %v7547_v17 = vpop.permute.xlu1 %7546 }
0x1b20   : > { %v7513_v52 = vpop.permute.xlu0 %7512  ;;  %v7531_v44 = vpop.permute.xlu1 %7530 }
0x1b24   : > { %v13422_v58 = vpop.permute.xlu0 %7496  ;;  %v7515_v41 = vpop.permute.xlu1 %7514 }
0x1b28   : > { %v13424_v16 = vpop.permute.xlu0 %7480  ;;  %v13426_v61 = vpop.permute.xlu1 %7498 }
0x1b2c   : > { %v13428_v2 = vpop.permute.xlu0 %7464  ;;  %v13430_v38 = vpop.permute.xlu1 %7482 }
0x1b30   : > { %v7565_v57 = vpop.permute.xlu0 %7564  ;;  %v13432_v29 = vpop.permute.xlu1 %7466 }
0x1b31   : > { %v7568_v22 = vsel %vm1463_vm1, %v7561_v46, %v7565_v57  ;;  %v7570_v28 = vsel %vm1463_vm1, %v7565_v57, %v7561_v46 }
0x1b32   : > { %v7572_v25 = vmul.f32 %v7568_v22, %v14855_v21  ;;  %v7573_v23 = vmul.f32 %v7570_v28, %v14856_v13 }
0x1b34   : > { %v7549_v11 = vpop.permute.xlu0 %7548  ;;  %v7567_v40 = vpop.permute.xlu1 %7566 }
0x1b35   : > { %v7569_v36 = vsel %vm1463_vm1, %v7563_v56, %v7567_v40  ;;  %v7571_v63 = vsel %vm1463_vm1, %v7567_v40, %v7563_v56  ;;  %v7552_v31 = vsel %vm1433_vm2, %v7545_v54, %v7549_v11  ;;  %v7554_v50 = vsel %vm1433_vm2, %v7549_v11, %v7545_v54 }
0x1b36   : > { %v7574_v32 = vmul.f32 %v7569_v36, %v14855_v21  ;;  %v7575_v20 = vmul.f32 %v7571_v63, %v14856_v13  ;;  %v7556_v6 = vmul.f32 %v7552_v31, %v14657_v55  ;;  %v7557_v62 = vmul.f32 %v7554_v50, %v14730_v15 }
0x1b38   : > { %v7606_v1 = vpack.c.bf16 %v7574_v32, %v7572_v25  ;;  %v7533_v60 = vpop.permute.xlu0 %7532  ;;  %v7551_v9 = vpop.permute.xlu1 %7550  ;;  %v7607_v5 = vpack.c.bf16 %v7575_v20, %v7573_v23  ;;  %v7601_v32 = vpack.c.bf16 %v13384_v0, %v13377_v12 }
0x1b39   : > { %v7553_v59 = vsel %vm1433_vm2, %v7547_v17, %v7551_v9  ;;  %v7555_v43 = vsel %vm1433_vm2, %v7551_v9, %v7547_v17  ;;  %v7536_v19 = vsel %vm1403_vm3, %v7529_v53, %v7533_v60  ;;  %v7538_v37 = vsel %vm1403_vm3, %v7533_v60, %v7529_v53 }
0x1b3a   : > { %v7558_v30 = vmul.f32 %v7553_v59, %v14657_v55  ;;  %v7559_v39 = vmul.f32 %v7555_v43, %v14730_v15  ;;  %7634 = vmatprep.subr.bf16.mxu0 %v7607_v5  ;;  %v7540_v28 = vmul.f32 %v7536_v19, %v14640_v27  ;;  %v7541_v11 = vmul.f32 %v7538_v37, %v14645_v42 }
0x1b3b   : > { %7635 = vmatpush1.bf16.msra.mxu0 %v7606_v1  ;;  %v7600_v9 = vpack.c.bf16 %v13350_v45, %v13345_v47 }
0x1b3c   : > { %v7604_v46 = vpack.c.bf16 %v7558_v30, %v7556_v6  ;;  %v13462_v54 = vpop.permute.xlu0 %7576  ;;  %v7535_v56 = vpop.permute.xlu1 %7534  ;;  %v7605_v17 = vpack.c.bf16 %v7559_v39, %v7557_v62 }
0x1b3d   : > { %v7537_v57 = vsel %vm1403_vm3, %v7531_v44, %v7535_v56  ;;  %v7539_v22 = vsel %vm1403_vm3, %v7535_v56, %v7531_v44 }
0x1b3e   : > { %v7542_v40 = vmul.f32 %v7537_v57, %v14640_v27  ;;  %v7543_v53 = vmul.f32 %v7539_v22, %v14645_v42  ;;  %7636 = vmatprep.subr.bf16.mxu0 %v7605_v17 }
0x1b3f   : > { %7637 = vmatpush1.bf16.msra.mxu0 %v7604_v46 }
0x1b40   : > { %v7602_v36 = vpack.c.bf16 %v7542_v40, %v7540_v28  ;;  %v7517_v63 = vpop.permute.xlu0 %7516  ;;  %v13472_v25 = vpop.permute.xlu1 %7578  ;;  %v7603_v23 = vpack.c.bf16 %v7543_v53, %v7541_v11 }
0x1b41   : > { %v7520_v44 = vsel %vm1373_vm4, %v7513_v52, %v7517_v63  ;;  %v7522_v20 = vsel %vm1373_vm4, %v7517_v63, %v7513_v52 }
0x1b42   : > { %7638 = vmatprep.subr.bf16.mxu0 %v7603_v23  ;;  %v7524_v5 = vmul.f32 %v7522_v20, %v14628_v3  ;;  %v7525_v59 = vmul.f32 %v7520_v44, %v14629_v4 }
0x1b43   : > { %7639 = vmatpush1.bf16.msra.mxu0 %v7602_v36 }
0x1b44   : > { %v7501_v31 = vpop.permute.xlu0 %7500  ;;  %v7519_v50 = vpop.permute.xlu1 %7518  ;;  %7640 = vmatprep.subr.bf16.mxu0 %v7601_v32 }
0x1b45   : > { %v7521_v1 = vsel %vm1373_vm4, %v7515_v41, %v7519_v50  ;;  %v7523_v60 = vsel %vm1373_vm4, %v7519_v50, %v7515_v41  ;;  %v7504_v6 = vsel %vm1343_vm5, %v13422_v58, %v7501_v31  ;;  %v7506_v62 = vsel %vm1343_vm5, %v7501_v31, %v13422_v58 }
0x1b46   : > { %v7526_v43 = vmul.f32 %v7523_v60, %v14628_v3  ;;  %v7527_v52 = vmul.f32 %v7521_v1, %v14629_v4  ;;  %v7508_v56 = vmul.f32 %v7506_v62, %v14841_v8  ;;  %v7509_v17 = vmul.f32 %v7504_v6, %v14842_v48 }
0x1b47   : > { %7641 = vmatpush1.bf16.msra.mxu0 %v7600_v9 }
0x1b48   : > { %v7598_v41 = vpack.c.bf16 %v7526_v43, %v7524_v5  ;;  %v7485_v30 = vpop.permute.xlu0 %7484  ;;  %v7503_v39 = vpop.permute.xlu1 %7502  ;;  %v7599_v19 = vpack.c.bf16 %v7527_v52, %v7525_v59 }
0x1b49   : > { %v7505_v37 = vsel %vm1343_vm5, %v13426_v61, %v7503_v39  ;;  %v7507_v46 = vsel %vm1343_vm5, %v7503_v39, %v13426_v61  ;;  %v7488_v22 = vsel %vm1313_vm6, %v13424_v16, %v7485_v30  ;;  %v7490_v28 = vsel %vm1313_vm6, %v7485_v30, %v13424_v16 }
0x1b4a   : > { %v7510_v57 = vmul.f32 %v7507_v46, %v14841_v8  ;;  %v7511_v58 = vmul.f32 %v7505_v37, %v14842_v48  ;;  %7642 = vmatprep.subr.bf16.mxu0 %v7599_v19  ;;  %v7492_v23 = vmul.f32 %v7490_v28, %v14898_v35  ;;  %v7493_v32 = vmul.f32 %v7488_v22, %v14899_v26  ;;  %v9491_v22 = vld [vmem:[%s14905_s5] ss:$8 sps:$4 sm:$0xff]  }
0x1b4b   : > { %7643 = vmatpush1.bf16.msra.mxu0 %v7598_v41 }
0x1b4c   : > { %v7596_v11 = vpack.c.bf16 %v7510_v57, %v7508_v56  ;;  %v7469_v61 = vpop.permute.xlu0 %7468  ;;  %v7487_v40 = vpop.permute.xlu1 %7486  ;;  %v7597_v53 = vpack.c.bf16 %v7511_v58, %v7509_v17  ;;  %v7612_v58 = vld [vmem:[%s14905_s5 + $0x10] sm:$0xff] }
0x1b4d   : > { %v7489_v36 = vsel %vm1313_vm6, %v13430_v38, %v7487_v40  ;;  %v7491_v63 = vsel %vm1313_vm6, %v7487_v40, %v13430_v38  ;;  %v7472_v20 = vsel %vm1284_vm7, %v13428_v2, %v7469_v61  ;;  %v7474_v31 = vsel %vm1284_vm7, %v7469_v61, %v13428_v2 }
0x1b4e   : > { %v7494_v44 = vmul.f32 %v7491_v63, %v14898_v35  ;;  %v7495_v16 = vmul.f32 %v7489_v36, %v14899_v26  ;;  %7644 = vmatprep.subr.bf16.mxu0 %v7597_v53  ;;  %v7476_v59 = vmul.f32 %v7474_v31, %v14896_v18  ;;  %v7477_v43 = vmul.f32 %v7472_v20, %v14897_v49 }
0x1b4f   : > { %7645 = vmatpush1.bf16.msra.mxu0 %v7596_v11  ;;  %v8806_v28 = vcombine.high %v7612_v58, %v7612_v58 }
0x1b50   : > { %v7594_v50 = vpack.c.bf16 %v7494_v44, %v7492_v23  ;;  %v7581_v38 = vpop.permute.xlu0 %7580  ;;  %v7471_v1 = vpop.permute.xlu1 %7470  ;;  %v7595_v60 = vpack.c.bf16 %v7495_v16, %v7493_v32 }
0x1b51   : > { %v7473_v9 = vsel %vm1284_vm7, %v13432_v29, %v7471_v1  ;;  %v7475_v5 = vsel %vm1284_vm7, %v7471_v1, %v13432_v29  ;;  %v7584_v6 = vsel %vm1493_vm8, %v13462_v54, %v7581_v38  ;;  %v7586_v62 = vsel %vm1493_vm8, %v7581_v38, %v13462_v54 }
0x1b52   : > { %v7478_v52 = vmul.f32 %v7475_v5, %v14896_v18  ;;  %v7479_v2 = vmul.f32 %v7473_v9, %v14897_v49  ;;  %7646 = vmatprep.subr.bf16.mxu0 %v7595_v60  ;;  %v7588_v37 = vmul.f32 %v7584_v6, %v14879_v14  ;;  %v7589_v46 = vmul.f32 %v7586_v62, %v14880_v34 }
0x1b53   : > { %7647 = vmatpush1.bf16.msra.mxu0 %v7594_v50 }
0x1b54   : > { %v7592_v29 = vpack.c.bf16 %v7478_v52, %v7476_v59  ;;  %v7583_v41 = vpop.permute.xlu1 %7582  ;;  %v7593_v30 = vpack.c.bf16 %v7479_v2, %v7477_v43  ;;  %v9496_v52 = vld [vmem:[%s14906_s4 + $0x4] ss:$8 sps:$4 sm:$0xff]  }
0x1b55   : > { %v7585_v39 = vsel %vm1493_vm8, %v13472_v25, %v7583_v41  ;;  %v7587_v19 = vsel %vm1493_vm8, %v7583_v41, %v13472_v25  ;;  %v8805_v25 = vcombine.low %v7612_v58, %v7612_v58  ;;  %8812 = vmatprep.mubr.msk.bf16.mxu1 %vm3253_vm9, %v9496_v52 }
0x1b56   : > { %v7590_v56 = vmul.f32 %v7585_v39, %v14879_v14  ;;  %v7591_v54 = vmul.f32 %v7587_v19, %v14880_v34  ;;  %7648 = vmatprep.subr.bf16.mxu0 %v7593_v30 }
0x1b57   : > { %7649 = vmatpush1.bf16.msra.mxu0 %v7592_v29 }
0x1b58   : > { %v7608_v17 = vpack.c.bf16 %v7590_v56, %v7588_v37  ;;  %v7609_v57 = vpack.c.bf16 %v7591_v54, %v7589_v46 }
0x1b5a   : > { %7664 = vmatprep.subr.bf16.mxu0 %v7609_v57 }
0x1b5b   : > { %7665 = vmatpush2.bf16.msra.mxu0 %v7608_v17 }
0x1b5e   : > { %7667 = vmatmul.mubr.bf16.vlgmr.msra.gmra.mxu0 %v9491_v22 }
0x1b5f   : > { %8808 = vmatprep.mubr.msk.bf16.mxu0 %vm1540_vm0, %v8806_v28 }
0x1b66   : > { %7677 = vmatmul.mubr.bf16.gmra.mxu0 %v8805_v25 }
0x1c1e   : > { %v7668_v11 = vpop.f32.mrf.mxu0 }
0x1c1f   : > { %vm7685_vm14 = vcmp.ge.f32.partialorder %v7668_v11, 0.0  ;;  %v7691_v61 = vmul.f32 %v7668_v11, %v14894_v7 }
0x1c20   : > { %v7670_v40 = vpop.f32.mrf.mxu0 }
0x1c21   : > { %v13558_v53 = vsel %vm7685_vm14, %v7668_v11, %v7691_v61  ;;  %vm7686_vm12 = vcmp.ge.f32.partialorder %v7670_v40, 0.0  ;;  %v7692_v36 = vmul.f32 %v7670_v40, %v14894_v7 }
0x1c22   : > { %7799 = vrot.lane.b32.xlu0 %v13558_v53, %s14547_s1  ;;  %v7672_v63 = vpop.f32.mrf.mxu0 }
0x1c23   : > { %v13563_v23 = vsel %vm7686_vm12, %v7670_v40, %v7692_v36  ;;  %v7693_v31 = vmul.f32 %v7672_v63, %v14894_v7  ;;  %vm7687_vm15 = vcmp.ge.f32.partialorder %v7672_v63, 0.0 }
0x1c24   : > { %7805 = vrot.lane.b32.xlu1 %v13563_v23, %s14547_s1  ;;  %v7674_v32 = vpop.f32.mrf.mxu0 }
0x1c25   : > { %v13578_v38 = vsel %vm7687_vm15, %v7672_v63, %v7693_v31  ;;  %v7694_v1 = vmul.f32 %v7674_v32, %v14894_v7  ;;  %vm7688_vm13 = vcmp.ge.f32.partialorder %v7674_v32, 0.0 }
0x1c26   : > { %7775 = vrot.lane.b32.xlu0 %v13558_v53, %s14545_s20  ;;  %v7678_v44 = vpop.f32.mrf.mxu0  ;;  %v7907_v57 = vpack.c.bf16 %v13578_v38, %v13558_v53 }
0x1c27   : > { %v7700_v60 = vsel %vm7688_vm13, %v7674_v32, %v7694_v1  ;;  %v7695_v9 = vmul.f32 %v7678_v44, %v14894_v7  ;;  %vm7689_vm10 = vcmp.ge.f32.partialorder %v7678_v44, 0.0 }
0x1c28   : > { %7781 = vrot.lane.b32.xlu1 %v13563_v23, %s14545_s20  ;;  %v7680_v16 = vpop.f32.mrf.mxu0  ;;  %v7908_v54 = vpack.c.bf16 %v7700_v60, %v13563_v23 }
0x1c29   : > { %v7701_v5 = vsel %vm7689_vm10, %v7678_v44, %v7695_v9  ;;  %v7696_v59 = vmul.f32 %v7680_v16, %v14894_v7  ;;  %vm7690_vm14 = vcmp.ge.f32.partialorder %v7680_v16, 0.0 }
0x1c2a   : > { %7751 = vrot.lane.b32.xlu0 %v13558_v53, %s14546_s0  ;;  %v7682_v20 = vpop.f32.mrf.mxu0 }
0x1c2b   : > { %v7702_v43 = vsel %vm7690_vm14, %v7680_v16, %v7696_v59 }
0x1c2c   : > { %7733 = vrot.lane.b32.xlu1 %v13563_v23, %s14505_s12  ;;  %v7683_v50 = vpop.f32.mrf.mxu0 }
0x1c2e   : > { %7727 = vrot.lane.b32.xlu0 %v13558_v53, %s14505_s12 }
0x1c30   : > { %7753 = vrot.lane.b32.xlu1 %v13578_v38, %s14546_s0 }
0x1c32   : > { %7703 = vrot.lane.b32.xlu0 %v13558_v53, %s14542_s30 }
0x1c34   : > { %7705 = vrot.lane.b32.xlu1 %v13578_v38, %s14542_s30 }
0x1c36   : > { %7871 = vrot.lane.b32.xlu0 %v13558_v53, %s14554_s3 }
0x1c38   : > { %7873 = vrot.lane.b32.xlu1 %v13578_v38, %s14554_s3 }
0x1c3a   : > { %7757 = vrot.lane.b32.xlu0 %v13563_v23, %s14546_s0 }
0x1c3c   : > { %7759 = vrot.lane.b32.xlu1 %v7700_v60, %s14546_s0 }
0x1c3e   : > { %7709 = vrot.lane.b32.xlu0 %v13563_v23, %s14542_s30 }
0x1c40   : > { %7711 = vrot.lane.b32.xlu1 %v7700_v60, %s14542_s30 }
0x1c42   : > { %7877 = vrot.lane.b32.xlu0 %v13563_v23, %s14554_s3 }
0x1c44   : > { %7879 = vrot.lane.b32.xlu1 %v7700_v60, %s14554_s3 }
0x1c46   : > { %7777 = vrot.lane.b32.xlu0 %v13578_v38, %s14545_s20 }
0x1c48   : > { %7779 = vrot.lane.b32.xlu1 %v7701_v5, %s14545_s20 }
0x1c4a   : > { %7729 = vrot.lane.b32.xlu0 %v13578_v38, %s14505_s12 }
0x1c4c   : > { %7731 = vrot.lane.b32.xlu1 %v7701_v5, %s14505_s12 }
0x1c4e   : > { %7783 = vrot.lane.b32.xlu0 %v7700_v60, %s14545_s20 }
0x1c50   : > { %7851 = vrot.lane.b32.xlu1 %v7701_v5, %s14504_s28 }
0x1c52   : > { %7735 = vrot.lane.b32.xlu0 %v7700_v60, %s14505_s12 }
0x1c54   : > { %7785 = vrot.lane.b32.xlu1 %v7702_v43, %s14545_s20 }
0x1c56   : > { %7755 = vrot.lane.b32.xlu0 %v7701_v5, %s14546_s0 }
0x1c58   : > { %7761 = vrot.lane.b32.xlu1 %v7702_v43, %s14546_s0 }
0x1c5a   : > { %7849 = vrot.lane.b32.xlu0 %v13578_v38, %s14504_s28 }
0x1c5c   : > { %7853 = vrot.lane.b32.xlu1 %v13563_v23, %s14504_s28 }
0x1c5e   : > { %7855 = vrot.lane.b32.xlu0 %v7700_v60, %s14504_s28 }
0x1c60   : > { %7737 = vrot.lane.b32.xlu1 %v7702_v43, %s14505_s12 }
0x1c62   : > { %7707 = vrot.lane.b32.xlu0 %v7701_v5, %s14542_s30 }
0x1c64   : > { %7713 = vrot.lane.b32.xlu1 %v7702_v43, %s14542_s30 }
0x1c66   : > { %7847 = vrot.lane.b32.xlu0 %v13558_v53, %s14504_s28 }
0x1c68   : > { %7825 = vrot.lane.b32.xlu1 %v13578_v38, %s14551_s2 }
0x1c6a   : > { %7875 = vrot.lane.b32.xlu0 %v7701_v5, %s14554_s3 }
0x1c6c   : > { %7881 = vrot.lane.b32.xlu1 %v7702_v43, %s14554_s3 }
0x1c6e   : > { %7827 = vrot.lane.b32.xlu0 %v7701_v5, %s14551_s2 }
0x1c70   : > { %7831 = vrot.lane.b32.xlu1 %v7700_v60, %s14551_s2 }
0x1c72   : > { %7823 = vrot.lane.b32.xlu0 %v13558_v53, %s14551_s2 }
0x1c74   : > { %7857 = vrot.lane.b32.xlu1 %v7702_v43, %s14504_s28 }
0x1c76   : > { %7829 = vrot.lane.b32.xlu0 %v13563_v23, %s14551_s2 }
0x1c78   : > { %7833 = vrot.lane.b32.xlu1 %v7702_v43, %s14551_s2 }
0x1c7a   : > { %7801 = vrot.lane.b32.xlu0 %v13578_v38, %s14547_s1 }
0x1c7c   : > { %7803 = vrot.lane.b32.xlu1 %v7701_v5, %s14547_s1 }
0x1c7e   : > { %7807 = vrot.lane.b32.xlu0 %v7700_v60, %s14547_s1 }
0x1c80   : > { %7809 = vrot.lane.b32.xlu1 %v7702_v43, %s14547_s1 }
0x1c94   : > { %v7800_v2 = vpop.permute.xlu0 %7799 }
0x1c96   : > { %v7806_v6 = vpop.permute.xlu1 %7805 }
0x1c97   : > { %v7811_v62 = vsel %vm1403_vm3, %v7800_v2, %v7806_v6  ;;  %v7814_v29 = vsel %vm1403_vm3, %v7806_v6, %v7800_v2 }
0x1c98   : > { %v7817_v41 = vmul.f32 %v7811_v62, %v14640_v27  ;;  %v7818_v30 = vmul.f32 %v7814_v29, %v14645_v42  ;;  %v7776_v39 = vpop.permute.xlu0 %7775 }
0x1c9a   : > { %v7909_v19 = vpack.c.bf16 %v7817_v41, %v7701_v5  ;;  %v7782_v37 = vpop.permute.xlu1 %7781  ;;  %v7910_v46 = vpack.c.bf16 %v7818_v30, %v7702_v43 }
0x1c9b   : > { %v7787_v59 = vsel %vm1373_vm4, %v7776_v39, %v7782_v37  ;;  %v7790_v43 = vsel %vm1373_vm4, %v7782_v37, %v7776_v39 }
0x1c9c   : > { %v7752_v56 = vpop.permute.xlu0 %7751  ;;  %7943 = vmatprep.subr.bf16.mxu1 %v7910_v46  ;;  %v7793_v39 = vmul.f32 %v7790_v43, %v14628_v3 }
0x1c9d   : > { %7944 = vmatpush1.bf16.msra.mxu1 %v7909_v19 }
0x1c9e   : > { %v13650_v17 = vpop.permute.xlu1 %7733  ;;  %7945 = vmatprep.subr.bf16.mxu1 %v7908_v54 }
0x1ca0   : > { %v13654_v58 = vpop.permute.xlu0 %7727 }
0x1ca1   : > { %7946 = vmatpush1.bf16.msra.mxu1 %v7907_v57  ;;  %v7794_v57 = vmul.f32 %v7787_v59, %v14629_v4 }
0x1ca2   : > { %v7754_v22 = vpop.permute.xlu1 %7753 }
0x1ca4   : > { %v13656_v28 = vpop.permute.xlu0 %7703 }
0x1ca6   : > { %v13658_v25 = vpop.permute.xlu1 %7705 }
0x1ca8   : > { %v13660_v11 = vpop.permute.xlu0 %7871 }
0x1caa   : > { %v13662_v61 = vpop.permute.xlu1 %7873 }
0x1cac   : > { %v7758_v40 = vpop.permute.xlu0 %7757 }
0x1cad   : > { %v7766_v59 = vsel %vm1343_vm5, %v7758_v40, %v7752_v56 }
0x1cae   : > { %v7760_v36 = vpop.permute.xlu1 %7759 }
0x1caf   : > { %v7764_v19 = vsel %vm1343_vm5, %v7754_v22, %v7760_v36 }
0x1cb0   : > { %v13664_v63 = vpop.permute.xlu0 %7709 }
0x1cb2   : > { %v13666_v23 = vpop.permute.xlu1 %7711 }
0x1cb4   : > { %v13668_v32 = vpop.permute.xlu0 %7877 }
0x1cb6   : > { %v13670_v53 = vpop.permute.xlu1 %7879 }
0x1cb8   : > { %v7778_v44 = vpop.permute.xlu0 %7777 }
0x1cba   : > { %v7780_v16 = vpop.permute.xlu1 %7779 }
0x1cbc   : > { %v7730_v20 = vpop.permute.xlu0 %7729 }
0x1cbe   : > { %v7732_v31 = vpop.permute.xlu1 %7731 }
0x1cc0   : > { %v7784_v50 = vpop.permute.xlu0 %7783 }
0x1cc1   : > { %v7788_v60 = vsel %vm1373_vm4, %v7778_v44, %v7784_v50  ;;  %v7791_v9 = vsel %vm1373_vm4, %v7784_v50, %v7778_v44  ;;  %v7763_v44 = vsel %vm1343_vm5, %v7752_v56, %v7758_v40  ;;  %v7739_v40 = vsel %vm1313_vm6, %v13654_v58, %v13650_v17 }
0x1cc2   : > { %v13672_v38 = vpop.permute.xlu1 %7851  ;;  %v7795_v6 = vmul.f32 %v7791_v9, %v14628_v3  ;;  %v7796_v62 = vmul.f32 %v7788_v60, %v14629_v4  ;;  %v7767_v60 = vsel %vm1343_vm5, %v7760_v36, %v7754_v22  ;;  %v7772_v9 = vmul.f32 %v7764_v19, %v14842_v48 }
0x1cc3   : > { %v7771_v22 = vmul.f32 %v7767_v60, %v14841_v8 }
0x1cc4   : > { %v7736_v1 = vpop.permute.xlu0 %7735 }
0x1cc5   : > { %v7740_v19 = vsel %vm1313_vm6, %v7730_v20, %v7736_v1  ;;  %v7743_v56 = vsel %vm1313_vm6, %v7736_v1, %v7730_v20 }
0x1cc6   : > { %v7786_v5 = vpop.permute.xlu1 %7785  ;;  %v7747_v1 = vmul.f32 %v7743_v56, %v14898_v35 }
0x1cc7   : > { %v7789_v52 = vsel %vm1373_vm4, %v7780_v16, %v7786_v5  ;;  %v7792_v2 = vsel %vm1373_vm4, %v7786_v5, %v7780_v16 }
0x1cc8   : > { %v7797_v29 = vmul.f32 %v7792_v2, %v14628_v3  ;;  %v7798_v41 = vmul.f32 %v7789_v52, %v14629_v4  ;;  %v7756_v30 = vpop.permute.xlu0 %7755  ;;  %v7770_v2 = vmul.f32 %v7763_v44, %v14842_v48 }
0x1cca   : > { %v7905_v37 = vpack.c.bf16 %v7797_v29, %v7795_v6  ;;  %v7762_v46 = vpop.permute.xlu1 %7761  ;;  %v7906_v54 = vpack.c.bf16 %v7798_v41, %v7796_v62  ;;  %v7902_v41 = vpack.c.bf16 %v7772_v9, %v7770_v2 }
0x1ccb   : > { %v7765_v16 = vsel %vm1343_vm5, %v7756_v30, %v7762_v46  ;;  %v7768_v50 = vsel %vm1343_vm5, %v7762_v46, %v7756_v30  ;;  %v7769_v30 = vmul.f32 %v7766_v59, %v14841_v8 }
0x1ccc   : > { %v7773_v5 = vmul.f32 %v7768_v50, %v14841_v8  ;;  %v7774_v43 = vmul.f32 %v7765_v16, %v14842_v48  ;;  %v13705_v52 = vpop.permute.xlu0 %7849  ;;  %7947 = vmatprep.subr.bf16.mxu1 %v7906_v54 }
0x1ccd   : > { %7948 = vmatpush1.bf16.msra.mxu1 %v7905_v37  ;;  %v7742_v37 = vsel %vm1313_vm6, %v13650_v17, %v13654_v58  ;;  %v7901_v46 = vpack.c.bf16 %v7771_v22, %v7769_v30  ;;  %v7716_v17 = vsel %vm1284_vm7, %v13658_v25, %v13666_v23 }
0x1cce   : > { %v7903_v6 = vpack.c.bf16 %v7793_v39, %v7773_v5  ;;  %v13710_v62 = vpop.permute.xlu1 %7853  ;;  %v7904_v29 = vpack.c.bf16 %v7794_v57, %v7774_v43  ;;  %v7748_v57 = vmul.f32 %v7740_v19, %v14899_v26  ;;  %v7745_v58 = vmul.f32 %v7742_v37, %v14898_v35 }
0x1ccf   : > { %v7746_v5 = vmul.f32 %v7739_v40, %v14899_v26  ;;  %v7715_v43 = vsel %vm1284_vm7, %v13656_v28, %v13664_v63  ;;  %v7718_v19 = vsel %vm1284_vm7, %v13664_v63, %v13656_v28  ;;  %v7886_v28 = vsel %vm1493_vm8, %v13668_v32, %v13660_v11 }
0x1cd0   : > { %v13713_v36 = vpop.permute.xlu0 %7855  ;;  %7949 = vmatprep.subr.bf16.mxu1 %v7904_v29  ;;  %v7724_v29 = vmul.f32 %v7716_v17, %v14897_v49  ;;  %v7722_v56 = vmul.f32 %v7715_v43, %v14897_v49 }
0x1cd1   : > { %7950 = vmatpush1.bf16.msra.mxu1 %v7903_v6  ;;  %v7719_v6 = vsel %vm1284_vm7, %v13666_v23, %v13658_v25 }
0x1cd2   : > { %v7738_v39 = vpop.permute.xlu1 %7737  ;;  %7951 = vmatprep.subr.bf16.mxu1 %v7902_v41  ;;  %v7723_v23 = vmul.f32 %v7719_v6, %v14896_v18 }
0x1cd3   : > { %v7741_v54 = vsel %vm1313_vm6, %v7732_v31, %v7738_v39  ;;  %v7744_v20 = vsel %vm1313_vm6, %v7738_v39, %v7732_v31 }
0x1cd4   : > { %v7749_v44 = vmul.f32 %v7744_v20, %v14898_v35  ;;  %v7750_v16 = vmul.f32 %v7741_v54, %v14899_v26  ;;  %v7708_v50 = vpop.permute.xlu0 %7707  ;;  %v7721_v54 = vmul.f32 %v7718_v19, %v14896_v18  ;;  %v7887_v20 = vsel %vm1493_vm8, %v13670_v53, %v13662_v61 }
0x1cd5   : > { %7952 = vmatpush1.bf16.msra.mxu1 %v7901_v46  ;;  %v7896_v46 = vpack.c.bf16 %v7724_v29, %v7722_v56  ;;  %v7863_v29 = vsel %vm1463_vm1, %v13713_v36, %v13705_v52 }
0x1cd6   : > { %v7899_v60 = vpack.c.bf16 %v7749_v44, %v7747_v1  ;;  %v7714_v9 = vpop.permute.xlu1 %7713  ;;  %v7900_v31 = vpack.c.bf16 %v7750_v16, %v7748_v57  ;;  %v7895_v1 = vpack.c.bf16 %v7723_v23, %v7721_v54  ;;  %v7884_v57 = vsel %vm1493_vm8, %v13662_v61, %v13670_v53 }
0x1cd7   : > { %v7717_v59 = vsel %vm1284_vm7, %v7708_v50, %v7714_v9  ;;  %v7720_v2 = vsel %vm1284_vm7, %v7714_v9, %v7708_v50  ;;  %v7892_v50 = vmul.f32 %v7887_v20, %v14880_v34  ;;  %v7883_v9 = vsel %vm1493_vm8, %v13660_v11, %v13668_v32 }
0x1cd8   : > { %v7725_v22 = vmul.f32 %v7720_v2, %v14896_v18  ;;  %v7726_v41 = vmul.f32 %v7717_v59, %v14897_v49  ;;  %v7848_v30 = vpop.permute.xlu0 %7847  ;;  %7953 = vmatprep.subr.bf16.mxu1 %v7900_v31  ;;  %v7890_v61 = vmul.f32 %v7886_v28, %v14880_v34  ;;  %v7891_v53 = vmul.f32 %v7884_v57, %v14879_v14 }
0x1cd9   : > { %7954 = vmatpush1.bf16.msra.mxu1 %v7899_v60  ;;  %v7889_v59 = vmul.f32 %v7883_v9, %v14879_v14  ;;  %v7860_v2 = vsel %vm1463_vm1, %v13705_v52, %v13713_v36  ;;  %v7859_v56 = vsel %vm1463_vm1, %v7848_v30, %v13710_v62  ;;  %v7868_v52 = vmul.f32 %v7863_v29, %v14856_v13 }
0x1cda   : > { %v7897_v40 = vpack.c.bf16 %v7745_v58, %v7725_v22  ;;  %v13762_v39 = vpop.permute.xlu1 %7825  ;;  %v7898_v25 = vpack.c.bf16 %v7746_v5, %v7726_v41  ;;  %v7920_v32 = vpack.c.bf16 %v7892_v50, %v7890_v61  ;;  %v7867_v19 = vmul.f32 %v7860_v2, %v14855_v21 }
0x1cdb   : > { %v7919_v22 = vpack.c.bf16 %v7891_v53, %v7889_v59  ;;  %v7862_v36 = vsel %vm1463_vm1, %v13710_v62, %v7848_v30  ;;  %v7865_v20 = vmul.f32 %v7859_v56, %v14855_v21 }
0x1cdc   : > { %v7876_v37 = vpop.permute.xlu0 %7875  ;;  %7955 = vmatprep.subr.bf16.mxu1 %v7898_v25 }
0x1cdd   : > { %7956 = vmatpush1.bf16.msra.mxu1 %v7897_v40 }
0x1cde   : > { %v7882_v63 = vpop.permute.xlu1 %7881  ;;  %7957 = vmatprep.subr.bf16.mxu1 %v7896_v46 }
0x1cdf   : > { %v7885_v44 = vsel %vm1493_vm8, %v7876_v37, %v7882_v63  ;;  %v7888_v16 = vsel %vm1493_vm8, %v7882_v63, %v7876_v37 }
0x1ce0   : > { %v7893_v17 = vmul.f32 %v7885_v44, %v14879_v14  ;;  %v7894_v58 = vmul.f32 %v7888_v16, %v14880_v34  ;;  %v7828_v60 = vpop.permute.xlu0 %7827 }
0x1ce1   : > { %7958 = vmatpush1.bf16.msra.mxu1 %v7895_v1  ;;  %v7866_v1 = vmul.f32 %v7862_v36, %v14856_v13  ;;  %v9498_v36 = vld [vmem:[%s14906_s4] ss:$8 sps:$4 sm:$0xff]   ;;  %s14907_s4 = sld [smem:[#allocation25_spill]] }
0x1ce2   : > { %v7921_v31 = vpack.c.bf16 %v7893_v17, %v7893_v17  ;;  %v7922_v5 = vpack.c.bf16 %v7894_v58, %v7894_v58  ;;  %v7832_v43 = vpop.permute.xlu1 %7831 }
0x1ce3   : > { %v7839_v62 = vsel %vm1433_vm2, %v7832_v43, %v13762_v39  ;;  %v7836_v9 = vsel %vm1433_vm2, %v13762_v39, %v7832_v43 }
0x1ce4   : > { %v7824_v6 = vpop.permute.xlu0 %7823  ;;  %8811 = vmatprep.subr.msk.bf16.mxu1 %vm1671_vm11, %v7922_v5  ;;  %v7938_v11 = vsel %vm1671_vm11, %v7921_v31, 0  ;;  %v7844_v61 = vmul.f32 %v7839_v62, %v14730_v15 }
0x1ce5   : > { %7964 = vmatpush2.bf16.msra.mxu1 %v7938_v11 }
0x1ce6   : > { %v7858_v41 = vpop.permute.xlu1 %7857  ;;  %7965 = vmatprep.subr.bf16.mxu1 %v7920_v32 }
0x1ce7   : > { %v7861_v40 = vsel %vm1463_vm1, %v13672_v38, %v7858_v41  ;;  %v7864_v25 = vsel %vm1463_vm1, %v7858_v41, %v13672_v38 }
0x1ce8   : > { %v7869_v23 = vmul.f32 %v7861_v40, %v14855_v21  ;;  %v7870_v37 = vmul.f32 %v7864_v25, %v14856_v13  ;;  %v7830_v46 = vpop.permute.xlu0 %7829 }
0x1ce9   : > { %v7838_v54 = vsel %vm1433_vm2, %v7830_v46, %v7824_v6  ;;  %7966 = vmatpush2.bf16.msra.mxu1 %v7919_v22  ;;  %v7835_v44 = vsel %vm1433_vm2, %v7824_v6, %v7830_v46  ;;  %v7843_v6 = vmul.f32 %v7836_v9, %v14657_v55 }
0x1cea   : > { %v7917_v28 = vpack.c.bf16 %v7869_v23, %v7867_v19  ;;  %v7834_v63 = vpop.permute.xlu1 %7833  ;;  %v7918_v38 = vpack.c.bf16 %v7870_v37, %v7868_v52  ;;  %v7842_v16 = vmul.f32 %v7838_v54, %v14730_v15  ;;  %v7841_v5 = vmul.f32 %v7835_v44, %v14657_v55 }
0x1ceb   : > { %v7837_v30 = vsel %vm1433_vm2, %v7828_v60, %v7834_v63  ;;  %v7840_v57 = vsel %vm1433_vm2, %v7834_v63, %v7828_v60 }
0x1cec   : > { %v7845_v50 = vmul.f32 %v7837_v30, %v14657_v55  ;;  %v7846_v17 = vmul.f32 %v7840_v57, %v14730_v15  ;;  %v7802_v58 = vpop.permute.xlu0 %7801  ;;  %7967 = vmatprep.subr.bf16.mxu1 %v7918_v38  ;;  %v7914_v2 = vpack.c.bf16 %v7844_v61, %v7842_v16  ;;  %v7913_v43 = vpack.c.bf16 %v7843_v6, %v7841_v5 }
0x1ced   : > { %7968 = vmatpush2.bf16.msra.mxu1 %v7917_v28 }
0x1cee   : > { %v7915_v53 = vpack.c.bf16 %v7865_v20, %v7845_v50  ;;  %v7804_v60 = vpop.permute.xlu1 %7803  ;;  %v7916_v31 = vpack.c.bf16 %v7866_v1, %v7846_v17 }
0x1cf0   : > { %v7808_v59 = vpop.permute.xlu0 %7807  ;;  %7969 = vmatprep.subr.bf16.mxu1 %v7916_v31 }
0x1cf1   : > { %v7812_v11 = vsel %vm1403_vm3, %v7802_v58, %v7808_v59  ;;  %v7815_v32 = vsel %vm1403_vm3, %v7808_v59, %v7802_v58  ;;  %7970 = vmatpush2.bf16.msra.mxu1 %v7915_v53 }
0x1cf2   : > { %v7810_v39 = vpop.permute.xlu1 %7809  ;;  %7971 = vmatprep.subr.bf16.mxu1 %v7914_v2  ;;  %v7819_v41 = vmul.f32 %v7812_v11, %v14640_v27  ;;  %v7820_v19 = vmul.f32 %v7815_v32, %v14645_v42 }
0x1cf3   : > { %v7813_v29 = vsel %vm1403_vm3, %v7804_v60, %v7810_v39  ;;  %v7816_v22 = vsel %vm1403_vm3, %v7810_v39, %v7804_v60 }
0x1cf4   : > { %v7821_v56 = vmul.f32 %v7813_v29, %v14640_v27  ;;  %v7822_v40 = vmul.f32 %v7816_v22, %v14645_v42 }
0x1cf5   : > { %7972 = vmatpush2.bf16.msra.mxu1 %v7913_v43 }
0x1cf6   : > { %v7911_v25 = vpack.c.bf16 %v7821_v56, %v7819_v41  ;;  %v7912_v52 = vpack.c.bf16 %v7822_v40, %v7820_v19 }
0x1cf8   : > { %7973 = vmatprep.subr.bf16.mxu1 %v7912_v52 }
0x1cf9   : > { %7974 = vmatpush2.bf16.msra.mxu1 %v7911_v25 }
0x1cfc   : > { %7976 = vmatmul.mubr.bf16.vlgmr.msra.gmra.mxu1 %v9498_v36 }
0x1cfd   : > { %8323 = vmatprep.mubr.bf16.mxu1 %v14893_v51 }
0x1dbc   : > { %v7977_v23 = vpop.f32.mrf.mxu1 }
0x1dbd   : > { %vm7986_vm9 = vcmp.ge.f32.partialorder %v7977_v23, 0.0  ;;  %v7990_v37 = vmul.f32 %v7977_v23, %v14894_v7 }
0x1dbe   : > { %v7979_v46 = vpop.f32.mrf.mxu1 }
0x1dbf   : > { %v7994_v54 = vsel %vm7986_vm9, %v7977_v23, %v7990_v37  ;;  %v7991_v20 = vmul.f32 %v7979_v46, %v14894_v7  ;;  %vm7987_vm12 = vcmp.ge.f32.partialorder %v7979_v46, 0.0 }
0x1dc0   : > { %v13857_v28 = vadd.f32 %v7994_v54, %v13345_v47  ;;  %v7981_v63 = vpop.f32.mrf.mxu1 }
0x1dc1   : > { %vm7988_vm15 = vcmp.ge.f32.partialorder %v7981_v63, 0.0  ;;  %v7992_v38 = vmul.f32 %v7981_v63, %v14894_v7  ;;  %v7995_v1 = vsel %vm7987_vm12, %v7979_v46, %v7991_v20 }
0x1dc2   : > { %8098 = vrot.lane.b32.xlu0 %v13857_v28, %s14504_s28  ;;  %v7983_v51 = vpop.f32.mrf.mxu1  ;;  %v13867_v47 = vadd.f32 %v7995_v1, %v13377_v12  ;;  %v13933_v12 = vld [vmem:[%s14907_s4] sm:$0xff]  ;;  %s8821_s4 = sshll.u32 %s14911_s15, 3 }
0x1dc3   : > { %v7996_v62 = vsel %vm7988_vm15, %v7981_v63, %v7992_v38  ;;  %vm7989_vm13 = vcmp.ge.f32.partialorder %v7983_v51, 0.0  ;;  %v7993_v30 = vmul.f32 %v7983_v51, %v14894_v7 }
0x1dc4   : > { %v13864_v57 = vadd.f32 %v7996_v62, %v13350_v45 }
0x1dc5   : > { %v7997_v44 = vsel %vm7989_vm13, %v7983_v51, %v7993_v30 }
0x1dc6   : > { %v13870_v16 = vadd.f32 %v7997_v44, %v13384_v0  ;;  %8082 = vrot.lane.b32.xlu0 %v13857_v28, %s14551_s2  ;;  %8100 = vrot.lane.b32.xlu1 %v13864_v57, %s14504_s28  ;;  %v8138_v50 = vpack.c.bf16 %v13864_v57, %v13857_v28  ;;  %v8814_v0 = vcombine.high %v13933_v12, %v13933_v12 }
0x1dc8   : > { %v8139_v45 = vpack.c.bf16 %v13870_v16, %v13867_v47  ;;  %8815 = vmatprep.mubr.msk.bf16.mxu0 %vm1540_vm0, %v8814_v0 }
0x1dca   : > { %8066 = vrot.lane.b32.xlu0 %v13857_v28, %s14547_s1  ;;  %8084 = vrot.lane.b32.xlu1 %v13864_v57, %s14551_s2 }
0x1dce   : > { %8050 = vrot.lane.b32.xlu0 %v13857_v28, %s14545_s20  ;;  %8068 = vrot.lane.b32.xlu1 %v13864_v57, %s14547_s1 }
0x1dd2   : > { %8034 = vrot.lane.b32.xlu0 %v13857_v28, %s14546_s0  ;;  %8052 = vrot.lane.b32.xlu1 %v13864_v57, %s14545_s20 }
0x1dd6   : > { %8018 = vrot.lane.b32.xlu0 %v13857_v28, %s14505_s12  ;;  %8036 = vrot.lane.b32.xlu1 %v13864_v57, %s14546_s0 }
0x1dda   : > { %8002 = vrot.lane.b32.xlu0 %v13857_v28, %s14542_s30  ;;  %8020 = vrot.lane.b32.xlu1 %v13864_v57, %s14505_s12 }
0x1dde   : > { %8102 = vrot.lane.b32.xlu0 %v13867_v47, %s14504_s28  ;;  %8004 = vrot.lane.b32.xlu1 %v13864_v57, %s14542_s30 }
0x1de2   : > { %8086 = vrot.lane.b32.xlu0 %v13867_v47, %s14551_s2  ;;  %8104 = vrot.lane.b32.xlu1 %v13870_v16, %s14504_s28 }
0x1de6   : > { %8070 = vrot.lane.b32.xlu0 %v13867_v47, %s14547_s1  ;;  %8088 = vrot.lane.b32.xlu1 %v13870_v16, %s14551_s2 }
0x1dea   : > { %8114 = vrot.lane.b32.xlu0 %v13857_v28, %s14554_s3  ;;  %8072 = vrot.lane.b32.xlu1 %v13870_v16, %s14547_s1 }
0x1dee   : > { %8054 = vrot.lane.b32.xlu0 %v13867_v47, %s14545_s20  ;;  %8116 = vrot.lane.b32.xlu1 %v13864_v57, %s14554_s3 }
0x1df2   : > { %8038 = vrot.lane.b32.xlu0 %v13867_v47, %s14546_s0  ;;  %8056 = vrot.lane.b32.xlu1 %v13870_v16, %s14545_s20 }
0x1df6   : > { %8022 = vrot.lane.b32.xlu0 %v13867_v47, %s14505_s12  ;;  %8040 = vrot.lane.b32.xlu1 %v13870_v16, %s14546_s0 }
0x1dfa   : > { %8006 = vrot.lane.b32.xlu0 %v13867_v47, %s14542_s30  ;;  %8024 = vrot.lane.b32.xlu1 %v13870_v16, %s14505_s12 }
0x1dfe   : > { %8118 = vrot.lane.b32.xlu0 %v13867_v47, %s14554_s3  ;;  %8008 = vrot.lane.b32.xlu1 %v13870_v16, %s14542_s30 }
0x1e02   : > { %8120 = vrot.lane.b32.xlu1 %v13870_v16, %s14554_s3 }
0x1e34   : > { %v8099_v17 = vpop.permute.xlu0 %8098 }
0x1e38   : > { %v8083_v58 = vpop.permute.xlu0 %8082  ;;  %v8101_v9 = vpop.permute.xlu1 %8100 }
0x1e3c   : > { %v8067_v61 = vpop.permute.xlu0 %8066  ;;  %v8085_v53 = vpop.permute.xlu1 %8084 }
0x1e40   : > { %v8051_v60 = vpop.permute.xlu0 %8050  ;;  %v8069_v31 = vpop.permute.xlu1 %8068 }
0x1e44   : > { %v13944_v5 = vpop.permute.xlu0 %8034  ;;  %v8053_v59 = vpop.permute.xlu1 %8052 }
0x1e48   : > { %v13946_v2 = vpop.permute.xlu0 %8018  ;;  %v13948_v6 = vpop.permute.xlu1 %8036 }
0x1e4c   : > { %v13950_v11 = vpop.permute.xlu0 %8002  ;;  %v13952_v32 = vpop.permute.xlu1 %8020 }
0x1e50   : > { %v8103_v39 = vpop.permute.xlu0 %8102  ;;  %v13954_v43 = vpop.permute.xlu1 %8004 }
0x1e51   : > { %v8106_v29 = vsel %vm1463_vm1, %v8099_v17, %v8103_v39  ;;  %v8108_v22 = vsel %vm1463_vm1, %v8103_v39, %v8099_v17 }
0x1e52   : > { %v8110_v25 = vmul.f32 %v8106_v29, %v14855_v21  ;;  %v8111_v52 = vmul.f32 %v8108_v22, %v14856_v13 }
0x1e54   : > { %v8087_v41 = vpop.permute.xlu0 %8086  ;;  %v8105_v19 = vpop.permute.xlu1 %8104 }
0x1e55   : > { %v8107_v56 = vsel %vm1463_vm1, %v8101_v9, %v8105_v19  ;;  %v8109_v40 = vsel %vm1463_vm1, %v8105_v19, %v8101_v9  ;;  %v8090_v37 = vsel %vm1433_vm2, %v8083_v58, %v8087_v41  ;;  %v8092_v46 = vsel %vm1433_vm2, %v8087_v41, %v8083_v58 }
0x1e56   : > { %v8112_v36 = vmul.f32 %v8107_v56, %v14855_v21  ;;  %v8113_v23 = vmul.f32 %v8109_v40, %v14856_v13  ;;  %v8094_v62 = vmul.f32 %v8090_v37, %v14657_v55  ;;  %v8095_v30 = vmul.f32 %v8092_v46, %v14730_v15 }
0x1e58   : > { %v8144_v54 = vpack.c.bf16 %v8112_v36, %v8110_v25  ;;  %v8071_v20 = vpop.permute.xlu0 %8070  ;;  %v8089_v63 = vpop.permute.xlu1 %8088  ;;  %v8145_v38 = vpack.c.bf16 %v8113_v23, %v8111_v52 }
0x1e59   : > { %v8091_v51 = vsel %vm1433_vm2, %v8085_v53, %v8089_v63  ;;  %v8093_v1 = vsel %vm1433_vm2, %v8089_v63, %v8085_v53  ;;  %v8074_v17 = vsel %vm1403_vm3, %v8067_v61, %v8071_v20  ;;  %v8076_v58 = vsel %vm1403_vm3, %v8071_v20, %v8067_v61 }
0x1e5a   : > { %v8096_v44 = vmul.f32 %v8091_v51, %v14657_v55  ;;  %v8097_v0 = vmul.f32 %v8093_v1, %v14730_v15  ;;  %8158 = vmatprep.subr.bf16.mxu0 %v8145_v38  ;;  %v8078_v19 = vmul.f32 %v8074_v17, %v14640_v27  ;;  %v8079_v56 = vmul.f32 %v8076_v58, %v14645_v42 }
0x1e5b   : > { %8159 = vmatpush1.bf16.msra.mxu0 %v8144_v54 }
0x1e5c   : > { %v8142_v9 = vpack.c.bf16 %v8096_v44, %v8094_v62  ;;  %v13984_v39 = vpop.permute.xlu0 %8114  ;;  %v8073_v53 = vpop.permute.xlu1 %8072  ;;  %v8143_v29 = vpack.c.bf16 %v8097_v0, %v8095_v30 }
0x1e5d   : > { %v8075_v22 = vsel %vm1403_vm3, %v8069_v31, %v8073_v53  ;;  %v8077_v41 = vsel %vm1403_vm3, %v8073_v53, %v8069_v31 }
0x1e5e   : > { %v8080_v40 = vmul.f32 %v8075_v22, %v14640_v27  ;;  %v8081_v61 = vmul.f32 %v8077_v41, %v14645_v42  ;;  %8160 = vmatprep.subr.bf16.mxu0 %v8143_v29 }
0x1e5f   : > { %8161 = vmatpush1.bf16.msra.mxu0 %v8142_v9 }
0x1e60   : > { %v8140_v25 = vpack.c.bf16 %v8080_v40, %v8078_v19  ;;  %v8055_v52 = vpop.permute.xlu0 %8054  ;;  %v13994_v36 = vpop.permute.xlu1 %8116  ;;  %v8141_v23 = vpack.c.bf16 %v8081_v61, %v8079_v56 }
0x1e61   : > { %v8058_v37 = vsel %vm1373_vm4, %v8051_v60, %v8055_v52  ;;  %v8060_v31 = vsel %vm1373_vm4, %v8055_v52, %v8051_v60 }
0x1e62   : > { %8162 = vmatprep.subr.bf16.mxu0 %v8141_v23  ;;  %v8062_v38 = vmul.f32 %v8060_v31, %v14628_v3  ;;  %v8063_v51 = vmul.f32 %v8058_v37, %v14629_v4 }
0x1e63   : > { %8163 = vmatpush1.bf16.msra.mxu0 %v8140_v25 }
0x1e64   : > { %v8039_v46 = vpop.permute.xlu0 %8038  ;;  %v8057_v54 = vpop.permute.xlu1 %8056  ;;  %8164 = vmatprep.subr.bf16.mxu0 %v8139_v45 }
0x1e65   : > { %v8059_v20 = vsel %vm1373_vm4, %v8053_v59, %v8057_v54  ;;  %v8061_v63 = vsel %vm1373_vm4, %v8057_v54, %v8053_v59  ;;  %v8042_v62 = vsel %vm1343_vm5, %v13944_v5, %v8039_v46  ;;  %v8044_v47 = vsel %vm1343_vm5, %v8039_v46, %v13944_v5 }
0x1e66   : > { %v8064_v1 = vmul.f32 %v8061_v63, %v14628_v3  ;;  %v8065_v60 = vmul.f32 %v8059_v20, %v14629_v4  ;;  %v8046_v17 = vmul.f32 %v8044_v47, %v14841_v8  ;;  %v8047_v5 = vmul.f32 %v8042_v62, %v14842_v48 }
0x1e67   : > { %8165 = vmatpush1.bf16.msra.mxu0 %v8138_v50 }
0x1e68   : > { %v8136_v16 = vpack.c.bf16 %v8064_v1, %v8062_v38  ;;  %v8023_v45 = vpop.permute.xlu0 %8022  ;;  %v8041_v59 = vpop.permute.xlu1 %8040  ;;  %v8137_v30 = vpack.c.bf16 %v8065_v60, %v8063_v51 }
0x1e69   : > { %v8043_v44 = vsel %vm1343_vm5, %v13948_v6, %v8041_v59  ;;  %v8045_v0 = vsel %vm1343_vm5, %v8041_v59, %v13948_v6  ;;  %v8026_v57 = vsel %vm1313_vm6, %v13946_v2, %v8023_v45  ;;  %v8028_v50 = vsel %vm1313_vm6, %v8023_v45, %v13946_v2 }
0x1e6a   : > { %v8048_v58 = vmul.f32 %v8045_v0, %v14841_v8  ;;  %v8049_v28 = vmul.f32 %v8043_v44, %v14842_v48  ;;  %8166 = vmatprep.subr.bf16.mxu0 %v8137_v30  ;;  %v8030_v19 = vmul.f32 %v8028_v50, %v14898_v35  ;;  %v8031_v56 = vmul.f32 %v8026_v57, %v14899_v26 }
0x1e6b   : > { %8167 = vmatpush1.bf16.msra.mxu0 %v8136_v16  ;;  %v8813_v0 = vcombine.low %v13933_v12, %v13933_v12 }
0x1e6c   : > { %v8134_v9 = vpack.c.bf16 %v8048_v58, %v8046_v17  ;;  %v8007_v6 = vpop.permute.xlu0 %8006  ;;  %v8025_v53 = vpop.permute.xlu1 %8024  ;;  %v8135_v29 = vpack.c.bf16 %v8049_v28, %v8047_v5 }
0x1e6d   : > { %v8027_v22 = vsel %vm1313_vm6, %v13952_v32, %v8025_v53  ;;  %v8029_v41 = vsel %vm1313_vm6, %v8025_v53, %v13952_v32  ;;  %v8010_v61 = vsel %vm1284_vm7, %v13950_v11, %v8007_v6  ;;  %v8012_v25 = vsel %vm1284_vm7, %v8007_v6, %v13950_v11 }
0x1e6e   : > { %v8032_v40 = vmul.f32 %v8029_v41, %v14898_v35  ;;  %v8033_v2 = vmul.f32 %v8027_v22, %v14899_v26  ;;  %8168 = vmatprep.subr.bf16.mxu0 %v8135_v29  ;;  %v8014_v54 = vmul.f32 %v8012_v25, %v14896_v18  ;;  %v8015_v20 = vmul.f32 %v8010_v61, %v14897_v49 }
0x1e6f   : > { %8169 = vmatpush1.bf16.msra.mxu0 %v8134_v9 }
0x1e70   : > { %v8132_v52 = vpack.c.bf16 %v8032_v40, %v8030_v19  ;;  %v8119_v32 = vpop.permute.xlu0 %8118  ;;  %v8009_v23 = vpop.permute.xlu1 %8008  ;;  %v8133_v37 = vpack.c.bf16 %v8033_v2, %v8031_v56 }
0x1e71   : > { %v8011_v31 = vsel %vm1284_vm7, %v13954_v43, %v8009_v23  ;;  %v8013_v46 = vsel %vm1284_vm7, %v8009_v23, %v13954_v43  ;;  %v8122_v38 = vsel %vm1493_vm8, %v13984_v39, %v8119_v32  ;;  %v8124_v51 = vsel %vm1493_vm8, %v8119_v32, %v13984_v39 }
0x1e72   : > { %v8016_v63 = vmul.f32 %v8013_v46, %v14896_v18  ;;  %v8017_v11 = vmul.f32 %v8011_v31, %v14897_v49  ;;  %8170 = vmatprep.subr.bf16.mxu0 %v8133_v37  ;;  %v8126_v16 = vmul.f32 %v8122_v38, %v14879_v14  ;;  %v8127_v45 = vmul.f32 %v8124_v51, %v14880_v34 }
0x1e73   : > { %8171 = vmatpush1.bf16.msra.mxu0 %v8132_v52 }
0x1e74   : > { %v8130_v1 = vpack.c.bf16 %v8016_v63, %v8014_v54  ;;  %v8121_v43 = vpop.permute.xlu1 %8120  ;;  %v8131_v60 = vpack.c.bf16 %v8017_v11, %v8015_v20 }
0x1e75   : > { %v8123_v62 = vsel %vm1493_vm8, %v13994_v36, %v8121_v43  ;;  %v8125_v47 = vsel %vm1493_vm8, %v8121_v43, %v13994_v36 }
0x1e76   : > { %v8128_v59 = vmul.f32 %v8123_v62, %v14879_v14  ;;  %v8129_v39 = vmul.f32 %v8125_v47, %v14880_v34  ;;  %8172 = vmatprep.subr.bf16.mxu0 %v8131_v60 }
0x1e77   : > { %8173 = vmatpush1.bf16.msra.mxu0 %v8130_v1 }
0x1e78   : > { %v8146_v30 = vpack.c.bf16 %v8128_v59, %v8126_v16  ;;  %v8147_v44 = vpack.c.bf16 %v8129_v39, %v8127_v45 }
0x1e7a   : > { %8188 = vmatprep.subr.bf16.mxu0 %v8147_v44 }
0x1e7b   : > { %8189 = vmatpush2.bf16.msra.mxu0 %v8146_v30 }
0x1e7e   : > { %8191 = vmatmul.mubr.bf16.vlgmr.msra.gmra.mxu0 %v8813_v0 }
0x1f3e   : > { %v8192_v17 = vpop.f32.mrf.mxu0 }
0x1f3f   : > { %vm8199_vm0 = vcmp.ge.f32.partialorder %v8192_v17, 0.0  ;;  %v8201_v36 = vmul.f32 %v8192_v17, %v14894_v7 }
0x1f40   : > { %v8194_v5 = vpop.f32.mrf.mxu0 }
0x1f41   : > { %v8203_v58 = vsel %vm8199_vm0, %v8192_v17, %v8201_v36  ;;  %vm8200_vm10 = vcmp.ge.f32.partialorder %v8194_v5, 0.0  ;;  %v8202_v28 = vmul.f32 %v8194_v5, %v14894_v7 }
0x1f42   : > { %v14083_v57 = vadd.f32 %v8203_v58, %v13253_v33  ;;  %v8196_v50 = vpop.f32.mrf.mxu0 }
0x1f43   : > { %v8204_v9 = vsel %vm8200_vm10, %v8194_v5, %v8202_v28 }
0x1f44   : > { %v8206_v6 = vadd.f32 %v8204_v9, %v13256_v24  ;;  %8263 = vrot.lane.b32.xlu0 %v14083_v57, %s14554_s3  ;;  %v8197_v12 = vpop.f32.mrf.mxu0 }
0x1f46   : > { %8265 = vrot.lane.b32.xlu1 %v8206_v6, %s14554_s3  ;;  %s14908_s3 = sld [smem:[#allocation26_spill]] }
0x1f48   : > { %8247 = vrot.lane.b32.xlu0 %v14083_v57, %s14551_s2 }
0x1f4a   : > { %8249 = vrot.lane.b32.xlu1 %v8206_v6, %s14551_s2 }
0x1f4c   : > { %8255 = vrot.lane.b32.xlu0 %v14083_v57, %s14504_s28 }
0x1f4e   : > { %8257 = vrot.lane.b32.xlu1 %v8206_v6, %s14504_s28 }
0x1f50   : > { %8239 = vrot.lane.b32.xlu0 %v14083_v57, %s14547_s1 }
0x1f52   : > { %8241 = vrot.lane.b32.xlu1 %v8206_v6, %s14547_s1  ;;  %s1267_s1 = scalar_lea.vmem %s9813_s19, %s8821_s4 }
0x1f54   : > { %8223 = vrot.lane.b32.xlu0 %v14083_v57, %s14546_s0 }
0x1f56   : > { %8225 = vrot.lane.b32.xlu1 %v8206_v6, %s14546_s0 }
0x1f58   : > { %8231 = vrot.lane.b32.xlu0 %v14083_v57, %s14545_s20 }
0x1f5a   : > { %8233 = vrot.lane.b32.xlu1 %v8206_v6, %s14545_s20 }
0x1f5c   : > { %8207 = vrot.lane.b32.xlu0 %v14083_v57, %s14542_s30 }
0x1f5e   : > { %8209 = vrot.lane.b32.xlu1 %v8206_v6, %s14542_s30 }
0x1f60   : > { %8215 = vrot.lane.b32.xlu0 %v14083_v57, %s14505_s12 }
0x1f62   : > { %8217 = vrot.lane.b32.xlu1 %v8206_v6, %s14505_s12 }
0x1fb6   : > { %v8264_v7 = vpop.permute.xlu0 %8263 }
0x1fb8   : > { %v8266_v33 = vpop.permute.xlu1 %8265 }
0x1fb9   : > { %v8267_v24 = vsel %vm1493_vm8, %v8264_v7, %v8266_v33  ;;  %v8268_v53 = vsel %vm1493_vm8, %v8266_v33, %v8264_v7  ;;  %v8281_v7 = vld [vmem:[%s14908_s3] sm:$0x3] }
0x1fba   : > { %v8269_v29 = vmul.f32 %v8267_v24, %v14879_v14  ;;  %v8270_v22 = vmul.f32 %v8268_v53, %v14880_v34  ;;  %v8248_v41 = vpop.permute.xlu0 %8247 }
0x1fbc   : > { %v8279_v19 = vpack.c.bf16 %v8269_v29, %v8269_v29  ;;  %v8280_v56 = vpack.c.bf16 %v8270_v22, %v8270_v22  ;;  %v8250_v40 = vpop.permute.xlu1 %8249 }
0x1fbd   : > { %v8251_v25 = vsel %vm1433_vm2, %v8248_v41, %v8250_v40  ;;  %v8252_v52 = vsel %vm1433_vm2, %v8250_v40, %v8248_v41 }
0x1fbe   : > { %v8256_v2 = vpop.permute.xlu0 %8255  ;;  %8816 = vmatprep.subr.msk.bf16.mxu1 %vm1671_vm11, %v8280_v56  ;;  %v8286_v61 = vsel %vm1671_vm11, %v8279_v19, 0  ;;  %v8253_v23 = vmul.f32 %v8251_v25, %v14657_v55  ;;  %v8254_v37 = vmul.f32 %v8252_v52, %v14730_v15 }
0x1fbf   : > { %8298 = vmatpush1.bf16.msra.mxu1 %v8286_v61 }
0x1fc0   : > { %v8258_v32 = vpop.permute.xlu1 %8257 }
0x1fc1   : > { %v8259_v14 = vsel %vm1463_vm1, %v8256_v2, %v8258_v32  ;;  %v8260_v34 = vsel %vm1463_vm1, %v8258_v32, %v8256_v2  ;;  %vm14909_vm1 = vcmask 588800  }
0x1fc2   : > { %v8261_v31 = vmul.f32 %v8259_v14, %v14855_v21  ;;  %v8262_v46 = vmul.f32 %v8260_v34, %v14856_v13  ;;  %v8240_v54 = vpop.permute.xlu0 %8239 }
0x1fc4   : > { %v8277_v20 = vpack.c.bf16 %v8261_v31, %v8253_v23  ;;  %v8242_v63 = vpop.permute.xlu1 %8241  ;;  %v8278_v11 = vpack.c.bf16 %v8262_v46, %v8254_v37 }
0x1fc5   : > { %v8243_v38 = vsel %vm1403_vm3, %v8240_v54, %v8242_v63  ;;  %v8244_v51 = vsel %vm1403_vm3, %v8242_v63, %v8240_v54 }
0x1fc6   : > { %v8245_v1 = vmul.f32 %v8243_v38, %v14640_v27  ;;  %v8246_v55 = vmul.f32 %v8244_v51, %v14645_v42  ;;  %v8224_v43 = vpop.permute.xlu0 %8223  ;;  %8299 = vmatprep.subr.bf16.mxu1 %v8278_v11 }
0x1fc7   : > { %8300 = vmatpush1.bf16.msra.mxu1 %v8277_v20 }
0x1fc8   : > { %v8275_v15 = vpack.c.bf16 %v8245_v1, %v14083_v57  ;;  %v8226_v21 = vpop.permute.xlu1 %8225  ;;  %v8276_v13 = vpack.c.bf16 %v8246_v55, %v8206_v6 }
0x1fc9   : > { %v8227_v62 = vsel %vm1343_vm5, %v8224_v43, %v8226_v21  ;;  %v8228_v47 = vsel %vm1343_vm5, %v8226_v21, %v8224_v43 }
0x1fca   : > { %v8232_v60 = vpop.permute.xlu0 %8231  ;;  %8301 = vmatprep.subr.bf16.mxu1 %v8276_v13  ;;  %v8229_v45 = vmul.f32 %v8228_v47, %v14841_v8  ;;  %v8230_v59 = vmul.f32 %v8227_v62, %v14842_v48 }
0x1fcb   : > { %8302 = vmatpush1.bf16.msra.mxu1 %v8275_v15 }
0x1fcc   : > { %v8234_v16 = vpop.permute.xlu1 %8233 }
0x1fcd   : > { %v8235_v27 = vsel %vm1373_vm4, %v8232_v60, %v8234_v16  ;;  %v8236_v42 = vsel %vm1373_vm4, %v8234_v16, %v8232_v60 }
0x1fce   : > { %v8237_v39 = vmul.f32 %v8236_v42, %v14628_v3  ;;  %v8238_v30 = vmul.f32 %v8235_v27, %v14629_v4  ;;  %v8208_v44 = vpop.permute.xlu0 %8207 }
0x1fd0   : > { %v8273_v0 = vpack.c.bf16 %v8237_v39, %v8229_v45  ;;  %v8210_v17 = vpop.permute.xlu1 %8209  ;;  %v8274_v36 = vpack.c.bf16 %v8238_v30, %v8230_v59 }
0x1fd1   : > { %v8211_v5 = vsel %vm1284_vm7, %v8208_v44, %v8210_v17  ;;  %v8212_v58 = vsel %vm1284_vm7, %v8210_v17, %v8208_v44 }
0x1fd2   : > { %8303 = vmatprep.subr.bf16.mxu1 %v8274_v36  ;;  %v8216_v8 = vpop.permute.xlu0 %8215  ;;  %v8213_v48 = vmul.f32 %v8212_v58, %v14896_v18  ;;  %v8214_v57 = vmul.f32 %v8211_v5, %v14897_v49 }
0x1fd3   : > { %8304 = vmatpush1.bf16.msra.mxu1 %v8273_v0 }
0x1fd4   : > { %v8218_v28 = vpop.permute.xlu1 %8217 }
0x1fd5   : > { %v8219_v3 = vsel %vm1313_vm6, %v8216_v8, %v8218_v28  ;;  %v8220_v4 = vsel %vm1313_vm6, %v8218_v28, %v8216_v8 }
0x1fd6   : > { %v8221_v50 = vmul.f32 %v8220_v4, %v14898_v35  ;;  %v8222_v9 = vmul.f32 %v8219_v3, %v14899_v26 }
0x1fd8   : > { %v8271_v6 = vpack.c.bf16 %v8221_v50, %v8213_v48  ;;  %v8272_v12 = vpack.c.bf16 %v8222_v9, %v8214_v57 }
0x1fda   : > { %8305 = vmatprep.subr.bf16.mxu1 %v8272_v12 }
0x1fdb   : > { %8306 = vmatpush1.bf16.msra.mxu1 %v8271_v6 }
0x1fde   : > { %8817 = vmatmul.mubr.msk.bf16.vlgmr.msra.gmra.mxu1 %vm14909_vm1, %v8281_v7 }
0x209e   : > { %v8325_v33 = vpop.f32.mrf.mxu1 }
0x209f   : > { %9501 = vtanh.f32 %v8325_v33 }
0x20a0   : > { %v8327_v10 = vpop.f32.mrf.mxu1 }
0x20a1   : > { %9503 = vtanh.f32 %v8327_v10 }
0x20a2   : > { %v8329_v18 = vpop.f32.mrf.mxu1 }
0x20a4   : > { %v8330_v24 = vpop.f32.mrf.mxu1 }
0x20ac   : > { %v9502_v49 = vpop.eup %9501 }
0x20ad   : > { %v8334_v53 = vmul.f32 0.5, %v9502_v49 }
0x20ae   : > { %v9504_v35 = vpop.eup %9503 }
0x20af   : > { %v8335_v26 = vmul.f32 0.5, %v9504_v35  ;;  %v8336_v29 = vadd.f32 0.5, %v8334_v53 }
0x20b1   : > { %v8337_v22 = vadd.f32 0.5, %v8335_v26 }
0x20b3   : > { %v8340_v41 = vcombine.low %v8336_v29, %v8337_v22 }
0x20b5   : > { %8342 = vst [vmem:[%s1267_s1] sm:$0xff] %v8340_v41 }
0x20b6 PF: > { %s96_s23 = sadd.s32 1, %s9527_s23  }
0x20b7   : > { %p93_p4 = scmp.ge.s32.totalorder %s96_s23, 4  }
0x20b9   :  { %95 = sbr.rel (!%p93_p4) target bundleno = 74 (0x4a), region = 311 }

</bundles_post_ra>
